<compile_context>
chip_gen: v7x
topology: tpu7x:2x2x1
jax: 0.10.0
libtpu: 0.0.40
codegen_flags: <defaults>
</compile_context>

<pallas_src>
import functools

import numpy as np

import jax
import jax.numpy as jnp
from jax.experimental import pallas as pl
from jax.experimental.pallas import tpu as pltpu


def _round_up(v, m):
    return (v + m - 1) // m * m


def _zero_idx(i, *, n):
    return (0,) * n


# ----------------- fused single-K-step matmul Pallas kernel ------------------

def _mm_kernel(*refs, act, mode):
    """y = epilogue(x @ w + shift [, res]); K fits in one tile (no scratch)."""
    if mode == "none":
        x_ref, w_ref, s_ref, o_ref = refs
        res_ref = None
    else:
        x_ref, w_ref, s_ref, res_ref, o_ref = refs

    y = jnp.dot(x_ref[...], w_ref[...],
                preferred_element_type=jnp.float32) + s_ref[...]
    if act == "relu":
        y = jnp.maximum(y, 0.0)
    elif act == "tanh":
        y = jnp.tanh(y)
    elif act == "sigmoid":
        y = jax.nn.sigmoid(y)
    if mode == "act_then_res":                 # decoder skip:  relu(y) + skip
        y = y + res_ref[...].astype(jnp.float32)
    elif mode == "final":                      # clamp(x_norm - (tanh+1)/2, 0, 1)
        xn = res_ref[...] * 2.0 - 1.0          # (x - 0.5) / 0.5 on raw input
        y = jnp.clip(xn - (y + 1.0) * 0.5, 0.0, 1.0)
    o_ref[...] = y.astype(o_ref.dtype)


# Single grid row for the largest (M=512) layers on single-TC chips; the
# 1-tile layers are latency-bound so splitting for v7x megacore isn't worth it.
_MAX_TM = 512


def matmul_fused(x, wmat, shift, *, act="none", res=None, mode="none",
                 out_dtype=jnp.bfloat16):
    """Tiled bf16 matmul (f32 MXU accumulate) with fused bias/act/residual.

    `wmat` (Kp, Np) bf16 and `shift` (1, Np) f32 are pre-padded to multiples
    of 128 at parameter-preparation time; only the activation is padded here.
    """
    M, K = x.shape
    Kp, Np = wmat.shape

    tm = min(_MAX_TM, _round_up(M, 8))
    tn = 256 if Np % 256 == 0 else 128
    Mp = _round_up(M, tm)

    xp = x.astype(jnp.bfloat16)
    if (Mp, Kp) != (M, K):
        xp = jnp.pad(xp, ((0, Mp - M), (0, Kp - K)))

    in_specs = [
        pl.BlockSpec((tm, Kp), lambda i, j: (i, 0)),
        pl.BlockSpec((Kp, tn), lambda i, j: (0, j)),
        pl.BlockSpec((1, tn), lambda i, j: (0, j)),
    ]
    inputs = [xp, wmat, shift]
    res_bytes = 0
    if mode == "act_then_res":
        rp = res
        if rp.shape != (Mp, Np):
            rp = jnp.pad(rp, ((0, Mp - rp.shape[0]), (0, Np - rp.shape[1])))
        in_specs.append(pl.BlockSpec((tm, tn), lambda i, j: (i, j)))
        inputs.append(rp)
        res_bytes = rp.size * rp.dtype.itemsize
    elif mode == "final":
        # Broadcast the 1-channel raw input to 128 lanes -> lane-dense load.
        rp = jnp.broadcast_to(res.astype(jnp.float32), (M, 128))
        if Mp != M:
            rp = jnp.pad(rp, ((0, Mp - M), (0, 0)))
        in_specs.append(pl.BlockSpec((tm, 128), lambda i, j: (i, 0)))
        inputs.append(rp)
        res_bytes = rp.size * 4

    cost = pl.CostEstimate(
        flops=2 * Mp * Np * Kp,
        transcendentals=Mp * Np if act in ("tanh", "sigmoid") else 0,
        bytes_accessed=(xp.size * 2 + wmat.size * 2 +
                        Mp * Np * jnp.dtype(out_dtype).itemsize + res_bytes))

    out = pl.pallas_call(
        functools.partial(_mm_kernel, act=act, mode=mode),
        grid=(Mp // tm, Np // tn),
        in_specs=in_specs,
        out_specs=pl.BlockSpec((tm, tn), lambda i, j: (i, j)),
        out_shape=jax.ShapeDtypeStruct((Mp, Np), out_dtype),
        compiler_params=pltpu.CompilerParams(
            dimension_semantics=("parallel", "parallel"),
            vmem_limit_bytes=32 * 1024 * 1024),
        cost_estimate=cost,
    )(*inputs)
    return out[:M] if Mp != M else out


# ------------------------------ conv via im2col ------------------------------

def im2col(x, kh, kw, stride, dilation, padding, pad_value=0.0):
    """x: [N,H,W,C] -> patches [N*Ho*Wo, kh*kw*C] (K order: kh, kw, C)."""
    N, H, W, C = x.shape
    if padding:
        x = jnp.pad(x, ((0, 0), (padding, padding), (padding, padding), (0, 0)),
                    constant_values=pad_value)
    Hp, Wp = H + 2 * padding, W + 2 * padding
    Ho = (Hp - dilation * (kh - 1) - 1) // stride + 1
    Wo = (Wp - dilation * (kw - 1) - 1) // stride + 1
    cols = []
    for i in range(kh):
        for j in range(kw):
            hi, wi = i * dilation, j * dilation
            patch = x[:, hi:hi + stride * (Ho - 1) + 1:stride,
                      wi:wi + stride * (Wo - 1) + 1:stride, :]
            cols.append(patch)
    patches = jnp.stack(cols, axis=-2)               # [N,Ho,Wo,kh*kw,C]
    return patches.reshape(N * Ho * Wo, kh * kw * C), (N, Ho, Wo)


def conv_w_to_mat(w):
    """PyTorch conv weight [O,I,kh,kw] -> matmul weight [kh*kw*I, O]."""
    O, I, kh, kw = w.shape
    return jnp.transpose(w, (2, 3, 1, 0)).reshape(kh * kw * I, O)


def conv2d(x, wmat, shift, *, c_out, kh, kw=None, stride=1, dilation=1,
           padding=0, act="none", res=None, mode="none", pad_value=0.0,
           out_dtype=jnp.bfloat16):
    kw = kh if kw is None else kw
    patches, (N, Ho, Wo) = im2col(x, kh, kw, stride, dilation, padding, pad_value)
    res2 = None
    if mode == "final":
        res2 = res.reshape(-1, 1)
    elif res is not None:
        res2 = res.reshape(-1, res.shape[-1])
    out = matmul_fused(patches, wmat, shift, act=act, res=res2, mode=mode,
                       out_dtype=out_dtype)
    return out[:, :c_out].reshape(N, Ho, Wo, c_out)


# ---------------- ConvTranspose2d via subpixel decomposition -----------------

_T_SEL = {(0, 0): 1, (1, 0): 2, (1, 1): 0}      # (output parity, 2x2 tap) -> k


def convT_weight_mat(w_t):
    """ConvTranspose2d(k=3,s=2,p=1,op=1) weight [Cin,Cout,3,3] -> subpixel
    matmul weight [4*Cin, 4*Cout] (rows: (di,dj,cin); cols: (r,c,cout))."""
    Cin, Cout, _, _ = w_t.shape
    W = jnp.zeros((2, 2, Cin, 2, 2, Cout), jnp.float32)
    for r in (0, 1):
        for di in (0, 1):
            kh = _T_SEL.get((r, di))
            if kh is None:
                continue
            for c in (0, 1):
                for dj in (0, 1):
                    kw = _T_SEL.get((c, dj))
                    if kw is None:
                        continue
                    W = W.at[di, dj, :, r, c, :].set(w_t[:, :, kh, kw])
    return W.reshape(4 * Cin, 4 * Cout)


def conv_transpose2d(x, wmat, shift, *, c_out, skip=None):
    """ConvTranspose2d(k=3, stride=2, padding=1, output_padding=1) as a single
    2x2-window matmul producing 4*c_out channels + pixel shuffle; relu and the
    decoder skip-add are fused into the kernel epilogue."""
    N, H, W, _ = x.shape
    xp = jnp.pad(x, ((0, 0), (0, 1), (0, 1), (0, 0)))      # bottom/right zero
    patches, _ = im2col(xp, 2, 2, 1, 1, 0)                 # [N*H*W, 4*Cin]
    res, mode = None, "none"
    if skip is not None:   # fuse the decoder skip-add:  relu(convT(x)) + skip
        res = skip.reshape(N, H, 2, W, 2, c_out).transpose(0, 1, 3, 2, 4, 5)
        res = res.reshape(N * H * W, 4 * c_out)
        mode = "act_then_res"
    out = matmul_fused(patches, wmat, shift, act="relu", res=res, mode=mode)
    out = out[:, :4 * c_out].reshape(N, H, W, 2, 2, c_out)
    out = out.transpose(0, 1, 3, 2, 4, 5)
    return out.reshape(N, 2 * H, 2 * W, c_out)


# ------------- fused bottleneck: res1 + res2 + CBAM in one kernel ------------

def _build_shift_mats(N, H, W):
    """Constant 0/1 matrices S_t so that S_t @ x_flat is the zero-padded 3x3
    tap shift of the flattened (N*H*W, C) feature map (block-diag over batch)."""
    R = N * H * W
    S = np.zeros((9, R, R), np.float32)
    for t in range(9):
        di, dj = t // 3 - 1, t % 3 - 1
        for n in range(N):
            for h in range(H):
                for w in range(W):
                    hs, ws = h + di, w + dj
                    if 0 <= hs < H and 0 <= ws < W:
                        S[t, (n * H + h) * W + w, (n * H + hs) * W + ws] = 1.0
    return S


def _bottleneck_kernel(x_ref, s_ref, rw_ref, rb_ref, w1_ref, b1_ref,
                       w2_ref, b2_ref, o_ref, *, nb, hw):
    def conv3x3(xb, layer):
        acc = jnp.zeros(o_ref.shape, jnp.float32)
        for t in range(9):
            shifted = jnp.dot(s_ref[t], xb, preferred_element_type=jnp.float32)
            acc = acc + jnp.dot(shifted.astype(jnp.bfloat16), rw_ref[layer, t],
                                preferred_element_type=jnp.float32)
        return acc + rb_ref[layer]

    xb = x_ref[...]                                       # (R, C) bf16
    x = xb.astype(jnp.float32)
    # residual block 1:  x = relu(conv2(relu(conv1(x))) + x)
    r = jnp.maximum(conv3x3(xb, 0), 0.0)
    x = jnp.maximum(conv3x3(r.astype(jnp.bfloat16), 1) + x, 0.0)
    # residual block 2
    r = jnp.maximum(conv3x3(x.astype(jnp.bfloat16), 2), 0.0)
    x = jnp.maximum(conv3x3(r.astype(jnp.bfloat16), 3) + x, 0.0)
    # CBAM channel attention: avg-pool -> fc1 -> relu -> fc2 -> sigmoid -> scale
    c = o_ref.shape[-1]
    xr = x.reshape(nb, hw, c)
    pooled = jnp.mean(xr, axis=1)                         # (nb, C)
    h = jnp.maximum(
        jnp.dot(pooled.astype(jnp.bfloat16), w1_ref[...],
                preferred_element_type=jnp.float32) + b1_ref[...], 0.0)
    s = jax.nn.sigmoid(
        jnp.dot(h.astype(jnp.bfloat16), w2_ref[...],
                preferred_element_type=jnp.float32) + b2_ref[...])
    o_ref[...] = (xr * s[:, None, :]).reshape(o_ref.shape).astype(o_ref.dtype)


def bottleneck(x3, bp):
    """res1 + res2 + CBAM fused into one pallas_call: the whole (N,4,4,128)
    feature map stays resident in VMEM; 3x3 taps via constant shift matmuls."""
    N, H, W, C = x3.shape
    R = N * H * W
    x_flat = x3.reshape(R, C)
    S = jnp.asarray(_build_shift_mats(N, H, W), jnp.bfloat16)   # jit constant
    inputs = (x_flat, S, bp["res_w"], bp["res_b"],
              bp["fc1_w"], bp["fc1_b"], bp["fc2_w"], bp["fc2_b"])
    in_specs = [pl.BlockSpec(a.shape, functools.partial(_zero_idx, n=a.ndim))
                for a in inputs]
    out = pl.pallas_call(
        functools.partial(_bottleneck_kernel, nb=N, hw=H * W),
        grid=(1,),
        in_specs=in_specs,
        out_specs=pl.BlockSpec((R, C), functools.partial(_zero_idx, n=2)),
        out_shape=jax.ShapeDtypeStruct((R, C), jnp.bfloat16),
        compiler_params=pltpu.CompilerParams(
            dimension_semantics=("arbitrary",),
            vmem_limit_bytes=32 * 1024 * 1024),
    )(*inputs)
    return out.reshape(N, H, W, C)


# ------------------------------- parameters ----------------------------------

def init_params(seed=0):
    keys = iter(jax.random.split(jax.random.PRNGKey(seed), 64))

    def nrm(shape, scale):
        return jax.random.normal(next(keys), shape, jnp.float32) * scale

    p = {}

    def enc(name, ci, co, k):
        fan = ci * k * k
        p[name] = dict(w=nrm((co, ci, k, k), (2.0 / fan) ** 0.5),
                       b=nrm((co,), 0.01),
                       gamma=jnp.ones((co,)) + nrm((co,), 0.01),
                       beta=nrm((co,), 0.01),
                       mean=jnp.zeros((co,)),
                       var=jnp.ones((co,)))

    def conv(name, ci, co, k):
        fan = ci * k * k
        p[name] = dict(w=nrm((co, ci, k, k), (2.0 / fan) ** 0.5),
                       b=nrm((co,), 0.01))

    def deconv(name, ci, co, k):
        fan = ci * k * k
        p[name] = dict(w=nrm((ci, co, k, k), (2.0 / fan) ** 0.5),
                       b=nrm((co,), 0.01))

    enc("enc1", 1, 32, 3)
    enc("enc2", 32, 64, 7)
    enc("enc3", 64, 128, 5)
    conv("res1_conv1", 128, 128, 3)
    conv("res1_conv2", 128, 128, 3)
    conv("res2_conv1", 128, 128, 3)
    conv("res2_conv2", 128, 128, 3)
    p["cbam"] = dict(fc1_w=nrm((32, 128), (2.0 / 128) ** 0.5),
                     fc1_b=nrm((32,), 0.01),
                     fc2_w=nrm((128, 32), (2.0 / 32) ** 0.5),
                     fc2_b=nrm((128,), 0.01))
    deconv("dec1", 128, 64, 3)
    deconv("dec2", 64, 32, 3)
    conv("dec3", 32, 1, 3)
    return p


def fold_bn(ep, eps=1e-5):
    """Eval-mode BatchNorm folded into the conv weight/shift."""
    s = ep["gamma"] / jnp.sqrt(ep["var"] + eps)
    w = ep["w"] * s[:, None, None, None]
    shift = (ep["b"] - ep["mean"]) * s + ep["beta"]
    return w, shift


def fold_bn_with_input_norm(ep, eps=1e-5):
    """fold_bn plus the input normalization (x-0.5)/0.5 = 2x-1 folded into the
    weights (the conv then runs on the raw input; padding uses value 0.5 which
    maps to 0 in normalized space, matching the reference zero-padding)."""
    s = ep["gamma"] / jnp.sqrt(ep["var"] + eps)
    w_eff = ep["w"] * 2.0
    b_eff = ep["b"] - jnp.sum(ep["w"], axis=(1, 2, 3))
    w = w_eff * s[:, None, None, None]
    shift = (b_eff - ep["mean"]) * s + ep["beta"]
    return w, shift


def _prep_mat(wmat, bias):
    """Pad K/N to multiples of 128, cast weight to bf16, bias to (1,Np) f32."""
    K, N = wmat.shape
    Kp, Np = _round_up(K, 128), _round_up(N, 128)
    w = jnp.pad(wmat.astype(jnp.float32),
                ((0, Kp - K), (0, Np - N))).astype(jnp.bfloat16)
    s = jnp.pad(jnp.asarray(bias, jnp.float32).reshape(1, N),
                ((0, 0), (0, Np - N)))
    return w, s


def prepare_params(p):
    """One-time weight preprocessing hoisted out of forward(): BN folding,
    matmul layouts, subpixel convT weights, bf16 cast, K/N padding."""
    prep = {}
    w, sh = fold_bn_with_input_norm(p["enc1"])
    prep["enc1"] = _prep_mat(conv_w_to_mat(w), sh)
    w, sh = fold_bn(p["enc2"])
    prep["enc2"] = _prep_mat(conv_w_to_mat(w), sh)
    w, sh = fold_bn(p["enc3"])
    prep["enc3"] = _prep_mat(conv_w_to_mat(w), sh)

    rw, rb = [], []
    for name in ("res1_conv1", "res1_conv2", "res2_conv1", "res2_conv2"):
        w = p[name]["w"]                                     # (O, I, 3, 3)
        rw.append(jnp.transpose(w, (2, 3, 1, 0)).reshape(9, w.shape[1], w.shape[0]))
        rb.append(p[name]["b"].reshape(1, -1))
    cb = p["cbam"]
    prep["bottleneck"] = dict(
        res_w=jnp.stack(rw).astype(jnp.bfloat16),            # (4, 9, 128, 128)
        res_b=jnp.stack(rb).astype(jnp.float32),             # (4, 1, 128)
        fc1_w=cb["fc1_w"].T.astype(jnp.bfloat16),             # (128, 32)
        fc1_b=cb["fc1_b"].reshape(1, -1).astype(jnp.float32),
        fc2_w=cb["fc2_w"].T.astype(jnp.bfloat16),             # (32, 128)
        fc2_b=cb["fc2_b"].reshape(1, -1).astype(jnp.float32))

    prep["dec1"] = _prep_mat(convT_weight_mat(p["dec1"]["w"]),
                             jnp.tile(p["dec1"]["b"], 4))
    prep["dec2"] = _prep_mat(convT_weight_mat(p["dec2"]["w"]),
                             jnp.tile(p["dec2"]["b"], 4))
    prep["dec3"] = _prep_mat(conv_w_to_mat(p["dec3"]["w"]), p["dec3"]["b"])
    return prep


# --------------------------------- forward -----------------------------------

def forward(prep, x_nchw):
    x = jnp.transpose(x_nchw, (0, 2, 3, 1)).astype(jnp.float32)   # NCHW -> NHWC
    xb = x.astype(jnp.bfloat16)

    # enc1: input-norm + BN folded into the weights; pad value 0.5 == 0 in
    # normalized space (matches the reference zero padding).
    w, s = prep["enc1"]
    x1 = conv2d(xb, w, s, c_out=32, kh=3, stride=1, padding=1, act="relu",
                pad_value=0.5)
    w, s = prep["enc2"]
    x2 = conv2d(x1, w, s, c_out=64, kh=7, stride=2, padding=3, act="relu")
    w, s = prep["enc3"]
    x3 = conv2d(x2, w, s, c_out=128, kh=5, stride=2, dilation=2, padding=4,
                act="relu")

    # res1 + res2 + CBAM fused into a single pallas_call at the 4x4 bottleneck
    x3 = bottleneck(x3, prep["bottleneck"])

    # decoders: subpixel ConvTranspose2d with the skip-add fused in-kernel
    w, s = prep["dec1"]
    x4 = conv_transpose2d(x3, w, s, c_out=64, skip=x2)
    w, s = prep["dec2"]
    x5 = conv_transpose2d(x4, w, s, c_out=32, skip=x1)

    # dec3 conv + tanh + (out+1)/2 + clamp(x_norm - out, 0, 1) in one epilogue
    w, s = prep["dec3"]
    out = conv2d(x5, w, s, c_out=1, kh=3, stride=1, padding=1, act="tanh",
                 res=x, mode="final", out_dtype=jnp.float32)
    return jnp.transpose(out, (0, 3, 1, 2))                       # NHWC -> NCHW


if __name__ == "__main__":
    params = init_params(0)
    prep = prepare_params(params)          # one-time weight prep (not per call)
    jax.block_until_ready(jax.tree_util.tree_leaves(prep))

    key = jax.random.PRNGKey(0)
    x = jax.random.uniform(key, (2, 1, 16, 16), jnp.float32)      # NCHW like torch
    out = jax.jit(forward)(prep, x)
    jax.block_until_ready(out)
    assert out.shape == (2, 1, 16, 16)
    assert bool(jnp.all(jnp.isfinite(out)))
    assert bool(jnp.all((out >= 0.0) & (out <= 1.0)))
    print("KERNEL_OK")
</pallas_src>

<mosaic_0001>
module attributes {stable_mosaic.version = 11 : i64} {
  func.func @_mm_kernel(%arg0: i32, %arg1: i32, %arg2: memref<512x128xbf16, #tpu.memory_space<vmem>>, %arg3: memref<128x128xbf16, #tpu.memory_space<vmem>>, %arg4: memref<1x128xf32, #tpu.memory_space<vmem>>, %arg5: memref<512x128xbf16, #tpu.memory_space<vmem>>) attributes {dimension_semantics = [#tpu.dimension_semantics<parallel>, #tpu.dimension_semantics<parallel>], iteration_bounds = array<i64: 1, 1>, scalar_prefetch = 0 : i64, scratch_operands = 0 : i64, tpu.core_type = #tpu.core_type<tc>, window_params = [{transform_indices = @transform_0, window_bounds = array<i64: 512, 128>}, {transform_indices = @transform_1, window_bounds = array<i64: 128, 128>}, {transform_indices = @transform_2, window_bounds = array<i64: 1, 128>}, {transform_indices = @transform_3, window_bounds = array<i64: 512, 128>}]} {
    %c0 = arith.constant 0 : index
    %c0_0 = arith.constant 0 : index
    %0 = vector.load %arg2[%c0, %c0_0] : memref<512x128xbf16, #tpu.memory_space<vmem>>, vector<512x128xbf16>
    %c0_1 = arith.constant 0 : index
    %c0_2 = arith.constant 0 : index
    %1 = vector.load %arg3[%c0_1, %c0_2] : memref<128x128xbf16, #tpu.memory_space<vmem>>, vector<128x128xbf16>
    %cst = arith.constant dense<0.000000e+00> : vector<512x128xf32>
    %2 = tpu.matmul %0, %1, %cst {dimension_numbers = #tpu.dot_dimension_numbers<[1], [0], [0], [1], [0, 0, 1, 1], [], []>} : vector<512x128xbf16>, vector<128x128xbf16>, vector<512x128xf32> -> vector<512x128xf32>
    %c0_3 = arith.constant 0 : index
    %c0_4 = arith.constant 0 : index
    %3 = vector.load %arg4[%c0_3, %c0_4] : memref<1x128xf32, #tpu.memory_space<vmem>>, vector<1x128xf32>
    %4 = vector.broadcast %3 : vector<1x128xf32> to vector<512x128xf32>
    %5 = arith.addf %2, %4 : vector<512x128xf32>
    %cst_5 = arith.constant 0.000000e+00 : f32
    %6 = vector.broadcast %cst_5 : f32 to vector<512x128xf32>
    %7 = arith.maximumf %5, %6 : vector<512x128xf32>
    %8 = arith.truncf %7 : vector<512x128xf32> to vector<512x128xbf16>
    %c0_6 = arith.constant 0 : index
    %c0_7 = arith.constant 0 : index
    %9 = vector.load %arg5[%c0_6, %c0_7] : memref<512x128xbf16, #tpu.memory_space<vmem>>, vector<512x128xbf16>
    tpu.vector_store %arg5[%c0_6, %c0_7], %8 {strides = array<i32>} : memref<512x128xbf16, #tpu.memory_space<vmem>>, vector<512x128xbf16>,
    return
  }
  func.func @transform_0(%arg0: i32, %arg1: i32) -> (i32, i32) {
    %c0_i32 = arith.constant 0 : i32
    %c0_i32_0 = arith.constant 0 : i32
    return %arg0, %c0_i32 : i32, i32
  }
  func.func @transform_1(%arg0: i32, %arg1: i32) -> (i32, i32) {
    %c0_i32 = arith.constant 0 : i32
    %c0_i32_0 = arith.constant 0 : i32
    return %c0_i32, %arg1 : i32, i32
  }
  func.func @transform_2(%arg0: i32, %arg1: i32) -> (i32, i32) {
    %c0_i32 = arith.constant 0 : i32
    %c0_i32_0 = arith.constant 0 : i32
    return %c0_i32, %arg1 : i32, i32
  }
  func.func @transform_3(%arg0: i32, %arg1: i32) -> (i32, i32) {
    %c0_i32 = arith.constant 0 : i32
    return %arg0, %arg1 : i32, i32
  }
}

module attributes {stable_mosaic.version = 11 : i64} {
  func.func @_mm_kernel(%arg0: i32, %arg1: i32, %arg2: memref<128x1664xbf16, #tpu.memory_space<vmem>>, %arg3: memref<1664x128xbf16, #tpu.memory_space<vmem>>, %arg4: memref<1x128xf32, #tpu.memory_space<vmem>>, %arg5: memref<128x128xbf16, #tpu.memory_space<vmem>>) attributes {dimension_semantics = [#tpu.dimension_semantics<parallel>, #tpu.dimension_semantics<parallel>], iteration_bounds = array<i64: 1, 1>, scalar_prefetch = 0 : i64, scratch_operands = 0 : i64, tpu.core_type = #tpu.core_type<tc>, window_params = [{transform_indices = @transform_0, window_bounds = array<i64: 128, 1664>}, {transform_indices = @transform_1, window_bounds = array<i64: 1664, 128>}, {transform_indices = @transform_2, window_bounds = array<i64: 1, 128>}, {transform_indices = @transform_3, window_bounds = array<i64: 128, 128>}]} {
    %c0 = arith.constant 0 : index
    %c0_0 = arith.constant 0 : index
    %0 = vector.load %arg2[%c0, %c0_0] : memref<128x1664xbf16, #tpu.memory_space<vmem>>, vector<128x1664xbf16>
    %c0_1 = arith.constant 0 : index
    %c0_2 = arith.constant 0 : index
    %1 = vector.load %arg3[%c0_1, %c0_2] : memref<1664x128xbf16, #tpu.memory_space<vmem>>, vector<1664x128xbf16>
    %cst = arith.constant dense<0.000000e+00> : vector<128x128xf32>
    %2 = tpu.matmul %0, %1, %cst {dimension_numbers = #tpu.dot_dimension_numbers<[1], [0], [0], [1], [0, 0, 1, 1], [], []>} : vector<128x1664xbf16>, vector<1664x128xbf16>, vector<128x128xf32> -> vector<128x128xf32>
    %c0_3 = arith.constant 0 : index
    %c0_4 = arith.constant 0 : index
    %3 = vector.load %arg4[%c0_3, %c0_4] : memref<1x128xf32, #tpu.memory_space<vmem>>, vector<1x128xf32>
    %4 = vector.broadcast %3 : vector<1x128xf32> to vector<128x128xf32>
    %5 = arith.addf %2, %4 : vector<128x128xf32>
    %cst_5 = arith.constant 0.000000e+00 : f32
    %6 = vector.broadcast %cst_5 : f32 to vector<128x128xf32>
    %7 = arith.maximumf %5, %6 : vector<128x128xf32>
    %8 = arith.truncf %7 : vector<128x128xf32> to vector<128x128xbf16>
    %c0_6 = arith.constant 0 : index
    %c0_7 = arith.constant 0 : index
    %9 = vector.load %arg5[%c0_6, %c0_7] : memref<128x128xbf16, #tpu.memory_space<vmem>>, vector<128x128xbf16>
    tpu.vector_store %arg5[%c0_6, %c0_7], %8 {strides = array<i32>} : memref<128x128xbf16, #tpu.memory_space<vmem>>, vector<128x128xbf16>,
    return
  }
  func.func @transform_0(%arg0: i32, %arg1: i32) -> (i32, i32) {
    %c0_i32 = arith.constant 0 : i32
    %c0_i32_0 = arith.constant 0 : i32
    return %arg0, %c0_i32 : i32, i32
  }
  func.func @transform_1(%arg0: i32, %arg1: i32) -> (i32, i32) {
    %c0_i32 = arith.constant 0 : i32
    %c0_i32_0 = arith.constant 0 : i32
    return %c0_i32, %arg1 : i32, i32
  }
  func.func @transform_2(%arg0: i32, %arg1: i32) -> (i32, i32) {
    %c0_i32 = arith.constant 0 : i32
    %c0_i32_0 = arith.constant 0 : i32
    return %c0_i32, %arg1 : i32, i32
  }
  func.func @transform_3(%arg0: i32, %arg1: i32) -> (i32, i32) {
    %c0_i32 = arith.constant 0 : i32
    return %arg0, %arg1 : i32, i32
  }
}

module attributes {stable_mosaic.version = 11 : i64} {
  func.func @_mm_kernel(%arg0: i32, %arg1: i32, %arg2: memref<32x1664xbf16, #tpu.memory_space<vmem>>, %arg3: memref<1664x128xbf16, #tpu.memory_space<vmem>>, %arg4: memref<1x128xf32, #tpu.memory_space<vmem>>, %arg5: memref<32x128xbf16, #tpu.memory_space<vmem>>) attributes {dimension_semantics = [#tpu.dimension_semantics<parallel>, #tpu.dimension_semantics<parallel>], iteration_bounds = array<i64: 1, 1>, scalar_prefetch = 0 : i64, scratch_operands = 0 : i64, tpu.core_type = #tpu.core_type<tc>, window_params = [{transform_indices = @transform_0, window_bounds = array<i64: 32, 1664>}, {transform_indices = @transform_1, window_bounds = array<i64: 1664, 128>}, {transform_indices = @transform_2, window_bounds = array<i64: 1, 128>}, {transform_indices = @transform_3, window_bounds = array<i64: 32, 128>}]} {
    %c0 = arith.constant 0 : index
    %c0_0 = arith.constant 0 : index
    %0 = vector.load %arg2[%c0, %c0_0] : memref<32x1664xbf16, #tpu.memory_space<vmem>>, vector<32x1664xbf16>
    %c0_1 = arith.constant 0 : index
    %c0_2 = arith.constant 0 : index
    %1 = vector.load %arg3[%c0_1, %c0_2] : memref<1664x128xbf16, #tpu.memory_space<vmem>>, vector<1664x128xbf16>
    %cst = arith.constant dense<0.000000e+00> : vector<32x128xf32>
    %2 = tpu.matmul %0, %1, %cst {dimension_numbers = #tpu.dot_dimension_numbers<[1], [0], [0], [1], [0, 0, 1, 1], [], []>} : vector<32x1664xbf16>, vector<1664x128xbf16>, vector<32x128xf32> -> vector<32x128xf32>
    %c0_3 = arith.constant 0 : index
    %c0_4 = arith.constant 0 : index
    %3 = vector.load %arg4[%c0_3, %c0_4] : memref<1x128xf32, #tpu.memory_space<vmem>>, vector<1x128xf32>
    %4 = vector.broadcast %3 : vector<1x128xf32> to vector<32x128xf32>
    %5 = arith.addf %2, %4 : vector<32x128xf32>
    %cst_5 = arith.constant 0.000000e+00 : f32
    %6 = vector.broadcast %cst_5 : f32 to vector<32x128xf32>
    %7 = arith.maximumf %5, %6 : vector<32x128xf32>
    %8 = arith.truncf %7 : vector<32x128xf32> to vector<32x128xbf16>
    %c0_6 = arith.constant 0 : index
    %c0_7 = arith.constant 0 : index
    %9 = vector.load %arg5[%c0_6, %c0_7] : memref<32x128xbf16, #tpu.memory_space<vmem>>, vector<32x128xbf16>
    tpu.vector_store %arg5[%c0_6, %c0_7], %8 {strides = array<i32>} : memref<32x128xbf16, #tpu.memory_space<vmem>>, vector<32x128xbf16>,
    return
  }
  func.func @transform_0(%arg0: i32, %arg1: i32) -> (i32, i32) {
    %c0_i32 = arith.constant 0 : i32
    %c0_i32_0 = arith.constant 0 : i32
    return %arg0, %c0_i32 : i32, i32
  }
  func.func @transform_1(%arg0: i32, %arg1: i32) -> (i32, i32) {
    %c0_i32 = arith.constant 0 : i32
    %c0_i32_0 = arith.constant 0 : i32
    return %c0_i32, %arg1 : i32, i32
  }
  func.func @transform_2(%arg0: i32, %arg1: i32) -> (i32, i32) {
    %c0_i32 = arith.constant 0 : i32
    %c0_i32_0 = arith.constant 0 : i32
    return %c0_i32, %arg1 : i32, i32
  }
  func.func @transform_3(%arg0: i32, %arg1: i32) -> (i32, i32) {
    %c0_i32 = arith.constant 0 : i32
    return %arg0, %arg1 : i32, i32
  }
}

module attributes {stable_mosaic.version = 11 : i64} {
  func.func @_bottleneck_kernel(%arg0: i32, %arg1: memref<32x128xbf16, #tpu.memory_space<vmem>>, %arg2: memref<9x32x32xbf16, #tpu.memory_space<vmem>>, %arg3: memref<4x9x128x128xbf16, #tpu.memory_space<vmem>>, %arg4: memref<4x1x128xf32, #tpu.memory_space<vmem>>, %arg5: memref<128x32xbf16, #tpu.memory_space<vmem>>, %arg6: memref<1x32xf32, #tpu.memory_space<vmem>>, %arg7: memref<32x128xbf16, #tpu.memory_space<vmem>>, %arg8: memref<1x128xf32, #tpu.memory_space<vmem>>, %arg9: memref<32x128xbf16, #tpu.memory_space<vmem>>) attributes {dimension_semantics = [#tpu.dimension_semantics<arbitrary>], iteration_bounds = array<i64: 1>, scalar_prefetch = 0 : i64, scratch_operands = 0 : i64, tpu.core_type = #tpu.core_type<tc>, window_params = [{pipeline_mode = #tpu.pipeline_mode<synchronous>, transform_indices = @transform_0, window_bounds = array<i64: 32, 128>}, {pipeline_mode = #tpu.pipeline_mode<synchronous>, transform_indices = @transform_1, window_bounds = array<i64: 9, 32, 32>}, {pipeline_mode = #tpu.pipeline_mode<synchronous>, transform_indices = @transform_2, window_bounds = array<i64: 4, 9, 128, 128>}, {pipeline_mode = #tpu.pipeline_mode<synchronous>, transform_indices = @transform_3, window_bounds = array<i64: 4, 1, 128>}, {pipeline_mode = #tpu.pipeline_mode<synchronous>, transform_indices = @transform_4, window_bounds = array<i64: 128, 32>}, {pipeline_mode = #tpu.pipeline_mode<synchronous>, transform_indices = @transform_5, window_bounds = array<i64: 1, 32>}, {pipeline_mode = #tpu.pipeline_mode<synchronous>, transform_indices = @transform_6, window_bounds = array<i64: 32, 128>}, {pipeline_mode = #tpu.pipeline_mode<synchronous>, transform_indices = @transform_7, window_bounds = array<i64: 1, 128>}, {pipeline_mode = #tpu.pipeline_mode<synchronous>, transform_indices = @transform_8, window_bounds = array<i64: 32, 128>}]} {
    %c0 = arith.constant 0 : index
    %c0_0 = arith.constant 0 : index
    %0 = vector.load %arg1[%c0, %c0_0] : memref<32x128xbf16, #tpu.memory_space<vmem>>, vector<32x128xbf16>
    %1 = arith.extf %0 : vector<32x128xbf16> to vector<32x128xf32>
    %cst = arith.constant 0.000000e+00 : f32
    %2 = vector.broadcast %cst : f32 to vector<32x128xf32>
    %c0_1 = arith.constant 0 : index
    %c0_2 = arith.constant 0 : index
    %c0_3 = arith.constant 0 : index
    %3 = vector.load %arg2[%c0_1, %c0_2, %c0_3] : memref<9x32x32xbf16, #tpu.memory_space<vmem>>, vector<1x32x32xbf16>
    %4 = vector.shape_cast %3 : vector<1x32x32xbf16> to vector<32x32xbf16>
    %cst_4 = arith.constant dense<0.000000e+00> : vector<32x128xf32>
    %5 = tpu.matmul %4, %0, %cst_4 {dimension_numbers = #tpu.dot_dimension_numbers<[1], [0], [0], [1], [0, 0, 1, 1], [], []>} : vector<32x32xbf16>, vector<32x128xbf16>, vector<32x128xf32> -> vector<32x128xf32>
    %6 = arith.truncf %5 : vector<32x128xf32> to vector<32x128xbf16>
    %c0_5 = arith.constant 0 : index
    %c0_6 = arith.constant 0 : index
    %c0_7 = arith.constant 0 : index
    %c0_8 = arith.constant 0 : index
    %7 = vector.load %arg3[%c0_5, %c0_6, %c0_7, %c0_8] : memref<4x9x128x128xbf16, #tpu.memory_space<vmem>>, vector<1x1x128x128xbf16>
    %8 = vector.shape_cast %7 : vector<1x1x128x128xbf16> to vector<128x128xbf16>
    %cst_9 = arith.constant dense<0.000000e+00> : vector<32x128xf32>
    %9 = tpu.matmul %6, %8, %cst_9 {dimension_numbers = #tpu.dot_dimension_numbers<[1], [0], [0], [1], [0, 0, 1, 1], [], []>} : vector<32x128xbf16>, vector<128x128xbf16>, vector<32x128xf32> -> vector<32x128xf32>
    %10 = arith.addf %2, %9 : vector<32x128xf32>
    %c1 = arith.constant 1 : index
    %c0_10 = arith.constant 0 : index
    %c0_11 = arith.constant 0 : index
    %11 = vector.load %arg2[%c1, %c0_10, %c0_11] : memref<9x32x32xbf16, #tpu.memory_space<vmem>>, vector<1x32x32xbf16>
    %12 = vector.shape_cast %11 : vector<1x32x32xbf16> to vector<32x32xbf16>
    %cst_12 = arith.constant dense<0.000000e+00> : vector<32x128xf32>
    %13 = tpu.matmul %12, %0, %cst_12 {dimension_numbers = #tpu.dot_dimension_numbers<[1], [0], [0], [1], [0, 0, 1, 1], [], []>} : vector<32x32xbf16>, vector<32x128xbf16>, vector<32x128xf32> -> vector<32x128xf32>
    %14 = arith.truncf %13 : vector<32x128xf32> to vector<32x128xbf16>
    %c0_13 = arith.constant 0 : index
    %c1_14 = arith.constant 1 : index
    %c0_15 = arith.constant 0 : index
    %c0_16 = arith.constant 0 : index
    %15 = vector.load %arg3[%c0_13, %c1_14, %c0_15, %c0_16] : memref<4x9x128x128xbf16, #tpu.memory_space<vmem>>, vector<1x1x128x128xbf16>
    %16 = vector.shape_cast %15 : vector<1x1x128x128xbf16> to vector<128x128xbf16>
    %cst_17 = arith.constant dense<0.000000e+00> : vector<32x128xf32>
    %17 = tpu.matmul %14, %16, %cst_17 {dimension_numbers = #tpu.dot_dimension_numbers<[1], [0], [0], [1], [0, 0, 1, 1], [], []>} : vector<32x128xbf16>, vector<128x128xbf16>, vector<32x128xf32> -> vector<32x128xf32>
    %18 = arith.addf %10, %17 : vector<32x128xf32>
    %c2 = arith.constant 2 : index
    %c0_18 = arith.constant 0 : index
    %c0_19 = arith.constant 0 : index
    %19 = vector.load %arg2[%c2, %c0_18, %c0_19] : memref<9x32x32xbf16, #tpu.memory_space<vmem>>, vector<1x32x32xbf16>
    %20 = vector.shape_cast %19 : vector<1x32x32xbf16> to vector<32x32xbf16>
    %cst_20 = arith.constant dense<0.000000e+00> : vector<32x128xf32>
    %21 = tpu.matmul %20, %0, %cst_20 {dimension_numbers = #tpu.dot_dimension_numbers<[1], [0], [0], [1], [0, 0, 1, 1], [], []>} : vector<32x32xbf16>, vector<32x128xbf16>, vector<32x128xf32> -> vector<32x128xf32>
    %22 = arith.truncf %21 : vector<32x128xf32> to vector<32x128xbf16>
    %c0_21 = arith.constant 0 : index
    %c2_22 = arith.constant 2 : index
    %c0_23 = arith.constant 0 : index
    %c0_24 = arith.constant 0 : index
    %23 = vector.load %arg3[%c0_21, %c2_22, %c0_23, %c0_24] : memref<4x9x128x128xbf16, #tpu.memory_space<vmem>>, vector<1x1x128x128xbf16>
    %24 = vector.shape_cast %23 : vector<1x1x128x128xbf16> to vector<128x128xbf16>
    %cst_25 = arith.constant dense<0.000000e+00> : vector<32x128xf32>
    %25 = tpu.matmul %22, %24, %cst_25 {dimension_numbers = #tpu.dot_dimension_numbers<[1], [0], [0], [1], [0, 0, 1, 1], [], []>} : vector<32x128xbf16>, vector<128x128xbf16>, vector<32x128xf32> -> vector<32x128xf32>
    %26 = arith.addf %18, %25 : vector<32x128xf32>
    %c3 = arith.constant 3 : index
    %c0_26 = arith.constant 0 : index
    %c0_27 = arith.constant 0 : index
    %27 = vector.load %arg2[%c3, %c0_26, %c0_27] : memref<9x32x32xbf16, #tpu.memory_space<vmem>>, vector<1x32x32xbf16>
    %28 = vector.shape_cast %27 : vector<1x32x32xbf16> to vector<32x32xbf16>
    %cst_28 = arith.constant dense<0.000000e+00> : vector<32x128xf32>
    %29 = tpu.matmul %28, %0, %cst_28 {dimension_numbers = #tpu.dot_dimension_numbers<[1], [0], [0], [1], [0, 0, 1, 1], [], []>} : vector<32x32xbf16>, vector<32x128xbf16>, vector<32x128xf32> -> vector<32x128xf32>
    %30 = arith.truncf %29 : vector<32x128xf32> to vector<32x128xbf16>
    %c0_29 = arith.constant 0 : index
    %c3_30 = arith.constant 3 : index
    %c0_31 = arith.constant 0 : index
    %c0_32 = arith.constant 0 : index
    %31 = vector.load %arg3[%c0_29, %c3_30, %c0_31, %c0_32] : memref<4x9x128x128xbf16, #tpu.memory_space<vmem>>, vector<1x1x128x128xbf16>
    %32 = vector.shape_cast %31 : vector<1x1x128x128xbf16> to vector<128x128xbf16>
    %cst_33 = arith.constant dense<0.000000e+00> : vector<32x128xf32>
    %33 = tpu.matmul %30, %32, %cst_33 {dimension_numbers = #tpu.dot_dimension_numbers<[1], [0], [0], [1], [0, 0, 1, 1], [], []>} : vector<32x128xbf16>, vector<128x128xbf16>, vector<32x128xf32> -> vector<32x128xf32>
    %34 = arith.addf %26, %33 : vector<32x128xf32>
    %c4 = arith.constant 4 : index
    %c0_34 = arith.constant 0 : index
    %c0_35 = arith.constant 0 : index
    %35 = vector.load %arg2[%c4, %c0_34, %c0_35] : memref<9x32x32xbf16, #tpu.memory_space<vmem>>, vector<1x32x32xbf16>
    %36 = vector.shape_cast %35 : vector<1x32x32xbf16> to vector<32x32xbf16>
    %cst_36 = arith.constant dense<0.000000e+00> : vector<32x128xf32>
    %37 = tpu.matmul %36, %0, %cst_36 {dimension_numbers = #tpu.dot_dimension_numbers<[1], [0], [0], [1], [0, 0, 1, 1], [], []>} : vector<32x32xbf16>, vector<32x128xbf16>, vector<32x128xf32> -> vector<32x128xf32>
    %38 = arith.truncf %37 : vector<32x128xf32> to vector<32x128xbf16>
    %c0_37 = arith.constant 0 : index
    %c4_38 = arith.constant 4 : index
    %c0_39 = arith.constant 0 : index
    %c0_40 = arith.constant 0 : index
    %39 = vector.load %arg3[%c0_37, %c4_38, %c0_39, %c0_40] : memref<4x9x128x128xbf16, #tpu.memory_space<vmem>>, vector<1x1x128x128xbf16>
    %40 = vector.shape_cast %39 : vector<1x1x128x128xbf16> to vector<128x128xbf16>
    %cst_41 = arith.constant dense<0.000000e+00> : vector<32x128xf32>
    %41 = tpu.matmul %38, %40, %cst_41 {dimension_numbers = #tpu.dot_dimension_numbers<[1], [0], [0], [1], [0, 0, 1, 1], [], []>} : vector<32x128xbf16>, vector<128x128xbf16>, vector<32x128xf32> -> vector<32x128xf32>
    %42 = arith.addf %34, %41 : vector<32x128xf32>
    %c5 = arith.constant 5 : index
    %c0_42 = arith.constant 0 : index
    %c0_43 = arith.constant 0 : index
    %43 = vector.load %arg2[%c5, %c0_42, %c0_43] : memref<9x32x32xbf16, #tpu.memory_space<vmem>>, vector<1x32x32xbf16>
    %44 = vector.shape_cast %43 : vector<1x32x32xbf16> to vector<32x32xbf16>
    %cst_44 = arith.constant dense<0.000000e+00> : vector<32x128xf32>
    %45 = tpu.matmul %44, %0, %cst_44 {dimension_numbers = #tpu.dot_dimension_numbers<[1], [0], [0], [1], [0, 0, 1, 1], [], []>} : vector<32x32xbf16>, vector<32x128xbf16>, vector<32x128xf32> -> vector<32x128xf32>
    %46 = arith.truncf %45 : vector<32x128xf32> to vector<32x128xbf16>
    %c0_45 = arith.constant 0 : index
    %c5_46 = arith.constant 5 : index
    %c0_47 = arith.constant 0 : index
    %c0_48 = arith.constant 0 : index
    %47 = vector.load %arg3[%c0_45, %c5_46, %c0_47, %c0_48] : memref<4x9x128x128xbf16, #tpu.memory_space<vmem>>, vector<1x1x128x128xbf16>
    %48 = vector.shape_cast %47 : vector<1x1x128x128xbf16> to vector<128x128xbf16>
    %cst_49 = arith.constant dense<0.000000e+00> : vector<32x128xf32>
    %49 = tpu.matmul %46, %48, %cst_49 {dimension_numbers = #tpu.dot_dimension_numbers<[1], [0], [0], [1], [0, 0, 1, 1], [], []>} : vector<32x128xbf16>, vector<128x128xbf16>, vector<32x128xf32> -> vector<32x128xf32>
    %50 = arith.addf %42, %49 : vector<32x128xf32>
    %c6 = arith.constant 6 : index
    %c0_50 = arith.constant 0 : index
    %c0_51 = arith.constant 0 : index
    %51 = vector.load %arg2[%c6, %c0_50, %c0_51] : memref<9x32x32xbf16, #tpu.memory_space<vmem>>, vector<1x32x32xbf16>
    %52 = vector.shape_cast %51 : vector<1x32x32xbf16> to vector<32x32xbf16>
    %cst_52 = arith.constant dense<0.000000e+00> : vector<32x128xf32>
    %53 = tpu.matmul %52, %0, %cst_52 {dimension_numbers = #tpu.dot_dimension_numbers<[1], [0], [0], [1], [0, 0, 1, 1], [], []>} : vector<32x32xbf16>, vector<32x128xbf16>, vector<32x128xf32> -> vector<32x128xf32>
    %54 = arith.truncf %53 : vector<32x128xf32> to vector<32x128xbf16>
    %c0_53 = arith.constant 0 : index
    %c6_54 = arith.constant 6 : index
    %c0_55 = arith.constant 0 : index
    %c0_56 = arith.constant 0 : index
    %55 = vector.load %arg3[%c0_53, %c6_54, %c0_55, %c0_56] : memref<4x9x128x128xbf16, #tpu.memory_space<vmem>>, vector<1x1x128x128xbf16>
    %56 = vector.shape_cast %55 : vector<1x1x128x128xbf16> to vector<128x128xbf16>
    %cst_57 = arith.constant dense<0.000000e+00> : vector<32x128xf32>
    %57 = tpu.matmul %54, %56, %cst_57 {dimension_numbers = #tpu.dot_dimension_numbers<[1], [0], [0], [1], [0, 0, 1, 1], [], []>} : vector<32x128xbf16>, vector<128x128xbf16>, vector<32x128xf32> -> vector<32x128xf32>
    %58 = arith.addf %50, %57 : vector<32x128xf32>
    %c7 = arith.constant 7 : index
    %c0_58 = arith.constant 0 : index
    %c0_59 = arith.constant 0 : index
    %59 = vector.load %arg2[%c7, %c0_58, %c0_59] : memref<9x32x32xbf16, #tpu.memory_space<vmem>>, vector<1x32x32xbf16>
    %60 = vector.shape_cast %59 : vector<1x32x32xbf16> to vector<32x32xbf16>
    %cst_60 = arith.constant dense<0.000000e+00> : vector<32x128xf32>
    %61 = tpu.matmul %60, %0, %cst_60 {dimension_numbers = #tpu.dot_dimension_numbers<[1], [0], [0], [1], [0, 0, 1, 1], [], []>} : vector<32x32xbf16>, vector<32x128xbf16>, vector<32x128xf32> -> vector<32x128xf32>
    %62 = arith.truncf %61 : vector<32x128xf32> to vector<32x128xbf16>
    %c0_61 = arith.constant 0 : index
    %c7_62 = arith.constant 7 : index
    %c0_63 = arith.constant 0 : index
    %c0_64 = arith.constant 0 : index
    %63 = vector.load %arg3[%c0_61, %c7_62, %c0_63, %c0_64] : memref<4x9x128x128xbf16, #tpu.memory_space<vmem>>, vector<1x1x128x128xbf16>
    %64 = vector.shape_cast %63 : vector<1x1x128x128xbf16> to vector<128x128xbf16>
    %cst_65 = arith.constant dense<0.000000e+00> : vector<32x128xf32>
    %65 = tpu.matmul %62, %64, %cst_65 {dimension_numbers = #tpu.dot_dimension_numbers<[1], [0], [0], [1], [0, 0, 1, 1], [], []>} : vector<32x128xbf16>, vector<128x128xbf16>, vector<32x128xf32> -> vector<32x128xf32>
    %66 = arith.addf %58, %65 : vector<32x128xf32>
    %c8 = arith.constant 8 : index
    %c0_66 = arith.constant 0 : index
    %c0_67 = arith.constant 0 : index
    %67 = vector.load %arg2[%c8, %c0_66, %c0_67] : memref<9x32x32xbf16, #tpu.memory_space<vmem>>, vector<1x32x32xbf16>
    %68 = vector.shape_cast %67 : vector<1x32x32xbf16> to vector<32x32xbf16>
    %cst_68 = arith.constant dense<0.000000e+00> : vector<32x128xf32>
    %69 = tpu.matmul %68, %0, %cst_68 {dimension_numbers = #tpu.dot_dimension_numbers<[1], [0], [0], [1], [0, 0, 1, 1], [], []>} : vector<32x32xbf16>, vector<32x128xbf16>, vector<32x128xf32> -> vector<32x128xf32>
    %70 = arith.truncf %69 : vector<32x128xf32> to vector<32x128xbf16>
    %c0_69 = arith.constant 0 : index
    %c8_70 = arith.constant 8 : index
    %c0_71 = arith.constant 0 : index
    %c0_72 = arith.constant 0 : index
    %71 = vector.load %arg3[%c0_69, %c8_70, %c0_71, %c0_72] : memref<4x9x128x128xbf16, #tpu.memory_space<vmem>>, vector<1x1x128x128xbf16>
    %72 = vector.shape_cast %71 : vector<1x1x128x128xbf16> to vector<128x128xbf16>
    %cst_73 = arith.constant dense<0.000000e+00> : vector<32x128xf32>
    %73 = tpu.matmul %70, %72, %cst_73 {dimension_numbers = #tpu.dot_dimension_numbers<[1], [0], [0], [1], [0, 0, 1, 1], [], []>} : vector<32x128xbf16>, vector<128x128xbf16>, vector<32x128xf32> -> vector<32x128xf32>
    %74 = arith.addf %66, %73 : vector<32x128xf32>
    %c0_74 = arith.constant 0 : index
    %c0_75 = arith.constant 0 : index
    %c0_76 = arith.constant 0 : index
    %75 = vector.load %arg4[%c0_74, %c0_75, %c0_76] : memref<4x1x128xf32, #tpu.memory_space<vmem>>, vector<1x1x128xf32>
    %76 = vector.shape_cast %75 : vector<1x1x128xf32> to vector<1x128xf32>
    %77 = vector.broadcast %76 : vector<1x128xf32> to vector<32x128xf32>
    %78 = arith.addf %74, %77 : vector<32x128xf32>
    %cst_77 = arith.constant 0.000000e+00 : f32
    %79 = vector.broadcast %cst_77 : f32 to vector<32x128xf32>
    %80 = arith.maximumf %78, %79 : vector<32x128xf32>
    %81 = arith.truncf %80 : vector<32x128xf32> to vector<32x128xbf16>
    %cst_78 = arith.constant 0.000000e+00 : f32
    %82 = vector.broadcast %cst_78 : f32 to vector<32x128xf32>
    %c0_79 = arith.constant 0 : index
    %c0_80 = arith.constant 0 : index
    %c0_81 = arith.constant 0 : index
    %83 = vector.load %arg2[%c0_79, %c0_80, %c0_81] : memref<9x32x32xbf16, #tpu.memory_space<vmem>>, vector<1x32x32xbf16>
    %84 = vector.shape_cast %83 : vector<1x32x32xbf16> to vector<32x32xbf16>
    %cst_82 = arith.constant dense<0.000000e+00> : vector<32x128xf32>
    %85 = tpu.matmul %84, %81, %cst_82 {dimension_numbers = #tpu.dot_dimension_numbers<[1], [0], [0], [1], [0, 0, 1, 1], [], []>} : vector<32x32xbf16>, vector<32x128xbf16>, vector<32x128xf32> -> vector<32x128xf32>
    %86 = arith.truncf %85 : vector<32x128xf32> to vector<32x128xbf16>
    %c1_83 = arith.constant 1 : index
    %c0_84 = arith.constant 0 : index
    %c0_85 = arith.constant 0 : index
    %c0_86 = arith.constant 0 : index
    %87 = vector.load %arg3[%c1_83, %c0_84, %c0_85, %c0_86] : memref<4x9x128x128xbf16, #tpu.memory_space<vmem>>, vector<1x1x128x128xbf16>
    %88 = vector.shape_cast %87 : vector<1x1x128x128xbf16> to vector<128x128xbf16>
    %cst_87 = arith.constant dense<0.000000e+00> : vector<32x128xf32>
    %89 = tpu.matmul %86, %88, %cst_87 {dimension_numbers = #tpu.dot_dimension_numbers<[1], [0], [0], [1], [0, 0, 1, 1], [], []>} : vector<32x128xbf16>, vector<128x128xbf16>, vector<32x128xf32> -> vector<32x128xf32>
    %90 = arith.addf %82, %89 : vector<32x128xf32>
    %c1_88 = arith.constant 1 : index
    %c0_89 = arith.constant 0 : index
    %c0_90 = arith.constant 0 : index
    %91 = vector.load %arg2[%c1_88, %c0_89, %c0_90] : memref<9x32x32xbf16, #tpu.memory_space<vmem>>, vector<1x32x32xbf16>
    %92 = vector.shape_cast %91 : vector<1x32x32xbf16> to vector<32x32xbf16>
    %cst_91 = arith.constant dense<0.000000e+00> : vector<32x128xf32>
    %93 = tpu.matmul %92, %81, %cst_91 {dimension_numbers = #tpu.dot_dimension_numbers<[1], [0], [0], [1], [0, 0, 1, 1], [], []>} : vector<32x32xbf16>, vector<32x128xbf16>, vector<32x128xf32> -> vector<32x128xf32>
    %94 = arith.truncf %93 : vector<32x128xf32> to vector<32x128xbf16>
    %c1_92 = arith.constant 1 : index
    %c1_93 = arith.constant 1 : index
    %c0_94 = arith.constant 0 : index
    %c0_95 = arith.constant 0 : index
    %95 = vector.load %arg3[%c1_92, %c1_93, %c0_94, %c0_95] : memref<4x9x128x128xbf16, #tpu.memory_space<vmem>>, vector<1x1x128x128xbf16>
    %96 = vector.shape_cast %95 : vector<1x1x128x128xbf16> to vector<128x128xbf16>
    %cst_96 = arith.constant dense<0.000000e+00> : vector<32x128xf32>
    %97 = tpu.matmul %94, %96, %cst_96 {dimension_numbers = #tpu.dot_dimension_numbers<[1], [0], [0], [1], [0, 0, 1, 1], [], []>} : vector<32x128xbf16>, vector<128x128xbf16>, vector<32x128xf32> -> vector<32x128xf32>
    %98 = arith.addf %90, %97 : vector<32x128xf32>
    %c2_97 = arith.constant 2 : index
    %c0_98 = arith.constant 0 : index
    %c0_99 = arith.constant 0 : index
    %99 = vector.load %arg2[%c2_97, %c0_98, %c0_99] : memref<9x32x32xbf16, #tpu.memory_space<vmem>>, vector<1x32x32xbf16>
    %100 = vector.shape_cast %99 : vector<1x32x32xbf16> to vector<32x32xbf16>
    %cst_100 = arith.constant dense<0.000000e+00> : vector<32x128xf32>
    %101 = tpu.matmul %100, %81, %cst_100 {dimension_numbers = #tpu.dot_dimension_numbers<[1], [0], [0], [1], [0, 0, 1, 1], [], []>} : vector<32x32xbf16>, vector<32x128xbf16>, vector<32x128xf32> -> vector<32x128xf32>
    %102 = arith.truncf %101 : vector<32x128xf32> to vector<32x128xbf16>
    %c1_101 = arith.constant 1 : index
    %c2_102 = arith.constant 2 : index
    %c0_103 = arith.constant 0 : index
    %c0_104 = arith.constant 0 : index
    %103 = vector.load %arg3[%c1_101, %c2_102, %c0_103, %c0_104] : memref<4x9x128x128xbf16, #tpu.memory_space<vmem>>, vector<1x1x128x128xbf16>
    %104 = vector.shape_cast %103 : vector<1x1x128x128xbf16> to vector<128x128xbf16>
    %cst_105 = arith.constant dense<0.000000e+00> : vector<32x128xf32>
    %105 = tpu.matmul %102, %104, %cst_105 {dimension_numbers = #tpu.dot_dimension_numbers<[1], [0], [0], [1], [0, 0, 1, 1], [], []>} : vector<32x128xbf16>, vector<128x128xbf16>, vector<32x128xf32> -> vector<32x128xf32>
    %106 = arith.addf %98, %105 : vector<32x128xf32>
    %c3_106 = arith.constant 3 : index
    %c0_107 = arith.constant 0 : index
    %c0_108 = arith.constant 0 : index
    %107 = vector.load %arg2[%c3_106, %c0_107, %c0_108] : memref<9x32x32xbf16, #tpu.memory_space<vmem>>, vector<1x32x32xbf16>
    %108 = vector.shape_cast %107 : vector<1x32x32xbf16> to vector<32x32xbf16>
    %cst_109 = arith.constant dense<0.000000e+00> : vector<32x128xf32>
    %109 = tpu.matmul %108, %81, %cst_109 {dimension_numbers = #tpu.dot_dimension_numbers<[1], [0], [0], [1], [0, 0, 1, 1], [], []>} : vector<32x32xbf16>, vector<32x128xbf16>, vector<32x128xf32> -> vector<32x128xf32>
    %110 = arith.truncf %109 : vector<32x128xf32> to vector<32x128xbf16>
    %c1_110 = arith.constant 1 : index
    %c3_111 = arith.constant 3 : index
    %c0_112 = arith.constant 0 : index
    %c0_113 = arith.constant 0 : index
    %111 = vector.load %arg3[%c1_110, %c3_111, %c0_112, %c0_113] : memref<4x9x128x128xbf16, #tpu.memory_space<vmem>>, vector<1x1x128x128xbf16>
    %112 = vector.shape_cast %111 : vector<1x1x128x128xbf16> to vector<128x128xbf16>
    %cst_114 = arith.constant dense<0.000000e+00> : vector<32x128xf32>
    %113 = tpu.matmul %110, %112, %cst_114 {dimension_numbers = #tpu.dot_dimension_numbers<[1], [0], [0], [1], [0, 0, 1, 1], [], []>} : vector<32x128xbf16>, vector<128x128xbf16>, vector<32x128xf32> -> vector<32x128xf32>
    %114 = arith.addf %106, %113 : vector<32x128xf32>
    %c4_115 = arith.constant 4 : index
    %c0_116 = arith.constant 0 : index
    %c0_117 = arith.constant 0 : index
    %115 = vector.load %arg2[%c4_115, %c0_116, %c0_117] : memref<9x32x32xbf16, #tpu.memory_space<vmem>>, vector<1x32x32xbf16>
    %116 = vector.shape_cast %115 : vector<1x32x32xbf16> to vector<32x32xbf16>
    %cst_118 = arith.constant dense<0.000000e+00> : vector<32x128xf32>
    %117 = tpu.matmul %116, %81, %cst_118 {dimension_numbers = #tpu.dot_dimension_numbers<[1], [0], [0], [1], [0, 0, 1, 1], [], []>} : vector<32x32xbf16>, vector<32x128xbf16>, vector<32x128xf32> -> vector<32x128xf32>
    %118 = arith.truncf %117 : vector<32x128xf32> to vector<32x128xbf16>
    %c1_119 = arith.constant 1 : index
    %c4_120 = arith.constant 4 : index
    %c0_121 = arith.constant 0 : index
    %c0_122 = arith.constant 0 : index
    %119 = vector.load %arg3[%c1_119, %c4_120, %c0_121, %c0_122] : memref<4x9x128x128xbf16, #tpu.memory_space<vmem>>, vector<1x1x128x128xbf16>
    %120 = vector.shape_cast %119 : vector<1x1x128x128xbf16> to vector<128x128xbf16>
    %cst_123 = arith.constant dense<0.000000e+00> : vector<32x128xf32>
    %121 = tpu.matmul %118, %120, %cst_123 {dimension_numbers = #tpu.dot_dimension_numbers<[1], [0], [0], [1], [0, 0, 1, 1], [], []>} : vector<32x128xbf16>, vector<128x128xbf16>, vector<32x128xf32> -> vector<32x128xf32>
    %122 = arith.addf %114, %121 : vector<32x128xf32>
    %c5_124 = arith.constant 5 : index
    %c0_125 = arith.constant 0 : index
    %c0_126 = arith.constant 0 : index
    %123 = vector.load %arg2[%c5_124, %c0_125, %c0_126] : memref<9x32x32xbf16, #tpu.memory_space<vmem>>, vector<1x32x32xbf16>
    %124 = vector.shape_cast %123 : vector<1x32x32xbf16> to vector<32x32xbf16>
    %cst_127 = arith.constant dense<0.000000e+00> : vector<32x128xf32>
    %125 = tpu.matmul %124, %81, %cst_127 {dimension_numbers = #tpu.dot_dimension_numbers<[1], [0], [0], [1], [0, 0, 1, 1], [], []>} : vector<32x32xbf16>, vector<32x128xbf16>, vector<32x128xf32> -> vector<32x128xf32>
    %126 = arith.truncf %125 : vector<32x128xf32> to vector<32x128xbf16>
    %c1_128 = arith.constant 1 : index
    %c5_129 = arith.constant 5 : index
    %c0_130 = arith.constant 0 : index
    %c0_131 = arith.constant 0 : index
    %127 = vector.load %arg3[%c1_128, %c5_129, %c0_130, %c0_131] : memref<4x9x128x128xbf16, #tpu.memory_space<vmem>>, vector<1x1x128x128xbf16>
    %128 = vector.shape_cast %127 : vector<1x1x128x128xbf16> to vector<128x128xbf16>
    %cst_132 = arith.constant dense<0.000000e+00> : vector<32x128xf32>
    %129 = tpu.matmul %126, %128, %cst_132 {dimension_numbers = #tpu.dot_dimension_numbers<[1], [0], [0], [1], [0, 0, 1, 1], [], []>} : vector<32x128xbf16>, vector<128x128xbf16>, vector<32x128xf32> -> vector<32x128xf32>
    %130 = arith.addf %122, %129 : vector<32x128xf32>
    %c6_133 = arith.constant 6 : index
    %c0_134 = arith.constant 0 : index
    %c0_135 = arith.constant 0 : index
    %131 = vector.load %arg2[%c6_133, %c0_134, %c0_135] : memref<9x32x32xbf16, #tpu.memory_space<vmem>>, vector<1x32x32xbf16>
    %132 = vector.shape_cast %131 : vector<1x32x32xbf16> to vector<32x32xbf16>
    %cst_136 = arith.constant dense<0.000000e+00> : vector<32x128xf32>
    %133 = tpu.matmul %132, %81, %cst_136 {dimension_numbers = #tpu.dot_dimension_numbers<[1], [0], [0], [1], [0, 0, 1, 1], [], []>} : vector<32x32xbf16>, vector<32x128xbf16>, vector<32x128xf32> -> vector<32x128xf32>
    %134 = arith.truncf %133 : vector<32x128xf32> to vector<32x128xbf16>
    %c1_137 = arith.constant 1 : index
    %c6_138 = arith.constant 6 : index
    %c0_139 = arith.constant 0 : index
    %c0_140 = arith.constant 0 : index
    %135 = vector.load %arg3[%c1_137, %c6_138, %c0_139, %c0_140] : memref<4x9x128x128xbf16, #tpu.memory_space<vmem>>, vector<1x1x128x128xbf16>
    %136 = vector.shape_cast %135 : vector<1x1x128x128xbf16> to vector<128x128xbf16>
    %cst_141 = arith.constant dense<0.000000e+00> : vector<32x128xf32>
    %137 = tpu.matmul %134, %136, %cst_141 {dimension_numbers = #tpu.dot_dimension_numbers<[1], [0], [0], [1], [0, 0, 1, 1], [], []>} : vector<32x128xbf16>, vector<128x128xbf16>, vector<32x128xf32> -> vector<32x128xf32>
    %138 = arith.addf %130, %137 : vector<32x128xf32>
    %c7_142 = arith.constant 7 : index
    %c0_143 = arith.constant 0 : index
    %c0_144 = arith.constant 0 : index
    %139 = vector.load %arg2[%c7_142, %c0_143, %c0_144] : memref<9x32x32xbf16, #tpu.memory_space<vmem>>, vector<1x32x32xbf16>
    %140 = vector.shape_cast %139 : vector<1x32x32xbf16> to vector<32x32xbf16>
    %cst_145 = arith.constant dense<0.000000e+00> : vector<32x128xf32>
    %141 = tpu.matmul %140, %81, %cst_145 {dimension_numbers = #tpu.dot_dimension_numbers<[1], [0], [0], [1], [0, 0, 1, 1], [], []>} : vector<32x32xbf16>, vector<32x128xbf16>, vector<32x128xf32> -> vector<32x128xf32>
    %142 = arith.truncf %141 : vector<32x128xf32> to vector<32x128xbf16>
    %c1_146 = arith.constant 1 : index
    %c7_147 = arith.constant 7 : index
    %c0_148 = arith.constant 0 : index
    %c0_149 = arith.constant 0 : index
    %143 = vector.load %arg3[%c1_146, %c7_147, %c0_148, %c0_149] : memref<4x9x128x128xbf16, #tpu.memory_space<vmem>>, vector<1x1x128x128xbf16>
    %144 = vector.shape_cast %143 : vector<1x1x128x128xbf16> to vector<128x128xbf16>
    %cst_150 = arith.constant dense<0.000000e+00> : vector<32x128xf32>
    %145 = tpu.matmul %142, %144, %cst_150 {dimension_numbers = #tpu.dot_dimension_numbers<[1], [0], [0], [1], [0, 0, 1, 1], [], []>} : vector<32x128xbf16>, vector<128x128xbf16>, vector<32x128xf32> -> vector<32x128xf32>
    %146 = arith.addf %138, %145 : vector<32x128xf32>
    %c8_151 = arith.constant 8 : index
    %c0_152 = arith.constant 0 : index
    %c0_153 = arith.constant 0 : index
    %147 = vector.load %arg2[%c8_151, %c0_152, %c0_153] : memref<9x32x32xbf16, #tpu.memory_space<vmem>>, vector<1x32x32xbf16>
    %148 = vector.shape_cast %147 : vector<1x32x32xbf16> to vector<32x32xbf16>
    %cst_154 = arith.constant dense<0.000000e+00> : vector<32x128xf32>
    %149 = tpu.matmul %148, %81, %cst_154 {dimension_numbers = #tpu.dot_dimension_numbers<[1], [0], [0], [1], [0, 0, 1, 1], [], []>} : vector<32x32xbf16>, vector<32x128xbf16>, vector<32x128xf32> -> vector<32x128xf32>
    %150 = arith.truncf %149 : vector<32x128xf32> to vector<32x128xbf16>
    %c1_155 = arith.constant 1 : index
    %c8_156 = arith.constant 8 : index
    %c0_157 = arith.constant 0 : index
    %c0_158 = arith.constant 0 : index
    %151 = vector.load %arg3[%c1_155, %c8_156, %c0_157, %c0_158] : memref<4x9x128x128xbf16, #tpu.memory_space<vmem>>, vector<1x1x128x128xbf16>
    %152 = vector.shape_cast %151 : vector<1x1x128x128xbf16> to vector<128x128xbf16>
    %cst_159 = arith.constant dense<0.000000e+00> : vector<32x128xf32>
    %153 = tpu.matmul %150, %152, %cst_159 {dimension_numbers = #tpu.dot_dimension_numbers<[1], [0], [0], [1], [0, 0, 1, 1], [], []>} : vector<32x128xbf16>, vector<128x128xbf16>, vector<32x128xf32> -> vector<32x128xf32>
    %154 = arith.addf %146, %153 : vector<32x128xf32>
    %c1_160 = arith.constant 1 : index
    %c0_161 = arith.constant 0 : index
    %c0_162 = arith.constant 0 : index
    %155 = vector.load %arg4[%c1_160, %c0_161, %c0_162] : memref<4x1x128xf32, #tpu.memory_space<vmem>>, vector<1x1x128xf32>
    %156 = vector.shape_cast %155 : vector<1x1x128xf32> to vector<1x128xf32>
    %157 = vector.broadcast %156 : vector<1x128xf32> to vector<32x128xf32>
    %158 = arith.addf %154, %157 : vector<32x128xf32>
    %159 = arith.addf %158, %1 : vector<32x128xf32>
    %cst_163 = arith.constant 0.000000e+00 : f32
    %160 = vector.broadcast %cst_163 : f32 to vector<32x128xf32>
    %161 = arith.maximumf %159, %160 : vector<32x128xf32>
    %162 = arith.truncf %161 : vector<32x128xf32> to vector<32x128xbf16>
    %cst_164 = arith.constant 0.000000e+00 : f32
    %163 = vector.broadcast %cst_164 : f32 to vector<32x128xf32>
    %c0_165 = arith.constant 0 : index
    %c0_166 = arith.constant 0 : index
    %c0_167 = arith.constant 0 : index
    %164 = vector.load %arg2[%c0_165, %c0_166, %c0_167] : memref<9x32x32xbf16, #tpu.memory_space<vmem>>, vector<1x32x32xbf16>
    %165 = vector.shape_cast %164 : vector<1x32x32xbf16> to vector<32x32xbf16>
    %cst_168 = arith.constant dense<0.000000e+00> : vector<32x128xf32>
    %166 = tpu.matmul %165, %162, %cst_168 {dimension_numbers = #tpu.dot_dimension_numbers<[1], [0], [0], [1], [0, 0, 1, 1], [], []>} : vector<32x32xbf16>, vector<32x128xbf16>, vector<32x128xf32> -> vector<32x128xf32>
    %167 = arith.truncf %166 : vector<32x128xf32> to vector<32x128xbf16>
    %c2_169 = arith.constant 2 : index
    %c0_170 = arith.constant 0 : index
    %c0_171 = arith.constant 0 : index
    %c0_172 = arith.constant 0 : index
    %168 = vector.load %arg3[%c2_169, %c0_170, %c0_171, %c0_172] : memref<4x9x128x128xbf16, #tpu.memory_space<vmem>>, vector<1x1x128x128xbf16>
    %169 = vector.shape_cast %168 : vector<1x1x128x128xbf16> to vector<128x128xbf16>
    %cst_173 = arith.constant dense<0.000000e+00> : vector<32x128xf32>
    %170 = tpu.matmul %167, %169, %cst_173 {dimension_numbers = #tpu.dot_dimension_numbers<[1], [0], [0], [1], [0, 0, 1, 1], [], []>} : vector<32x128xbf16>, vector<128x128xbf16>, vector<32x128xf32> -> vector<32x128xf32>
    %171 = arith.addf %163, %170 : vector<32x128xf32>
    %c1_174 = arith.constant 1 : index
    %c0_175 = arith.constant 0 : index
    %c0_176 = arith.constant 0 : index
    %172 = vector.load %arg2[%c1_174, %c0_175, %c0_176] : memref<9x32x32xbf16, #tpu.memory_space<vmem>>, vector<1x32x32xbf16>
    %173 = vector.shape_cast %172 : vector<1x32x32xbf16> to vector<32x32xbf16>
    %cst_177 = arith.constant dense<0.000000e+00> : vector<32x128xf32>
    %174 = tpu.matmul %173, %162, %cst_177 {dimension_numbers = #tpu.dot_dimension_numbers<[1], [0], [0], [1], [0, 0, 1, 1], [], []>} : vector<32x32xbf16>, vector<32x128xbf16>, vector<32x128xf32> -> vector<32x128xf32>
    %175 = arith.truncf %174 : vector<32x128xf32> to vector<32x128xbf16>
    %c2_178 = arith.constant 2 : index
    %c1_179 = arith.constant 1 : index
    %c0_180 = arith.constant 0 : index
    %c0_181 = arith.constant 0 : index
    %176 = vector.load %arg3[%c2_178, %c1_179, %c0_180, %c0_181] : memref<4x9x128x128xbf16, #tpu.memory_space<vmem>>, vector<1x1x128x128xbf16>
    %177 = vector.shape_cast %176 : vector<1x1x128x128xbf16> to vector<128x128xbf16>
    %cst_182 = arith.constant dense<0.000000e+00> : vector<32x128xf32>
    %178 = tpu.matmul %175, %177, %cst_182 {dimension_numbers = #tpu.dot_dimension_numbers<[1], [0], [0], [1], [0, 0, 1, 1], [], []>} : vector<32x128xbf16>, vector<128x128xbf16>, vector<32x128xf32> -> vector<32x128xf32>
    %179 = arith.addf %171, %178 : vector<32x128xf32>
    %c2_183 = arith.constant 2 : index
    %c0_184 = arith.constant 0 : index
    %c0_185 = arith.constant 0 : index
    %180 = vector.load %arg2[%c2_183, %c0_184, %c0_185] : memref<9x32x32xbf16, #tpu.memory_space<vmem>>, vector<1x32x32xbf16>
    %181 = vector.shape_cast %180 : vector<1x32x32xbf16> to vector<32x32xbf16>
    %cst_186 = arith.constant dense<0.000000e+00> : vector<32x128xf32>
    %182 = tpu.matmul %181, %162, %cst_186 {dimension_numbers = #tpu.dot_dimension_numbers<[1], [0], [0], [1], [0, 0, 1, 1], [], []>} : vector<32x32xbf16>, vector<32x128xbf16>, vector<32x128xf32> -> vector<32x128xf32>
    %183 = arith.truncf %182 : vector<32x128xf32> to vector<32x128xbf16>
    %c2_187 = arith.constant 2 : index
    %c2_188 = arith.constant 2 : index
    %c0_189 = arith.constant 0 : index
    %c0_190 = arith.constant 0 : index
    %184 = vector.load %arg3[%c2_187, %c2_188, %c0_189, %c0_190] : memref<4x9x128x128xbf16, #tpu.memory_space<vmem>>, vector<1x1x128x128xbf16>
    %185 = vector.shape_cast %184 : vector<1x1x128x128xbf16> to vector<128x128xbf16>
    %cst_191 = arith.constant dense<0.000000e+00> : vector<32x128xf32>
    %186 = tpu.matmul %183, %185, %cst_191 {dimension_numbers = #tpu.dot_dimension_numbers<[1], [0], [0], [1], [0, 0, 1, 1], [], []>} : vector<32x128xbf16>, vector<128x128xbf16>, vector<32x128xf32> -> vector<32x128xf32>
    %187 = arith.addf %179, %186 : vector<32x128xf32>
    %c3_192 = arith.constant 3 : index
    %c0_193 = arith.constant 0 : index
    %c0_194 = arith.constant 0 : index
    %188 = vector.load %arg2[%c3_192, %c0_193, %c0_194] : memref<9x32x32xbf16, #tpu.memory_space<vmem>>, vector<1x32x32xbf16>
    %189 = vector.shape_cast %188 : vector<1x32x32xbf16> to vector<32x32xbf16>
    %cst_195 = arith.constant dense<0.000000e+00> : vector<32x128xf32>
    %190 = tpu.matmul %189, %162, %cst_195 {dimension_numbers = #tpu.dot_dimension_numbers<[1], [0], [0], [1], [0, 0, 1, 1], [], []>} : vector<32x32xbf16>, vector<32x128xbf16>, vector<32x128xf32> -> vector<32x128xf32>
    %191 = arith.truncf %190 : vector<32x128xf32> to vector<32x128xbf16>
    %c2_196 = arith.constant 2 : index
    %c3_197 = arith.constant 3 : index
    %c0_198 = arith.constant 0 : index
    %c0_199 = arith.constant 0 : index
    %192 = vector.load %arg3[%c2_196, %c3_197, %c0_198, %c0_199] : memref<4x9x128x128xbf16, #tpu.memory_space<vmem>>, vector<1x1x128x128xbf16>
    %193 = vector.shape_cast %192 : vector<1x1x128x128xbf16> to vector<128x128xbf16>
    %cst_200 = arith.constant dense<0.000000e+00> : vector<32x128xf32>
    %194 = tpu.matmul %191, %193, %cst_200 {dimension_numbers = #tpu.dot_dimension_numbers<[1], [0], [0], [1], [0, 0, 1, 1], [], []>} : vector<32x128xbf16>, vector<128x128xbf16>, vector<32x128xf32> -> vector<32x128xf32>
    %195 = arith.addf %187, %194 : vector<32x128xf32>
    %c4_201 = arith.constant 4 : index
    %c0_202 = arith.constant 0 : index
    %c0_203 = arith.constant 0 : index
    %196 = vector.load %arg2[%c4_201, %c0_202, %c0_203] : memref<9x32x32xbf16, #tpu.memory_space<vmem>>, vector<1x32x32xbf16>
    %197 = vector.shape_cast %196 : vector<1x32x32xbf16> to vector<32x32xbf16>
    %cst_204 = arith.constant dense<0.000000e+00> : vector<32x128xf32>
    %198 = tpu.matmul %197, %162, %cst_204 {dimension_numbers = #tpu.dot_dimension_numbers<[1], [0], [0], [1], [0, 0, 1, 1], [], []>} : vector<32x32xbf16>, vector<32x128xbf16>, vector<32x128xf32> -> vector<32x128xf32>
    %199 = arith.truncf %198 : vector<32x128xf32> to vector<32x128xbf16>
    %c2_205 = arith.constant 2 : index
    %c4_206 = arith.constant 4 : index
    %c0_207 = arith.constant 0 : index
    %c0_208 = arith.constant 0 : index
    %200 = vector.load %arg3[%c2_205, %c4_206, %c0_207, %c0_208] : memref<4x9x128x128xbf16, #tpu.memory_space<vmem>>, vector<1x1x128x128xbf16>
    %201 = vector.shape_cast %200 : vector<1x1x128x128xbf16> to vector<128x128xbf16>
    %cst_209 = arith.constant dense<0.000000e+00> : vector<32x128xf32>
    %202 = tpu.matmul %199, %201, %cst_209 {dimension_numbers = #tpu.dot_dimension_numbers<[1], [0], [0], [1], [0, 0, 1, 1], [], []>} : vector<32x128xbf16>, vector<128x128xbf16>, vector<32x128xf32> -> vector<32x128xf32>
    %203 = arith.addf %195, %202 : vector<32x128xf32>
    %c5_210 = arith.constant 5 : index
    %c0_211 = arith.constant 0 : index
    %c0_212 = arith.constant 0 : index
    %204 = vector.load %arg2[%c5_210, %c0_211, %c0_212] : memref<9x32x32xbf16, #tpu.memory_space<vmem>>, vector<1x32x32xbf16>
    %205 = vector.shape_cast %204 : vector<1x32x32xbf16> to vector<32x32xbf16>
    %cst_213 = arith.constant dense<0.000000e+00> : vector<32x128xf32>
    %206 = tpu.matmul %205, %162, %cst_213 {dimension_numbers = #tpu.dot_dimension_numbers<[1], [0], [0], [1], [0, 0, 1, 1], [], []>} : vector<32x32xbf16>, vector<32x128xbf16>, vector<32x128xf32> -> vector<32x128xf32>
    %207 = arith.truncf %206 : vector<32x128xf32> to vector<32x128xbf16>
    %c2_214 = arith.constant 2 : index
    %c5_215 = arith.constant 5 : index
    %c0_216 = arith.constant 0 : index
    %c0_217 = arith.constant 0 : index
    %208 = vector.load %arg3[%c2_214, %c5_215, %c0_216, %c0_217] : memref<4x9x128x128xbf16, #tpu.memory_space<vmem>>, vector<1x1x128x128xbf16>
    %209 = vector.shape_cast %208 : vector<1x1x128x128xbf16> to vector<128x128xbf16>
    %cst_218 = arith.constant dense<0.000000e+00> : vector<32x128xf32>
    %210 = tpu.matmul %207, %209, %cst_218 {dimension_numbers = #tpu.dot_dimension_numbers<[1], [0], [0], [1], [0, 0, 1, 1], [], []>} : vector<32x128xbf16>, vector<128x128xbf16>, vector<32x128xf32> -> vector<32x128xf32>
    %211 = arith.addf %203, %210 : vector<32x128xf32>
    %c6_219 = arith.constant 6 : index
    %c0_220 = arith.constant 0 : index
    %c0_221 = arith.constant 0 : index
    %212 = vector.load %arg2[%c6_219, %c0_220, %c0_221] : memref<9x32x32xbf16, #tpu.memory_space<vmem>>, vector<1x32x32xbf16>
    %213 = vector.shape_cast %212 : vector<1x32x32xbf16> to vector<32x32xbf16>
    %cst_222 = arith.constant dense<0.000000e+00> : vector<32x128xf32>
    %214 = tpu.matmul %213, %162, %cst_222 {dimension_numbers = #tpu.dot_dimension_numbers<[1], [0], [0], [1], [0, 0, 1, 1], [], []>} : vector<32x32xbf16>, vector<32x128xbf16>, vector<32x128xf32> -> vector<32x128xf32>
    %215 = arith.truncf %214 : vector<32x128xf32> to vector<32x128xbf16>
    %c2_223 = arith.constant 2 : index
    %c6_224 = arith.constant 6 : index
    %c0_225 = arith.constant 0 : index
    %c0_226 = arith.constant 0 : index
    %216 = vector.load %arg3[%c2_223, %c6_224, %c0_225, %c0_226] : memref<4x9x128x128xbf16, #tpu.memory_space<vmem>>, vector<1x1x128x128xbf16>
    %217 = vector.shape_cast %216 : vector<1x1x128x128xbf16> to vector<128x128xbf16>
    %cst_227 = arith.constant dense<0.000000e+00> : vector<32x128xf32>
    %218 = tpu.matmul %215, %217, %cst_227 {dimension_numbers = #tpu.dot_dimension_numbers<[1], [0], [0], [1], [0, 0, 1, 1], [], []>} : vector<32x128xbf16>, vector<128x128xbf16>, vector<32x128xf32> -> vector<32x128xf32>
    %219 = arith.addf %211, %218 : vector<32x128xf32>
    %c7_228 = arith.constant 7 : index
    %c0_229 = arith.constant 0 : index
    %c0_230 = arith.constant 0 : index
    %220 = vector.load %arg2[%c7_228, %c0_229, %c0_230] : memref<9x32x32xbf16, #tpu.memory_space<vmem>>, vector<1x32x32xbf16>
    %221 = vector.shape_cast %220 : vector<1x32x32xbf16> to vector<32x32xbf16>
    %cst_231 = arith.constant dense<0.000000e+00> : vector<32x128xf32>
    %222 = tpu.matmul %221, %162, %cst_231 {dimension_numbers = #tpu.dot_dimension_numbers<[1], [0], [0], [1], [0, 0, 1, 1], [], []>} : vector<32x32xbf16>, vector<32x128xbf16>, vector<32x128xf32> -> vector<32x128xf32>
    %223 = arith.truncf %222 : vector<32x128xf32> to vector<32x128xbf16>
    %c2_232 = arith.constant 2 : index
    %c7_233 = arith.constant 7 : index
    %c0_234 = arith.constant 0 : index
    %c0_235 = arith.constant 0 : index
    %224 = vector.load %arg3[%c2_232, %c7_233, %c0_234, %c0_235] : memref<4x9x128x128xbf16, #tpu.memory_space<vmem>>, vector<1x1x128x128xbf16>
    %225 = vector.shape_cast %224 : vector<1x1x128x128xbf16> to vector<128x128xbf16>
    %cst_236 = arith.constant dense<0.000000e+00> : vector<32x128xf32>
    %226 = tpu.matmul %223, %225, %cst_236 {dimension_numbers = #tpu.dot_dimension_numbers<[1], [0], [0], [1], [0, 0, 1, 1], [], []>} : vector<32x128xbf16>, vector<128x128xbf16>, vector<32x128xf32> -> vector<32x128xf32>
    %227 = arith.addf %219, %226 : vector<32x128xf32>
    %c8_237 = arith.constant 8 : index
    %c0_238 = arith.constant 0 : index
    %c0_239 = arith.constant 0 : index
    %228 = vector.load %arg2[%c8_237, %c0_238, %c0_239] : memref<9x32x32xbf16, #tpu.memory_space<vmem>>, vector<1x32x32xbf16>
    %229 = vector.shape_cast %228 : vector<1x32x32xbf16> to vector<32x32xbf16>
    %cst_240 = arith.constant dense<0.000000e+00> : vector<32x128xf32>
    %230 = tpu.matmul %229, %162, %cst_240 {dimension_numbers = #tpu.dot_dimension_numbers<[1], [0], [0], [1], [0, 0, 1, 1], [], []>} : vector<32x32xbf16>, vector<32x128xbf16>, vector<32x128xf32> -> vector<32x128xf32>
    %231 = arith.truncf %230 : vector<32x128xf32> to vector<32x128xbf16>
    %c2_241 = arith.constant 2 : index
    %c8_242 = arith.constant 8 : index
    %c0_243 = arith.constant 0 : index
    %c0_244 = arith.constant 0 : index
    %232 = vector.load %arg3[%c2_241, %c8_242, %c0_243, %c0_244] : memref<4x9x128x128xbf16, #tpu.memory_space<vmem>>, vector<1x1x128x128xbf16>
    %233 = vector.shape_cast %232 : vector<1x1x128x128xbf16> to vector<128x128xbf16>
    %cst_245 = arith.constant dense<0.000000e+00> : vector<32x128xf32>
    %234 = tpu.matmul %231, %233, %cst_245 {dimension_numbers = #tpu.dot_dimension_numbers<[1], [0], [0], [1], [0, 0, 1, 1], [], []>} : vector<32x128xbf16>, vector<128x128xbf16>, vector<32x128xf32> -> vector<32x128xf32>
    %235 = arith.addf %227, %234 : vector<32x128xf32>
    %c2_246 = arith.constant 2 : index
    %c0_247 = arith.constant 0 : index
    %c0_248 = arith.constant 0 : index
    %236 = vector.load %arg4[%c2_246, %c0_247, %c0_248] : memref<4x1x128xf32, #tpu.memory_space<vmem>>, vector<1x1x128xf32>
    %237 = vector.shape_cast %236 : vector<1x1x128xf32> to vector<1x128xf32>
    %238 = vector.broadcast %237 : vector<1x128xf32> to vector<32x128xf32>
    %239 = arith.addf %235, %238 : vector<32x128xf32>
    %cst_249 = arith.constant 0.000000e+00 : f32
    %240 = vector.broadcast %cst_249 : f32 to vector<32x128xf32>
    %241 = arith.maximumf %239, %240 : vector<32x128xf32>
    %242 = arith.truncf %241 : vector<32x128xf32> to vector<32x128xbf16>
    %cst_250 = arith.constant 0.000000e+00 : f32
    %243 = vector.broadcast %cst_250 : f32 to vector<32x128xf32>
    %c0_251 = arith.constant 0 : index
    %c0_252 = arith.constant 0 : index
    %c0_253 = arith.constant 0 : index
    %244 = vector.load %arg2[%c0_251, %c0_252, %c0_253] : memref<9x32x32xbf16, #tpu.memory_space<vmem>>, vector<1x32x32xbf16>
    %245 = vector.shape_cast %244 : vector<1x32x32xbf16> to vector<32x32xbf16>
    %cst_254 = arith.constant dense<0.000000e+00> : vector<32x128xf32>
    %246 = tpu.matmul %245, %242, %cst_254 {dimension_numbers = #tpu.dot_dimension_numbers<[1], [0], [0], [1], [0, 0, 1, 1], [], []>} : vector<32x32xbf16>, vector<32x128xbf16>, vector<32x128xf32> -> vector<32x128xf32>
    %247 = arith.truncf %246 : vector<32x128xf32> to vector<32x128xbf16>
    %c3_255 = arith.constant 3 : index
    %c0_256 = arith.constant 0 : index
    %c0_257 = arith.constant 0 : index
    %c0_258 = arith.constant 0 : index
    %248 = vector.load %arg3[%c3_255, %c0_256, %c0_257, %c0_258] : memref<4x9x128x128xbf16, #tpu.memory_space<vmem>>, vector<1x1x128x128xbf16>
    %249 = vector.shape_cast %248 : vector<1x1x128x128xbf16> to vector<128x128xbf16>
    %cst_259 = arith.constant dense<0.000000e+00> : vector<32x128xf32>
    %250 = tpu.matmul %247, %249, %cst_259 {dimension_numbers = #tpu.dot_dimension_numbers<[1], [0], [0], [1], [0, 0, 1, 1], [], []>} : vector<32x128xbf16>, vector<128x128xbf16>, vector<32x128xf32> -> vector<32x128xf32>
    %251 = arith.addf %243, %250 : vector<32x128xf32>
    %c1_260 = arith.constant 1 : index
    %c0_261 = arith.constant 0 : index
    %c0_262 = arith.constant 0 : index
    %252 = vector.load %arg2[%c1_260, %c0_261, %c0_262] : memref<9x32x32xbf16, #tpu.memory_space<vmem>>, vector<1x32x32xbf16>
    %253 = vector.shape_cast %252 : vector<1x32x32xbf16> to vector<32x32xbf16>
    %cst_263 = arith.constant dense<0.000000e+00> : vector<32x128xf32>
    %254 = tpu.matmul %253, %242, %cst_263 {dimension_numbers = #tpu.dot_dimension_numbers<[1], [0], [0], [1], [0, 0, 1, 1], [], []>} : vector<32x32xbf16>, vector<32x128xbf16>, vector<32x128xf32> -> vector<32x128xf32>
    %255 = arith.truncf %254 : vector<32x128xf32> to vector<32x128xbf16>
    %c3_264 = arith.constant 3 : index
    %c1_265 = arith.constant 1 : index
    %c0_266 = arith.constant 0 : index
    %c0_267 = arith.constant 0 : index
    %256 = vector.load %arg3[%c3_264, %c1_265, %c0_266, %c0_267] : memref<4x9x128x128xbf16, #tpu.memory_space<vmem>>, vector<1x1x128x128xbf16>
    %257 = vector.shape_cast %256 : vector<1x1x128x128xbf16> to vector<128x128xbf16>
    %cst_268 = arith.constant dense<0.000000e+00> : vector<32x128xf32>
    %258 = tpu.matmul %255, %257, %cst_268 {dimension_numbers = #tpu.dot_dimension_numbers<[1], [0], [0], [1], [0, 0, 1, 1], [], []>} : vector<32x128xbf16>, vector<128x128xbf16>, vector<32x128xf32> -> vector<32x128xf32>
    %259 = arith.addf %251, %258 : vector<32x128xf32>
    %c2_269 = arith.constant 2 : index
    %c0_270 = arith.constant 0 : index
    %c0_271 = arith.constant 0 : index
    %260 = vector.load %arg2[%c2_269, %c0_270, %c0_271] : memref<9x32x32xbf16, #tpu.memory_space<vmem>>, vector<1x32x32xbf16>
    %261 = vector.shape_cast %260 : vector<1x32x32xbf16> to vector<32x32xbf16>
    %cst_272 = arith.constant dense<0.000000e+00> : vector<32x128xf32>
    %262 = tpu.matmul %261, %242, %cst_272 {dimension_numbers = #tpu.dot_dimension_numbers<[1], [0], [0], [1], [0, 0, 1, 1], [], []>} : vector<32x32xbf16>, vector<32x128xbf16>, vector<32x128xf32> -> vector<32x128xf32>
    %263 = arith.truncf %262 : vector<32x128xf32> to vector<32x128xbf16>
    %c3_273 = arith.constant 3 : index
    %c2_274 = arith.constant 2 : index
    %c0_275 = arith.constant 0 : index
    %c0_276 = arith.constant 0 : index
    %264 = vector.load %arg3[%c3_273, %c2_274, %c0_275, %c0_276] : memref<4x9x128x128xbf16, #tpu.memory_space<vmem>>, vector<1x1x128x128xbf16>
    %265 = vector.shape_cast %264 : vector<1x1x128x128xbf16> to vector<128x128xbf16>
    %cst_277 = arith.constant dense<0.000000e+00> : vector<32x128xf32>
    %266 = tpu.matmul %263, %265, %cst_277 {dimension_numbers = #tpu.dot_dimension_numbers<[1], [0], [0], [1], [0, 0, 1, 1], [], []>} : vector<32x128xbf16>, vector<128x128xbf16>, vector<32x128xf32> -> vector<32x128xf32>
    %267 = arith.addf %259, %266 : vector<32x128xf32>
    %c3_278 = arith.constant 3 : index
    %c0_279 = arith.constant 0 : index
    %c0_280 = arith.constant 0 : index
    %268 = vector.load %arg2[%c3_278, %c0_279, %c0_280] : memref<9x32x32xbf16, #tpu.memory_space<vmem>>, vector<1x32x32xbf16>
    %269 = vector.shape_cast %268 : vector<1x32x32xbf16> to vector<32x32xbf16>
    %cst_281 = arith.constant dense<0.000000e+00> : vector<32x128xf32>
    %270 = tpu.matmul %269, %242, %cst_281 {dimension_numbers = #tpu.dot_dimension_numbers<[1], [0], [0], [1], [0, 0, 1, 1], [], []>} : vector<32x32xbf16>, vector<32x128xbf16>, vector<32x128xf32> -> vector<32x128xf32>
    %271 = arith.truncf %270 : vector<32x128xf32> to vector<32x128xbf16>
    %c3_282 = arith.constant 3 : index
    %c3_283 = arith.constant 3 : index
    %c0_284 = arith.constant 0 : index
    %c0_285 = arith.constant 0 : index
    %272 = vector.load %arg3[%c3_282, %c3_283, %c0_284, %c0_285] : memref<4x9x128x128xbf16, #tpu.memory_space<vmem>>, vector<1x1x128x128xbf16>
    %273 = vector.shape_cast %272 : vector<1x1x128x128xbf16> to vector<128x128xbf16>
    %cst_286 = arith.constant dense<0.000000e+00> : vector<32x128xf32>
    %274 = tpu.matmul %271, %273, %cst_286 {dimension_numbers = #tpu.dot_dimension_numbers<[1], [0], [0], [1], [0, 0, 1, 1], [], []>} : vector<32x128xbf16>, vector<128x128xbf16>, vector<32x128xf32> -> vector<32x128xf32>
    %275 = arith.addf %267, %274 : vector<32x128xf32>
    %c4_287 = arith.constant 4 : index
    %c0_288 = arith.constant 0 : index
    %c0_289 = arith.constant 0 : index
    %276 = vector.load %arg2[%c4_287, %c0_288, %c0_289] : memref<9x32x32xbf16, #tpu.memory_space<vmem>>, vector<1x32x32xbf16>
    %277 = vector.shape_cast %276 : vector<1x32x32xbf16> to vector<32x32xbf16>
    %cst_290 = arith.constant dense<0.000000e+00> : vector<32x128xf32>
    %278 = tpu.matmul %277, %242, %cst_290 {dimension_numbers = #tpu.dot_dimension_numbers<[1], [0], [0], [1], [0, 0, 1, 1], [], []>} : vector<32x32xbf16>, vector<32x128xbf16>, vector<32x128xf32> -> vector<32x128xf32>
    %279 = arith.truncf %278 : vector<32x128xf32> to vector<32x128xbf16>
    %c3_291 = arith.constant 3 : index
    %c4_292 = arith.constant 4 : index
    %c0_293 = arith.constant 0 : index
    %c0_294 = arith.constant 0 : index
    %280 = vector.load %arg3[%c3_291, %c4_292, %c0_293, %c0_294] : memref<4x9x128x128xbf16, #tpu.memory_space<vmem>>, vector<1x1x128x128xbf16>
    %281 = vector.shape_cast %280 : vector<1x1x128x128xbf16> to vector<128x128xbf16>
    %cst_295 = arith.constant dense<0.000000e+00> : vector<32x128xf32>
    %282 = tpu.matmul %279, %281, %cst_295 {dimension_numbers = #tpu.dot_dimension_numbers<[1], [0], [0], [1], [0, 0, 1, 1], [], []>} : vector<32x128xbf16>, vector<128x128xbf16>, vector<32x128xf32> -> vector<32x128xf32>
    %283 = arith.addf %275, %282 : vector<32x128xf32>
    %c5_296 = arith.constant 5 : index
    %c0_297 = arith.constant 0 : index
    %c0_298 = arith.constant 0 : index
    %284 = vector.load %arg2[%c5_296, %c0_297, %c0_298] : memref<9x32x32xbf16, #tpu.memory_space<vmem>>, vector<1x32x32xbf16>
    %285 = vector.shape_cast %284 : vector<1x32x32xbf16> to vector<32x32xbf16>
    %cst_299 = arith.constant dense<0.000000e+00> : vector<32x128xf32>
    %286 = tpu.matmul %285, %242, %cst_299 {dimension_numbers = #tpu.dot_dimension_numbers<[1], [0], [0], [1], [0, 0, 1, 1], [], []>} : vector<32x32xbf16>, vector<32x128xbf16>, vector<32x128xf32> -> vector<32x128xf32>
    %287 = arith.truncf %286 : vector<32x128xf32> to vector<32x128xbf16>
    %c3_300 = arith.constant 3 : index
    %c5_301 = arith.constant 5 : index
    %c0_302 = arith.constant 0 : index
    %c0_303 = arith.constant 0 : index
    %288 = vector.load %arg3[%c3_300, %c5_301, %c0_302, %c0_303] : memref<4x9x128x128xbf16, #tpu.memory_space<vmem>>, vector<1x1x128x128xbf16>
    %289 = vector.shape_cast %288 : vector<1x1x128x128xbf16> to vector<128x128xbf16>
    %cst_304 = arith.constant dense<0.000000e+00> : vector<32x128xf32>
    %290 = tpu.matmul %287, %289, %cst_304 {dimension_numbers = #tpu.dot_dimension_numbers<[1], [0], [0], [1], [0, 0, 1, 1], [], []>} : vector<32x128xbf16>, vector<128x128xbf16>, vector<32x128xf32> -> vector<32x128xf32>
    %291 = arith.addf %283, %290 : vector<32x128xf32>
    %c6_305 = arith.constant 6 : index
    %c0_306 = arith.constant 0 : index
    %c0_307 = arith.constant 0 : index
    %292 = vector.load %arg2[%c6_305, %c0_306, %c0_307] : memref<9x32x32xbf16, #tpu.memory_space<vmem>>, vector<1x32x32xbf16>
    %293 = vector.shape_cast %292 : vector<1x32x32xbf16> to vector<32x32xbf16>
    %cst_308 = arith.constant dense<0.000000e+00> : vector<32x128xf32>
    %294 = tpu.matmul %293, %242, %cst_308 {dimension_numbers = #tpu.dot_dimension_numbers<[1], [0], [0], [1], [0, 0, 1, 1], [], []>} : vector<32x32xbf16>, vector<32x128xbf16>, vector<32x128xf32> -> vector<32x128xf32>
    %295 = arith.truncf %294 : vector<32x128xf32> to vector<32x128xbf16>
    %c3_309 = arith.constant 3 : index
    %c6_310 = arith.constant 6 : index
    %c0_311 = arith.constant 0 : index
    %c0_312 = arith.constant 0 : index
    %296 = vector.load %arg3[%c3_309, %c6_310, %c0_311, %c0_312] : memref<4x9x128x128xbf16, #tpu.memory_space<vmem>>, vector<1x1x128x128xbf16>
    %297 = vector.shape_cast %296 : vector<1x1x128x128xbf16> to vector<128x128xbf16>
    %cst_313 = arith.constant dense<0.000000e+00> : vector<32x128xf32>
    %298 = tpu.matmul %295, %297, %cst_313 {dimension_numbers = #tpu.dot_dimension_numbers<[1], [0], [0], [1], [0, 0, 1, 1], [], []>} : vector<32x128xbf16>, vector<128x128xbf16>, vector<32x128xf32> -> vector<32x128xf32>
    %299 = arith.addf %291, %298 : vector<32x128xf32>
    %c7_314 = arith.constant 7 : index
    %c0_315 = arith.constant 0 : index
    %c0_316 = arith.constant 0 : index
    %300 = vector.load %arg2[%c7_314, %c0_315, %c0_316] : memref<9x32x32xbf16, #tpu.memory_space<vmem>>, vector<1x32x32xbf16>
    %301 = vector.shape_cast %300 : vector<1x32x32xbf16> to vector<32x32xbf16>
    %cst_317 = arith.constant dense<0.000000e+00> : vector<32x128xf32>
    %302 = tpu.matmul %301, %242, %cst_317 {dimension_numbers = #tpu.dot_dimension_numbers<[1], [0], [0], [1], [0, 0, 1, 1], [], []>} : vector<32x32xbf16>, vector<32x128xbf16>, vector<32x128xf32> -> vector<32x128xf32>
    %303 = arith.truncf %302 : vector<32x128xf32> to vector<32x128xbf16>
    %c3_318 = arith.constant 3 : index
    %c7_319 = arith.constant 7 : index
    %c0_320 = arith.constant 0 : index
    %c0_321 = arith.constant 0 : index
    %304 = vector.load %arg3[%c3_318, %c7_319, %c0_320, %c0_321] : memref<4x9x128x128xbf16, #tpu.memory_space<vmem>>, vector<1x1x128x128xbf16>
    %305 = vector.shape_cast %304 : vector<1x1x128x128xbf16> to vector<128x128xbf16>
    %cst_322 = arith.constant dense<0.000000e+00> : vector<32x128xf32>
    %306 = tpu.matmul %303, %305, %cst_322 {dimension_numbers = #tpu.dot_dimension_numbers<[1], [0], [0], [1], [0, 0, 1, 1], [], []>} : vector<32x128xbf16>, vector<128x128xbf16>, vector<32x128xf32> -> vector<32x128xf32>
    %307 = arith.addf %299, %306 : vector<32x128xf32>
    %c8_323 = arith.constant 8 : index
    %c0_324 = arith.constant 0 : index
    %c0_325 = arith.constant 0 : index
    %308 = vector.load %arg2[%c8_323, %c0_324, %c0_325] : memref<9x32x32xbf16, #tpu.memory_space<vmem>>, vector<1x32x32xbf16>
    %309 = vector.shape_cast %308 : vector<1x32x32xbf16> to vector<32x32xbf16>
    %cst_326 = arith.constant dense<0.000000e+00> : vector<32x128xf32>
    %310 = tpu.matmul %309, %242, %cst_326 {dimension_numbers = #tpu.dot_dimension_numbers<[1], [0], [0], [1], [0, 0, 1, 1], [], []>} : vector<32x32xbf16>, vector<32x128xbf16>, vector<32x128xf32> -> vector<32x128xf32>
    %311 = arith.truncf %310 : vector<32x128xf32> to vector<32x128xbf16>
    %c3_327 = arith.constant 3 : index
    %c8_328 = arith.constant 8 : index
    %c0_329 = arith.constant 0 : index
    %c0_330 = arith.constant 0 : index
    %312 = vector.load %arg3[%c3_327, %c8_328, %c0_329, %c0_330] : memref<4x9x128x128xbf16, #tpu.memory_space<vmem>>, vector<1x1x128x128xbf16>
    %313 = vector.shape_cast %312 : vector<1x1x128x128xbf16> to vector<128x128xbf16>
    %cst_331 = arith.constant dense<0.000000e+00> : vector<32x128xf32>
    %314 = tpu.matmul %311, %313, %cst_331 {dimension_numbers = #tpu.dot_dimension_numbers<[1], [0], [0], [1], [0, 0, 1, 1], [], []>} : vector<32x128xbf16>, vector<128x128xbf16>, vector<32x128xf32> -> vector<32x128xf32>
    %315 = arith.addf %307, %314 : vector<32x128xf32>
    %c3_332 = arith.constant 3 : index
    %c0_333 = arith.constant 0 : index
    %c0_334 = arith.constant 0 : index
    %316 = vector.load %arg4[%c3_332, %c0_333, %c0_334] : memref<4x1x128xf32, #tpu.memory_space<vmem>>, vector<1x1x128xf32>
    %317 = vector.shape_cast %316 : vector<1x1x128xf32> to vector<1x128xf32>
    %318 = vector.broadcast %317 : vector<1x128xf32> to vector<32x128xf32>
    %319 = arith.addf %315, %318 : vector<32x128xf32>
    %320 = arith.addf %319, %161 : vector<32x128xf32>
    %cst_335 = arith.constant 0.000000e+00 : f32
    %321 = vector.broadcast %cst_335 : f32 to vector<32x128xf32>
    %322 = arith.maximumf %320, %321 : vector<32x128xf32>
    %323 = vector.shape_cast %322 : vector<32x128xf32> to vector<2x16x128xf32>
    %cst_336 = arith.constant dense<0.000000e+00> : vector<2x128xf32>
    %324 = vector.multi_reduction <add>, %323, %cst_336 [1] : vector<2x16x128xf32> to vector<2x128xf32>
    %cst_337 = arith.constant 1.600000e+01 : f32
    %325 = vector.broadcast %cst_337 : f32 to vector<2x128xf32>
    %326 = arith.divf %324, %325 : vector<2x128xf32>
    %327 = arith.truncf %326 : vector<2x128xf32> to vector<2x128xbf16>
    %c0_338 = arith.constant 0 : index
    %c0_339 = arith.constant 0 : index
    %328 = vector.load %arg5[%c0_338, %c0_339] : memref<128x32xbf16, #tpu.memory_space<vmem>>, vector<128x32xbf16>
    %cst_340 = arith.constant dense<0.000000e+00> : vector<2x32xf32>
    %329 = tpu.matmul %327, %328, %cst_340 {dimension_numbers = #tpu.dot_dimension_numbers<[1], [0], [0], [1], [0, 0, 1, 1], [], []>} : vector<2x128xbf16>, vector<128x32xbf16>, vector<2x32xf32> -> vector<2x32xf32>
    %c0_341 = arith.constant 0 : index
    %c0_342 = arith.constant 0 : index
    %330 = vector.load %arg6[%c0_341, %c0_342] : memref<1x32xf32, #tpu.memory_space<vmem>>, vector<1x32xf32>
    %331 = vector.broadcast %330 : vector<1x32xf32> to vector<2x32xf32>
    %332 = arith.addf %329, %331 : vector<2x32xf32>
    %cst_343 = arith.constant 0.000000e+00 : f32
    %333 = vector.broadcast %cst_343 : f32 to vector<2x32xf32>
    %334 = arith.maximumf %332, %333 : vector<2x32xf32>
    %335 = arith.truncf %334 : vector<2x32xf32> to vector<2x32xbf16>
    %c0_344 = arith.constant 0 : index
    %c0_345 = arith.constant 0 : index
    %336 = vector.load %arg7[%c0_344, %c0_345] : memref<32x128xbf16, #tpu.memory_space<vmem>>, vector<32x128xbf16>
    %cst_346 = arith.constant dense<0.000000e+00> : vector<2x128xf32>
    %337 = tpu.matmul %335, %336, %cst_346 {dimension_numbers = #tpu.dot_dimension_numbers<[1], [0], [0], [1], [0, 0, 1, 1], [], []>} : vector<2x32xbf16>, vector<32x128xbf16>, vector<2x128xf32> -> vector<2x128xf32>
    %c0_347 = arith.constant 0 : index
    %c0_348 = arith.constant 0 : index
    %338 = vector.load %arg8[%c0_347, %c0_348] : memref<1x128xf32, #tpu.memory_space<vmem>>, vector<1x128xf32>
    %339 = vector.broadcast %338 : vector<1x128xf32> to vector<2x128xf32>
    %340 = arith.addf %337, %339 : vector<2x128xf32>
    %341 = arith.negf %340 : vector<2x128xf32>
    %342 = math.exp %341 : vector<2x128xf32>
    %cst_349 = arith.constant 1.000000e+00 : f32
    %343 = vector.broadcast %cst_349 : f32 to vector<2x128xf32>
    %344 = arith.addf %343, %342 : vector<2x128xf32>
    %345 = arith.divf %343, %344 : vector<2x128xf32>
    %346 = vector.shape_cast %345 : vector<2x128xf32> to vector<2x1x128xf32>
    %347 = vector.broadcast %346 : vector<2x1x128xf32> to vector<2x16x128xf32>
    %348 = arith.mulf %323, %347 : vector<2x16x128xf32>
    %349 = vector.shape_cast %348 : vector<2x16x128xf32> to vector<32x128xf32>
    %350 = arith.truncf %349 : vector<32x128xf32> to vector<32x128xbf16>
    %c0_350 = arith.constant 0 : index
    %c0_351 = arith.constant 0 : index
    %351 = vector.load %arg9[%c0_350, %c0_351] : memref<32x128xbf16, #tpu.memory_space<vmem>>, vector<32x128xbf16>
    tpu.vector_store %arg9[%c0_350, %c0_351], %350 {strides = array<i32>} : memref<32x128xbf16, #tpu.memory_space<vmem>>, vector<32x128xbf16>,
    return
  }
  func.func @transform_0(%arg0: i32) -> (i32, i32) {
    %c0_i32 = arith.constant 0 : i32
    %c0_i32_0 = arith.constant 0 : i32
    %c0_i32_1 = arith.constant 0 : i32
    return %c0_i32, %c0_i32_0 : i32, i32
  }
  func.func @transform_1(%arg0: i32) -> (i32, i32, i32) {
    %c0_i32 = arith.constant 0 : i32
    %c0_i32_0 = arith.constant 0 : i32
    %c0_i32_1 = arith.constant 0 : i32
    %c0_i32_2 = arith.constant 0 : i32
    return %c0_i32, %c0_i32_0, %c0_i32_1 : i32, i32, i32
  }
  func.func @transform_2(%arg0: i32) -> (i32, i32, i32, i32) {
    %c0_i32 = arith.constant 0 : i32
    %c0_i32_0 = arith.constant 0 : i32
    %c0_i32_1 = arith.constant 0 : i32
    %c0_i32_2 = arith.constant 0 : i32
    %c0_i32_3 = arith.constant 0 : i32
    return %c0_i32, %c0_i32_0, %c0_i32_1, %c0_i32_2 : i32, i32, i32, i32
  }
  func.func @transform_3(%arg0: i32) -> (i32, i32, i32) {
    %c0_i32 = arith.constant 0 : i32
    %c0_i32_0 = arith.constant 0 : i32
    %c0_i32_1 = arith.constant 0 : i32
    %c0_i32_2 = arith.constant 0 : i32
    return %c0_i32, %c0_i32_0, %c0_i32_1 : i32, i32, i32
  }
  func.func @transform_4(%arg0: i32) -> (i32, i32) {
    %c0_i32 = arith.constant 0 : i32
    %c0_i32_0 = arith.constant 0 : i32
    %c0_i32_1 = arith.constant 0 : i32
    return %c0_i32, %c0_i32_0 : i32, i32
  }
  func.func @transform_5(%arg0: i32) -> (i32, i32) {
    %c0_i32 = arith.constant 0 : i32
    %c0_i32_0 = arith.constant 0 : i32
    %c0_i32_1 = arith.constant 0 : i32
    return %c0_i32, %c0_i32_0 : i32, i32
  }
  func.func @transform_6(%arg0: i32) -> (i32, i32) {
    %c0_i32 = arith.constant 0 : i32
    %c0_i32_0 = arith.constant 0 : i32
    %c0_i32_1 = arith.constant 0 : i32
    return %c0_i32, %c0_i32_0 : i32, i32
  }
  func.func @transform_7(%arg0: i32) -> (i32, i32) {
    %c0_i32 = arith.constant 0 : i32
    %c0_i32_0 = arith.constant 0 : i32
    %c0_i32_1 = arith.constant 0 : i32
    return %c0_i32, %c0_i32_0 : i32, i32
  }
  func.func @transform_8(%arg0: i32) -> (i32, i32) {
    %c0_i32 = arith.constant 0 : i32
    %c0_i32_0 = arith.constant 0 : i32
    %c0_i32_1 = arith.constant 0 : i32
    return %c0_i32, %c0_i32_0 : i32, i32
  }
}

module attributes {stable_mosaic.version = 11 : i64} {
  func.func @_mm_kernel(%arg0: i32, %arg1: i32, %arg2: memref<32x512xbf16, #tpu.memory_space<vmem>>, %arg3: memref<512x256xbf16, #tpu.memory_space<vmem>>, %arg4: memref<1x256xf32, #tpu.memory_space<vmem>>, %arg5: memref<32x256xbf16, #tpu.memory_space<vmem>>, %arg6: memref<32x256xbf16, #tpu.memory_space<vmem>>) attributes {dimension_semantics = [#tpu.dimension_semantics<parallel>, #tpu.dimension_semantics<parallel>], iteration_bounds = array<i64: 1, 1>, scalar_prefetch = 0 : i64, scratch_operands = 0 : i64, tpu.core_type = #tpu.core_type<tc>, window_params = [{transform_indices = @transform_0, window_bounds = array<i64: 32, 512>}, {transform_indices = @transform_1, window_bounds = array<i64: 512, 256>}, {transform_indices = @transform_2, window_bounds = array<i64: 1, 256>}, {transform_indices = @transform_3, window_bounds = array<i64: 32, 256>}, {transform_indices = @transform_4, window_bounds = array<i64: 32, 256>}]} {
    %c0 = arith.constant 0 : index
    %c0_0 = arith.constant 0 : index
    %0 = vector.load %arg2[%c0, %c0_0] : memref<32x512xbf16, #tpu.memory_space<vmem>>, vector<32x512xbf16>
    %c0_1 = arith.constant 0 : index
    %c0_2 = arith.constant 0 : index
    %1 = vector.load %arg3[%c0_1, %c0_2] : memref<512x256xbf16, #tpu.memory_space<vmem>>, vector<512x256xbf16>
    %cst = arith.constant dense<0.000000e+00> : vector<32x256xf32>
    %2 = tpu.matmul %0, %1, %cst {dimension_numbers = #tpu.dot_dimension_numbers<[1], [0], [0], [1], [0, 0, 1, 1], [], []>} : vector<32x512xbf16>, vector<512x256xbf16>, vector<32x256xf32> -> vector<32x256xf32>
    %c0_3 = arith.constant 0 : index
    %c0_4 = arith.constant 0 : index
    %3 = vector.load %arg4[%c0_3, %c0_4] : memref<1x256xf32, #tpu.memory_space<vmem>>, vector<1x256xf32>
    %4 = vector.broadcast %3 : vector<1x256xf32> to vector<32x256xf32>
    %5 = arith.addf %2, %4 : vector<32x256xf32>
    %cst_5 = arith.constant 0.000000e+00 : f32
    %6 = vector.broadcast %cst_5 : f32 to vector<32x256xf32>
    %7 = arith.maximumf %5, %6 : vector<32x256xf32>
    %c0_6 = arith.constant 0 : index
    %c0_7 = arith.constant 0 : index
    %8 = vector.load %arg5[%c0_6, %c0_7] : memref<32x256xbf16, #tpu.memory_space<vmem>>, vector<32x256xbf16>
    %9 = arith.extf %8 : vector<32x256xbf16> to vector<32x256xf32>
    %10 = arith.addf %7, %9 : vector<32x256xf32>
    %11 = arith.truncf %10 : vector<32x256xf32> to vector<32x256xbf16>
    %c0_8 = arith.constant 0 : index
    %c0_9 = arith.constant 0 : index
    %12 = vector.load %arg6[%c0_8, %c0_9] : memref<32x256xbf16, #tpu.memory_space<vmem>>, vector<32x256xbf16>
    tpu.vector_store %arg6[%c0_8, %c0_9], %11 {strides = array<i32>} : memref<32x256xbf16, #tpu.memory_space<vmem>>, vector<32x256xbf16>,
    return
  }
  func.func @transform_0(%arg0: i32, %arg1: i32) -> (i32, i32) {
    %c0_i32 = arith.constant 0 : i32
    %c0_i32_0 = arith.constant 0 : i32
    return %arg0, %c0_i32 : i32, i32
  }
  func.func @transform_1(%arg0: i32, %arg1: i32) -> (i32, i32) {
    %c0_i32 = arith.constant 0 : i32
    %c0_i32_0 = arith.constant 0 : i32
    return %c0_i32, %arg1 : i32, i32
  }
  func.func @transform_2(%arg0: i32, %arg1: i32) -> (i32, i32) {
    %c0_i32 = arith.constant 0 : i32
    %c0_i32_0 = arith.constant 0 : i32
    return %c0_i32, %arg1 : i32, i32
  }
  func.func @transform_3(%arg0: i32, %arg1: i32) -> (i32, i32) {
    %c0_i32 = arith.constant 0 : i32
    return %arg0, %arg1 : i32, i32
  }
  func.func @transform_4(%arg0: i32, %arg1: i32) -> (i32, i32) {
    %c0_i32 = arith.constant 0 : i32
    return %arg0, %arg1 : i32, i32
  }
}

module attributes {stable_mosaic.version = 11 : i64} {
  func.func @_mm_kernel(%arg0: i32, %arg1: i32, %arg2: memref<128x256xbf16, #tpu.memory_space<vmem>>, %arg3: memref<256x128xbf16, #tpu.memory_space<vmem>>, %arg4: memref<1x128xf32, #tpu.memory_space<vmem>>, %arg5: memref<128x128xbf16, #tpu.memory_space<vmem>>, %arg6: memref<128x128xbf16, #tpu.memory_space<vmem>>) attributes {dimension_semantics = [#tpu.dimension_semantics<parallel>, #tpu.dimension_semantics<parallel>], iteration_bounds = array<i64: 1, 1>, scalar_prefetch = 0 : i64, scratch_operands = 0 : i64, tpu.core_type = #tpu.core_type<tc>, window_params = [{transform_indices = @transform_0, window_bounds = array<i64: 128, 256>}, {transform_indices = @transform_1, window_bounds = array<i64: 256, 128>}, {transform_indices = @transform_2, window_bounds = array<i64: 1, 128>}, {transform_indices = @transform_3, window_bounds = array<i64: 128, 128>}, {transform_indices = @transform_4, window_bounds = array<i64: 128, 128>}]} {
    %c0 = arith.constant 0 : index
    %c0_0 = arith.constant 0 : index
    %0 = vector.load %arg2[%c0, %c0_0] : memref<128x256xbf16, #tpu.memory_space<vmem>>, vector<128x256xbf16>
    %c0_1 = arith.constant 0 : index
    %c0_2 = arith.constant 0 : index
    %1 = vector.load %arg3[%c0_1, %c0_2] : memref<256x128xbf16, #tpu.memory_space<vmem>>, vector<256x128xbf16>
    %cst = arith.constant dense<0.000000e+00> : vector<128x128xf32>
    %2 = tpu.matmul %0, %1, %cst {dimension_numbers = #tpu.dot_dimension_numbers<[1], [0], [0], [1], [0, 0, 1, 1], [], []>} : vector<128x256xbf16>, vector<256x128xbf16>, vector<128x128xf32> -> vector<128x128xf32>
    %c0_3 = arith.constant 0 : index
    %c0_4 = arith.constant 0 : index
    %3 = vector.load %arg4[%c0_3, %c0_4] : memref<1x128xf32, #tpu.memory_space<vmem>>, vector<1x128xf32>
    %4 = vector.broadcast %3 : vector<1x128xf32> to vector<128x128xf32>
    %5 = arith.addf %2, %4 : vector<128x128xf32>
    %cst_5 = arith.constant 0.000000e+00 : f32
    %6 = vector.broadcast %cst_5 : f32 to vector<128x128xf32>
    %7 = arith.maximumf %5, %6 : vector<128x128xf32>
    %c0_6 = arith.constant 0 : index
    %c0_7 = arith.constant 0 : index
    %8 = vector.load %arg5[%c0_6, %c0_7] : memref<128x128xbf16, #tpu.memory_space<vmem>>, vector<128x128xbf16>
    %9 = arith.extf %8 : vector<128x128xbf16> to vector<128x128xf32>
    %10 = arith.addf %7, %9 : vector<128x128xf32>
    %11 = arith.truncf %10 : vector<128x128xf32> to vector<128x128xbf16>
    %c0_8 = arith.constant 0 : index
    %c0_9 = arith.constant 0 : index
    %12 = vector.load %arg6[%c0_8, %c0_9] : memref<128x128xbf16, #tpu.memory_space<vmem>>, vector<128x128xbf16>
    tpu.vector_store %arg6[%c0_8, %c0_9], %11 {strides = array<i32>} : memref<128x128xbf16, #tpu.memory_space<vmem>>, vector<128x128xbf16>,
    return
  }
  func.func @transform_0(%arg0: i32, %arg1: i32) -> (i32, i32) {
    %c0_i32 = arith.constant 0 : i32
    %c0_i32_0 = arith.constant 0 : i32
    return %arg0, %c0_i32 : i32, i32
  }
  func.func @transform_1(%arg0: i32, %arg1: i32) -> (i32, i32) {
    %c0_i32 = arith.constant 0 : i32
    %c0_i32_0 = arith.constant 0 : i32
    return %c0_i32, %arg1 : i32, i32
  }
  func.func @transform_2(%arg0: i32, %arg1: i32) -> (i32, i32) {
    %c0_i32 = arith.constant 0 : i32
    %c0_i32_0 = arith.constant 0 : i32
    return %c0_i32, %arg1 : i32, i32
  }
  func.func @transform_3(%arg0: i32, %arg1: i32) -> (i32, i32) {
    %c0_i32 = arith.constant 0 : i32
    return %arg0, %arg1 : i32, i32
  }
  func.func @transform_4(%arg0: i32, %arg1: i32) -> (i32, i32) {
    %c0_i32 = arith.constant 0 : i32
    return %arg0, %arg1 : i32, i32
  }
}

module attributes {stable_mosaic.version = 11 : i64} {
  func.func @_mm_kernel(%arg0: i32, %arg1: i32, %arg2: memref<512x384xbf16, #tpu.memory_space<vmem>>, %arg3: memref<384x128xbf16, #tpu.memory_space<vmem>>, %arg4: memref<1x128xf32, #tpu.memory_space<vmem>>, %arg5: memref<512x128xf32, #tpu.memory_space<vmem>>, %arg6: memref<512x128xf32, #tpu.memory_space<vmem>>) attributes {dimension_semantics = [#tpu.dimension_semantics<parallel>, #tpu.dimension_semantics<parallel>], iteration_bounds = array<i64: 1, 1>, scalar_prefetch = 0 : i64, scratch_operands = 0 : i64, tpu.core_type = #tpu.core_type<tc>, window_params = [{transform_indices = @transform_0, window_bounds = array<i64: 512, 384>}, {transform_indices = @transform_1, window_bounds = array<i64: 384, 128>}, {transform_indices = @transform_2, window_bounds = array<i64: 1, 128>}, {transform_indices = @transform_3, window_bounds = array<i64: 512, 128>}, {transform_indices = @transform_4, window_bounds = array<i64: 512, 128>}]} {
    %c0 = arith.constant 0 : index
    %c0_0 = arith.constant 0 : index
    %0 = vector.load %arg2[%c0, %c0_0] : memref<512x384xbf16, #tpu.memory_space<vmem>>, vector<512x384xbf16>
    %c0_1 = arith.constant 0 : index
    %c0_2 = arith.constant 0 : index
    %1 = vector.load %arg3[%c0_1, %c0_2] : memref<384x128xbf16, #tpu.memory_space<vmem>>, vector<384x128xbf16>
    %cst = arith.constant dense<0.000000e+00> : vector<512x128xf32>
    %2 = tpu.matmul %0, %1, %cst {dimension_numbers = #tpu.dot_dimension_numbers<[1], [0], [0], [1], [0, 0, 1, 1], [], []>} : vector<512x384xbf16>, vector<384x128xbf16>, vector<512x128xf32> -> vector<512x128xf32>
    %c0_3 = arith.constant 0 : index
    %c0_4 = arith.constant 0 : index
    %3 = vector.load %arg4[%c0_3, %c0_4] : memref<1x128xf32, #tpu.memory_space<vmem>>, vector<1x128xf32>
    %4 = vector.broadcast %3 : vector<1x128xf32> to vector<512x128xf32>
    %5 = arith.addf %2, %4 : vector<512x128xf32>
    %6 = math.tanh %5 : vector<512x128xf32>
    %c0_5 = arith.constant 0 : index
    %c0_6 = arith.constant 0 : index
    %7 = vector.load %arg5[%c0_5, %c0_6] : memref<512x128xf32, #tpu.memory_space<vmem>>, vector<512x128xf32>
    %cst_7 = arith.constant 2.000000e+00 : f32
    %8 = vector.broadcast %cst_7 : f32 to vector<512x128xf32>
    %9 = arith.mulf %7, %8 : vector<512x128xf32>
    %cst_8 = arith.constant 1.000000e+00 : f32
    %10 = vector.broadcast %cst_8 : f32 to vector<512x128xf32>
    %11 = arith.subf %9, %10 : vector<512x128xf32>
    %cst_9 = arith.constant 1.000000e+00 : f32
    %12 = vector.broadcast %cst_9 : f32 to vector<512x128xf32>
    %13 = arith.addf %6, %12 : vector<512x128xf32>
    %cst_10 = arith.constant 5.000000e-01 : f32
    %14 = vector.broadcast %cst_10 : f32 to vector<512x128xf32>
    %15 = arith.mulf %13, %14 : vector<512x128xf32>
    %16 = arith.subf %11, %15 : vector<512x128xf32>
    %cst_11 = arith.constant 0.000000e+00 : f32
    %cst_12 = arith.constant 1.000000e+00 : f32
    %17 = vector.broadcast %cst_11 : f32 to vector<512x128xf32>
    %18 = arith.maximumf %17, %16 : vector<512x128xf32>
    %19 = vector.broadcast %cst_12 : f32 to vector<512x128xf32>
    %20 = arith.minimumf %19, %18 : vector<512x128xf32>
    %c0_13 = arith.constant 0 : index
    %c0_14 = arith.constant 0 : index
    %21 = vector.load %arg6[%c0_13, %c0_14] : memref<512x128xf32, #tpu.memory_space<vmem>>, vector<512x128xf32>
    tpu.vector_store %arg6[%c0_13, %c0_14], %20 {strides = array<i32>} : memref<512x128xf32, #tpu.memory_space<vmem>>, vector<512x128xf32>,
    return
  }
  func.func @transform_0(%arg0: i32, %arg1: i32) -> (i32, i32) {
    %c0_i32 = arith.constant 0 : i32
    %c0_i32_0 = arith.constant 0 : i32
    return %arg0, %c0_i32 : i32, i32
  }
  func.func @transform_1(%arg0: i32, %arg1: i32) -> (i32, i32) {
    %c0_i32 = arith.constant 0 : i32
    %c0_i32_0 = arith.constant 0 : i32
    return %c0_i32, %arg1 : i32, i32
  }
  func.func @transform_2(%arg0: i32, %arg1: i32) -> (i32, i32) {
    %c0_i32 = arith.constant 0 : i32
    %c0_i32_0 = arith.constant 0 : i32
    return %c0_i32, %arg1 : i32, i32
  }
  func.func @transform_3(%arg0: i32, %arg1: i32) -> (i32, i32) {
    %c0_i32 = arith.constant 0 : i32
    %c0_i32_0 = arith.constant 0 : i32
    return %arg0, %c0_i32 : i32, i32
  }
  func.func @transform_4(%arg0: i32, %arg1: i32) -> (i32, i32) {
    %c0_i32 = arith.constant 0 : i32
    return %arg0, %arg1 : i32, i32
  }
}

</mosaic_0001>

<bundles_post_ra>
// kernel: forward.7
= control target key start
LH: loop header
LB: loop body
LE: loop exit
PB: predicated region body
PF: predicated region fallthrough
CT: control target
= control target key end

     0   :  { %8 = vsyncpa [#allocation3], 0  ;;  %s1941_s0 = inlined_call_operand.vmem [shape: bf16[512,128], index: 0, kind: input, shape index: {}]   ;;  %s1942_s1 = inlined_call_operand.hbm [shape: bf16[128,128], index: 1, kind: input, shape index: {}]   ;;  %s1943_s2 = inlined_call_operand.hbm [shape: f32[1,128], index: 2, kind: input, shape index: {}]   ;;  %s1944_s3 = inlined_call_operand.vmem [shape: bf16[512,128], index: 3, kind: output, shape index: {}]  }
   0x1   :  { %9 = vsyncpa [#allocation5], 0  ;;  %s1635_s12 = smov [#allocation2]   ;;  %s1587_s16 = scalar_lea.hbm %s1942_s1, 1024 }
   0x2   :  { %s17_s13 = sshll.u32 %s1635_s12, 4  ;;  %p1588_p0 = scmp.ne.s32.totalorder %s1942_s1, %s1587_s16  ;;  %s18_s13 = int_to_ptr.vmem [resolvable:$true] %s17_s13 }
   0x3   :  { %p1591_p1 = scmp.lt.u32.totalorder %s1587_s16, %s1942_s1 }
   0x5   :  { %p1593_p2 = pnand %p1591_p1, %p1588_p0 }
   0x7   :  { %1596 = shalt.err (!%p1593_p2)
}
   0x8   :  { %s1597_s21 = scalar_lea.vmem %s18_s13, 1024  ;;  %p1602_p4 = scmp.lt.s32.totalorder %s18_s13, %s18_s13 }
   0x9   :  { %p1598_p3 = scmp.ne.s32.totalorder %s18_s13, %s1597_s21  ;;  %p1603_p5 = scmp.lt.s32.totalorder %s1597_s21, %s1597_s21 }
   0xb   :  { %p1604_p6 = por %p1603_p5, %p1602_p4 }
   0xd   :  { %p1605_p7 = pnand %p1604_p6, %p1598_p3 }
   0xf   :  { %1608 = shalt.err (!%p1605_p7)
}
  0x10   :  { %s1636_s22 = smov 64   ;;  %s1637_s23 = smov 4  }
  0x11   :  { %23 = dma.hbm_to_vmem [thread:$0]  %s1942_s1, 1024, %s18_s13, [#allocation3], %s1636_s22, %s1636_s22, %s1637_s23  }
  0x12   :  { %s1638_s26 = smov [#allocation4]   ;;  %s1609_s30 = scalar_lea.hbm %s1943_s2, 16 }
  0x13   :  { %s30_s27 = sshll.u32 %s1638_s26, 4  ;;  %p1610_p8 = scmp.ne.s32.totalorder %s1943_s2, %s1609_s30  ;;  %s31_s27 = int_to_ptr.vmem [resolvable:$true] %s30_s27 }
  0x14   :  { %p1613_p9 = scmp.lt.u32.totalorder %s1609_s30, %s1943_s2 }
  0x16   :  { %p1615_p10 = pnand %p1613_p9, %p1610_p8 }
  0x18   :  { %1618 = shalt.err (!%p1615_p10)
}
  0x19   :  { %s1619_s8 = scalar_lea.vmem %s31_s27, 16  ;;  %s1623_s1 = scalar_lea.vmem %s31_s27, 32 }
  0x1a   :  { %p1620_p11 = scmp.ne.s32.totalorder %s31_s27, %s1619_s8  ;;  %p1624_p12 = scmp.lt.s32.totalorder %s31_s27, %s31_s27 }
  0x1b   :  { %p1625_p13 = scmp.lt.s32.totalorder %s1623_s1, %s1619_s8 }
  0x1d   :  { %p1626_p0 = por %p1625_p13, %p1624_p12 }
  0x1f   :  { %p1627_p1 = pnand %p1626_p0, %p1620_p11 }
  0x21   :  { %1630 = shalt.err (!%p1627_p1)
}
  0x22   :  { %33 = dma.hbm_to_vmem [thread:$0]  %s1943_s2, 16, %s31_s27, [#allocation5]  }
  0x23   :  { %1631 = dma.done.wait [#allocation3], 1024  }
  0x24   :  { %1632 = vsyncadd [#allocation3], 4294966272 }
  0x25   :  { %1633 = dma.done.wait [#allocation5], 16  }
  0x26   :  { %1634 = vsyncadd [#allocation5], 4294967280  ;;  %v1547_v0 = vld [vmem:[#allocation2] sm:$0xff]   ;;  %v1548_v1 = vld [vmem:[#allocation2 + $0x8] sm:$0xff]  }
  0x27   :  { %1447 = vmatprep.subr.bf16.mxu0 %v1547_v0  ;;  %1527 = vmatprep.subr.bf16.mxu1 %v1547_v0  ;;  %v1549_v2 = vld [vmem:[#allocation2 + $0x10] sm:$0xff]   ;;  %v1550_v3 = vld [vmem:[#allocation2 + $0x18] sm:$0xff]   ;;  %v1555_v4 = vld [vmem:[%s1941_s0] sm:$0xff]  }
  0x28   :  { %1448 = vmatpush3.bf16.msra.mxu0 %v1547_v0  ;;  %1535 = vmatpush3.bf16.msra.mxu1 %v1547_v0  ;;  %v1556_v5 = vld [vmem:[%s1941_s0 + $0x80] sm:$0xff]   ;;  %v1552_v7 = vld [vmem:[#allocation2 + $0x28] sm:$0xff]   ;;  %v1553_v8 = vld [vmem:[#allocation2 + $0x30] sm:$0xff]  }
  0x29   :  { %1449 = vmatprep.subr.bf16.mxu0 %v1548_v1  ;;  %1528 = vmatprep.subr.bf16.mxu1 %v1548_v1  ;;  %v1551_v6 = vld [vmem:[#allocation2 + $0x20] sm:$0xff]   ;;  %v1554_v9 = vld [vmem:[#allocation2 + $0x38] sm:$0xff]   ;;  %v1557_v10 = vld [vmem:[%s1941_s0 + $0x8] sm:$0xff]  }
  0x2a   :  { %1463 = vmatprep.mubr.bf16.mxu0 %v1555_v4  ;;  %1495 = vmatprep.mubr.bf16.mxu1 %v1556_v5  ;;  %v1558_v11 = vld [vmem:[%s1941_s0 + $0x88] sm:$0xff]   ;;  %v1559_v12 = vld [vmem:[%s1941_s0 + $0x10] sm:$0xff]   ;;  %v1561_v14 = vld [vmem:[%s1941_s0 + $0x18] sm:$0xff]  }
  0x2b   :  { %v1560_v13 = vld [vmem:[%s1941_s0 + $0x90] sm:$0xff]   ;;  %v1562_v15 = vld [vmem:[%s1941_s0 + $0x98] sm:$0xff]   ;;  %v1563_v16 = vld [vmem:[%s1941_s0 + $0x20] sm:$0xff]  }
  0x2c   :  { %1450 = vmatpush3.bf16.msra.mxu0 %v1548_v1  ;;  %1536 = vmatpush3.bf16.msra.mxu1 %v1548_v1  ;;  %v1564_v17 = vld [vmem:[%s1941_s0 + $0xa0] sm:$0xff]   ;;  %v1565_v18 = vld [vmem:[%s1941_s0 + $0x28] sm:$0xff]   ;;  %v1567_v20 = vld [vmem:[%s1941_s0 + $0x30] sm:$0xff]  }
  0x2d   :  { %1451 = vmatprep.subr.bf16.mxu0 %v1549_v2  ;;  %1529 = vmatprep.subr.bf16.mxu1 %v1549_v2  ;;  %v1566_v19 = vld [vmem:[%s1941_s0 + $0xa8] sm:$0xff]   ;;  %v1568_v21 = vld [vmem:[%s1941_s0 + $0xb0] sm:$0xff]   ;;  %v1569_v22 = vld [vmem:[%s1941_s0 + $0x38] sm:$0xff]  }
  0x2e   :  { %v1570_v23 = vld [vmem:[%s1941_s0 + $0xb8] sm:$0xff]   ;;  %v1571_v24 = vld [vmem:[%s1941_s0 + $0x40] sm:$0xff]   ;;  %v1573_v26 = vld [vmem:[%s1941_s0 + $0x48] sm:$0xff]  }
  0x2f   :  { %v1572_v25 = vld [vmem:[%s1941_s0 + $0xc0] sm:$0xff]   ;;  %v1574_v27 = vld [vmem:[%s1941_s0 + $0xc8] sm:$0xff]   ;;  %v1575_v28 = vld [vmem:[%s1941_s0 + $0x50] sm:$0xff]  }
  0x30   :  { %1452 = vmatpush3.bf16.msra.mxu0 %v1549_v2  ;;  %1537 = vmatpush3.bf16.msra.mxu1 %v1549_v2  ;;  %v1576_v29 = vld [vmem:[%s1941_s0 + $0xd0] sm:$0xff]   ;;  %v1577_v30 = vld [vmem:[%s1941_s0 + $0x58] sm:$0xff]   ;;  %v1579_v32 = vld [vmem:[%s1941_s0 + $0x60] sm:$0xff]  }
  0x31   :  { %1453 = vmatprep.subr.bf16.mxu0 %v1550_v3  ;;  %1530 = vmatprep.subr.bf16.mxu1 %v1550_v3  ;;  %v1578_v31 = vld [vmem:[%s1941_s0 + $0xd8] sm:$0xff]   ;;  %v1580_v33 = vld [vmem:[%s1941_s0 + $0xe0] sm:$0xff]   ;;  %v1581_v34 = vld [vmem:[%s1941_s0 + $0x68] sm:$0xff]  }
  0x32   :  { %v1582_v35 = vld [vmem:[%s1941_s0 + $0xe8] sm:$0xff]   ;;  %v1583_v36 = vld [vmem:[%s1941_s0 + $0x70] sm:$0xff]   ;;  %v1585_v38 = vld [vmem:[%s1941_s0 + $0x78] sm:$0xff]  }
  0x33   :  { %v1584_v37 = vld [vmem:[%s1941_s0 + $0xf0] sm:$0xff]   ;;  %v1586_v39 = vld [vmem:[%s1941_s0 + $0xf8] sm:$0xff]   ;;  %v1779_v40 = vld [vmem:[#allocation4] ss:$0 sm:$0xff] }
  0x34   :  { %1454 = vmatpush3.bf16.msra.mxu0 %v1550_v3  ;;  %1538 = vmatpush3.bf16.msra.mxu1 %v1550_v3 }
  0x35   :  { %1455 = vmatprep.subr.bf16.mxu0 %v1551_v6  ;;  %1531 = vmatprep.subr.bf16.mxu1 %v1551_v6 }
  0x38   :  { %1456 = vmatpush3.bf16.msra.mxu0 %v1551_v6  ;;  %1539 = vmatpush3.bf16.msra.mxu1 %v1551_v6 }
  0x39   :  { %1457 = vmatprep.subr.bf16.mxu0 %v1552_v7  ;;  %1532 = vmatprep.subr.bf16.mxu1 %v1552_v7 }
  0x3c   :  { %1458 = vmatpush3.bf16.msra.mxu0 %v1552_v7  ;;  %1540 = vmatpush3.bf16.msra.mxu1 %v1552_v7 }
  0x3d   :  { %1459 = vmatprep.subr.bf16.mxu0 %v1553_v8  ;;  %1533 = vmatprep.subr.bf16.mxu1 %v1553_v8 }
  0x40   :  { %1460 = vmatpush3.bf16.msra.mxu0 %v1553_v8  ;;  %1541 = vmatpush3.bf16.msra.mxu1 %v1553_v8 }
  0x41   :  { %1461 = vmatprep.subr.bf16.mxu0 %v1554_v9  ;;  %1534 = vmatprep.subr.bf16.mxu1 %v1554_v9 }
  0x44   :  { %1462 = vmatpush3.bf16.msra.mxu0 %v1554_v9  ;;  %1542 = vmatpush3.bf16.msra.mxu1 %v1554_v9 }
  0x47   :  { %1464 = vmatmul.mubr.bf16.vlgmr.msra.gmra.mrb[0].mxu0 %v1557_v10  ;;  %1496 = vmatmul.mubr.bf16.vlgmr.msra.gmra.mrb[0].mxu1 %v1558_v11 }
  0x48   :  { %1467 = vmatprep.mubr.bf16.mxu0 %v1559_v12  ;;  %1499 = vmatprep.mubr.bf16.mxu1 %v1560_v13 }
  0x4f   :  { %1468 = vmatmul.mubr.bf16.gmra.mrb[4].mxu0 %v1561_v14  ;;  %1500 = vmatmul.mubr.bf16.gmra.mrb[4].mxu1 %v1562_v15 }
  0x50   :  { %1471 = vmatprep.mubr.bf16.mxu0 %v1563_v16  ;;  %1503 = vmatprep.mubr.bf16.mxu1 %v1564_v17 }
  0x57   :  { %1472 = vmatmul.mubr.bf16.gmra.mrb[8].mxu0 %v1565_v18  ;;  %1504 = vmatmul.mubr.bf16.gmra.mrb[8].mxu1 %v1566_v19 }
  0x58   :  { %1475 = vmatprep.mubr.bf16.mxu0 %v1567_v20  ;;  %1507 = vmatprep.mubr.bf16.mxu1 %v1568_v21 }
  0x5f   :  { %1476 = vmatmul.mubr.bf16.gmra.mrb[12].mxu0 %v1569_v22  ;;  %1508 = vmatmul.mubr.bf16.gmra.mrb[12].mxu1 %v1570_v23 }
  0x60   :  { %1479 = vmatprep.mubr.bf16.mxu0 %v1571_v24  ;;  %1511 = vmatprep.mubr.bf16.mxu1 %v1572_v25 }
  0x67   :  { %1480 = vmatmul.mubr.bf16.gmra.mrb[16].mxu0 %v1573_v26  ;;  %1512 = vmatmul.mubr.bf16.gmra.mrb[16].mxu1 %v1574_v27 }
  0x68   :  { %1483 = vmatprep.mubr.bf16.mxu0 %v1575_v28  ;;  %1515 = vmatprep.mubr.bf16.mxu1 %v1576_v29 }
  0x6f   :  { %1484 = vmatmul.mubr.bf16.gmra.mrb[20].mxu0 %v1577_v30  ;;  %1516 = vmatmul.mubr.bf16.gmra.mrb[20].mxu1 %v1578_v31 }
  0x70   :  { %1487 = vmatprep.mubr.bf16.mxu0 %v1579_v32  ;;  %1519 = vmatprep.mubr.bf16.mxu1 %v1580_v33 }
  0x77   :  { %1488 = vmatmul.mubr.bf16.gmra.mrb[24].mxu0 %v1581_v34  ;;  %1520 = vmatmul.mubr.bf16.gmra.mrb[24].mxu1 %v1582_v35 }
  0x78   :  { %1491 = vmatprep.mubr.bf16.mxu0 %v1583_v36  ;;  %1523 = vmatprep.mubr.bf16.mxu1 %v1584_v37 }
  0x7f   :  { %1492 = vmatmul.mubr.bf16.gmra.mrb[28].mxu0 %v1585_v38  ;;  %1524 = vmatmul.mubr.bf16.gmra.mrb[28].mxu1 %v1586_v39 }
 0x11a   :  { %v1465_v41 = vpop.f32.mrb[0].mxu0  ;;  %v1497_v42 = vpop.f32.mrb[0].mxu1 }
 0x11b   :  { %v411_v43 = vadd.f32 %v1465_v41, %v1779_v40  ;;  %v539_v44 = vadd.f32 %v1497_v42, %v1779_v40  ;;  %v402_v45 = vpop.f32.mrb[1].mxu0  ;;  %v530_v46 = vpop.f32.mrb[1].mxu1 }
 0x11c   :  { %v403_v47 = vadd.f32 %v1779_v40, %v402_v45  ;;  %v531_v48 = vadd.f32 %v1779_v40, %v530_v46  ;;  %v1466_v49 = vpop.f32.mrb[2].mxu0  ;;  %v1498_v50 = vpop.f32.mrb[2].mxu1 }
 0x11d   :  { %v414_v51 = vadd.f32 %v1466_v49, %v1779_v40  ;;  %v542_v52 = vadd.f32 %v1498_v50, %v1779_v40  ;;  %v405_v53 = vpop.f32.mrb[3].mxu0  ;;  %v533_v54 = vpop.f32.mrb[3].mxu1  ;;  %v659_v57 = vmax.f32 %v411_v43, 0.0  ;;  %v691_v58 = vmax.f32 %v539_v44, 0.0 }
 0x11e   :  { %v406_v55 = vadd.f32 %v1779_v40, %v405_v53  ;;  %v534_v56 = vadd.f32 %v1779_v40, %v533_v54  ;;  %v657_v61 = vmax.f32 %v403_v47, 0.0  ;;  %v689_v62 = vmax.f32 %v531_v48, 0.0 }
 0x11f   :  { %v660_v59 = vmax.f32 %v414_v51, 0.0  ;;  %v692_v60 = vmax.f32 %v542_v52, 0.0 }
 0x120   :  { %v658_v63 = vmax.f32 %v406_v55, 0.0  ;;  %v690_v0 = vmax.f32 %v534_v56, 0.0 }
 0x121   :  { %v1224_v1 = vpack.c.bf16 %v660_v59, %v659_v57  ;;  %v1304_v2 = vpack.c.bf16 %v692_v60, %v691_v58 }
 0x122   :  { %v1219_v3 = vpack.c.bf16 %v658_v63, %v657_v61  ;;  %v1299_v4 = vpack.c.bf16 %v690_v0, %v689_v62  ;;  %v1469_v5 = vpop.f32.mrb[4].mxu0  ;;  %v1501_v6 = vpop.f32.mrb[4].mxu1 }
 0x123   :  { %1376 = vst [vmem:[%s1944_s3 + $0x8] sm:$0xff] %v1224_v1   ;;  %1392 = vst [vmem:[%s1944_s3 + $0x88] sm:$0xff] %v1304_v2   ;;  %v427_v7 = vadd.f32 %v1469_v5, %v1779_v40  ;;  %v555_v8 = vadd.f32 %v1501_v6, %v1779_v40  ;;  %v418_v9 = vpop.f32.mrb[5].mxu0  ;;  %v546_v10 = vpop.f32.mrb[5].mxu1 }
 0x124   :  { %1220 = vst [vmem:[%s1944_s3] sm:$0xff] %v1219_v3   ;;  %1391 = vst [vmem:[%s1944_s3 + $0x80] sm:$0xff] %v1299_v4   ;;  %v419_v11 = vadd.f32 %v1779_v40, %v418_v9  ;;  %v547_v12 = vadd.f32 %v1779_v40, %v546_v10  ;;  %v1470_v13 = vpop.f32.mrb[6].mxu0  ;;  %v1502_v14 = vpop.f32.mrb[6].mxu1 }
 0x125   :  { %v430_v15 = vadd.f32 %v1470_v13, %v1779_v40  ;;  %v558_v16 = vadd.f32 %v1502_v14, %v1779_v40  ;;  %v421_v17 = vpop.f32.mrb[7].mxu0  ;;  %v549_v18 = vpop.f32.mrb[7].mxu1  ;;  %v663_v21 = vmax.f32 %v427_v7, 0.0  ;;  %v695_v22 = vmax.f32 %v555_v8, 0.0 }
 0x126   :  { %v422_v19 = vadd.f32 %v1779_v40, %v421_v17  ;;  %v550_v20 = vadd.f32 %v1779_v40, %v549_v18  ;;  %v661_v25 = vmax.f32 %v419_v11, 0.0  ;;  %v693_v26 = vmax.f32 %v547_v12, 0.0 }
 0x127   :  { %v664_v23 = vmax.f32 %v430_v15, 0.0  ;;  %v696_v24 = vmax.f32 %v558_v16, 0.0 }
 0x128   :  { %v662_v27 = vmax.f32 %v422_v19, 0.0  ;;  %v694_v28 = vmax.f32 %v550_v20, 0.0 }
 0x129   :  { %v1234_v29 = vpack.c.bf16 %v664_v23, %v663_v21  ;;  %v1314_v30 = vpack.c.bf16 %v696_v24, %v695_v22 }
 0x12a   :  { %v1229_v31 = vpack.c.bf16 %v662_v27, %v661_v25  ;;  %v1309_v32 = vpack.c.bf16 %v694_v28, %v693_v26  ;;  %v1473_v33 = vpop.f32.mrb[8].mxu0  ;;  %v1505_v34 = vpop.f32.mrb[8].mxu1 }
 0x12b   :  { %1378 = vst [vmem:[%s1944_s3 + $0x18] sm:$0xff] %v1234_v29   ;;  %1394 = vst [vmem:[%s1944_s3 + $0x98] sm:$0xff] %v1314_v30   ;;  %v443_v35 = vadd.f32 %v1473_v33, %v1779_v40  ;;  %v571_v36 = vadd.f32 %v1505_v34, %v1779_v40  ;;  %v434_v37 = vpop.f32.mrb[9].mxu0  ;;  %v562_v38 = vpop.f32.mrb[9].mxu1 }
 0x12c   :  { %1377 = vst [vmem:[%s1944_s3 + $0x10] sm:$0xff] %v1229_v31   ;;  %1393 = vst [vmem:[%s1944_s3 + $0x90] sm:$0xff] %v1309_v32   ;;  %v435_v39 = vadd.f32 %v1779_v40, %v434_v37  ;;  %v563_v41 = vadd.f32 %v1779_v40, %v562_v38  ;;  %v1474_v42 = vpop.f32.mrb[10].mxu0  ;;  %v1506_v43 = vpop.f32.mrb[10].mxu1 }
 0x12d   :  { %v446_v44 = vadd.f32 %v1474_v42, %v1779_v40  ;;  %v574_v45 = vadd.f32 %v1506_v43, %v1779_v40  ;;  %v437_v46 = vpop.f32.mrb[11].mxu0  ;;  %v565_v47 = vpop.f32.mrb[11].mxu1  ;;  %v667_v50 = vmax.f32 %v443_v35, 0.0  ;;  %v699_v51 = vmax.f32 %v571_v36, 0.0 }
 0x12e   :  { %v438_v48 = vadd.f32 %v1779_v40, %v437_v46  ;;  %v566_v49 = vadd.f32 %v1779_v40, %v565_v47  ;;  %v665_v54 = vmax.f32 %v435_v39, 0.0  ;;  %v697_v55 = vmax.f32 %v563_v41, 0.0 }
 0x12f   :  { %v668_v52 = vmax.f32 %v446_v44, 0.0  ;;  %v700_v53 = vmax.f32 %v574_v45, 0.0 }
 0x130   :  { %v666_v56 = vmax.f32 %v438_v48, 0.0  ;;  %v698_v57 = vmax.f32 %v566_v49, 0.0 }
 0x131   :  { %v1244_v58 = vpack.c.bf16 %v668_v52, %v667_v50  ;;  %v1324_v59 = vpack.c.bf16 %v700_v53, %v699_v51 }
 0x132   :  { %v1239_v60 = vpack.c.bf16 %v666_v56, %v665_v54  ;;  %v1319_v61 = vpack.c.bf16 %v698_v57, %v697_v55  ;;  %v1477_v62 = vpop.f32.mrb[12].mxu0  ;;  %v1509_v63 = vpop.f32.mrb[12].mxu1 }
 0x133   :  { %1380 = vst [vmem:[%s1944_s3 + $0x28] sm:$0xff] %v1244_v58   ;;  %1396 = vst [vmem:[%s1944_s3 + $0xa8] sm:$0xff] %v1324_v59   ;;  %v459_v0 = vadd.f32 %v1477_v62, %v1779_v40  ;;  %v587_v1 = vadd.f32 %v1509_v63, %v1779_v40  ;;  %v450_v2 = vpop.f32.mrb[13].mxu0  ;;  %v578_v3 = vpop.f32.mrb[13].mxu1 }
 0x134   :  { %1379 = vst [vmem:[%s1944_s3 + $0x20] sm:$0xff] %v1239_v60   ;;  %1395 = vst [vmem:[%s1944_s3 + $0xa0] sm:$0xff] %v1319_v61   ;;  %v451_v4 = vadd.f32 %v1779_v40, %v450_v2  ;;  %v579_v5 = vadd.f32 %v1779_v40, %v578_v3  ;;  %v1478_v6 = vpop.f32.mrb[14].mxu0  ;;  %v1510_v7 = vpop.f32.mrb[14].mxu1 }
 0x135   :  { %v462_v8 = vadd.f32 %v1478_v6, %v1779_v40  ;;  %v590_v9 = vadd.f32 %v1510_v7, %v1779_v40  ;;  %v453_v10 = vpop.f32.mrb[15].mxu0  ;;  %v581_v11 = vpop.f32.mrb[15].mxu1  ;;  %v671_v14 = vmax.f32 %v459_v0, 0.0  ;;  %v703_v15 = vmax.f32 %v587_v1, 0.0 }
 0x136   :  { %v454_v12 = vadd.f32 %v1779_v40, %v453_v10  ;;  %v582_v13 = vadd.f32 %v1779_v40, %v581_v11  ;;  %v669_v18 = vmax.f32 %v451_v4, 0.0  ;;  %v701_v19 = vmax.f32 %v579_v5, 0.0 }
 0x137   :  { %v672_v16 = vmax.f32 %v462_v8, 0.0  ;;  %v704_v17 = vmax.f32 %v590_v9, 0.0 }
 0x138   :  { %v670_v20 = vmax.f32 %v454_v12, 0.0  ;;  %v702_v21 = vmax.f32 %v582_v13, 0.0 }
 0x139   :  { %v1254_v22 = vpack.c.bf16 %v672_v16, %v671_v14  ;;  %v1334_v23 = vpack.c.bf16 %v704_v17, %v703_v15 }
 0x13a   :  { %v1249_v24 = vpack.c.bf16 %v670_v20, %v669_v18  ;;  %v1329_v25 = vpack.c.bf16 %v702_v21, %v701_v19  ;;  %v1481_v26 = vpop.f32.mrb[16].mxu0  ;;  %v1513_v27 = vpop.f32.mrb[16].mxu1 }
 0x13b   :  { %1382 = vst [vmem:[%s1944_s3 + $0x38] sm:$0xff] %v1254_v22   ;;  %1398 = vst [vmem:[%s1944_s3 + $0xb8] sm:$0xff] %v1334_v23   ;;  %v475_v28 = vadd.f32 %v1481_v26, %v1779_v40  ;;  %v603_v29 = vadd.f32 %v1513_v27, %v1779_v40  ;;  %v466_v30 = vpop.f32.mrb[17].mxu0  ;;  %v594_v31 = vpop.f32.mrb[17].mxu1 }
 0x13c   :  { %1381 = vst [vmem:[%s1944_s3 + $0x30] sm:$0xff] %v1249_v24   ;;  %1397 = vst [vmem:[%s1944_s3 + $0xb0] sm:$0xff] %v1329_v25   ;;  %v467_v32 = vadd.f32 %v1779_v40, %v466_v30  ;;  %v595_v33 = vadd.f32 %v1779_v40, %v594_v31  ;;  %v1482_v34 = vpop.f32.mrb[18].mxu0  ;;  %v1514_v35 = vpop.f32.mrb[18].mxu1 }
 0x13d   :  { %v478_v36 = vadd.f32 %v1482_v34, %v1779_v40  ;;  %v606_v37 = vadd.f32 %v1514_v35, %v1779_v40  ;;  %v469_v38 = vpop.f32.mrb[19].mxu0  ;;  %v597_v39 = vpop.f32.mrb[19].mxu1  ;;  %v675_v43 = vmax.f32 %v475_v28, 0.0  ;;  %v707_v44 = vmax.f32 %v603_v29, 0.0 }
 0x13e   :  { %v470_v41 = vadd.f32 %v1779_v40, %v469_v38  ;;  %v598_v42 = vadd.f32 %v1779_v40, %v597_v39  ;;  %v673_v47 = vmax.f32 %v467_v32, 0.0  ;;  %v705_v48 = vmax.f32 %v595_v33, 0.0 }
 0x13f   :  { %v676_v45 = vmax.f32 %v478_v36, 0.0  ;;  %v708_v46 = vmax.f32 %v606_v37, 0.0 }
 0x140   :  { %v674_v49 = vmax.f32 %v470_v41, 0.0  ;;  %v706_v50 = vmax.f32 %v598_v42, 0.0 }
 0x141   :  { %v1264_v51 = vpack.c.bf16 %v676_v45, %v675_v43  ;;  %v1344_v52 = vpack.c.bf16 %v708_v46, %v707_v44 }
 0x142   :  { %v1259_v53 = vpack.c.bf16 %v674_v49, %v673_v47  ;;  %v1339_v54 = vpack.c.bf16 %v706_v50, %v705_v48  ;;  %v1485_v55 = vpop.f32.mrb[20].mxu0  ;;  %v1517_v56 = vpop.f32.mrb[20].mxu1 }
 0x143   :  { %1384 = vst [vmem:[%s1944_s3 + $0x48] sm:$0xff] %v1264_v51   ;;  %1400 = vst [vmem:[%s1944_s3 + $0xc8] sm:$0xff] %v1344_v52   ;;  %v491_v57 = vadd.f32 %v1485_v55, %v1779_v40  ;;  %v619_v58 = vadd.f32 %v1517_v56, %v1779_v40  ;;  %v482_v59 = vpop.f32.mrb[21].mxu0  ;;  %v610_v60 = vpop.f32.mrb[21].mxu1 }
 0x144   :  { %1383 = vst [vmem:[%s1944_s3 + $0x40] sm:$0xff] %v1259_v53   ;;  %1399 = vst [vmem:[%s1944_s3 + $0xc0] sm:$0xff] %v1339_v54   ;;  %v483_v61 = vadd.f32 %v1779_v40, %v482_v59  ;;  %v611_v62 = vadd.f32 %v1779_v40, %v610_v60  ;;  %v1486_v63 = vpop.f32.mrb[22].mxu0  ;;  %v1518_v0 = vpop.f32.mrb[22].mxu1 }
 0x145   :  { %v494_v1 = vadd.f32 %v1486_v63, %v1779_v40  ;;  %v622_v2 = vadd.f32 %v1518_v0, %v1779_v40  ;;  %v485_v3 = vpop.f32.mrb[23].mxu0  ;;  %v613_v4 = vpop.f32.mrb[23].mxu1  ;;  %v679_v7 = vmax.f32 %v491_v57, 0.0  ;;  %v711_v8 = vmax.f32 %v619_v58, 0.0 }
 0x146   :  { %v486_v5 = vadd.f32 %v1779_v40, %v485_v3  ;;  %v614_v6 = vadd.f32 %v1779_v40, %v613_v4  ;;  %v677_v11 = vmax.f32 %v483_v61, 0.0  ;;  %v709_v12 = vmax.f32 %v611_v62, 0.0 }
 0x147   :  { %v680_v9 = vmax.f32 %v494_v1, 0.0  ;;  %v712_v10 = vmax.f32 %v622_v2, 0.0 }
 0x148   :  { %v678_v13 = vmax.f32 %v486_v5, 0.0  ;;  %v710_v14 = vmax.f32 %v614_v6, 0.0 }
 0x149   :  { %v1274_v15 = vpack.c.bf16 %v680_v9, %v679_v7  ;;  %v1354_v16 = vpack.c.bf16 %v712_v10, %v711_v8 }
 0x14a   :  { %v1269_v17 = vpack.c.bf16 %v678_v13, %v677_v11  ;;  %v1349_v18 = vpack.c.bf16 %v710_v14, %v709_v12  ;;  %v1489_v19 = vpop.f32.mrb[24].mxu0  ;;  %v1521_v20 = vpop.f32.mrb[24].mxu1 }
 0x14b   :  { %1386 = vst [vmem:[%s1944_s3 + $0x58] sm:$0xff] %v1274_v15   ;;  %1402 = vst [vmem:[%s1944_s3 + $0xd8] sm:$0xff] %v1354_v16   ;;  %v507_v21 = vadd.f32 %v1489_v19, %v1779_v40  ;;  %v635_v22 = vadd.f32 %v1521_v20, %v1779_v40  ;;  %v498_v23 = vpop.f32.mrb[25].mxu0  ;;  %v626_v24 = vpop.f32.mrb[25].mxu1 }
 0x14c   :  { %1385 = vst [vmem:[%s1944_s3 + $0x50] sm:$0xff] %v1269_v17   ;;  %1401 = vst [vmem:[%s1944_s3 + $0xd0] sm:$0xff] %v1349_v18   ;;  %v499_v25 = vadd.f32 %v1779_v40, %v498_v23  ;;  %v627_v26 = vadd.f32 %v1779_v40, %v626_v24  ;;  %v1490_v27 = vpop.f32.mrb[26].mxu0  ;;  %v1522_v28 = vpop.f32.mrb[26].mxu1 }
 0x14d   :  { %v510_v29 = vadd.f32 %v1490_v27, %v1779_v40  ;;  %v638_v30 = vadd.f32 %v1522_v28, %v1779_v40  ;;  %v501_v31 = vpop.f32.mrb[27].mxu0  ;;  %v629_v32 = vpop.f32.mrb[27].mxu1  ;;  %v683_v35 = vmax.f32 %v507_v21, 0.0  ;;  %v715_v36 = vmax.f32 %v635_v22, 0.0 }
 0x14e   :  { %v502_v33 = vadd.f32 %v1779_v40, %v501_v31  ;;  %v630_v34 = vadd.f32 %v1779_v40, %v629_v32  ;;  %v681_v39 = vmax.f32 %v499_v25, 0.0  ;;  %v713_v41 = vmax.f32 %v627_v26, 0.0 }
 0x14f   :  { %v684_v37 = vmax.f32 %v510_v29, 0.0  ;;  %v716_v38 = vmax.f32 %v638_v30, 0.0 }
 0x150   :  { %v682_v42 = vmax.f32 %v502_v33, 0.0  ;;  %v714_v43 = vmax.f32 %v630_v34, 0.0 }
 0x151   :  { %v1284_v44 = vpack.c.bf16 %v684_v37, %v683_v35  ;;  %v1364_v45 = vpack.c.bf16 %v716_v38, %v715_v36 }
 0x152   :  { %v1279_v46 = vpack.c.bf16 %v682_v42, %v681_v39  ;;  %v1359_v47 = vpack.c.bf16 %v714_v43, %v713_v41  ;;  %v1493_v48 = vpop.f32.mrb[28].mxu0  ;;  %v1525_v49 = vpop.f32.mrb[28].mxu1 }
 0x153   :  { %1388 = vst [vmem:[%s1944_s3 + $0x68] sm:$0xff] %v1284_v44   ;;  %1404 = vst [vmem:[%s1944_s3 + $0xe8] sm:$0xff] %v1364_v45   ;;  %v523_v50 = vadd.f32 %v1493_v48, %v1779_v40  ;;  %v651_v51 = vadd.f32 %v1525_v49, %v1779_v40  ;;  %v514_v52 = vpop.f32.mrb[29].mxu0  ;;  %v642_v53 = vpop.f32.mrb[29].mxu1 }
 0x154   :  { %1387 = vst [vmem:[%s1944_s3 + $0x60] sm:$0xff] %v1279_v46   ;;  %1403 = vst [vmem:[%s1944_s3 + $0xe0] sm:$0xff] %v1359_v47   ;;  %v515_v54 = vadd.f32 %v1779_v40, %v514_v52  ;;  %v643_v55 = vadd.f32 %v1779_v40, %v642_v53  ;;  %v1494_v56 = vpop.f32.mrb[30].mxu0  ;;  %v1526_v57 = vpop.f32.mrb[30].mxu1 }
 0x155   :  { %v526_v58 = vadd.f32 %v1494_v56, %v1779_v40  ;;  %v654_v59 = vadd.f32 %v1526_v57, %v1779_v40  ;;  %v517_v60 = vpop.f32.mrb[31].mxu0  ;;  %v645_v61 = vpop.f32.mrb[31].mxu1  ;;  %v687_v0 = vmax.f32 %v523_v50, 0.0  ;;  %v719_v1 = vmax.f32 %v651_v51, 0.0 }
 0x156   :  { %v518_v62 = vadd.f32 %v1779_v40, %v517_v60  ;;  %v646_v63 = vadd.f32 %v1779_v40, %v645_v61  ;;  %v685_v4 = vmax.f32 %v515_v54, 0.0  ;;  %v717_v5 = vmax.f32 %v643_v55, 0.0 }
 0x157   :  { %v688_v2 = vmax.f32 %v526_v58, 0.0  ;;  %v720_v3 = vmax.f32 %v654_v59, 0.0 }
 0x158   :  { %v686_v6 = vmax.f32 %v518_v62, 0.0  ;;  %v718_v7 = vmax.f32 %v646_v63, 0.0 }
 0x159   :  { %v1294_v8 = vpack.c.bf16 %v688_v2, %v687_v0  ;;  %v1374_v9 = vpack.c.bf16 %v720_v3, %v719_v1 }
 0x15a   :  { %v1289_v10 = vpack.c.bf16 %v686_v6, %v685_v4  ;;  %v1369_v11 = vpack.c.bf16 %v718_v7, %v717_v5 }
 0x15b   :  { %1390 = vst [vmem:[%s1944_s3 + $0x78] sm:$0xff] %v1294_v8   ;;  %1406 = vst [vmem:[%s1944_s3 + $0xf8] sm:$0xff] %v1374_v9  }
 0x15c   :  { %1389 = vst [vmem:[%s1944_s3 + $0x70] sm:$0xff] %v1289_v10   ;;  %1405 = vst [vmem:[%s1944_s3 + $0xf0] sm:$0xff] %v1369_v11  }
 0x15d   :  { %1045 = vsyncpa [#allocation3], 1 }
 0x15e   :  { %1046 = vsyncpa [#allocation5], 1 }

// kernel: forward.8
= control target key start
LH: loop header
LB: loop body
LE: loop exit
PB: predicated region body
PF: predicated region fallthrough
CT: control target
= control target key end

     0   :  { %s4080_s1 = inlined_call_operand.vmem [shape: bf16[1664,128], index: 1, kind: input, shape index: {}]   ;;  %s4081_s0 = inlined_call_operand.vmem [shape: bf16[128,1664], index: 0, kind: input, shape index: {}]   ;;  %s4082_s2 = inlined_call_operand.vmem [shape: f32[1,128], index: 2, kind: input, shape index: {}]   ;;  %s4083_s3 = inlined_call_operand.vmem [shape: bf16[128,128], index: 3, kind: output, shape index: {}]  }
   0x1   :  { %v3009_v0 = vld [vmem:[%s4080_s1 + $0x40] sm:$0xff]   ;;  %v3013_v4 = vld [vmem:[%s4080_s1 + $0x48] sm:$0xff]   ;;  %v3017_v8 = vld [vmem:[%s4080_s1 + $0x50] sm:$0xff]  }
   0x2   :  { %v3010_v1 = vld [vmem:[%s4080_s1 + $0xc0] sm:$0xff]   ;;  %2561 = vmatprep.subr.bf16.mxu0 %v3009_v0  ;;  %v3014_v5 = vld [vmem:[%s4080_s1 + $0xc8] sm:$0xff]   ;;  %v3018_v9 = vld [vmem:[%s4080_s1 + $0xd0] sm:$0xff]  }
   0x3   :  { %v3011_v2 = vld [vmem:[%s4080_s1] sm:$0xff]   ;;  %2625 = vmatprep.subr.bf16.mxu1 %v3010_v1  ;;  %v3015_v6 = vld [vmem:[%s4080_s1 + $0x8] sm:$0xff]   ;;  %v3019_v10 = vld [vmem:[%s4080_s1 + $0x10] sm:$0xff]  }
   0x4   :  { %v3012_v3 = vld [vmem:[%s4080_s1 + $0x80] sm:$0xff]   ;;  %2562 = vmatpush3.bf16.msra.mxu0 %v3011_v2  ;;  %v3016_v7 = vld [vmem:[%s4080_s1 + $0x88] sm:$0xff]   ;;  %v3020_v11 = vld [vmem:[%s4080_s1 + $0x90] sm:$0xff]  }
   0x5   :  { %2626 = vmatpush3.bf16.msra.mxu1 %v3012_v3  ;;  %2563 = vmatprep.subr.bf16.mxu0 %v3013_v4  ;;  %v3021_v12 = vld [vmem:[%s4080_s1 + $0x58] sm:$0xff]   ;;  %v3025_v16 = vld [vmem:[%s4080_s1 + $0x60] sm:$0xff]   ;;  %v3029_v20 = vld [vmem:[%s4080_s1 + $0x68] sm:$0xff]  }
   0x6   :  { %2627 = vmatprep.subr.bf16.mxu1 %v3014_v5  ;;  %v3022_v13 = vld [vmem:[%s4080_s1 + $0xd8] sm:$0xff]   ;;  %v3026_v17 = vld [vmem:[%s4080_s1 + $0xe0] sm:$0xff]   ;;  %v3030_v21 = vld [vmem:[%s4080_s1 + $0xe8] sm:$0xff]  }
   0x7   :  { %v3023_v14 = vld [vmem:[%s4080_s1 + $0x18] sm:$0xff]   ;;  %v3027_v18 = vld [vmem:[%s4080_s1 + $0x20] sm:$0xff]   ;;  %v3031_v22 = vld [vmem:[%s4080_s1 + $0x28] sm:$0xff]  }
   0x8   :  { %2564 = vmatpush3.bf16.msra.mxu0 %v3015_v6  ;;  %v3024_v15 = vld [vmem:[%s4080_s1 + $0x98] sm:$0xff]   ;;  %v3028_v19 = vld [vmem:[%s4080_s1 + $0xa0] sm:$0xff]   ;;  %v3032_v23 = vld [vmem:[%s4080_s1 + $0xa8] sm:$0xff]  }
   0x9   :  { %2628 = vmatpush3.bf16.msra.mxu1 %v3016_v7  ;;  %2565 = vmatprep.subr.bf16.mxu0 %v3017_v8  ;;  %v3033_v24 = vld [vmem:[%s4080_s1 + $0x70] sm:$0xff]   ;;  %v3037_v28 = vld [vmem:[%s4080_s1 + $0x78] sm:$0xff]   ;;  %v3046_v35 = vld [vmem:[%s4081_s0 + $0xc] ss:$52 sps:$4 sm:$0xff]  }
   0xa   :  { %2629 = vmatprep.subr.bf16.mxu1 %v3018_v9  ;;  %v3034_v25 = vld [vmem:[%s4080_s1 + $0xf0] sm:$0xff]   ;;  %v3038_v29 = vld [vmem:[%s4080_s1 + $0xf8] sm:$0xff]   ;;  %v3047_v36 = vld [vmem:[%s4080_s1 + $0x140] sm:$0xff]   ;;  %1623 = vmatprep.mubr.bf16.mxu1 %v3046_v35 }
   0xb   :  { %v3035_v26 = vld [vmem:[%s4080_s1 + $0x30] sm:$0xff]   ;;  %v3039_v30 = vld [vmem:[%s4080_s1 + $0x38] sm:$0xff]   ;;  %v3048_v37 = vld [vmem:[%s4080_s1 + $0x1c0] sm:$0xff]  }
   0xc   :  { %2566 = vmatpush3.bf16.msra.mxu0 %v3019_v10  ;;  %v3036_v27 = vld [vmem:[%s4080_s1 + $0xb0] sm:$0xff]   ;;  %v3040_v31 = vld [vmem:[%s4080_s1 + $0xb8] sm:$0xff]   ;;  %v3049_v38 = vld [vmem:[%s4080_s1 + $0x100] sm:$0xff]  }
   0xd   :  { %2630 = vmatpush3.bf16.msra.mxu1 %v3020_v11  ;;  %2567 = vmatprep.subr.bf16.mxu0 %v3021_v12  ;;  %v3041_v32 = vld [vmem:[%s4081_s0] ss:$52 sps:$4 sm:$0xff]   ;;  %v3043_v33 = vld [vmem:[%s4081_s0 + $0x4] ss:$52 sps:$4 sm:$0xff]   ;;  %v3044_v34 = vld [vmem:[%s4081_s0 + $0x8] ss:$52 sps:$4 sm:$0xff]  }
   0xe   :  { %2631 = vmatprep.subr.bf16.mxu1 %v3022_v13  ;;  %1526 = vmatprep.mubr.bf16.mxu0 %v3043_v33  ;;  %v3050_v39 = vld [vmem:[%s4080_s1 + $0x180] sm:$0xff]   ;;  %v3053_v41 = vld [vmem:[%s4081_s0 + $0x74] ss:$52 sps:$4 sm:$0xff]   ;;  %v3063_v49 = vld [vmem:[%s4081_s0 + $0xdc] ss:$52 sps:$4 sm:$0xff]  }
   0xf   :  { %v3051_v40 = vld [vmem:[%s4081_s0 + $0x6c] ss:$52 sps:$4 sm:$0xff]   ;;  %v3055_v42 = vld [vmem:[%s4081_s0 + $0x68] ss:$52 sps:$4 sm:$0xff]   ;;  %v3056_v43 = vld [vmem:[%s4081_s0 + $0x70] ss:$52 sps:$4 sm:$0xff]  }
  0x10   :  { %2568 = vmatpush3.bf16.msra.mxu0 %v3023_v14  ;;  %v3057_v44 = vld [vmem:[%s4080_s1 + $0x148] sm:$0xff]   ;;  %v3065_v50 = vld [vmem:[%s4081_s0 + $0xd0] ss:$52 sps:$4 sm:$0xff]   ;;  %v3076_v59 = vld [vmem:[%s4081_s0 + $0x140] ss:$52 sps:$4 sm:$0xff]  }
  0x11   :  { %2632 = vmatpush3.bf16.msra.mxu1 %v3024_v15  ;;  %2569 = vmatprep.subr.bf16.mxu0 %v3025_v16  ;;  %v3058_v45 = vld [vmem:[%s4080_s1 + $0x1c8] sm:$0xff]   ;;  %v3067_v52 = vld [vmem:[%s4080_s1 + $0x150] sm:$0xff]   ;;  %v3073_v57 = vld [vmem:[%s4081_s0 + $0x144] ss:$52 sps:$4 sm:$0xff]  }
  0x12   :  { %2633 = vmatprep.subr.bf16.mxu1 %v3026_v17  ;;  %v3059_v46 = vld [vmem:[%s4080_s1 + $0x108] sm:$0xff]   ;;  %v3068_v53 = vld [vmem:[%s4080_s1 + $0x1d0] sm:$0xff]   ;;  %v3077_v60 = vld [vmem:[%s4080_s1 + $0x158] sm:$0xff]  }
  0x13   :  { %v3060_v47 = vld [vmem:[%s4080_s1 + $0x188] sm:$0xff]   ;;  %v3069_v54 = vld [vmem:[%s4080_s1 + $0x110] sm:$0xff]   ;;  %v3078_v61 = vld [vmem:[%s4080_s1 + $0x1d8] sm:$0xff]  }
  0x14   :  { %2570 = vmatpush3.bf16.msra.mxu0 %v3027_v18  ;;  %v3061_v48 = vld [vmem:[%s4081_s0 + $0xd4] ss:$52 sps:$4 sm:$0xff]   ;;  %v3066_v51 = vld [vmem:[%s4081_s0 + $0xd8] ss:$52 sps:$4 sm:$0xff]   ;;  %v3071_v56 = vld [vmem:[%s4081_s0 + $0x13c] ss:$52 sps:$4 sm:$0xff]  }
  0x15   :  { %2634 = vmatpush3.bf16.msra.mxu1 %v3028_v19  ;;  %2571 = vmatprep.subr.bf16.mxu0 %v3029_v20  ;;  %v3070_v55 = vld [vmem:[%s4080_s1 + $0x190] sm:$0xff]   ;;  %v3075_v58 = vld [vmem:[%s4081_s0 + $0x138] ss:$52 sps:$4 sm:$0xff]   ;;  %v3087_v3 = vld [vmem:[%s4080_s1 + $0x160] sm:$0xff]  }
  0x16   :  { %2635 = vmatprep.subr.bf16.mxu1 %v3030_v21  ;;  %v3079_v62 = vld [vmem:[%s4080_s1 + $0x118] sm:$0xff]   ;;  %v3083_v1 = vld [vmem:[%s4081_s0 + $0x1ac] ss:$52 sps:$4 sm:$0xff]   ;;  %v3093_v9 = vld [vmem:[%s4081_s0 + $0x214] ss:$52 sps:$4 sm:$0xff]  }
  0x17   :  { %v3080_v63 = vld [vmem:[%s4080_s1 + $0x198] sm:$0xff]   ;;  %v3085_v2 = vld [vmem:[%s4081_s0 + $0x1a0] ss:$52 sps:$4 sm:$0xff]   ;;  %v3097_v10 = vld [vmem:[%s4080_s1 + $0x168] sm:$0xff]  }
  0x18   :  { %2572 = vmatpush3.bf16.msra.mxu0 %v3031_v22  ;;  %v3081_v0 = vld [vmem:[%s4081_s0 + $0x1a4] ss:$52 sps:$4 sm:$0xff]   ;;  %v3086_v4 = vld [vmem:[%s4081_s0 + $0x1a8] ss:$52 sps:$4 sm:$0xff]   ;;  %v3091_v8 = vld [vmem:[%s4081_s0 + $0x20c] ss:$52 sps:$4 sm:$0xff]  }
  0x19   :  { %2636 = vmatpush3.bf16.msra.mxu1 %v3032_v23  ;;  %2573 = vmatprep.subr.bf16.mxu0 %v3033_v24  ;;  %v3088_v5 = vld [vmem:[%s4080_s1 + $0x1e0] sm:$0xff]   ;;  %v3098_v11 = vld [vmem:[%s4080_s1 + $0x1e8] sm:$0xff]   ;;  %v3103_v17 = vld [vmem:[%s4081_s0 + $0x27c] ss:$52 sps:$4 sm:$0xff]  }
  0x1a   :  { %2637 = vmatprep.subr.bf16.mxu1 %v3034_v25  ;;  %v3089_v6 = vld [vmem:[%s4080_s1 + $0x120] sm:$0xff]   ;;  %v3095_v12 = vld [vmem:[%s4081_s0 + $0x208] ss:$52 sps:$4 sm:$0xff]   ;;  %v3107_v18 = vld [vmem:[%s4080_s1 + $0x170] sm:$0xff]  }
  0x1b   :  { %v3090_v7 = vld [vmem:[%s4080_s1 + $0x1a0] sm:$0xff]   ;;  %v3099_v13 = vld [vmem:[%s4080_s1 + $0x128] sm:$0xff]   ;;  %v3108_v19 = vld [vmem:[%s4080_s1 + $0x1f0] sm:$0xff]  }
  0x1c   :  { %2574 = vmatpush3.bf16.msra.mxu0 %v3035_v26  ;;  %v3100_v14 = vld [vmem:[%s4080_s1 + $0x1a8] sm:$0xff]   ;;  %v3096_v15 = vld [vmem:[%s4081_s0 + $0x210] ss:$52 sps:$4 sm:$0xff]   ;;  %v3117_v26 = vld [vmem:[%s4080_s1 + $0x178] sm:$0xff]  }
  0x1d   :  { %2638 = vmatpush3.bf16.msra.mxu1 %v3036_v27  ;;  %2575 = vmatprep.subr.bf16.mxu0 %v3037_v28  ;;  %v3101_v16 = vld [vmem:[%s4081_s0 + $0x274] ss:$52 sps:$4 sm:$0xff]   ;;  %v3105_v22 = vld [vmem:[%s4081_s0 + $0x270] ss:$52 sps:$4 sm:$0xff]   ;;  %v3106_v23 = vld [vmem:[%s4081_s0 + $0x278] ss:$52 sps:$4 sm:$0xff]  }
  0x1e   :  { %2639 = vmatprep.subr.bf16.mxu1 %v3038_v29  ;;  %v3109_v20 = vld [vmem:[%s4080_s1 + $0x130] sm:$0xff]   ;;  %v3113_v25 = vld [vmem:[%s4081_s0 + $0x2e4] ss:$52 sps:$4 sm:$0xff]  }
  0x1f   :  { %v3110_v21 = vld [vmem:[%s4080_s1 + $0x1b0] sm:$0xff]   ;;  %v3118_v27 = vld [vmem:[%s4080_s1 + $0x1f8] sm:$0xff]   ;;  %v3127_v33 = vld [vmem:[%s4080_s1 + $0x240] sm:$0xff]  }
  0x20   :  { %2576 = vmatpush3.bf16.msra.mxu0 %v3039_v30  ;;  %v3111_v24 = vld [vmem:[%s4081_s0 + $0x2dc] ss:$52 sps:$4 sm:$0xff]   ;;  %v3115_v30 = vld [vmem:[%s4081_s0 + $0x2d8] ss:$52 sps:$4 sm:$0xff]  }
  0x21   :  { %2640 = vmatpush3.bf16.msra.mxu1 %v3040_v31  ;;  %2689 = vmatprep.subr.bf16.mxu0 %v3047_v36  ;;  %v3119_v28 = vld [vmem:[%s4080_s1 + $0x138] sm:$0xff]   ;;  %v3116_v31 = vld [vmem:[%s4081_s0 + $0x2e0] ss:$52 sps:$4 sm:$0xff]   ;;  %v3121_v36 = vld [vmem:[%s4081_s0 + $0x10] ss:$52 sps:$4 sm:$0xff]  }
  0x22   :  { %2753 = vmatprep.subr.bf16.mxu1 %v3048_v37  ;;  %v3120_v29 = vld [vmem:[%s4080_s1 + $0x1b8] sm:$0xff]  }
  0x23   :  { %1527 = vmatmul.mubr.bf16.vlgmr.msra.gmra.mrb[0].mxu0 %v3041_v32  ;;  %v3123_v32 = vld [vmem:[%s4081_s0 + $0x14] ss:$52 sps:$4 sm:$0xff]   ;;  %v3126_v35 = vld [vmem:[%s4081_s0 + $0x1c] ss:$52 sps:$4 sm:$0xff]   ;;  %v3124_v37 = vld [vmem:[%s4081_s0 + $0x18] ss:$52 sps:$4 sm:$0xff]  }
  0x24   :  { %1624 = vmatmul.mubr.bf16.vlgmr.msra.gmra.mrb[0].mxu1 %v3044_v34  ;;  %2690 = vmatpush3.bf16.msra.mxu0 %v3049_v38  ;;  %v3128_v34 = vld [vmem:[%s4080_s1 + $0x2c0] sm:$0xff]  }
  0x25   :  { %2754 = vmatpush3.bf16.msra.mxu1 %v3050_v39  ;;  %1534 = vmatprep.mubr.bf16.mxu0 %v3051_v40  ;;  %v3129_v38 = vld [vmem:[%s4080_s1 + $0x200] sm:$0xff]   ;;  %v3131_v40 = vld [vmem:[%s4081_s0 + $0x7c] ss:$52 sps:$4 sm:$0xff]  }
  0x26   :  { %1631 = vmatprep.mubr.bf16.mxu1 %v3053_v41  ;;  %2691 = vmatprep.subr.bf16.mxu0 %v3057_v44  ;;  %v3130_v39 = vld [vmem:[%s4080_s1 + $0x280] sm:$0xff]   ;;  %v3139_v44 = vld [vmem:[%s4080_s1 + $0x208] sm:$0xff]  }
  0x27   :  { %2755 = vmatprep.subr.bf16.mxu1 %v3058_v45  ;;  %v3133_v41 = vld [vmem:[%s4081_s0 + $0x84] ss:$52 sps:$4 sm:$0xff]   ;;  %v3140_v45 = vld [vmem:[%s4080_s1 + $0x288] sm:$0xff]  }
  0x28   :  { %2692 = vmatpush3.bf16.msra.mxu0 %v3059_v46  ;;  %v3135_v46 = vld [vmem:[%s4081_s0 + $0x78] ss:$52 sps:$4 sm:$0xff]  }
  0x29   :  { %2756 = vmatpush3.bf16.msra.mxu1 %v3060_v47  ;;  %2693 = vmatprep.subr.bf16.mxu0 %v3067_v52  ;;  %v3147_v47 = vld [vmem:[%s4080_s1 + $0x250] sm:$0xff]  }
  0x2a   :  { %2757 = vmatprep.subr.bf16.mxu1 %v3068_v53  ;;  %v3149_v52 = vld [vmem:[%s4080_s1 + $0x210] sm:$0xff]  }
  0x2b   :  { %1535 = vmatmul.mubr.bf16.gmra.mrb[4].mxu0 %v3055_v42  ;;  %v3137_v42 = vld [vmem:[%s4080_s1 + $0x248] sm:$0xff]   ;;  %v3150_v53 = vld [vmem:[%s4080_s1 + $0x290] sm:$0xff]  }
  0x2c   :  { %1632 = vmatmul.mubr.bf16.gmra.mrb[4].mxu1 %v3056_v43  ;;  %1542 = vmatprep.mubr.bf16.mxu0 %v3061_v48  ;;  %v3138_v43 = vld [vmem:[%s4080_s1 + $0x2c8] sm:$0xff]   ;;  %v3136_v48 = vld [vmem:[%s4081_s0 + $0x80] ss:$52 sps:$4 sm:$0xff]  }
  0x2d   :  { %1639 = vmatprep.mubr.bf16.mxu1 %v3063_v49  ;;  %2694 = vmatpush3.bf16.msra.mxu0 %v3069_v54  ;;  %v3148_v49 = vld [vmem:[%s4080_s1 + $0x2d0] sm:$0xff]   ;;  %v3157_v54 = vld [vmem:[%s4080_s1 + $0x258] sm:$0xff]  }
  0x2e   :  { %2758 = vmatpush3.bf16.msra.mxu1 %v3070_v55  ;;  %2695 = vmatprep.subr.bf16.mxu0 %v3077_v60  ;;  %v3158_v55 = vld [vmem:[%s4080_s1 + $0x2d8] sm:$0xff]   ;;  %v3151_v60 = vld [vmem:[%s4081_s0 + $0x14c] ss:$52 sps:$4 sm:$0xff]  }
  0x2f   :  { %2759 = vmatprep.subr.bf16.mxu1 %v3078_v61  ;;  %v3153_v61 = vld [vmem:[%s4081_s0 + $0x154] ss:$52 sps:$4 sm:$0xff]  }
  0x31   :  { %2696 = vmatpush3.bf16.msra.mxu0 %v3079_v62  ;;  %v3167_v62 = vld [vmem:[%s4080_s1 + $0x260] sm:$0xff]  }
  0x32   :  { %2760 = vmatpush3.bf16.msra.mxu1 %v3080_v63  ;;  %2697 = vmatprep.subr.bf16.mxu0 %v3087_v3  ;;  %v3168_v63 = vld [vmem:[%s4080_s1 + $0x2e0] sm:$0xff]  }
  0x33   :  { %1543 = vmatmul.mubr.bf16.gmra.mrb[8].mxu0 %v3065_v50  ;;  %2761 = vmatprep.subr.bf16.mxu1 %v3088_v5  ;;  %v3141_v50 = vld [vmem:[%s4081_s0 + $0xe4] ss:$52 sps:$4 sm:$0xff]   ;;  %v3163_v5 = vld [vmem:[%s4081_s0 + $0x1bc] ss:$52 sps:$4 sm:$0xff]  }
  0x34   :  { %1640 = vmatmul.mubr.bf16.gmra.mrb[8].mxu1 %v3066_v51  ;;  %1550 = vmatprep.mubr.bf16.mxu0 %v3071_v56  ;;  %v3143_v51 = vld [vmem:[%s4081_s0 + $0xec] ss:$52 sps:$4 sm:$0xff]   ;;  %v3156_v3 = vld [vmem:[%s4081_s0 + $0x150] ss:$52 sps:$4 sm:$0xff]  }
  0x35   :  { %1647 = vmatprep.mubr.bf16.mxu1 %v3073_v57  ;;  %2698 = vmatpush3.bf16.msra.mxu0 %v3089_v6  ;;  %v3145_v56 = vld [vmem:[%s4081_s0 + $0xe0] ss:$52 sps:$4 sm:$0xff]   ;;  %v3159_v57 = vld [vmem:[%s4080_s1 + $0x218] sm:$0xff]   ;;  %v3177_v6 = vld [vmem:[%s4080_s1 + $0x268] sm:$0xff]  }
  0x36   :  { %2762 = vmatpush3.bf16.msra.mxu1 %v3090_v7  ;;  %2699 = vmatprep.subr.bf16.mxu0 %v3097_v10  ;;  %v3178_v7 = vld [vmem:[%s4080_s1 + $0x2e8] sm:$0xff]   ;;  %v3165_v10 = vld [vmem:[%s4081_s0 + $0x1b0] ss:$52 sps:$4 sm:$0xff]  }
  0x37   :  { %2763 = vmatprep.subr.bf16.mxu1 %v3098_v11  ;;  %v3166_v11 = vld [vmem:[%s4081_s0 + $0x1b8] ss:$52 sps:$4 sm:$0xff]  }
  0x39   :  { %2700 = vmatpush3.bf16.msra.mxu0 %v3099_v13  ;;  %v3173_v13 = vld [vmem:[%s4081_s0 + $0x224] ss:$52 sps:$4 sm:$0xff]  }
  0x3a   :  { %2764 = vmatpush3.bf16.msra.mxu1 %v3100_v14  ;;  %2701 = vmatprep.subr.bf16.mxu0 %v3107_v18  ;;  %v3187_v14 = vld [vmem:[%s4080_s1 + $0x270] sm:$0xff]   ;;  %v3175_v18 = vld [vmem:[%s4081_s0 + $0x218] ss:$52 sps:$4 sm:$0xff]  }
  0x3b   :  { %1551 = vmatmul.mubr.bf16.gmra.mrb[12].mxu0 %v3075_v58  ;;  %2765 = vmatprep.subr.bf16.mxu1 %v3108_v19  ;;  %v3160_v58 = vld [vmem:[%s4080_s1 + $0x298] sm:$0xff]   ;;  %v3176_v19 = vld [vmem:[%s4081_s0 + $0x220] ss:$52 sps:$4 sm:$0xff]  }
  0x3c   :  { %1648 = vmatmul.mubr.bf16.gmra.mrb[12].mxu1 %v3076_v59  ;;  %1558 = vmatprep.mubr.bf16.mxu0 %v3081_v0  ;;  %v3146_v59 = vld [vmem:[%s4081_s0 + $0xe8] ss:$52 sps:$4 sm:$0xff]   ;;  %v3169_v0 = vld [vmem:[%s4080_s1 + $0x220] sm:$0xff]  }
  0x3d   :  { %1655 = vmatprep.mubr.bf16.mxu1 %v3083_v1  ;;  %2702 = vmatpush3.bf16.msra.mxu0 %v3109_v20  ;;  %v3170_v1 = vld [vmem:[%s4080_s1 + $0x2a0] sm:$0xff]  }
  0x3e   :  { %2766 = vmatpush3.bf16.msra.mxu1 %v3110_v21  ;;  %2703 = vmatprep.subr.bf16.mxu0 %v3117_v26  ;;  %v3181_v20 = vld [vmem:[%s4081_s0 + $0x284] ss:$52 sps:$4 sm:$0xff]  }
  0x3f   :  { %2767 = vmatprep.subr.bf16.mxu1 %v3118_v27  ;;  %v3197_v21 = vld [vmem:[%s4080_s1 + $0x278] sm:$0xff]   ;;  %v3207_v26 = vld [vmem:[%s4080_s1 + $0x300] sm:$0xff]  }
  0x40   :  { %v3185_v27 = vld [vmem:[%s4081_s0 + $0x280] ss:$52 sps:$4 sm:$0xff]  }
  0x41   :  { %2704 = vmatpush3.bf16.msra.mxu0 %v3119_v28  ;;  %v3186_v28 = vld [vmem:[%s4081_s0 + $0x288] ss:$52 sps:$4 sm:$0xff]  }
  0x42   :  { %2768 = vmatpush3.bf16.msra.mxu1 %v3120_v29  ;;  %2817 = vmatprep.subr.bf16.mxu0 %v3127_v33  ;;  %v3191_v29 = vld [vmem:[%s4081_s0 + $0x2ec] ss:$52 sps:$4 sm:$0xff]   ;;  %v3203_v33 = vld [vmem:[%s4081_s0 + $0x24] ss:$52 sps:$4 sm:$0xff]  }
  0x43   :  { %1559 = vmatmul.mubr.bf16.gmra.mrb[16].mxu0 %v3085_v2  ;;  %2881 = vmatprep.subr.bf16.mxu1 %v3128_v34  ;;  %v3155_v2 = vld [vmem:[%s4081_s0 + $0x148] ss:$52 sps:$4 sm:$0xff]   ;;  %v3206_v34 = vld [vmem:[%s4081_s0 + $0x2c] ss:$52 sps:$4 sm:$0xff]  }
  0x44   :  { %1656 = vmatmul.mubr.bf16.gmra.mrb[16].mxu1 %v3086_v4  ;;  %1566 = vmatprep.mubr.bf16.mxu0 %v3091_v8  ;;  %v3161_v4 = vld [vmem:[%s4081_s0 + $0x1b4] ss:$52 sps:$4 sm:$0xff]  }
  0x45   :  { %1663 = vmatprep.mubr.bf16.mxu1 %v3093_v9  ;;  %v3179_v8 = vld [vmem:[%s4080_s1 + $0x228] sm:$0xff]  }
  0x46   :  { %v3180_v9 = vld [vmem:[%s4080_s1 + $0x2a8] sm:$0xff]  }
  0x4b   :  { %1567 = vmatmul.mubr.bf16.gmra.mrb[20].mxu0 %v3095_v12  ;;  %v3171_v12 = vld [vmem:[%s4081_s0 + $0x21c] ss:$52 sps:$4 sm:$0xff]  }
  0x4c   :  { %1664 = vmatmul.mubr.bf16.gmra.mrb[20].mxu1 %v3096_v15  ;;  %1574 = vmatprep.mubr.bf16.mxu0 %v3101_v16  ;;  %v3188_v15 = vld [vmem:[%s4080_s1 + $0x2f0] sm:$0xff]  }
  0x4d   :  { %1671 = vmatprep.mubr.bf16.mxu1 %v3103_v17  ;;  %v3189_v16 = vld [vmem:[%s4080_s1 + $0x230] sm:$0xff]  }
  0x4e   :  { %v3190_v17 = vld [vmem:[%s4080_s1 + $0x2b0] sm:$0xff]  }
  0x53   :  { %1575 = vmatmul.mubr.bf16.gmra.mrb[24].mxu0 %v3105_v22  ;;  %v3183_v22 = vld [vmem:[%s4081_s0 + $0x28c] ss:$52 sps:$4 sm:$0xff]  }
  0x54   :  { %1672 = vmatmul.mubr.bf16.gmra.mrb[24].mxu1 %v3106_v23  ;;  %1582 = vmatprep.mubr.bf16.mxu0 %v3111_v24  ;;  %v3198_v23 = vld [vmem:[%s4080_s1 + $0x2f8] sm:$0xff]  }
  0x55   :  { %1679 = vmatprep.mubr.bf16.mxu1 %v3113_v25  ;;  %v3199_v24 = vld [vmem:[%s4080_s1 + $0x238] sm:$0xff]  }
  0x56   :  { %v3200_v25 = vld [vmem:[%s4080_s1 + $0x2b8] sm:$0xff]  }
  0x5b   :  { %1583 = vmatmul.mubr.bf16.gmra.mrb[28].mxu0 %v3115_v30  ;;  %v3193_v30 = vld [vmem:[%s4081_s0 + $0x2f4] ss:$52 sps:$4 sm:$0xff]  }
  0x5c   :  { %1680 = vmatmul.mubr.bf16.gmra.mrb[28].mxu1 %v3116_v31  ;;  %1720 = vmatprep.mubr.bf16.mxu0 %v3123_v32  ;;  %v3195_v31 = vld [vmem:[%s4081_s0 + $0x2e8] ss:$52 sps:$4 sm:$0xff]   ;;  %v3196_v32 = vld [vmem:[%s4081_s0 + $0x2f0] ss:$52 sps:$4 sm:$0xff]  }
  0x5d   :  { %1817 = vmatprep.mubr.bf16.mxu1 %v3126_v35  ;;  %v3201_v35 = vld [vmem:[%s4081_s0 + $0x20] ss:$52 sps:$4 sm:$0xff]  }
  0x63   :  { %1721 = vmatmul.mubr.bf16.vlgmr.msra.gmra.mrb[32].mxu0 %v3121_v36  ;;  %v3204_v36 = vld [vmem:[%s4081_s0 + $0x28] ss:$52 sps:$4 sm:$0xff]  }
  0x64   :  { %1818 = vmatmul.mubr.bf16.vlgmr.msra.gmra.mrb[32].mxu1 %v3124_v37  ;;  %2818 = vmatpush3.bf16.msra.mxu0 %v3129_v38  ;;  %v3208_v37 = vld [vmem:[%s4081_s0 + $0x8c] ss:$52 sps:$4 sm:$0xff]   ;;  %v3210_v38 = vld [vmem:[%s4081_s0 + $0x94] ss:$52 sps:$4 sm:$0xff]  }
  0x65   :  { %2882 = vmatpush3.bf16.msra.mxu1 %v3130_v39  ;;  %1728 = vmatprep.mubr.bf16.mxu0 %v3131_v40  ;;  %v3214_v39 = vld [vmem:[%s4080_s1 + $0x308] sm:$0xff]   ;;  %v3221_v40 = vld [vmem:[%s4080_s1 + $0x310] sm:$0xff]  }
  0x66   :  { %1825 = vmatprep.mubr.bf16.mxu1 %v3133_v41  ;;  %2819 = vmatprep.subr.bf16.mxu0 %v3137_v42  ;;  %v3212_v41 = vld [vmem:[%s4081_s0 + $0x88] ss:$52 sps:$4 sm:$0xff]   ;;  %v3213_v42 = vld [vmem:[%s4081_s0 + $0x90] ss:$52 sps:$4 sm:$0xff]  }
  0x67   :  { %2883 = vmatprep.subr.bf16.mxu1 %v3138_v43  ;;  %v3215_v43 = vld [vmem:[%s4081_s0 + $0xf4] ss:$52 sps:$4 sm:$0xff]  }
  0x68   :  { %2820 = vmatpush3.bf16.msra.mxu0 %v3139_v44  ;;  %v3217_v44 = vld [vmem:[%s4081_s0 + $0xfc] ss:$52 sps:$4 sm:$0xff]  }
  0x69   :  { %2884 = vmatpush3.bf16.msra.mxu1 %v3140_v45  ;;  %2821 = vmatprep.subr.bf16.mxu0 %v3147_v47  ;;  %v3228_v45 = vld [vmem:[%s4080_s1 + $0x318] sm:$0xff]   ;;  %v3219_v47 = vld [vmem:[%s4081_s0 + $0xf0] ss:$52 sps:$4 sm:$0xff]  }
  0x6a   :  { %2885 = vmatprep.subr.bf16.mxu1 %v3148_v49  ;;  %v3222_v49 = vld [vmem:[%s4081_s0 + $0x15c] ss:$52 sps:$4 sm:$0xff]  }
  0x6b   :  { %1729 = vmatmul.mubr.bf16.gmra.mrb[36].mxu0 %v3135_v46  ;;  %v3235_v46 = vld [vmem:[%s4080_s1 + $0x320] sm:$0xff]  }
  0x6c   :  { %1826 = vmatmul.mubr.bf16.gmra.mrb[36].mxu1 %v3136_v48  ;;  %1736 = vmatprep.mubr.bf16.mxu0 %v3141_v50  ;;  %v3220_v48 = vld [vmem:[%s4081_s0 + $0xf8] ss:$52 sps:$4 sm:$0xff]  }
  0x6d   :  { %1833 = vmatprep.mubr.bf16.mxu1 %v3143_v51  ;;  %2822 = vmatpush3.bf16.msra.mxu0 %v3149_v52  ;;  %v3224_v50 = vld [vmem:[%s4081_s0 + $0x164] ss:$52 sps:$4 sm:$0xff]   ;;  %v3242_v51 = vld [vmem:[%s4080_s1 + $0x328] sm:$0xff]   ;;  %v3249_v52 = vld [vmem:[%s4080_s1 + $0x330] sm:$0xff]  }
  0x6e   :  { %2886 = vmatpush3.bf16.msra.mxu1 %v3150_v53  ;;  %2823 = vmatprep.subr.bf16.mxu0 %v3157_v54  ;;  %v3226_v53 = vld [vmem:[%s4081_s0 + $0x158] ss:$52 sps:$4 sm:$0xff]   ;;  %v3227_v54 = vld [vmem:[%s4081_s0 + $0x160] ss:$52 sps:$4 sm:$0xff]  }
  0x6f   :  { %2887 = vmatprep.subr.bf16.mxu1 %v3158_v55  ;;  %v3229_v55 = vld [vmem:[%s4081_s0 + $0x1c4] ss:$52 sps:$4 sm:$0xff]  }
  0x71   :  { %2824 = vmatpush3.bf16.msra.mxu0 %v3159_v57  ;;  %v3256_v57 = vld [vmem:[%s4080_s1 + $0x338] sm:$0xff]  }
  0x72   :  { %2888 = vmatpush3.bf16.msra.mxu1 %v3160_v58  ;;  %2825 = vmatprep.subr.bf16.mxu0 %v3167_v62  ;;  %v3233_v58 = vld [vmem:[%s4081_s0 + $0x1c0] ss:$52 sps:$4 sm:$0xff]   ;;  %v3240_v62 = vld [vmem:[%s4081_s0 + $0x228] ss:$52 sps:$4 sm:$0xff]  }
  0x73   :  { %1737 = vmatmul.mubr.bf16.gmra.mrb[40].mxu0 %v3145_v56  ;;  %2889 = vmatprep.subr.bf16.mxu1 %v3168_v63  ;;  %v3231_v56 = vld [vmem:[%s4081_s0 + $0x1cc] ss:$52 sps:$4 sm:$0xff]   ;;  %v3241_v63 = vld [vmem:[%s4081_s0 + $0x230] ss:$52 sps:$4 sm:$0xff]  }
  0x74   :  { %1834 = vmatmul.mubr.bf16.gmra.mrb[40].mxu1 %v3146_v59  ;;  %1744 = vmatprep.mubr.bf16.mxu0 %v3151_v60  ;;  %v3234_v59 = vld [vmem:[%s4081_s0 + $0x1c8] ss:$52 sps:$4 sm:$0xff]   ;;  %v3236_v60 = vld [vmem:[%s4081_s0 + $0x22c] ss:$52 sps:$4 sm:$0xff]  }
  0x75   :  { %1841 = vmatprep.mubr.bf16.mxu1 %v3153_v61  ;;  %2826 = vmatpush3.bf16.msra.mxu0 %v3169_v0  ;;  %v3238_v61 = vld [vmem:[%s4081_s0 + $0x234] ss:$52 sps:$4 sm:$0xff]  }
  0x76   :  { %2890 = vmatpush3.bf16.msra.mxu1 %v3170_v1  ;;  %2827 = vmatprep.subr.bf16.mxu0 %v3177_v6  ;;  %v3243_v0 = vld [vmem:[%s4081_s0 + $0x294] ss:$52 sps:$4 sm:$0xff]   ;;  %v3245_v1 = vld [vmem:[%s4081_s0 + $0x29c] ss:$52 sps:$4 sm:$0xff]   ;;  %v3254_v6 = vld [vmem:[%s4081_s0 + $0x2f8] ss:$52 sps:$4 sm:$0xff]  }
  0x77   :  { %2891 = vmatprep.subr.bf16.mxu1 %v3178_v7  ;;  %v3255_v7 = vld [vmem:[%s4081_s0 + $0x300] ss:$52 sps:$4 sm:$0xff]  }
  0x79   :  { %2828 = vmatpush3.bf16.msra.mxu0 %v3179_v8  ;;  %v3257_v8 = vld [vmem:[%s4081_s0 + $0x30] ss:$52 sps:$4 sm:$0xff]  }
  0x7a   :  { %2892 = vmatpush3.bf16.msra.mxu1 %v3180_v9  ;;  %2829 = vmatprep.subr.bf16.mxu0 %v3187_v14  ;;  %v3258_v9 = vld [vmem:[%s4081_s0 + $0x1d0] ss:$52 sps:$4 sm:$0xff]   ;;  %v3263_v14 = vld [vmem:[%s4081_s0 + $0x168] ss:$52 sps:$4 sm:$0xff]  }
  0x7b   :  { %1745 = vmatmul.mubr.bf16.gmra.mrb[44].mxu0 %v3155_v2  ;;  %2893 = vmatprep.subr.bf16.mxu1 %v3188_v15  ;;  %v3247_v2 = vld [vmem:[%s4081_s0 + $0x290] ss:$52 sps:$4 sm:$0xff]   ;;  %v3264_v15 = vld [vmem:[%s4081_s0 + $0x308] ss:$52 sps:$4 sm:$0xff]  }
  0x7c   :  { %1842 = vmatmul.mubr.bf16.gmra.mrb[44].mxu1 %v3156_v3  ;;  %1752 = vmatprep.mubr.bf16.mxu0 %v3161_v4  ;;  %v3248_v3 = vld [vmem:[%s4081_s0 + $0x298] ss:$52 sps:$4 sm:$0xff]   ;;  %v3250_v4 = vld [vmem:[%s4081_s0 + $0x2fc] ss:$52 sps:$4 sm:$0xff]  }
  0x7d   :  { %1849 = vmatprep.mubr.bf16.mxu1 %v3163_v5  ;;  %2830 = vmatpush3.bf16.msra.mxu0 %v3189_v16  ;;  %v3252_v5 = vld [vmem:[%s4081_s0 + $0x304] ss:$52 sps:$4 sm:$0xff]  }
  0x7e   :  { %2894 = vmatpush3.bf16.msra.mxu1 %v3190_v17  ;;  %2831 = vmatprep.subr.bf16.mxu0 %v3197_v21 }
  0x7f   :  { %2895 = vmatprep.subr.bf16.mxu1 %v3198_v23 }
  0x81   :  { %2832 = vmatpush3.bf16.msra.mxu0 %v3199_v24 }
  0x82   :  { %2896 = vmatpush3.bf16.msra.mxu1 %v3200_v25  ;;  %2961 = vmatprep.subr.bf16.mxu0 %v3207_v26 }
  0x83   :  { %1753 = vmatmul.mubr.bf16.gmra.mrb[48].mxu0 %v3165_v10  ;;  %2993 = vmatprep.subr.bf16.mxu1 %v3207_v26  ;;  %v3259_v10 = vld [vmem:[%s4081_s0 + $0x98] ss:$52 sps:$4 sm:$0xff]  }
  0x84   :  { %1850 = vmatmul.mubr.bf16.gmra.mrb[48].mxu1 %v3166_v11  ;;  %1760 = vmatprep.mubr.bf16.mxu0 %v3171_v12  ;;  %v3260_v11 = vld [vmem:[%s4081_s0 + $0x238] ss:$52 sps:$4 sm:$0xff]   ;;  %v3261_v12 = vld [vmem:[%s4081_s0 + $0x100] ss:$52 sps:$4 sm:$0xff]  }
  0x85   :  { %1857 = vmatprep.mubr.bf16.mxu1 %v3173_v13  ;;  %v3262_v13 = vld [vmem:[%s4081_s0 + $0x2a0] ss:$52 sps:$4 sm:$0xff]  }
  0x8b   :  { %1761 = vmatmul.mubr.bf16.gmra.mrb[52].mxu0 %v3175_v18  ;;  %v3912_v18 = vld [vmem:[%s4082_s2] ss:$0 sm:$0xff] }
  0x8c   :  { %1858 = vmatmul.mubr.bf16.gmra.mrb[52].mxu1 %v3176_v19  ;;  %1768 = vmatprep.mubr.bf16.mxu0 %v3181_v20 }
  0x8d   :  { %1865 = vmatprep.mubr.bf16.mxu1 %v3183_v22 }
  0x93   :  { %1769 = vmatmul.mubr.bf16.gmra.mrb[56].mxu0 %v3185_v27 }
  0x94   :  { %1866 = vmatmul.mubr.bf16.gmra.mrb[56].mxu1 %v3186_v28  ;;  %1776 = vmatprep.mubr.bf16.mxu0 %v3191_v29 }
  0x95   :  { %1873 = vmatprep.mubr.bf16.mxu1 %v3193_v30 }
  0x9b   :  { %1777 = vmatmul.mubr.bf16.gmra.mrb[60].mxu0 %v3195_v31 }
  0x9c   :  { %1874 = vmatmul.mubr.bf16.gmra.mrb[60].mxu1 %v3196_v32  ;;  %1914 = vmatprep.mubr.bf16.mxu0 %v3203_v33 }
  0x9d   :  { %2011 = vmatprep.mubr.bf16.mxu1 %v3206_v34 }
  0xa3   :  { %1915 = vmatmul.mubr.bf16.vlgmr.msra.gmra.mrb[64].mxu0 %v3201_v35 }
  0xa4   :  { %2012 = vmatmul.mubr.bf16.vlgmr.msra.gmra.mrb[64].mxu1 %v3204_v36  ;;  %2962 = vmatpush3.bf16.msra.mxu0 %v3207_v26 }
  0xa5   :  { %3001 = vmatpush3.bf16.msra.mxu1 %v3207_v26  ;;  %1922 = vmatprep.mubr.bf16.mxu0 %v3208_v37 }
  0xa6   :  { %2019 = vmatprep.mubr.bf16.mxu1 %v3210_v38  ;;  %2963 = vmatprep.subr.bf16.mxu0 %v3214_v39 }
  0xa7   :  { %2994 = vmatprep.subr.bf16.mxu1 %v3214_v39 }
  0xa8   :  { %2964 = vmatpush3.bf16.msra.mxu0 %v3214_v39 }
  0xa9   :  { %3002 = vmatpush3.bf16.msra.mxu1 %v3214_v39  ;;  %2965 = vmatprep.subr.bf16.mxu0 %v3221_v40 }
  0xaa   :  { %2995 = vmatprep.subr.bf16.mxu1 %v3221_v40 }
  0xab   :  { %1923 = vmatmul.mubr.bf16.gmra.mrb[68].mxu0 %v3212_v41 }
  0xac   :  { %2020 = vmatmul.mubr.bf16.gmra.mrb[68].mxu1 %v3213_v42  ;;  %1930 = vmatprep.mubr.bf16.mxu0 %v3215_v43 }
  0xad   :  { %2027 = vmatprep.mubr.bf16.mxu1 %v3217_v44  ;;  %2966 = vmatpush3.bf16.msra.mxu0 %v3221_v40 }
  0xae   :  { %3003 = vmatpush3.bf16.msra.mxu1 %v3221_v40  ;;  %2967 = vmatprep.subr.bf16.mxu0 %v3228_v45 }
  0xaf   :  { %2996 = vmatprep.subr.bf16.mxu1 %v3228_v45 }
  0xb1   :  { %2968 = vmatpush3.bf16.msra.mxu0 %v3228_v45 }
  0xb2   :  { %3004 = vmatpush3.bf16.msra.mxu1 %v3228_v45  ;;  %2969 = vmatprep.subr.bf16.mxu0 %v3235_v46 }
  0xb3   :  { %1931 = vmatmul.mubr.bf16.gmra.mrb[72].mxu0 %v3219_v47  ;;  %2997 = vmatprep.subr.bf16.mxu1 %v3235_v46 }
  0xb4   :  { %2028 = vmatmul.mubr.bf16.gmra.mrb[72].mxu1 %v3220_v48  ;;  %1938 = vmatprep.mubr.bf16.mxu0 %v3222_v49 }
  0xb5   :  { %2035 = vmatprep.mubr.bf16.mxu1 %v3224_v50  ;;  %2970 = vmatpush3.bf16.msra.mxu0 %v3235_v46 }
  0xb6   :  { %3005 = vmatpush3.bf16.msra.mxu1 %v3235_v46  ;;  %2971 = vmatprep.subr.bf16.mxu0 %v3242_v51 }
  0xb7   :  { %2998 = vmatprep.subr.bf16.mxu1 %v3242_v51 }
  0xb9   :  { %2972 = vmatpush3.bf16.msra.mxu0 %v3242_v51 }
  0xba   :  { %3006 = vmatpush3.bf16.msra.mxu1 %v3242_v51  ;;  %2973 = vmatprep.subr.bf16.mxu0 %v3249_v52 }
  0xbb   :  { %1939 = vmatmul.mubr.bf16.gmra.mrb[76].mxu0 %v3226_v53  ;;  %2999 = vmatprep.subr.bf16.mxu1 %v3249_v52 }
  0xbc   :  { %2036 = vmatmul.mubr.bf16.gmra.mrb[76].mxu1 %v3227_v54  ;;  %1946 = vmatprep.mubr.bf16.mxu0 %v3229_v55 }
  0xbd   :  { %2043 = vmatprep.mubr.bf16.mxu1 %v3231_v56  ;;  %2974 = vmatpush3.bf16.msra.mxu0 %v3249_v52 }
  0xbe   :  { %3007 = vmatpush3.bf16.msra.mxu1 %v3249_v52  ;;  %2975 = vmatprep.subr.bf16.mxu0 %v3256_v57 }
  0xbf   :  { %3000 = vmatprep.subr.bf16.mxu1 %v3256_v57 }
  0xc1   :  { %2976 = vmatpush3.bf16.msra.mxu0 %v3256_v57 }
  0xc2   :  { %3008 = vmatpush3.bf16.msra.mxu1 %v3256_v57 }
  0xc3   :  { %1947 = vmatmul.mubr.bf16.gmra.mrb[80].mxu0 %v3233_v58 }
  0xc4   :  { %2044 = vmatmul.mubr.bf16.gmra.mrb[80].mxu1 %v3234_v59  ;;  %1954 = vmatprep.mubr.bf16.mxu0 %v3236_v60 }
  0xc5   :  { %2051 = vmatprep.mubr.bf16.mxu1 %v3238_v61 }
  0xcb   :  { %1955 = vmatmul.mubr.bf16.gmra.mrb[84].mxu0 %v3240_v62 }
  0xcc   :  { %2052 = vmatmul.mubr.bf16.gmra.mrb[84].mxu1 %v3241_v63  ;;  %1962 = vmatprep.mubr.bf16.mxu0 %v3243_v0 }
  0xcd   :  { %2059 = vmatprep.mubr.bf16.mxu1 %v3245_v1 }
  0xd3   :  { %1963 = vmatmul.mubr.bf16.gmra.mrb[88].mxu0 %v3247_v2 }
  0xd4   :  { %2060 = vmatmul.mubr.bf16.gmra.mrb[88].mxu1 %v3248_v3  ;;  %1970 = vmatprep.mubr.bf16.mxu0 %v3250_v4 }
  0xd5   :  { %2067 = vmatprep.mubr.bf16.mxu1 %v3252_v5 }
  0xdb   :  { %1971 = vmatmul.mubr.bf16.gmra.mrb[92].mxu0 %v3254_v6 }
  0xdc   :  { %2068 = vmatmul.mubr.bf16.gmra.mrb[92].mxu1 %v3255_v7  ;;  %2977 = vmatprep.mubr.bf16.mxu0 %v3257_v8 }
  0xdd   :  { %2985 = vmatprep.mubr.bf16.mxu1 %v3258_v9 }
  0xe3   :  { %2978 = vmatmul.mubr.bf16.vlgmr.msra.gmra.mrb[96].mxu0 %v3259_v10 }
  0xe4   :  { %2986 = vmatmul.mubr.bf16.vlgmr.msra.gmra.mrb[96].mxu1 %v3260_v11  ;;  %2981 = vmatprep.mubr.bf16.mxu0 %v3261_v12 }
  0xe5   :  { %2989 = vmatprep.mubr.bf16.mxu1 %v3262_v13 }
  0xeb   :  { %2982 = vmatmul.mubr.bf16.gmra.mrb[100].mxu0 %v3263_v14 }
  0xec   :  { %2990 = vmatmul.mubr.bf16.gmra.mrb[100].mxu1 %v3264_v15 }
  0xf6   :  { %v2577_v16 = vpop.f32.mrb[0].mxu0 }
  0xf7   :  { %v2641_v17 = vpop.f32.mrb[0].mxu1  ;;  %v2578_v19 = vpop.f32.mrb[1].mxu0 }
  0xf8   :  { %v2579_v20 = vadd.f32 %v2578_v19, %v2577_v16  ;;  %v2642_v21 = vpop.f32.mrb[1].mxu1  ;;  %v2580_v22 = vpop.f32.mrb[2].mxu0 }
  0xf9   :  { %v2643_v23 = vadd.f32 %v2642_v21, %v2641_v17  ;;  %v2644_v24 = vpop.f32.mrb[2].mxu1  ;;  %v2581_v25 = vpop.f32.mrb[3].mxu0 }
  0xfa   :  { %v1529_v26 = vadd.f32 %v2579_v20, %v3912_v18  ;;  %v2582_v27 = vadd.f32 %v2581_v25, %v2580_v22  ;;  %v2645_v28 = vpop.f32.mrb[3].mxu1 }
  0xfb   :  { %v2646_v29 = vadd.f32 %v2645_v28, %v2644_v24 }
  0xfc   :  { %v3915_v30 = vadd.f32 %v2643_v23, %v1529_v26  ;;  %v1532_v31 = vadd.f32 %v2582_v27, %v3912_v18 }
  0xfe   :  { %v3918_v32 = vadd.f32 %v2646_v29, %v1532_v31  ;;  %v2583_v33 = vpop.f32.mrb[4].mxu0 }
  0xff   :  { %v2647_v34 = vpop.f32.mrb[4].mxu1  ;;  %v2584_v35 = vpop.f32.mrb[5].mxu0 }
 0x100   :  { %v2585_v36 = vadd.f32 %v2584_v35, %v2583_v33  ;;  %v2648_v37 = vpop.f32.mrb[5].mxu1  ;;  %v2586_v38 = vpop.f32.mrb[6].mxu0 }
 0x101   :  { %v2649_v39 = vadd.f32 %v2648_v37, %v2647_v34  ;;  %v2650_v40 = vpop.f32.mrb[6].mxu1  ;;  %v2587_v41 = vpop.f32.mrb[7].mxu0 }
 0x102   :  { %v1537_v42 = vadd.f32 %v2585_v36, %v3912_v18  ;;  %v2588_v43 = vadd.f32 %v2587_v41, %v2586_v38  ;;  %v2651_v44 = vpop.f32.mrb[7].mxu1 }
 0x103   :  { %v2652_v45 = vadd.f32 %v2651_v44, %v2650_v40 }
 0x104   :  { %v3921_v46 = vadd.f32 %v2649_v39, %v1537_v42  ;;  %v1540_v47 = vadd.f32 %v2588_v43, %v3912_v18 }
 0x106   :  { %v3924_v48 = vadd.f32 %v2652_v45, %v1540_v47  ;;  %v2589_v49 = vpop.f32.mrb[8].mxu0 }
 0x107   :  { %v2653_v50 = vpop.f32.mrb[8].mxu1  ;;  %v2590_v51 = vpop.f32.mrb[9].mxu0 }
 0x108   :  { %v2591_v52 = vadd.f32 %v2590_v51, %v2589_v49  ;;  %v2654_v53 = vpop.f32.mrb[9].mxu1  ;;  %v2592_v54 = vpop.f32.mrb[10].mxu0 }
 0x109   :  { %v2655_v55 = vadd.f32 %v2654_v53, %v2653_v50  ;;  %v2656_v56 = vpop.f32.mrb[10].mxu1  ;;  %v2593_v57 = vpop.f32.mrb[11].mxu0 }
 0x10a   :  { %v1545_v58 = vadd.f32 %v2591_v52, %v3912_v18  ;;  %v2594_v59 = vadd.f32 %v2593_v57, %v2592_v54  ;;  %v2657_v60 = vpop.f32.mrb[11].mxu1 }
 0x10b   :  { %v2658_v61 = vadd.f32 %v2657_v60, %v2656_v56 }
 0x10c   :  { %v3927_v62 = vadd.f32 %v2655_v55, %v1545_v58  ;;  %v1548_v63 = vadd.f32 %v2594_v59, %v3912_v18 }
 0x10e   :  { %v3930_v0 = vadd.f32 %v2658_v61, %v1548_v63  ;;  %v2595_v1 = vpop.f32.mrb[12].mxu0 }
 0x10f   :  { %v2659_v2 = vpop.f32.mrb[12].mxu1  ;;  %v2596_v3 = vpop.f32.mrb[13].mxu0 }
 0x110   :  { %v2597_v4 = vadd.f32 %v2596_v3, %v2595_v1  ;;  %v2660_v5 = vpop.f32.mrb[13].mxu1  ;;  %v2598_v6 = vpop.f32.mrb[14].mxu0 }
 0x111   :  { %v2661_v7 = vadd.f32 %v2660_v5, %v2659_v2  ;;  %v2662_v8 = vpop.f32.mrb[14].mxu1  ;;  %v2599_v9 = vpop.f32.mrb[15].mxu0 }
 0x112   :  { %v1553_v10 = vadd.f32 %v2597_v4, %v3912_v18  ;;  %v2600_v11 = vadd.f32 %v2599_v9, %v2598_v6  ;;  %v2663_v12 = vpop.f32.mrb[15].mxu1 }
 0x113   :  { %v2664_v13 = vadd.f32 %v2663_v12, %v2662_v8 }
 0x114   :  { %v3933_v14 = vadd.f32 %v2661_v7, %v1553_v10  ;;  %v1556_v15 = vadd.f32 %v2600_v11, %v3912_v18 }
 0x116   :  { %v3936_v16 = vadd.f32 %v2664_v13, %v1556_v15  ;;  %v2601_v17 = vpop.f32.mrb[16].mxu0 }
 0x117   :  { %v2665_v19 = vpop.f32.mrb[16].mxu1  ;;  %v2602_v20 = vpop.f32.mrb[17].mxu0 }
 0x118   :  { %v2603_v21 = vadd.f32 %v2602_v20, %v2601_v17  ;;  %v2666_v22 = vpop.f32.mrb[17].mxu1  ;;  %v2604_v23 = vpop.f32.mrb[18].mxu0 }
 0x119   :  { %v2667_v24 = vadd.f32 %v2666_v22, %v2665_v19  ;;  %v2668_v25 = vpop.f32.mrb[18].mxu1  ;;  %v2605_v26 = vpop.f32.mrb[19].mxu0 }
 0x11a   :  { %v1561_v27 = vadd.f32 %v2603_v21, %v3912_v18  ;;  %v2606_v28 = vadd.f32 %v2605_v26, %v2604_v23  ;;  %v2669_v29 = vpop.f32.mrb[19].mxu1 }
 0x11b   :  { %v2670_v31 = vadd.f32 %v2669_v29, %v2668_v25 }
 0x11c   :  { %v3939_v33 = vadd.f32 %v2667_v24, %v1561_v27  ;;  %v1564_v34 = vadd.f32 %v2606_v28, %v3912_v18 }
 0x11e   :  { %v3942_v35 = vadd.f32 %v2670_v31, %v1564_v34  ;;  %v2607_v36 = vpop.f32.mrb[20].mxu0 }
 0x11f   :  { %v2671_v37 = vpop.f32.mrb[20].mxu1  ;;  %v2608_v38 = vpop.f32.mrb[21].mxu0 }
 0x120   :  { %v2609_v39 = vadd.f32 %v2608_v38, %v2607_v36  ;;  %v2672_v40 = vpop.f32.mrb[21].mxu1  ;;  %v2610_v41 = vpop.f32.mrb[22].mxu0 }
 0x121   :  { %v2673_v42 = vadd.f32 %v2672_v40, %v2671_v37  ;;  %v2674_v43 = vpop.f32.mrb[22].mxu1  ;;  %v2611_v44 = vpop.f32.mrb[23].mxu0 }
 0x122   :  { %v1569_v45 = vadd.f32 %v2609_v39, %v3912_v18  ;;  %v2612_v47 = vadd.f32 %v2611_v44, %v2610_v41  ;;  %v2675_v49 = vpop.f32.mrb[23].mxu1 }
 0x123   :  { %v2676_v50 = vadd.f32 %v2675_v49, %v2674_v43 }
 0x124   :  { %v3945_v51 = vadd.f32 %v2673_v42, %v1569_v45  ;;  %v1572_v52 = vadd.f32 %v2612_v47, %v3912_v18 }
 0x126   :  { %v3948_v53 = vadd.f32 %v2676_v50, %v1572_v52  ;;  %v2613_v54 = vpop.f32.mrb[24].mxu0 }
 0x127   :  { %v2677_v55 = vpop.f32.mrb[24].mxu1  ;;  %v2614_v56 = vpop.f32.mrb[25].mxu0 }
 0x128   :  { %v2615_v57 = vadd.f32 %v2614_v56, %v2613_v54  ;;  %v2678_v58 = vpop.f32.mrb[25].mxu1  ;;  %v2616_v59 = vpop.f32.mrb[26].mxu0 }
 0x129   :  { %v2679_v60 = vadd.f32 %v2678_v58, %v2677_v55  ;;  %v2680_v61 = vpop.f32.mrb[26].mxu1  ;;  %v2617_v63 = vpop.f32.mrb[27].mxu0 }
 0x12a   :  { %v1577_v1 = vadd.f32 %v2615_v57, %v3912_v18  ;;  %v2618_v2 = vadd.f32 %v2617_v63, %v2616_v59  ;;  %v2681_v3 = vpop.f32.mrb[27].mxu1 }
 0x12b   :  { %v2682_v4 = vadd.f32 %v2681_v3, %v2680_v61 }
 0x12c   :  { %v3951_v5 = vadd.f32 %v2679_v60, %v1577_v1  ;;  %v1580_v6 = vadd.f32 %v2618_v2, %v3912_v18 }
 0x12e   :  { %v3954_v7 = vadd.f32 %v2682_v4, %v1580_v6  ;;  %v2619_v8 = vpop.f32.mrb[28].mxu0 }
 0x12f   :  { %v2683_v9 = vpop.f32.mrb[28].mxu1  ;;  %v2620_v10 = vpop.f32.mrb[29].mxu0 }
 0x130   :  { %v2621_v11 = vadd.f32 %v2620_v10, %v2619_v8  ;;  %v2684_v12 = vpop.f32.mrb[29].mxu1  ;;  %v2622_v13 = vpop.f32.mrb[30].mxu0 }
 0x131   :  { %v2685_v15 = vadd.f32 %v2684_v12, %v2683_v9  ;;  %v2686_v17 = vpop.f32.mrb[30].mxu1  ;;  %v2623_v19 = vpop.f32.mrb[31].mxu0 }
 0x132   :  { %v1585_v20 = vadd.f32 %v2621_v11, %v3912_v18  ;;  %v2624_v21 = vadd.f32 %v2623_v19, %v2622_v13  ;;  %v2687_v22 = vpop.f32.mrb[31].mxu1 }
 0x133   :  { %v2688_v23 = vadd.f32 %v2687_v22, %v2686_v17 }
 0x134   :  { %v3957_v24 = vadd.f32 %v2685_v15, %v1585_v20  ;;  %v1588_v25 = vadd.f32 %v2624_v21, %v3912_v18 }
 0x136   :  { %v3960_v26 = vadd.f32 %v2688_v23, %v1588_v25  ;;  %v2705_v27 = vpop.f32.mrb[32].mxu0 }
 0x137   :  { %v2769_v28 = vpop.f32.mrb[32].mxu1  ;;  %v2706_v29 = vpop.f32.mrb[33].mxu0 }
 0x138   :  { %v2707_v31 = vadd.f32 %v2706_v29, %v2705_v27  ;;  %v2770_v34 = vpop.f32.mrb[33].mxu1  ;;  %v2708_v36 = vpop.f32.mrb[34].mxu0 }
 0x139   :  { %v2771_v37 = vadd.f32 %v2770_v34, %v2769_v28  ;;  %v2772_v38 = vpop.f32.mrb[34].mxu1  ;;  %v2709_v39 = vpop.f32.mrb[35].mxu0 }
 0x13a   :  { %v1723_v40 = vadd.f32 %v2707_v31, %v3915_v30  ;;  %v2710_v41 = vadd.f32 %v2709_v39, %v2708_v36  ;;  %v2773_v42 = vpop.f32.mrb[35].mxu1 }
 0x13b   :  { %v2774_v43 = vadd.f32 %v2773_v42, %v2772_v38 }
 0x13c   :  { %v3963_v44 = vadd.f32 %v2771_v37, %v1723_v40  ;;  %v1726_v18 = vadd.f32 %v2710_v41, %v3918_v32 }
 0x13e   :  { %v3966_v45 = vadd.f32 %v2774_v43, %v1726_v18  ;;  %v2711_v47 = vpop.f32.mrb[36].mxu0 }
 0x13f   :  { %v2775_v49 = vpop.f32.mrb[36].mxu1  ;;  %v2712_v50 = vpop.f32.mrb[37].mxu0 }
 0x140   :  { %v2713_v52 = vadd.f32 %v2712_v50, %v2711_v47  ;;  %v2776_v54 = vpop.f32.mrb[37].mxu1  ;;  %v2714_v55 = vpop.f32.mrb[38].mxu0 }
 0x141   :  { %v2777_v56 = vadd.f32 %v2776_v54, %v2775_v49  ;;  %v2778_v57 = vpop.f32.mrb[38].mxu1  ;;  %v2715_v58 = vpop.f32.mrb[39].mxu0 }
 0x142   :  { %v1731_v30 = vadd.f32 %v2713_v52, %v3921_v46  ;;  %v2716_v59 = vadd.f32 %v2715_v58, %v2714_v55  ;;  %v2779_v60 = vpop.f32.mrb[39].mxu1 }
 0x143   :  { %v2780_v61 = vadd.f32 %v2779_v60, %v2778_v57 }
 0x144   :  { %v3969_v63 = vadd.f32 %v2777_v56, %v1731_v30  ;;  %v1734_v32 = vadd.f32 %v2716_v59, %v3924_v48 }
 0x146   :  { %v3972_v1 = vadd.f32 %v2780_v61, %v1734_v32  ;;  %v2717_v2 = vpop.f32.mrb[40].mxu0 }
 0x147   :  { %v2781_v3 = vpop.f32.mrb[40].mxu1  ;;  %v2718_v4 = vpop.f32.mrb[41].mxu0 }
 0x148   :  { %v2719_v6 = vadd.f32 %v2718_v4, %v2717_v2  ;;  %v2782_v8 = vpop.f32.mrb[41].mxu1  ;;  %v2720_v9 = vpop.f32.mrb[42].mxu0 }
 0x149   :  { %v2783_v10 = vadd.f32 %v2782_v8, %v2781_v3  ;;  %v2784_v11 = vpop.f32.mrb[42].mxu1  ;;  %v2721_v12 = vpop.f32.mrb[43].mxu0 }
 0x14a   :  { %v1739_v46 = vadd.f32 %v2719_v6, %v3927_v62  ;;  %v2722_v13 = vadd.f32 %v2721_v12, %v2720_v9  ;;  %v2785_v15 = vpop.f32.mrb[43].mxu1 }
 0x14b   :  { %v2786_v17 = vadd.f32 %v2785_v15, %v2784_v11 }
 0x14c   :  { %v3975_v19 = vadd.f32 %v2783_v10, %v1739_v46  ;;  %v1742_v48 = vadd.f32 %v2722_v13, %v3930_v0 }
 0x14e   :  { %v3978_v20 = vadd.f32 %v2786_v17, %v1742_v48  ;;  %v2723_v21 = vpop.f32.mrb[44].mxu0 }
 0x14f   :  { %v2787_v22 = vpop.f32.mrb[44].mxu1  ;;  %v2724_v23 = vpop.f32.mrb[45].mxu0 }
 0x150   :  { %v2725_v25 = vadd.f32 %v2724_v23, %v2723_v21  ;;  %v2788_v27 = vpop.f32.mrb[45].mxu1  ;;  %v2726_v28 = vpop.f32.mrb[46].mxu0 }
 0x151   :  { %v2789_v29 = vadd.f32 %v2788_v27, %v2787_v22  ;;  %v2790_v31 = vpop.f32.mrb[46].mxu1  ;;  %v2727_v34 = vpop.f32.mrb[47].mxu0 }
 0x152   :  { %v1747_v62 = vadd.f32 %v2725_v25, %v3933_v14  ;;  %v2728_v36 = vadd.f32 %v2727_v34, %v2726_v28  ;;  %v2791_v37 = vpop.f32.mrb[47].mxu1 }
 0x153   :  { %v2792_v38 = vadd.f32 %v2791_v37, %v2790_v31 }
 0x154   :  { %v3981_v39 = vadd.f32 %v2789_v29, %v1747_v62  ;;  %v1750_v0 = vadd.f32 %v2728_v36, %v3936_v16 }
 0x156   :  { %v3984_v40 = vadd.f32 %v2792_v38, %v1750_v0  ;;  %v2729_v41 = vpop.f32.mrb[48].mxu0 }
 0x157   :  { %v2793_v42 = vpop.f32.mrb[48].mxu1  ;;  %v2730_v43 = vpop.f32.mrb[49].mxu0 }
 0x158   :  { %v2731_v18 = vadd.f32 %v2730_v43, %v2729_v41  ;;  %v2794_v47 = vpop.f32.mrb[49].mxu1  ;;  %v2732_v49 = vpop.f32.mrb[50].mxu0 }
 0x159   :  { %v2795_v50 = vadd.f32 %v2794_v47, %v2793_v42  ;;  %v2796_v52 = vpop.f32.mrb[50].mxu1  ;;  %v2733_v54 = vpop.f32.mrb[51].mxu0 }
 0x15a   :  { %v1755_v14 = vadd.f32 %v2731_v18, %v3939_v33  ;;  %v2734_v55 = vadd.f32 %v2733_v54, %v2732_v49  ;;  %v2797_v56 = vpop.f32.mrb[51].mxu1 }
 0x15b   :  { %v2798_v57 = vadd.f32 %v2797_v56, %v2796_v52 }
 0x15c   :  { %v3987_v58 = vadd.f32 %v2795_v50, %v1755_v14  ;;  %v1758_v16 = vadd.f32 %v2734_v55, %v3942_v35 }
 0x15e   :  { %v3990_v30 = vadd.f32 %v2798_v57, %v1758_v16  ;;  %v2735_v59 = vpop.f32.mrb[52].mxu0 }
 0x15f   :  { %v2799_v60 = vpop.f32.mrb[52].mxu1  ;;  %v2736_v61 = vpop.f32.mrb[53].mxu0 }
 0x160   :  { %v2737_v32 = vadd.f32 %v2736_v61, %v2735_v59  ;;  %v2800_v2 = vpop.f32.mrb[53].mxu1  ;;  %v2738_v3 = vpop.f32.mrb[54].mxu0 }
 0x161   :  { %v2801_v4 = vadd.f32 %v2800_v2, %v2799_v60  ;;  %v2802_v6 = vpop.f32.mrb[54].mxu1  ;;  %v2739_v8 = vpop.f32.mrb[55].mxu0 }
 0x162   :  { %v1763_v33 = vadd.f32 %v2737_v32, %v3945_v51  ;;  %v2740_v9 = vadd.f32 %v2739_v8, %v2738_v3  ;;  %v2803_v10 = vpop.f32.mrb[55].mxu1 }
 0x163   :  { %v2804_v11 = vadd.f32 %v2803_v10, %v2802_v6 }
 0x164   :  { %v3993_v12 = vadd.f32 %v2801_v4, %v1763_v33  ;;  %v1766_v35 = vadd.f32 %v2740_v9, %v3948_v53 }
 0x166   :  { %v3996_v46 = vadd.f32 %v2804_v11, %v1766_v35  ;;  %v2741_v13 = vpop.f32.mrb[56].mxu0 }
 0x167   :  { %v2805_v15 = vpop.f32.mrb[56].mxu1  ;;  %v2742_v17 = vpop.f32.mrb[57].mxu0 }
 0x168   :  { %v2743_v48 = vadd.f32 %v2742_v17, %v2741_v13  ;;  %v2806_v21 = vpop.f32.mrb[57].mxu1  ;;  %v2744_v22 = vpop.f32.mrb[58].mxu0 }
 0x169   :  { %v2807_v23 = vadd.f32 %v2806_v21, %v2805_v15  ;;  %v2808_v25 = vpop.f32.mrb[58].mxu1  ;;  %v2745_v27 = vpop.f32.mrb[59].mxu0 }
 0x16a   :  { %v1771_v51 = vadd.f32 %v2743_v48, %v3951_v5  ;;  %v2746_v28 = vadd.f32 %v2745_v27, %v2744_v22  ;;  %v2809_v29 = vpop.f32.mrb[59].mxu1 }
 0x16b   :  { %v2810_v31 = vadd.f32 %v2809_v29, %v2808_v25 }
 0x16c   :  { %v3999_v34 = vadd.f32 %v2807_v23, %v1771_v51  ;;  %v1774_v53 = vadd.f32 %v2746_v28, %v3954_v7 }
 0x16e   :  { %v4002_v62 = vadd.f32 %v2810_v31, %v1774_v53  ;;  %v2747_v36 = vpop.f32.mrb[60].mxu0 }
 0x16f   :  { %v2811_v37 = vpop.f32.mrb[60].mxu1  ;;  %v2748_v38 = vpop.f32.mrb[61].mxu0 }
 0x170   :  { %v2749_v0 = vadd.f32 %v2748_v38, %v2747_v36  ;;  %v2812_v41 = vpop.f32.mrb[61].mxu1  ;;  %v2750_v42 = vpop.f32.mrb[62].mxu0 }
 0x171   :  { %v2813_v43 = vadd.f32 %v2812_v41, %v2811_v37  ;;  %v2814_v18 = vpop.f32.mrb[62].mxu1  ;;  %v2751_v47 = vpop.f32.mrb[63].mxu0 }
 0x172   :  { %v1779_v5 = vadd.f32 %v2749_v0, %v3957_v24  ;;  %v2752_v49 = vadd.f32 %v2751_v47, %v2750_v42  ;;  %v2815_v50 = vpop.f32.mrb[63].mxu1 }
 0x173   :  { %v2816_v52 = vadd.f32 %v2815_v50, %v2814_v18 }
 0x174   :  { %v4005_v54 = vadd.f32 %v2813_v43, %v1779_v5  ;;  %v1782_v7 = vadd.f32 %v2752_v49, %v3960_v26 }
 0x176   :  { %v4008_v14 = vadd.f32 %v2816_v52, %v1782_v7  ;;  %v2833_v55 = vpop.f32.mrb[64].mxu0 }
 0x177   :  { %v2897_v56 = vpop.f32.mrb[64].mxu1  ;;  %v2834_v57 = vpop.f32.mrb[65].mxu0 }
 0x178   :  { %v2835_v16 = vadd.f32 %v2834_v57, %v2833_v55  ;;  %v2898_v59 = vpop.f32.mrb[65].mxu1  ;;  %v2836_v60 = vpop.f32.mrb[66].mxu0 }
 0x179   :  { %v2899_v61 = vadd.f32 %v2898_v59, %v2897_v56  ;;  %v2900_v32 = vpop.f32.mrb[66].mxu1  ;;  %v2837_v2 = vpop.f32.mrb[67].mxu0 }
 0x17a   :  { %v1917_v24 = vadd.f32 %v2835_v16, %v3963_v44  ;;  %v2838_v3 = vadd.f32 %v2837_v2, %v2836_v60  ;;  %v2901_v4 = vpop.f32.mrb[67].mxu1 }
 0x17b   :  { %v2902_v6 = vadd.f32 %v2901_v4, %v2900_v32 }
 0x17c   :  { %v1920_v8 = vadd.f32 %v2838_v3, %v3966_v45  ;;  %v4012_v33 = vadd.f32 %v2899_v61, %v1917_v24 }
 0x17e   :  { %v2839_v26 = vpop.f32.mrb[68].mxu0  ;;  %v4014_v9 = vadd.f32 %v2902_v6, %v1920_v8 }
 0x17f   :  { %v2903_v10 = vpop.f32.mrb[68].mxu1  ;;  %v2840_v11 = vpop.f32.mrb[69].mxu0 }
 0x180   :  { %v2841_v35 = vadd.f32 %v2840_v11, %v2839_v26  ;;  %v2904_v13 = vpop.f32.mrb[69].mxu1  ;;  %v2842_v15 = vpop.f32.mrb[70].mxu0 }
 0x181   :  { %v2905_v17 = vadd.f32 %v2904_v13, %v2903_v10  ;;  %v2906_v48 = vpop.f32.mrb[70].mxu1  ;;  %v2843_v21 = vpop.f32.mrb[71].mxu0 }
 0x182   :  { %v1925_v44 = vadd.f32 %v2841_v35, %v3969_v63  ;;  %v2844_v22 = vadd.f32 %v2843_v21, %v2842_v15  ;;  %v2907_v23 = vpop.f32.mrb[71].mxu1 }
 0x183   :  { %v2908_v25 = vadd.f32 %v2907_v23, %v2906_v48 }
 0x184   :  { %v1928_v45 = vadd.f32 %v2844_v22, %v3972_v1  ;;  %v4018_v27 = vadd.f32 %v2905_v17, %v1925_v44 }
 0x186   :  { %v2845_v51 = vpop.f32.mrb[72].mxu0  ;;  %v4020_v28 = vadd.f32 %v2908_v25, %v1928_v45 }
 0x187   :  { %v2909_v29 = vpop.f32.mrb[72].mxu1  ;;  %v2846_v31 = vpop.f32.mrb[73].mxu0 }
 0x188   :  { %v2847_v53 = vadd.f32 %v2846_v31, %v2845_v51  ;;  %v2910_v36 = vpop.f32.mrb[73].mxu1  ;;  %v2848_v37 = vpop.f32.mrb[74].mxu0 }
 0x189   :  { %v2911_v38 = vadd.f32 %v2910_v36, %v2909_v29  ;;  %v2912_v0 = vpop.f32.mrb[74].mxu1  ;;  %v2849_v41 = vpop.f32.mrb[75].mxu0 }
 0x18a   :  { %v1933_v63 = vadd.f32 %v2847_v53, %v3975_v19  ;;  %v2850_v42 = vadd.f32 %v2849_v41, %v2848_v37  ;;  %v2913_v43 = vpop.f32.mrb[75].mxu1 }
 0x18b   :  { %v2914_v18 = vadd.f32 %v2913_v43, %v2912_v0 }
 0x18c   :  { %v1936_v1 = vadd.f32 %v2850_v42, %v3978_v20  ;;  %v4024_v47 = vadd.f32 %v2911_v38, %v1933_v63 }
 0x18e   :  { %v2851_v5 = vpop.f32.mrb[76].mxu0  ;;  %v4026_v49 = vadd.f32 %v2914_v18, %v1936_v1 }
 0x18f   :  { %v2915_v50 = vpop.f32.mrb[76].mxu1  ;;  %v2852_v52 = vpop.f32.mrb[77].mxu0 }
 0x190   :  { %v2853_v7 = vadd.f32 %v2852_v52, %v2851_v5  ;;  %v2916_v55 = vpop.f32.mrb[77].mxu1  ;;  %v2854_v56 = vpop.f32.mrb[78].mxu0 }
 0x191   :  { %v2917_v57 = vadd.f32 %v2916_v55, %v2915_v50  ;;  %v2918_v16 = vpop.f32.mrb[78].mxu1  ;;  %v2855_v59 = vpop.f32.mrb[79].mxu0 }
 0x192   :  { %v1941_v19 = vadd.f32 %v2853_v7, %v3981_v39  ;;  %v2856_v60 = vadd.f32 %v2855_v59, %v2854_v56  ;;  %v2919_v61 = vpop.f32.mrb[79].mxu1 }
 0x193   :  { %v2920_v32 = vadd.f32 %v2919_v61, %v2918_v16 }
 0x194   :  { %v1944_v20 = vadd.f32 %v2856_v60, %v3984_v40  ;;  %v4030_v2 = vadd.f32 %v2917_v57, %v1941_v19 }
 0x196   :  { %v2857_v24 = vpop.f32.mrb[80].mxu0  ;;  %v4032_v3 = vadd.f32 %v2920_v32, %v1944_v20 }
 0x197   :  { %v2921_v4 = vpop.f32.mrb[80].mxu1  ;;  %v2858_v6 = vpop.f32.mrb[81].mxu0 }
 0x198   :  { %v2859_v8 = vadd.f32 %v2858_v6, %v2857_v24  ;;  %v2922_v26 = vpop.f32.mrb[81].mxu1  ;;  %v2860_v10 = vpop.f32.mrb[82].mxu0 }
 0x199   :  { %v2923_v11 = vadd.f32 %v2922_v26, %v2921_v4  ;;  %v2924_v35 = vpop.f32.mrb[82].mxu1  ;;  %v2861_v13 = vpop.f32.mrb[83].mxu0 }
 0x19a   :  { %v1949_v39 = vadd.f32 %v2859_v8, %v3987_v58  ;;  %v2862_v15 = vadd.f32 %v2861_v13, %v2860_v10  ;;  %v2925_v17 = vpop.f32.mrb[83].mxu1 }
 0x19b   :  { %v2926_v48 = vadd.f32 %v2925_v17, %v2924_v35 }
 0x19c   :  { %v1952_v40 = vadd.f32 %v2862_v15, %v3990_v30  ;;  %v2046_v21 = vadd.f32 %v2923_v11, %v1949_v39 }
 0x19e   :  { %v2863_v44 = vpop.f32.mrb[84].mxu0  ;;  %v4036_v22 = vadd.f32 %v2926_v48, %v1952_v40 }
 0x19f   :  { %v2927_v23 = vpop.f32.mrb[84].mxu1  ;;  %v2864_v25 = vpop.f32.mrb[85].mxu0 }
 0x1a0   :  { %v2865_v45 = vadd.f32 %v2864_v25, %v2863_v44  ;;  %v2928_v51 = vpop.f32.mrb[85].mxu1  ;;  %v2866_v29 = vpop.f32.mrb[86].mxu0 }
 0x1a1   :  { %v2929_v31 = vadd.f32 %v2928_v51, %v2927_v23  ;;  %v2930_v53 = vpop.f32.mrb[86].mxu1  ;;  %v2867_v36 = vpop.f32.mrb[87].mxu0 }
 0x1a2   :  { %v1957_v37 = vadd.f32 %v2865_v45, %v3993_v12  ;;  %v2868_v58 = vadd.f32 %v2867_v36, %v2866_v29  ;;  %v2931_v38 = vpop.f32.mrb[87].mxu1 }
 0x1a3   :  { %v2932_v0 = vadd.f32 %v2931_v38, %v2930_v53 }
 0x1a4   :  { %v1960_v41 = vadd.f32 %v2868_v58, %v3996_v46  ;;  %v2054_v30 = vadd.f32 %v2929_v31, %v1957_v37 }
 0x1a6   :  { %v2869_v63 = vpop.f32.mrb[88].mxu0  ;;  %v2057_v42 = vadd.f32 %v2932_v0, %v1960_v41 }
 0x1a7   :  { %v2933_v43 = vpop.f32.mrb[88].mxu1  ;;  %v2870_v18 = vpop.f32.mrb[89].mxu0 }
 0x1a8   :  { %v2871_v1 = vadd.f32 %v2870_v18, %v2869_v63  ;;  %v2934_v5 = vpop.f32.mrb[89].mxu1  ;;  %v2872_v50 = vpop.f32.mrb[90].mxu0 }
 0x1a9   :  { %v2935_v52 = vadd.f32 %v2934_v5, %v2933_v43  ;;  %v2936_v7 = vpop.f32.mrb[90].mxu1  ;;  %v2873_v55 = vpop.f32.mrb[91].mxu0 }
 0x1aa   :  { %v1965_v56 = vadd.f32 %v2871_v1, %v3999_v34  ;;  %v2874_v57 = vadd.f32 %v2873_v55, %v2872_v50  ;;  %v2937_v12 = vpop.f32.mrb[91].mxu1 }
 0x1ab   :  { %v2938_v16 = vadd.f32 %v2937_v12, %v2936_v7 }
 0x1ac   :  { %v1968_v59 = vadd.f32 %v2874_v57, %v4002_v62  ;;  %v2062_v19 = vadd.f32 %v2935_v52, %v1965_v56 }
 0x1ae   :  { %v2875_v46 = vpop.f32.mrb[92].mxu0  ;;  %v4042_v60 = vadd.f32 %v2938_v16, %v1968_v59 }
 0x1af   :  { %v2939_v61 = vpop.f32.mrb[92].mxu1  ;;  %v2876_v32 = vpop.f32.mrb[93].mxu0 }
 0x1b0   :  { %v2877_v20 = vadd.f32 %v2876_v32, %v2875_v46  ;;  %v2940_v24 = vpop.f32.mrb[93].mxu1  ;;  %v2878_v4 = vpop.f32.mrb[94].mxu0 }
 0x1b1   :  { %v2941_v6 = vadd.f32 %v2940_v24, %v2939_v61  ;;  %v2942_v8 = vpop.f32.mrb[94].mxu1  ;;  %v2879_v26 = vpop.f32.mrb[95].mxu0 }
 0x1b2   :  { %v1973_v10 = vadd.f32 %v2877_v20, %v4005_v54  ;;  %v2880_v34 = vadd.f32 %v2879_v26, %v2878_v4  ;;  %v2943_v11 = vpop.f32.mrb[95].mxu1 }
 0x1b3   :  { %v2944_v35 = vadd.f32 %v2943_v11, %v2942_v8 }
 0x1b4   :  { %v1976_v13 = vadd.f32 %v2880_v34, %v4008_v14  ;;  %v2070_v62 = vadd.f32 %v2941_v6, %v1973_v10 }
 0x1b6   :  { %v2979_v39 = vpop.f32.mrb[96].mxu0  ;;  %v2073_v15 = vadd.f32 %v2944_v35, %v1976_v13 }
 0x1b7   :  { %v2119_v17 = vadd.f32 %v2979_v39, %v4018_v27  ;;  %v2987_v48 = vpop.f32.mrb[96].mxu1  ;;  %v2110_v40 = vpop.f32.mrb[97].mxu0 }
 0x1b8   :  { %v2151_v44 = vadd.f32 %v2987_v48, %v2054_v30  ;;  %v2111_v23 = vadd.f32 %v2110_v40, %v4012_v33  ;;  %v2142_v25 = vpop.f32.mrb[97].mxu1  ;;  %v2980_v45 = vpop.f32.mrb[98].mxu0 }
 0x1b9   :  { %v2143_v51 = vadd.f32 %v2142_v25, %v2046_v21  ;;  %v2122_v54 = vadd.f32 %v2980_v45, %v4020_v28  ;;  %v2988_v29 = vpop.f32.mrb[98].mxu1  ;;  %v2113_v31 = vpop.f32.mrb[99].mxu0  ;;  %v2175_v37 = vmax.f32 %v2119_v17, 0.0 }
 0x1ba   :  { %v2154_v53 = vadd.f32 %v2988_v29, %v2057_v42  ;;  %v2114_v14 = vadd.f32 %v2113_v31, %v4014_v9  ;;  %v2145_v36 = vpop.f32.mrb[99].mxu1  ;;  %v2183_v38 = vmax.f32 %v2151_v44, 0.0  ;;  %v2173_v0 = vmax.f32 %v2111_v23, 0.0 }
 0x1bb   :  { %v2176_v58 = vmax.f32 %v2122_v54, 0.0  ;;  %v2146_v27 = vadd.f32 %v2145_v36, %v4036_v22  ;;  %v2181_v33 = vmax.f32 %v2143_v51, 0.0 }
 0x1bc   :  { %v2184_v41 = vmax.f32 %v2154_v53, 0.0  ;;  %v2174_v30 = vmax.f32 %v2114_v14, 0.0 }
 0x1bd   :  { %v2522_v63 = vpack.c.bf16 %v2176_v58, %v2175_v37  ;;  %v2182_v43 = vmax.f32 %v2146_v27, 0.0 }
 0x1be   :  { %v2542_v21 = vpack.c.bf16 %v2184_v41, %v2183_v38  ;;  %v2517_v18 = vpack.c.bf16 %v2174_v30, %v2173_v0  ;;  %v2983_v28 = vpop.f32.mrb[100].mxu0 }
 0x1bf   :  { %2554 = vst [vmem:[%s4083_s3 + $0x8] sm:$0xff] %v2522_v63   ;;  %v2537_v9 = vpack.c.bf16 %v2182_v43, %v2181_v33  ;;  %v2135_v42 = vadd.f32 %v2983_v28, %v4030_v2  ;;  %v2991_v1 = vpop.f32.mrb[100].mxu1  ;;  %v2126_v5 = vpop.f32.mrb[101].mxu0 }
 0x1c0   :  { %2558 = vst [vmem:[%s4083_s3 + $0x28] sm:$0xff] %v2542_v21   ;;  %2518 = vst [vmem:[%s4083_s3] sm:$0xff] %v2517_v18   ;;  %v2167_v22 = vadd.f32 %v2991_v1, %v2070_v62  ;;  %v2127_v50 = vadd.f32 %v2126_v5, %v4024_v47  ;;  %v2158_v52 = vpop.f32.mrb[101].mxu1  ;;  %v2984_v7 = vpop.f32.mrb[102].mxu0 }
 0x1c1   :  { %2557 = vst [vmem:[%s4083_s3 + $0x20] sm:$0xff] %v2537_v9   ;;  %v2159_v2 = vadd.f32 %v2158_v52, %v2062_v19  ;;  %v2138_v55 = vadd.f32 %v2984_v7, %v4032_v3  ;;  %v2992_v56 = vpop.f32.mrb[102].mxu1  ;;  %v2129_v57 = vpop.f32.mrb[103].mxu0  ;;  %v2179_v46 = vmax.f32 %v2135_v42, 0.0 }
 0x1c2   :  { %v2170_v12 = vadd.f32 %v2992_v56, %v2073_v15  ;;  %v2130_v16 = vadd.f32 %v2129_v57, %v4026_v49  ;;  %v2161_v59 = vpop.f32.mrb[103].mxu1  ;;  %v2187_v47 = vmax.f32 %v2167_v22, 0.0  ;;  %v2177_v20 = vmax.f32 %v2127_v50, 0.0 }
 0x1c3   :  { %v2180_v61 = vmax.f32 %v2138_v55, 0.0  ;;  %v2162_v32 = vadd.f32 %v2161_v59, %v4042_v60  ;;  %v2185_v6 = vmax.f32 %v2159_v2, 0.0 }
 0x1c4   :  { %v2188_v24 = vmax.f32 %v2170_v12, 0.0  ;;  %v2178_v4 = vmax.f32 %v2130_v16, 0.0 }
 0x1c5   :  { %v2532_v8 = vpack.c.bf16 %v2180_v61, %v2179_v46  ;;  %v2186_v26 = vmax.f32 %v2162_v32, 0.0 }
 0x1c6   :  { %v2552_v19 = vpack.c.bf16 %v2188_v24, %v2187_v47  ;;  %v2527_v10 = vpack.c.bf16 %v2178_v4, %v2177_v20 }
 0x1c7   :  { %2556 = vst [vmem:[%s4083_s3 + $0x18] sm:$0xff] %v2532_v8   ;;  %v2547_v3 = vpack.c.bf16 %v2186_v26, %v2185_v6 }
 0x1c8   :  { %2560 = vst [vmem:[%s4083_s3 + $0x38] sm:$0xff] %v2552_v19   ;;  %2555 = vst [vmem:[%s4083_s3 + $0x10] sm:$0xff] %v2527_v10  }
 0x1c9   :  { %2559 = vst [vmem:[%s4083_s3 + $0x30] sm:$0xff] %v2547_v3  }

// kernel: forward.9
= control target key start
LH: loop header
LB: loop body
LE: loop exit
PB: predicated region body
PF: predicated region fallthrough
CT: control target
= control target key end

     0   :  { %s2294_s1 = inlined_call_operand.vmem [shape: bf16[1664,128], index: 1, kind: input, shape index: {}]   ;;  %s2295_s0 = inlined_call_operand.vmem [shape: bf16[32,1664], index: 0, kind: input, shape index: {}]   ;;  %s2296_s2 = inlined_call_operand.vmem [shape: f32[1,128], index: 2, kind: input, shape index: {}]   ;;  %s2297_s3 = inlined_call_operand.vmem [shape: bf16[32,128], index: 3, kind: output, shape index: {}]  }
   0x1   :  { %v1733_v0 = vld [vmem:[%s2294_s1 + $0x40] sm:$0xff]   ;;  %v1737_v4 = vld [vmem:[%s2294_s1 + $0x48] sm:$0xff]   ;;  %v1741_v8 = vld [vmem:[%s2294_s1 + $0x50] sm:$0xff]  }
   0x2   :  { %v1734_v1 = vld [vmem:[%s2294_s1] sm:$0xff]   ;;  %1535 = vmatprep.subr.bf16.mxu0 %v1733_v0  ;;  %v1738_v5 = vld [vmem:[%s2294_s1 + $0x8] sm:$0xff]   ;;  %v1742_v9 = vld [vmem:[%s2294_s1 + $0x10] sm:$0xff]  }
   0x3   :  { %v1735_v2 = vld [vmem:[%s2294_s1 + $0xc0] sm:$0xff]   ;;  %1536 = vmatpush3.bf16.msra.mxu0 %v1734_v1  ;;  %v1739_v6 = vld [vmem:[%s2294_s1 + $0xc8] sm:$0xff]   ;;  %v1743_v10 = vld [vmem:[%s2294_s1 + $0xd0] sm:$0xff]  }
   0x4   :  { %v1736_v3 = vld [vmem:[%s2294_s1 + $0x80] sm:$0xff]   ;;  %1563 = vmatprep.subr.bf16.mxu1 %v1735_v2  ;;  %1537 = vmatprep.subr.bf16.mxu0 %v1737_v4  ;;  %v1740_v7 = vld [vmem:[%s2294_s1 + $0x88] sm:$0xff]   ;;  %v1744_v11 = vld [vmem:[%s2294_s1 + $0x90] sm:$0xff]  }
   0x5   :  { %1564 = vmatpush3.bf16.msra.mxu1 %v1736_v3  ;;  %v1745_v12 = vld [vmem:[%s2294_s1 + $0x58] sm:$0xff]   ;;  %v1749_v16 = vld [vmem:[%s2294_s1 + $0x60] sm:$0xff]   ;;  %v1753_v20 = vld [vmem:[%s2294_s1 + $0x68] sm:$0xff]  }
   0x6   :  { %1565 = vmatprep.subr.bf16.mxu1 %v1739_v6  ;;  %v1746_v13 = vld [vmem:[%s2294_s1 + $0x18] sm:$0xff]   ;;  %v1750_v17 = vld [vmem:[%s2294_s1 + $0x20] sm:$0xff]   ;;  %v1754_v21 = vld [vmem:[%s2294_s1 + $0x28] sm:$0xff]  }
   0x7   :  { %1538 = vmatpush3.bf16.msra.mxu0 %v1738_v5  ;;  %v1747_v14 = vld [vmem:[%s2294_s1 + $0xd8] sm:$0xff]   ;;  %v1751_v18 = vld [vmem:[%s2294_s1 + $0xe0] sm:$0xff]   ;;  %v1755_v22 = vld [vmem:[%s2294_s1 + $0xe8] sm:$0xff]  }
   0x8   :  { %1539 = vmatprep.subr.bf16.mxu0 %v1741_v8  ;;  %v1748_v15 = vld [vmem:[%s2294_s1 + $0x98] sm:$0xff]   ;;  %v1752_v19 = vld [vmem:[%s2294_s1 + $0xa0] sm:$0xff]   ;;  %v1756_v23 = vld [vmem:[%s2294_s1 + $0xa8] sm:$0xff]  }
   0x9   :  { %1566 = vmatpush3.bf16.msra.mxu1 %v1740_v7  ;;  %v1757_v24 = vld [vmem:[%s2294_s1 + $0x70] sm:$0xff]   ;;  %v1761_v28 = vld [vmem:[%s2294_s1 + $0x78] sm:$0xff]   ;;  %v1768_v34 = vld [vmem:[%s2294_s1 + $0x140] sm:$0xff]  }
   0xa   :  { %1567 = vmatprep.subr.bf16.mxu1 %v1743_v10  ;;  %v1758_v25 = vld [vmem:[%s2294_s1 + $0x30] sm:$0xff]   ;;  %v1762_v29 = vld [vmem:[%s2294_s1 + $0x38] sm:$0xff]   ;;  %v1771_v36 = vld [vmem:[%s2295_s0 + $0xc] ss:$52 sps:$4 sm:$0xff]  }
   0xb   :  { %1540 = vmatpush3.bf16.msra.mxu0 %v1742_v9  ;;  %v1759_v26 = vld [vmem:[%s2294_s1 + $0xf0] sm:$0xff]   ;;  %v1763_v30 = vld [vmem:[%s2294_s1 + $0xf8] sm:$0xff]   ;;  %v1772_v37 = vld [vmem:[%s2294_s1 + $0x100] sm:$0xff]   ;;  %1095 = vmatprep.mubr.bf16.mxu1 %v1771_v36 }
   0xc   :  { %1541 = vmatprep.subr.bf16.mxu0 %v1745_v12  ;;  %v1760_v27 = vld [vmem:[%s2294_s1 + $0xb0] sm:$0xff]   ;;  %v1766_v32 = vld [vmem:[%s2295_s0 + $0x4] ss:$52 sps:$4 sm:$0xff]   ;;  %v1769_v35 = vld [vmem:[%s2295_s0 + $0x8] ss:$52 sps:$4 sm:$0xff]  }
   0xd   :  { %1568 = vmatpush3.bf16.msra.mxu1 %v1744_v11  ;;  %v1764_v31 = vld [vmem:[%s2295_s0] ss:$52 sps:$4 sm:$0xff]   ;;  %v1767_v33 = vld [vmem:[%s2294_s1 + $0xb8] sm:$0xff]   ;;  %1046 = vmatprep.mubr.bf16.mxu0 %v1766_v32  ;;  %v1775_v40 = vld [vmem:[%s2294_s1 + $0x148] sm:$0xff]  }
   0xe   :  { %1569 = vmatprep.subr.bf16.mxu1 %v1747_v14  ;;  %v1773_v38 = vld [vmem:[%s2294_s1 + $0x1c0] sm:$0xff]   ;;  %v1776_v41 = vld [vmem:[%s2294_s1 + $0x108] sm:$0xff]   ;;  %v1779_v44 = vld [vmem:[%s2294_s1 + $0x150] sm:$0xff]  }
   0xf   :  { %1542 = vmatpush3.bf16.msra.mxu0 %v1746_v13  ;;  %v1774_v39 = vld [vmem:[%s2294_s1 + $0x180] sm:$0xff]   ;;  %v1777_v42 = vld [vmem:[%s2294_s1 + $0x1c8] sm:$0xff]   ;;  %v1780_v45 = vld [vmem:[%s2294_s1 + $0x110] sm:$0xff]  }
  0x10   :  { %1543 = vmatprep.subr.bf16.mxu0 %v1749_v16  ;;  %v1778_v43 = vld [vmem:[%s2294_s1 + $0x188] sm:$0xff]   ;;  %v1781_v46 = vld [vmem:[%s2294_s1 + $0x1d0] sm:$0xff]   ;;  %v1783_v48 = vld [vmem:[%s2294_s1 + $0x158] sm:$0xff]  }
  0x11   :  { %1570 = vmatpush3.bf16.msra.mxu1 %v1748_v15  ;;  %v1782_v47 = vld [vmem:[%s2294_s1 + $0x190] sm:$0xff]   ;;  %v1784_v49 = vld [vmem:[%s2294_s1 + $0x118] sm:$0xff]   ;;  %v1787_v52 = vld [vmem:[%s2294_s1 + $0x160] sm:$0xff]  }
  0x12   :  { %1571 = vmatprep.subr.bf16.mxu1 %v1751_v18  ;;  %v1785_v50 = vld [vmem:[%s2294_s1 + $0x1d8] sm:$0xff]   ;;  %v1788_v53 = vld [vmem:[%s2294_s1 + $0x120] sm:$0xff]   ;;  %v1791_v56 = vld [vmem:[%s2294_s1 + $0x168] sm:$0xff]  }
  0x13   :  { %1544 = vmatpush3.bf16.msra.mxu0 %v1750_v17  ;;  %v1786_v51 = vld [vmem:[%s2294_s1 + $0x198] sm:$0xff]   ;;  %v1789_v54 = vld [vmem:[%s2294_s1 + $0x1e0] sm:$0xff]   ;;  %v1794_v58 = vld [vmem:[%s2294_s1 + $0x128] sm:$0xff]  }
  0x14   :  { %1545 = vmatprep.subr.bf16.mxu0 %v1753_v20  ;;  %v1790_v55 = vld [vmem:[%s2294_s1 + $0x1a0] sm:$0xff]   ;;  %v1795_v59 = vld [vmem:[%s2295_s0 + $0x68] ss:$52 sps:$4 sm:$0xff]   ;;  %v1801_v0 = vld [vmem:[%s2294_s1 + $0x170] sm:$0xff]  }
  0x15   :  { %1572 = vmatpush3.bf16.msra.mxu1 %v1752_v19  ;;  %v1792_v57 = vld [vmem:[%s2295_s0 + $0x6c] ss:$52 sps:$4 sm:$0xff]   ;;  %v1797_v61 = vld [vmem:[%s2295_s0 + $0x74] ss:$52 sps:$4 sm:$0xff]   ;;  %v1800_v63 = vld [vmem:[%s2295_s0 + $0x70] ss:$52 sps:$4 sm:$0xff]  }
  0x16   :  { %1573 = vmatprep.subr.bf16.mxu1 %v1755_v22  ;;  %v1796_v60 = vld [vmem:[%s2294_s1 + $0x1e8] sm:$0xff]   ;;  %v1802_v1 = vld [vmem:[%s2294_s1 + $0x130] sm:$0xff]   ;;  %v1805_v4 = vld [vmem:[%s2294_s1 + $0x178] sm:$0xff]  }
  0x17   :  { %1546 = vmatpush3.bf16.msra.mxu0 %v1754_v21  ;;  %v1799_v62 = vld [vmem:[%s2294_s1 + $0x1a8] sm:$0xff]   ;;  %v1803_v2 = vld [vmem:[%s2294_s1 + $0x1f0] sm:$0xff]   ;;  %v1806_v5 = vld [vmem:[%s2294_s1 + $0x138] sm:$0xff]  }
  0x18   :  { %1547 = vmatprep.subr.bf16.mxu0 %v1757_v24  ;;  %v1804_v3 = vld [vmem:[%s2294_s1 + $0x1b0] sm:$0xff]   ;;  %v1807_v6 = vld [vmem:[%s2294_s1 + $0x1f8] sm:$0xff]   ;;  %v1812_v10 = vld [vmem:[%s2294_s1 + $0x240] sm:$0xff]  }
  0x19   :  { %1574 = vmatpush3.bf16.msra.mxu1 %v1756_v23  ;;  %v1808_v7 = vld [vmem:[%s2295_s0 + $0x10] ss:$52 sps:$4 sm:$0xff]   ;;  %v1810_v8 = vld [vmem:[%s2295_s0 + $0x14] ss:$52 sps:$4 sm:$0xff]   ;;  %v1811_v9 = vld [vmem:[%s2294_s1 + $0x1b8] sm:$0xff]  }
  0x1a   :  { %1575 = vmatprep.subr.bf16.mxu1 %v1759_v26  ;;  %v1813_v11 = vld [vmem:[%s2295_s0 + $0x18] ss:$52 sps:$4 sm:$0xff]   ;;  %v1815_v12 = vld [vmem:[%s2295_s0 + $0x1c] ss:$52 sps:$4 sm:$0xff]   ;;  %v1816_v13 = vld [vmem:[%s2294_s1 + $0x200] sm:$0xff]  }
  0x1b   :  { %1548 = vmatpush3.bf16.msra.mxu0 %v1758_v25  ;;  %v1817_v14 = vld [vmem:[%s2294_s1 + $0x2c0] sm:$0xff]   ;;  %v1819_v16 = vld [vmem:[%s2294_s1 + $0x248] sm:$0xff]   ;;  %v1822_v19 = vld [vmem:[%s2295_s0 + $0x7c] ss:$52 sps:$4 sm:$0xff]  }
  0x1c   :  { %1549 = vmatprep.subr.bf16.mxu0 %v1761_v28  ;;  %v1818_v15 = vld [vmem:[%s2294_s1 + $0x280] sm:$0xff]   ;;  %v1820_v17 = vld [vmem:[%s2294_s1 + $0x208] sm:$0xff]   ;;  %v1826_v22 = vld [vmem:[%s2294_s1 + $0x250] sm:$0xff]  }
  0x1d   :  { %1576 = vmatpush3.bf16.msra.mxu1 %v1760_v27  ;;  %v1821_v18 = vld [vmem:[%s2294_s1 + $0x2c8] sm:$0xff]   ;;  %v1827_v23 = vld [vmem:[%s2295_s0 + $0x84] ss:$52 sps:$4 sm:$0xff]   ;;  %v1829_v24 = vld [vmem:[%s2294_s1 + $0x210] sm:$0xff]  }
  0x1e   :  { %1577 = vmatprep.subr.bf16.mxu1 %v1763_v30  ;;  %v1824_v20 = vld [vmem:[%s2294_s1 + $0x288] sm:$0xff]   ;;  %v1830_v25 = vld [vmem:[%s2295_s0 + $0x80] ss:$52 sps:$4 sm:$0xff]   ;;  %v1833_v28 = vld [vmem:[%s2294_s1 + $0x258] sm:$0xff]  }
  0x1f   :  { %1550 = vmatpush3.bf16.msra.mxu0 %v1762_v29  ;;  %v1825_v21 = vld [vmem:[%s2295_s0 + $0x78] ss:$52 sps:$4 sm:$0xff]   ;;  %v1831_v26 = vld [vmem:[%s2294_s1 + $0x2d0] sm:$0xff]   ;;  %v1837_v32 = vld [vmem:[%s2294_s1 + $0x260] sm:$0xff]  }
  0x20   :  { %1591 = vmatprep.subr.bf16.mxu0 %v1768_v34  ;;  %v1832_v27 = vld [vmem:[%s2294_s1 + $0x290] sm:$0xff]   ;;  %v1834_v29 = vld [vmem:[%s2294_s1 + $0x218] sm:$0xff]   ;;  %v1839_v34 = vld [vmem:[%s2294_s1 + $0x2e0] sm:$0xff]  }
  0x21   :  { %1578 = vmatpush3.bf16.msra.mxu1 %v1767_v33  ;;  %v1835_v30 = vld [vmem:[%s2294_s1 + $0x2d8] sm:$0xff]   ;;  %v1838_v33 = vld [vmem:[%s2294_s1 + $0x220] sm:$0xff]   ;;  %v1841_v36 = vld [vmem:[%s2294_s1 + $0x268] sm:$0xff]  }
  0x22   :  { %1047 = vmatmul.mubr.bf16.vlgmr.msra.gmra.mrb[0].mxu0 %v1764_v31  ;;  %1619 = vmatprep.subr.bf16.mxu1 %v1773_v38  ;;  %v1836_v31 = vld [vmem:[%s2294_s1 + $0x298] sm:$0xff]   ;;  %v1843_v38 = vld [vmem:[%s2294_s1 + $0x2e8] sm:$0xff]  }
  0x23   :  { %1592 = vmatpush3.bf16.msra.mxu0 %v1772_v37  ;;  %1054 = vmatprep.mubr.bf16.mxu0 %v1792_v57  ;;  %v1842_v37 = vld [vmem:[%s2294_s1 + $0x228] sm:$0xff]  }
  0x24   :  { %1096 = vmatmul.mubr.bf16.vlgmr.msra.gmra.mrb[0].mxu1 %v1769_v35  ;;  %1593 = vmatprep.subr.bf16.mxu0 %v1775_v40  ;;  %v1840_v35 = vld [vmem:[%s2294_s1 + $0x2a0] sm:$0xff]   ;;  %v1845_v40 = vld [vmem:[%s2294_s1 + $0x270] sm:$0xff]  }
  0x25   :  { %1620 = vmatpush3.bf16.msra.mxu1 %v1774_v39  ;;  %1103 = vmatprep.mubr.bf16.mxu1 %v1797_v61  ;;  %v1844_v39 = vld [vmem:[%s2294_s1 + $0x2a8] sm:$0xff]   ;;  %v1873_v61 = vld [vmem:[%s2295_s0 + $0x30] ss:$52 sps:$4 sm:$0xff]  }
  0x26   :  { %1621 = vmatprep.subr.bf16.mxu1 %v1777_v42  ;;  %v1847_v42 = vld [vmem:[%s2294_s1 + $0x2f0] sm:$0xff]  }
  0x27   :  { %1594 = vmatpush3.bf16.msra.mxu0 %v1776_v41  ;;  %v1846_v41 = vld [vmem:[%s2294_s1 + $0x230] sm:$0xff]  }
  0x28   :  { %1595 = vmatprep.subr.bf16.mxu0 %v1779_v44  ;;  %v1849_v44 = vld [vmem:[%s2294_s1 + $0x278] sm:$0xff]   ;;  %v1865_v57 = vld [vmem:[%s2295_s0 + $0x94] ss:$52 sps:$4 sm:$0xff]  }
  0x29   :  { %1622 = vmatpush3.bf16.msra.mxu1 %v1778_v43  ;;  %v1848_v43 = vld [vmem:[%s2294_s1 + $0x2b0] sm:$0xff]  }
  0x2a   :  { %1623 = vmatprep.subr.bf16.mxu1 %v1781_v46  ;;  %1055 = vmatmul.mubr.bf16.gmra.mrb[4].mxu0 %v1795_v59  ;;  %v1851_v46 = vld [vmem:[%s2294_s1 + $0x2f8] sm:$0xff]   ;;  %v1867_v59 = vld [vmem:[%s2295_s0 + $0x90] ss:$52 sps:$4 sm:$0xff]  }
  0x2b   :  { %1596 = vmatpush3.bf16.msra.mxu0 %v1780_v45  ;;  %1144 = vmatprep.mubr.bf16.mxu0 %v1810_v8  ;;  %v1850_v45 = vld [vmem:[%s2294_s1 + $0x238] sm:$0xff]  }
  0x2c   :  { %1597 = vmatprep.subr.bf16.mxu0 %v1783_v48  ;;  %1104 = vmatmul.mubr.bf16.gmra.mrb[4].mxu1 %v1800_v63  ;;  %v1854_v48 = vld [vmem:[%s2295_s0 + $0x24] ss:$52 sps:$4 sm:$0xff]   ;;  %v1871_v63 = vld [vmem:[%s2294_s1 + $0x330] sm:$0xff]  }
  0x2d   :  { %1624 = vmatpush3.bf16.msra.mxu1 %v1782_v47  ;;  %1193 = vmatprep.mubr.bf16.mxu1 %v1815_v12  ;;  %v1852_v47 = vld [vmem:[%s2295_s0 + $0x20] ss:$52 sps:$4 sm:$0xff]  }
  0x2e   :  { %1625 = vmatprep.subr.bf16.mxu1 %v1785_v50  ;;  %v1856_v50 = vld [vmem:[%s2294_s1 + $0x300] sm:$0xff]  }
  0x2f   :  { %1598 = vmatpush3.bf16.msra.mxu0 %v1784_v49  ;;  %v1855_v49 = vld [vmem:[%s2294_s1 + $0x2b8] sm:$0xff]  }
  0x30   :  { %1599 = vmatprep.subr.bf16.mxu0 %v1787_v52  ;;  %v1859_v52 = vld [vmem:[%s2295_s0 + $0x2c] ss:$52 sps:$4 sm:$0xff]  }
  0x31   :  { %1626 = vmatpush3.bf16.msra.mxu1 %v1786_v51  ;;  %v1857_v51 = vld [vmem:[%s2295_s0 + $0x28] ss:$52 sps:$4 sm:$0xff]  }
  0x32   :  { %1627 = vmatprep.subr.bf16.mxu1 %v1789_v54  ;;  %v1861_v54 = vld [vmem:[%s2295_s0 + $0x8c] ss:$52 sps:$4 sm:$0xff]  }
  0x33   :  { %1600 = vmatpush3.bf16.msra.mxu0 %v1788_v53  ;;  %v1860_v53 = vld [vmem:[%s2294_s1 + $0x308] sm:$0xff]  }
  0x34   :  { %1601 = vmatprep.subr.bf16.mxu0 %v1791_v56  ;;  %v1864_v56 = vld [vmem:[%s2294_s1 + $0x310] sm:$0xff]  }
  0x35   :  { %1628 = vmatpush3.bf16.msra.mxu1 %v1790_v55  ;;  %v1863_v55 = vld [vmem:[%s2295_s0 + $0x88] ss:$52 sps:$4 sm:$0xff]  }
  0x36   :  { %1629 = vmatprep.subr.bf16.mxu1 %v1796_v60  ;;  %v1869_v60 = vld [vmem:[%s2294_s1 + $0x320] sm:$0xff]  }
  0x37   :  { %1602 = vmatpush3.bf16.msra.mxu0 %v1794_v58  ;;  %v1868_v58 = vld [vmem:[%s2294_s1 + $0x318] sm:$0xff]  }
  0x38   :  { %1603 = vmatprep.subr.bf16.mxu0 %v1801_v0  ;;  %v1872_v0 = vld [vmem:[%s2294_s1 + $0x338] sm:$0xff]  }
  0x39   :  { %1630 = vmatpush3.bf16.msra.mxu1 %v1799_v62  ;;  %v1870_v62 = vld [vmem:[%s2294_s1 + $0x328] sm:$0xff]  }
  0x3a   :  { %1631 = vmatprep.subr.bf16.mxu1 %v1803_v2 }
  0x3b   :  { %1604 = vmatpush3.bf16.msra.mxu0 %v1802_v1  ;;  %v1874_v1 = vld [vmem:[%s2295_s0 + $0x98] ss:$52 sps:$4 sm:$0xff]  }
  0x3c   :  { %1605 = vmatprep.subr.bf16.mxu0 %v1805_v4 }
  0x3d   :  { %1632 = vmatpush3.bf16.msra.mxu1 %v1804_v3  ;;  %v1385_v3 = vld [vmem:[%s2296_s2] ss:$0 sm:$0xff] }
  0x3e   :  { %1633 = vmatprep.subr.bf16.mxu1 %v1807_v6 }
  0x3f   :  { %1606 = vmatpush3.bf16.msra.mxu0 %v1806_v5 }
  0x40   :  { %1647 = vmatprep.subr.bf16.mxu0 %v1812_v10 }
  0x41   :  { %1634 = vmatpush3.bf16.msra.mxu1 %v1811_v9 }
  0x42   :  { %1145 = vmatmul.mubr.bf16.vlgmr.msra.gmra.mrb[8].mxu0 %v1808_v7  ;;  %1675 = vmatprep.subr.bf16.mxu1 %v1817_v14 }
  0x43   :  { %1648 = vmatpush3.bf16.msra.mxu0 %v1816_v13  ;;  %1152 = vmatprep.mubr.bf16.mxu0 %v1822_v19 }
  0x44   :  { %1194 = vmatmul.mubr.bf16.vlgmr.msra.gmra.mrb[8].mxu1 %v1813_v11  ;;  %1649 = vmatprep.subr.bf16.mxu0 %v1819_v16 }
  0x45   :  { %1676 = vmatpush3.bf16.msra.mxu1 %v1818_v15  ;;  %1201 = vmatprep.mubr.bf16.mxu1 %v1827_v23 }
  0x46   :  { %1677 = vmatprep.subr.bf16.mxu1 %v1821_v18 }
  0x47   :  { %1650 = vmatpush3.bf16.msra.mxu0 %v1820_v17 }
  0x48   :  { %1651 = vmatprep.subr.bf16.mxu0 %v1826_v22 }
  0x49   :  { %1678 = vmatpush3.bf16.msra.mxu1 %v1824_v20 }
  0x4a   :  { %1153 = vmatmul.mubr.bf16.gmra.mrb[12].mxu0 %v1825_v21  ;;  %1679 = vmatprep.subr.bf16.mxu1 %v1831_v26 }
  0x4b   :  { %1652 = vmatpush3.bf16.msra.mxu0 %v1829_v24  ;;  %1242 = vmatprep.mubr.bf16.mxu0 %v1854_v48 }
  0x4c   :  { %1202 = vmatmul.mubr.bf16.gmra.mrb[12].mxu1 %v1830_v25  ;;  %1653 = vmatprep.subr.bf16.mxu0 %v1833_v28 }
  0x4d   :  { %1680 = vmatpush3.bf16.msra.mxu1 %v1832_v27  ;;  %1291 = vmatprep.mubr.bf16.mxu1 %v1859_v52 }
  0x4e   :  { %1681 = vmatprep.subr.bf16.mxu1 %v1835_v30 }
  0x4f   :  { %1654 = vmatpush3.bf16.msra.mxu0 %v1834_v29 }
  0x50   :  { %1655 = vmatprep.subr.bf16.mxu0 %v1837_v32 }
  0x51   :  { %1682 = vmatpush3.bf16.msra.mxu1 %v1836_v31 }
  0x52   :  { %1683 = vmatprep.subr.bf16.mxu1 %v1839_v34 }
  0x53   :  { %1656 = vmatpush3.bf16.msra.mxu0 %v1838_v33 }
  0x54   :  { %1657 = vmatprep.subr.bf16.mxu0 %v1841_v36 }
  0x55   :  { %1684 = vmatpush3.bf16.msra.mxu1 %v1840_v35 }
  0x56   :  { %1685 = vmatprep.subr.bf16.mxu1 %v1843_v38 }
  0x57   :  { %1658 = vmatpush3.bf16.msra.mxu0 %v1842_v37 }
  0x58   :  { %1659 = vmatprep.subr.bf16.mxu0 %v1845_v40 }
  0x59   :  { %1686 = vmatpush3.bf16.msra.mxu1 %v1844_v39 }
  0x5a   :  { %1687 = vmatprep.subr.bf16.mxu1 %v1847_v42 }
  0x5b   :  { %1660 = vmatpush3.bf16.msra.mxu0 %v1846_v41 }
  0x5c   :  { %1661 = vmatprep.subr.bf16.mxu0 %v1849_v44 }
  0x5d   :  { %1688 = vmatpush3.bf16.msra.mxu1 %v1848_v43 }
  0x5e   :  { %1689 = vmatprep.subr.bf16.mxu1 %v1851_v46 }
  0x5f   :  { %1662 = vmatpush3.bf16.msra.mxu0 %v1850_v45 }
  0x60   :  { %1713 = vmatprep.subr.bf16.mxu0 %v1856_v50 }
  0x61   :  { %1690 = vmatpush3.bf16.msra.mxu1 %v1855_v49 }
  0x62   :  { %1243 = vmatmul.mubr.bf16.vlgmr.msra.gmra.mrb[16].mxu0 %v1852_v47 }
  0x63   :  { %1714 = vmatpush3.bf16.msra.mxu0 %v1856_v50  ;;  %1250 = vmatprep.mubr.bf16.mxu0 %v1861_v54 }
  0x64   :  { %1292 = vmatmul.mubr.bf16.vlgmr.msra.gmra.mrb[16].mxu1 %v1857_v51  ;;  %1715 = vmatprep.subr.bf16.mxu0 %v1860_v53 }
  0x65   :  { %1299 = vmatprep.mubr.bf16.mxu1 %v1865_v57 }
  0x67   :  { %1716 = vmatpush3.bf16.msra.mxu0 %v1860_v53 }
  0x68   :  { %1717 = vmatprep.subr.bf16.mxu0 %v1864_v56 }
  0x6a   :  { %1251 = vmatmul.mubr.bf16.gmra.mrb[20].mxu0 %v1863_v55 }
  0x6b   :  { %1718 = vmatpush3.bf16.msra.mxu0 %v1864_v56  ;;  %1729 = vmatprep.mubr.bf16.mxu0 %v1873_v61 }
  0x6c   :  { %1719 = vmatprep.subr.bf16.mxu0 %v1868_v58  ;;  %1300 = vmatmul.mubr.bf16.gmra.mrb[20].mxu1 %v1867_v59 }
  0x6f   :  { %1720 = vmatpush3.bf16.msra.mxu0 %v1868_v58 }
  0x70   :  { %1721 = vmatprep.subr.bf16.mxu0 %v1869_v60 }
  0x73   :  { %1722 = vmatpush3.bf16.msra.mxu0 %v1869_v60 }
  0x74   :  { %1723 = vmatprep.subr.bf16.mxu0 %v1870_v62 }
  0x77   :  { %1724 = vmatpush3.bf16.msra.mxu0 %v1870_v62 }
  0x78   :  { %1725 = vmatprep.subr.bf16.mxu0 %v1871_v63 }
  0x7b   :  { %1726 = vmatpush3.bf16.msra.mxu0 %v1871_v63 }
  0x7c   :  { %1727 = vmatprep.subr.bf16.mxu0 %v1872_v0 }
  0x7f   :  { %1728 = vmatpush3.bf16.msra.mxu0 %v1872_v0 }
  0x82   :  { %1730 = vmatmul.mubr.bf16.vlgmr.msra.gmra.mrb[24].mxu0 %v1874_v1 }
  0xf5   :  { %v1551_v2 = vpop.f32.mrb[0].mxu0 }
  0xf6   :  { %v1552_v4 = vpop.f32.mrb[1].mxu0 }
  0xf7   :  { %v1553_v5 = vadd.f32 %v1552_v4, %v1551_v2  ;;  %v1554_v6 = vpop.f32.mrb[2].mxu0  ;;  %v1579_v7 = vpop.f32.mrb[0].mxu1 }
  0xf8   :  { %v1555_v8 = vpop.f32.mrb[3].mxu0  ;;  %v1580_v11 = vpop.f32.mrb[1].mxu1 }
  0xf9   :  { %v1049_v9 = vadd.f32 %v1553_v5, %v1385_v3  ;;  %v1556_v10 = vadd.f32 %v1555_v8, %v1554_v6  ;;  %v1581_v12 = vadd.f32 %v1580_v11, %v1579_v7  ;;  %v1582_v13 = vpop.f32.mrb[2].mxu1 }
  0xfa   :  { %v1583_v15 = vpop.f32.mrb[3].mxu1 }
  0xfb   :  { %v1052_v14 = vadd.f32 %v1556_v10, %v1385_v3  ;;  %v1098_v16 = vadd.f32 %v1581_v12, %v1049_v9  ;;  %v1584_v17 = vadd.f32 %v1583_v15, %v1582_v13 }
  0xfd   :  { %v1101_v18 = vadd.f32 %v1584_v17, %v1052_v14  ;;  %v1557_v19 = vpop.f32.mrb[4].mxu0 }
  0xfe   :  { %v1558_v20 = vpop.f32.mrb[5].mxu0 }
  0xff   :  { %v1559_v21 = vadd.f32 %v1558_v20, %v1557_v19  ;;  %v1560_v22 = vpop.f32.mrb[6].mxu0  ;;  %v1585_v23 = vpop.f32.mrb[4].mxu1 }
 0x100   :  { %v1561_v24 = vpop.f32.mrb[7].mxu0  ;;  %v1586_v27 = vpop.f32.mrb[5].mxu1 }
 0x101   :  { %v1057_v25 = vadd.f32 %v1559_v21, %v1385_v3  ;;  %v1562_v26 = vadd.f32 %v1561_v24, %v1560_v22  ;;  %v1587_v28 = vadd.f32 %v1586_v27, %v1585_v23  ;;  %v1588_v29 = vpop.f32.mrb[6].mxu1 }
 0x102   :  { %v1589_v31 = vpop.f32.mrb[7].mxu1 }
 0x103   :  { %v1060_v30 = vadd.f32 %v1562_v26, %v1385_v3  ;;  %v1106_v32 = vadd.f32 %v1587_v28, %v1057_v25  ;;  %v1590_v33 = vadd.f32 %v1589_v31, %v1588_v29 }
 0x105   :  { %v1109_v34 = vadd.f32 %v1590_v33, %v1060_v30 }
 0x115   :  { %v1607_v35 = vpop.f32.mrb[8].mxu0 }
 0x116   :  { %v1608_v36 = vpop.f32.mrb[9].mxu0 }
 0x117   :  { %v1609_v37 = vadd.f32 %v1608_v36, %v1607_v35  ;;  %v1610_v38 = vpop.f32.mrb[10].mxu0  ;;  %v1635_v39 = vpop.f32.mrb[8].mxu1 }
 0x118   :  { %v1611_v40 = vpop.f32.mrb[11].mxu0  ;;  %v1636_v43 = vpop.f32.mrb[9].mxu1 }
 0x119   :  { %v1147_v41 = vadd.f32 %v1609_v37, %v1098_v16  ;;  %v1612_v42 = vadd.f32 %v1611_v40, %v1610_v38  ;;  %v1637_v44 = vadd.f32 %v1636_v43, %v1635_v39  ;;  %v1638_v45 = vpop.f32.mrb[10].mxu1 }
 0x11a   :  { %v1639_v47 = vpop.f32.mrb[11].mxu1 }
 0x11b   :  { %v1150_v46 = vadd.f32 %v1612_v42, %v1101_v18  ;;  %v1196_v48 = vadd.f32 %v1637_v44, %v1147_v41  ;;  %v1640_v49 = vadd.f32 %v1639_v47, %v1638_v45 }
 0x11d   :  { %v1199_v50 = vadd.f32 %v1640_v49, %v1150_v46  ;;  %v1613_v51 = vpop.f32.mrb[12].mxu0 }
 0x11e   :  { %v1614_v52 = vpop.f32.mrb[13].mxu0 }
 0x11f   :  { %v1615_v53 = vadd.f32 %v1614_v52, %v1613_v51  ;;  %v1616_v54 = vpop.f32.mrb[14].mxu0  ;;  %v1641_v55 = vpop.f32.mrb[12].mxu1 }
 0x120   :  { %v1617_v56 = vpop.f32.mrb[15].mxu0  ;;  %v1642_v59 = vpop.f32.mrb[13].mxu1 }
 0x121   :  { %v1155_v57 = vadd.f32 %v1615_v53, %v1106_v32  ;;  %v1618_v58 = vadd.f32 %v1617_v56, %v1616_v54  ;;  %v1643_v60 = vadd.f32 %v1642_v59, %v1641_v55  ;;  %v1644_v61 = vpop.f32.mrb[14].mxu1 }
 0x122   :  { %v1645_v63 = vpop.f32.mrb[15].mxu1 }
 0x123   :  { %v1158_v62 = vadd.f32 %v1618_v58, %v1109_v34  ;;  %v1204_v0 = vadd.f32 %v1643_v60, %v1155_v57  ;;  %v1646_v1 = vadd.f32 %v1645_v63, %v1644_v61 }
 0x125   :  { %v1207_v2 = vadd.f32 %v1646_v1, %v1158_v62 }
 0x135   :  { %v1663_v3 = vpop.f32.mrb[16].mxu0 }
 0x136   :  { %v1664_v4 = vpop.f32.mrb[17].mxu0 }
 0x137   :  { %v1665_v5 = vadd.f32 %v1664_v4, %v1663_v3  ;;  %v1666_v6 = vpop.f32.mrb[18].mxu0  ;;  %v1691_v9 = vpop.f32.mrb[16].mxu1 }
 0x138   :  { %v1667_v7 = vpop.f32.mrb[19].mxu0  ;;  %v1692_v11 = vpop.f32.mrb[17].mxu1 }
 0x139   :  { %v1245_v8 = vadd.f32 %v1665_v5, %v1196_v48  ;;  %v1668_v10 = vadd.f32 %v1667_v7, %v1666_v6  ;;  %v1693_v13 = vadd.f32 %v1692_v11, %v1691_v9  ;;  %v1694_v14 = vpop.f32.mrb[18].mxu1 }
 0x13a   :  { %v1695_v15 = vpop.f32.mrb[19].mxu1 }
 0x13b   :  { %v1248_v12 = vadd.f32 %v1668_v10, %v1199_v50  ;;  %v1696_v16 = vadd.f32 %v1695_v15, %v1694_v14  ;;  %v1294_v18 = vadd.f32 %v1693_v13, %v1245_v8 }
 0x13d   :  { %v1669_v17 = vpop.f32.mrb[20].mxu0  ;;  %v1297_v22 = vadd.f32 %v1696_v16, %v1248_v12 }
 0x13e   :  { %v1670_v19 = vpop.f32.mrb[21].mxu0 }
 0x13f   :  { %v1671_v20 = vadd.f32 %v1670_v19, %v1669_v17  ;;  %v1672_v21 = vpop.f32.mrb[22].mxu0  ;;  %v1697_v25 = vpop.f32.mrb[20].mxu1 }
 0x140   :  { %v1673_v23 = vpop.f32.mrb[23].mxu0  ;;  %v1698_v27 = vpop.f32.mrb[21].mxu1 }
 0x141   :  { %v1253_v24 = vadd.f32 %v1671_v20, %v1204_v0  ;;  %v1674_v26 = vadd.f32 %v1673_v23, %v1672_v21  ;;  %v1699_v29 = vadd.f32 %v1698_v27, %v1697_v25  ;;  %v1700_v30 = vpop.f32.mrb[22].mxu1 }
 0x142   :  { %v1701_v31 = vpop.f32.mrb[23].mxu1 }
 0x143   :  { %v1256_v28 = vadd.f32 %v1674_v26, %v1207_v2  ;;  %v1702_v32 = vadd.f32 %v1701_v31, %v1700_v30  ;;  %v1302_v33 = vadd.f32 %v1699_v29, %v1253_v24 }
 0x145   :  { %v1305_v34 = vadd.f32 %v1702_v32, %v1256_v28 }
 0x155   :  { %v1731_v35 = vpop.f32.mrb[24].mxu0 }
 0x156   :  { %v1351_v36 = vadd.f32 %v1731_v35, %v1302_v33  ;;  %v1342_v37 = vpop.f32.mrb[25].mxu0 }
 0x157   :  { %v1343_v38 = vadd.f32 %v1342_v37, %v1294_v18  ;;  %v1732_v39 = vpop.f32.mrb[26].mxu0 }
 0x158   :  { %v1354_v40 = vadd.f32 %v1732_v39, %v1305_v34  ;;  %v1345_v41 = vpop.f32.mrb[27].mxu0  ;;  %v1359_v43 = vmax.f32 %v1351_v36, 0.0 }
 0x159   :  { %v1346_v42 = vadd.f32 %v1345_v41, %v1297_v22  ;;  %v1357_v45 = vmax.f32 %v1343_v38, 0.0 }
 0x15a   :  { %v1360_v44 = vmax.f32 %v1354_v40, 0.0 }
 0x15b   :  { %v1358_v46 = vmax.f32 %v1346_v42, 0.0 }
 0x15c   :  { %v1532_v47 = vpack.c.bf16 %v1360_v44, %v1359_v43 }
 0x15d   :  { %v1527_v48 = vpack.c.bf16 %v1358_v46, %v1357_v45 }
 0x15e   :  { %1534 = vst [vmem:[%s2297_s3 + $0x8] sm:$0xff] %v1532_v47  }
 0x15f   :  { %1528 = vst [vmem:[%s2297_s3] sm:$0xff] %v1527_v48  }

// kernel: forward.11
= control target key start
LH: loop header
LB: loop body
LE: loop exit
PB: predicated region body
PF: predicated region fallthrough
CT: control target
= control target key end

     0   :  { %s1099_s1 = inlined_call_operand.vmem [shape: bf16[512,256], index: 1, kind: input, shape index: {}]   ;;  %s1100_s0 = inlined_call_operand.vmem [shape: bf16[32,512], index: 0, kind: input, shape index: {}]   ;;  %s1101_s2 = inlined_call_operand.vmem [shape: f32[1,256], index: 2, kind: input, shape index: {}]   ;;  %s1102_s3 = inlined_call_operand.vmem [shape: bf16[32,256], index: 3, kind: input, shape index: {}]   ;;  %s1103_s4 = inlined_call_operand.vmem [shape: bf16[32,256], index: 4, kind: output, shape index: {}]  }
   0x1   :  { %v723_v0 = vld [vmem:[%s1099_s1 + $0x4] ss:$8 sps:$4 sm:$0xff]   ;;  %v727_v2 = vld [vmem:[%s1099_s1] ss:$8 sps:$4 sm:$0xff]   ;;  %v729_v4 = vld [vmem:[%s1099_s1 + $0x14] ss:$8 sps:$4 sm:$0xff]  }
   0x2   :  { %v725_v1 = vld [vmem:[%s1099_s1 + $0x104] ss:$8 sps:$4 sm:$0xff]   ;;  %461 = vmatprep.subr.bf16.mxu1 %v723_v0  ;;  %v728_v3 = vld [vmem:[%s1099_s1 + $0x100] ss:$8 sps:$4 sm:$0xff]   ;;  %v731_v5 = vld [vmem:[%s1099_s1 + $0x114] ss:$8 sps:$4 sm:$0xff]  }
   0x3   :  { %514 = vmatprep.subr.bf16.mxu0 %v725_v1  ;;  %462 = vmatpush1.bf16.msra.mxu1 %v727_v2  ;;  %v733_v6 = vld [vmem:[%s1099_s1 + $0x10] ss:$8 sps:$4 sm:$0xff]   ;;  %v735_v8 = vld [vmem:[%s1099_s1 + $0x24] ss:$8 sps:$4 sm:$0xff]   ;;  %v739_v10 = vld [vmem:[%s1099_s1 + $0x20] ss:$8 sps:$4 sm:$0xff]  }
   0x4   :  { %515 = vmatpush1.bf16.msra.mxu0 %v728_v3  ;;  %463 = vmatprep.subr.bf16.mxu1 %v729_v4  ;;  %v734_v7 = vld [vmem:[%s1099_s1 + $0x110] ss:$8 sps:$4 sm:$0xff]   ;;  %v737_v9 = vld [vmem:[%s1099_s1 + $0x124] ss:$8 sps:$4 sm:$0xff]   ;;  %v740_v11 = vld [vmem:[%s1099_s1 + $0x120] ss:$8 sps:$4 sm:$0xff]  }
   0x5   :  { %516 = vmatprep.subr.bf16.mxu0 %v731_v5  ;;  %v741_v12 = vld [vmem:[%s1099_s1 + $0x34] ss:$8 sps:$4 sm:$0xff]   ;;  %v745_v14 = vld [vmem:[%s1099_s1 + $0x30] ss:$8 sps:$4 sm:$0xff]   ;;  %v747_v16 = vld [vmem:[%s1099_s1 + $0x44] ss:$8 sps:$4 sm:$0xff]  }
   0x6   :  { %v743_v13 = vld [vmem:[%s1099_s1 + $0x134] ss:$8 sps:$4 sm:$0xff]   ;;  %v746_v15 = vld [vmem:[%s1099_s1 + $0x130] ss:$8 sps:$4 sm:$0xff]   ;;  %v749_v17 = vld [vmem:[%s1099_s1 + $0x144] ss:$8 sps:$4 sm:$0xff]  }
   0x7   :  { %464 = vmatpush1.bf16.msra.mxu1 %v733_v6  ;;  %v751_v18 = vld [vmem:[%s1099_s1 + $0x40] ss:$8 sps:$4 sm:$0xff]   ;;  %v753_v20 = vld [vmem:[%s1099_s1 + $0x54] ss:$8 sps:$4 sm:$0xff]   ;;  %v757_v22 = vld [vmem:[%s1099_s1 + $0x50] ss:$8 sps:$4 sm:$0xff]  }
   0x8   :  { %517 = vmatpush1.bf16.msra.mxu0 %v734_v7  ;;  %465 = vmatprep.subr.bf16.mxu1 %v735_v8  ;;  %v752_v19 = vld [vmem:[%s1099_s1 + $0x140] ss:$8 sps:$4 sm:$0xff]   ;;  %v755_v21 = vld [vmem:[%s1099_s1 + $0x154] ss:$8 sps:$4 sm:$0xff]   ;;  %v758_v23 = vld [vmem:[%s1099_s1 + $0x150] ss:$8 sps:$4 sm:$0xff]   ;;  %v91_v8 = vlaneseq }
   0x9   :  { %518 = vmatprep.subr.bf16.mxu0 %v737_v9  ;;  %v759_v24 = vld [vmem:[%s1099_s1 + $0x64] ss:$8 sps:$4 sm:$0xff]   ;;  %v763_v26 = vld [vmem:[%s1099_s1 + $0x60] ss:$8 sps:$4 sm:$0xff]   ;;  %v765_v28 = vld [vmem:[%s1099_s1 + $0x74] ss:$8 sps:$4 sm:$0xff]  }
   0xa   :  { %v761_v25 = vld [vmem:[%s1099_s1 + $0x164] ss:$8 sps:$4 sm:$0xff]   ;;  %v764_v27 = vld [vmem:[%s1099_s1 + $0x160] ss:$8 sps:$4 sm:$0xff]   ;;  %v767_v29 = vld [vmem:[%s1099_s1 + $0x174] ss:$8 sps:$4 sm:$0xff]  }
   0xb   :  { %466 = vmatpush1.bf16.msra.mxu1 %v739_v10  ;;  %v769_v30 = vld [vmem:[%s1099_s1 + $0x70] ss:$8 sps:$4 sm:$0xff]   ;;  %v771_v32 = vld [vmem:[%s1099_s1 + $0x84] ss:$8 sps:$4 sm:$0xff]   ;;  %v775_v34 = vld [vmem:[%s1099_s1 + $0x80] ss:$8 sps:$4 sm:$0xff]  }
   0xc   :  { %519 = vmatpush1.bf16.msra.mxu0 %v740_v11  ;;  %467 = vmatprep.subr.bf16.mxu1 %v741_v12  ;;  %v770_v31 = vld [vmem:[%s1099_s1 + $0x170] ss:$8 sps:$4 sm:$0xff]   ;;  %v773_v33 = vld [vmem:[%s1099_s1 + $0x184] ss:$8 sps:$4 sm:$0xff]   ;;  %v776_v35 = vld [vmem:[%s1099_s1 + $0x180] ss:$8 sps:$4 sm:$0xff]  }
   0xd   :  { %520 = vmatprep.subr.bf16.mxu0 %v743_v13  ;;  %v777_v36 = vld [vmem:[%s1099_s1 + $0x94] ss:$8 sps:$4 sm:$0xff]   ;;  %v781_v38 = vld [vmem:[%s1099_s1 + $0x90] ss:$8 sps:$4 sm:$0xff]   ;;  %v783_v40 = vld [vmem:[%s1099_s1 + $0xa4] ss:$8 sps:$4 sm:$0xff]  }
   0xe   :  { %v779_v37 = vld [vmem:[%s1099_s1 + $0x194] ss:$8 sps:$4 sm:$0xff]   ;;  %v782_v39 = vld [vmem:[%s1099_s1 + $0x190] ss:$8 sps:$4 sm:$0xff]   ;;  %v785_v41 = vld [vmem:[%s1099_s1 + $0x1a4] ss:$8 sps:$4 sm:$0xff]  }
   0xf   :  { %468 = vmatpush1.bf16.msra.mxu1 %v745_v14  ;;  %v787_v42 = vld [vmem:[%s1099_s1 + $0xa0] ss:$8 sps:$4 sm:$0xff]   ;;  %v789_v44 = vld [vmem:[%s1099_s1 + $0xb4] ss:$8 sps:$4 sm:$0xff]   ;;  %v793_v46 = vld [vmem:[%s1099_s1 + $0xb0] ss:$8 sps:$4 sm:$0xff]  }
  0x10   :  { %521 = vmatpush1.bf16.msra.mxu0 %v746_v15  ;;  %469 = vmatprep.subr.bf16.mxu1 %v747_v16  ;;  %v788_v43 = vld [vmem:[%s1099_s1 + $0x1a0] ss:$8 sps:$4 sm:$0xff]   ;;  %v791_v45 = vld [vmem:[%s1099_s1 + $0x1b4] ss:$8 sps:$4 sm:$0xff]   ;;  %v794_v47 = vld [vmem:[%s1099_s1 + $0x1b0] ss:$8 sps:$4 sm:$0xff]  }
  0x11   :  { %522 = vmatprep.subr.bf16.mxu0 %v749_v17  ;;  %v795_v48 = vld [vmem:[%s1099_s1 + $0xc4] ss:$8 sps:$4 sm:$0xff]   ;;  %v799_v52 = vld [vmem:[%s1099_s1 + $0xc0] ss:$8 sps:$4 sm:$0xff]   ;;  %v801_v54 = vld [vmem:[%s1099_s1 + $0xd4] ss:$8 sps:$4 sm:$0xff]  }
  0x12   :  { %v821_v49 = vld [vmem:[%s1100_s0 + $0x4] ss:$16 sps:$4 sm:$0xff]   ;;  %v824_v51 = vld [vmem:[%s1100_s0 + $0xc] ss:$16 sps:$4 sm:$0xff]   ;;  %v800_v53 = vld [vmem:[%s1099_s1 + $0x1c0] ss:$8 sps:$4 sm:$0xff]  }
  0x13   :  { %470 = vmatpush1.bf16.msra.mxu1 %v751_v18  ;;  %v797_v50 = vld [vmem:[%s1099_s1 + $0x1c4] ss:$8 sps:$4 sm:$0xff]   ;;  %493 = vmatprep.mubr.bf16.mxu1 %v821_v49  ;;  %v803_v55 = vld [vmem:[%s1099_s1 + $0x1d4] ss:$8 sps:$4 sm:$0xff]   ;;  %v805_v56 = vld [vmem:[%s1099_s1 + $0xd0] ss:$8 sps:$4 sm:$0xff]  }
  0x14   :  { %523 = vmatpush1.bf16.msra.mxu0 %v752_v19  ;;  %471 = vmatprep.subr.bf16.mxu1 %v753_v20  ;;  %v806_v57 = vld [vmem:[%s1099_s1 + $0x1d0] ss:$8 sps:$4 sm:$0xff]   ;;  %v807_v58 = vld [vmem:[%s1099_s1 + $0xe4] ss:$8 sps:$4 sm:$0xff]   ;;  %v811_v60 = vld [vmem:[%s1099_s1 + $0xe0] ss:$8 sps:$4 sm:$0xff]  }
  0x15   :  { %524 = vmatprep.subr.bf16.mxu0 %v755_v21  ;;  %546 = vmatprep.mubr.bf16.mxu0 %v824_v51  ;;  %v809_v59 = vld [vmem:[%s1099_s1 + $0x1e4] ss:$8 sps:$4 sm:$0xff]   ;;  %v812_v61 = vld [vmem:[%s1099_s1 + $0x1e0] ss:$8 sps:$4 sm:$0xff]   ;;  %v813_v62 = vld [vmem:[%s1099_s1 + $0xf4] ss:$8 sps:$4 sm:$0xff]  }
  0x16   :  { %v815_v63 = vld [vmem:[%s1099_s1 + $0x1f4] ss:$8 sps:$4 sm:$0xff]   ;;  %v817_v0 = vld [vmem:[%s1099_s1 + $0xf0] ss:$8 sps:$4 sm:$0xff]   ;;  %v92_v9 = vshrl.u32 %v91_v8, 7  ;;  %v575_v17 = vld [vmem:[%s1102_s3] sm:$0xff] }
  0x17   :  { %472 = vmatpush1.bf16.msra.mxu1 %v757_v22  ;;  %v818_v1 = vld [vmem:[%s1099_s1 + $0x1f0] ss:$8 sps:$4 sm:$0xff]   ;;  %v825_v4 = vld [vmem:[%s1100_s0 + $0x24] ss:$16 sps:$4 sm:$0xff]   ;;  %v827_v5 = vld [vmem:[%s1100_s0 + $0x2c] ss:$16 sps:$4 sm:$0xff]  }
  0x18   :  { %525 = vmatpush1.bf16.msra.mxu0 %v758_v23  ;;  %473 = vmatprep.subr.bf16.mxu1 %v759_v24  ;;  %v819_v2 = vld [vmem:[%s1100_s0] ss:$16 sps:$4 sm:$0xff]   ;;  %v822_v3 = vld [vmem:[%s1100_s0 + $0x8] ss:$16 sps:$4 sm:$0xff]   ;;  %v93_v10 = vsub.s32 0, %v92_v9  ;;  %v97_v12 = vsub.s32 1, %v92_v9 }
  0x19   :  { %526 = vmatprep.subr.bf16.mxu0 %v761_v25  ;;  %v829_v6 = vld [vmem:[%s1100_s0 + $0x20] ss:$16 sps:$4 sm:$0xff]   ;;  %v830_v7 = vld [vmem:[%s1100_s0 + $0x28] ss:$16 sps:$4 sm:$0xff]  }
  0x1a   :  { %v89_v11 = vld [vmem:[%s1101_s2] sm:$0x3]  ;;  %v576_v24 = vld [vmem:[%s1102_s3 + $0x8] sm:$0xff] }
  0x1b   :  { %474 = vmatpush1.bf16.msra.mxu1 %v763_v26  ;;  %v94_v13 = vrot.slane %v89_v11, %v93_v10  ;;  %v98_v14 = vrot.slane %v89_v11, %v97_v12  ;;  %v579_v26 = vunpack.c.l.bf16 %v575_v17 }
  0x1c   :  { %527 = vmatpush1.bf16.msra.mxu0 %v764_v27  ;;  %475 = vmatprep.subr.bf16.mxu1 %v765_v28 }
  0x1d   :  { %528 = vmatprep.subr.bf16.mxu0 %v767_v29 }
  0x1f   :  { %476 = vmatpush1.bf16.msra.mxu1 %v769_v30 }
  0x20   :  { %529 = vmatpush1.bf16.msra.mxu0 %v770_v31  ;;  %477 = vmatprep.subr.bf16.mxu1 %v771_v32  ;;  %v580_v31 = vunpack.c.h.bf16 %v575_v17 }
  0x21   :  { %530 = vmatprep.subr.bf16.mxu0 %v773_v33 }
  0x23   :  { %478 = vmatpush1.bf16.msra.mxu1 %v775_v34 }
  0x24   :  { %531 = vmatpush1.bf16.msra.mxu0 %v776_v35  ;;  %479 = vmatprep.subr.bf16.mxu1 %v777_v36  ;;  %v581_v35 = vunpack.c.l.bf16 %v576_v24 }
  0x25   :  { %532 = vmatprep.subr.bf16.mxu0 %v779_v37 }
  0x27   :  { %480 = vmatpush1.bf16.msra.mxu1 %v781_v38  ;;  %v582_v38 = vunpack.c.h.bf16 %v576_v24 }
  0x28   :  { %533 = vmatpush1.bf16.msra.mxu0 %v782_v39  ;;  %481 = vmatprep.subr.bf16.mxu1 %v783_v40 }
  0x29   :  { %534 = vmatprep.subr.bf16.mxu0 %v785_v41 }
  0x2b   :  { %482 = vmatpush1.bf16.msra.mxu1 %v787_v42 }
  0x2c   :  { %535 = vmatpush1.bf16.msra.mxu0 %v788_v43  ;;  %483 = vmatprep.subr.bf16.mxu1 %v789_v44 }
  0x2d   :  { %536 = vmatprep.subr.bf16.mxu0 %v791_v45  ;;  %v577_v45 = vld [vmem:[%s1102_s3 + $0x10] sm:$0xff] }
  0x2f   :  { %484 = vmatpush1.bf16.msra.mxu1 %v793_v46 }
  0x30   :  { %537 = vmatpush1.bf16.msra.mxu0 %v794_v47  ;;  %485 = vmatprep.subr.bf16.mxu1 %v795_v48 }
  0x31   :  { %538 = vmatprep.subr.bf16.mxu0 %v797_v50 }
  0x33   :  { %486 = vmatpush1.bf16.msra.mxu1 %v799_v52 }
  0x34   :  { %539 = vmatpush1.bf16.msra.mxu0 %v800_v53  ;;  %487 = vmatprep.subr.bf16.mxu1 %v801_v54 }
  0x35   :  { %540 = vmatprep.subr.bf16.mxu0 %v803_v55  ;;  %v578_v55 = vld [vmem:[%s1102_s3 + $0x18] sm:$0xff] }
  0x37   :  { %488 = vmatpush1.bf16.msra.mxu1 %v805_v56 }
  0x38   :  { %541 = vmatpush1.bf16.msra.mxu0 %v806_v57  ;;  %489 = vmatprep.subr.bf16.mxu1 %v807_v58  ;;  %v583_v57 = vunpack.c.l.bf16 %v577_v45 }
  0x39   :  { %542 = vmatprep.subr.bf16.mxu0 %v809_v59 }
  0x3b   :  { %490 = vmatpush1.bf16.msra.mxu1 %v811_v60 }
  0x3c   :  { %543 = vmatpush1.bf16.msra.mxu0 %v812_v61  ;;  %491 = vmatprep.subr.bf16.mxu1 %v813_v62 }
  0x3d   :  { %544 = vmatprep.subr.bf16.mxu0 %v815_v63  ;;  %v584_v63 = vunpack.c.h.bf16 %v577_v45 }
  0x3f   :  { %492 = vmatpush1.bf16.msra.mxu1 %v817_v0 }
  0x40   :  { %545 = vmatpush1.bf16.msra.mxu0 %v818_v1 }
  0x42   :  { %494 = vmatmul.mubr.bf16.vlgmr.msra.gmra.mrb[0].mxu1 %v819_v2 }
  0x43   :  { %547 = vmatmul.mubr.bf16.vlgmr.msra.gmra.mrb[0].mxu0 %v822_v3  ;;  %503 = vmatprep.mubr.bf16.mxu1 %v825_v4  ;;  %v585_v3 = vunpack.c.l.bf16 %v578_v55 }
  0x44   :  { %556 = vmatprep.mubr.bf16.mxu0 %v827_v5 }
  0x4a   :  { %504 = vmatmul.mubr.bf16.gmra.mrb[4].mxu1 %v829_v6  ;;  %v586_v6 = vunpack.c.h.bf16 %v578_v55 }
  0x4b   :  { %557 = vmatmul.mubr.bf16.gmra.mrb[4].mxu0 %v830_v7 }
 0x115   :  { %v495_v15 = vpop.f32.mrb[0].mxu1 }
 0x116   :  { %v548_v16 = vpop.f32.mrb[0].mxu0  ;;  %v496_v18 = vadd.f32 %v495_v15, %v94_v13  ;;  %v497_v19 = vpop.f32.mrb[1].mxu1 }
 0x117   :  { %v550_v20 = vpop.f32.mrb[1].mxu0  ;;  %v498_v21 = vadd.f32 %v497_v19, %v98_v14  ;;  %v499_v22 = vpop.f32.mrb[2].mxu1 }
 0x118   :  { %v552_v23 = vpop.f32.mrb[2].mxu0  ;;  %v549_v25 = vadd.f32 %v548_v16, %v496_v18  ;;  %v500_v27 = vadd.f32 %v499_v22, %v94_v13  ;;  %v501_v28 = vpop.f32.mrb[3].mxu1 }
 0x119   :  { %v554_v29 = vpop.f32.mrb[3].mxu0  ;;  %v551_v30 = vadd.f32 %v550_v20, %v498_v21  ;;  %v502_v32 = vadd.f32 %v501_v28, %v98_v14 }
 0x11a   :  { %v567_v33 = vmax.f32 %v549_v25, 0.0  ;;  %v553_v34 = vadd.f32 %v552_v23, %v500_v27 }
 0x11b   :  { %v568_v36 = vmax.f32 %v551_v30, 0.0  ;;  %v555_v37 = vadd.f32 %v554_v29, %v502_v32 }
 0x11c   :  { %v587_v39 = vadd.f32 %v579_v26, %v567_v33  ;;  %v569_v40 = vmax.f32 %v553_v34, 0.0 }
 0x11d   :  { %v588_v41 = vadd.f32 %v580_v31, %v568_v36  ;;  %v570_v42 = vmax.f32 %v555_v37, 0.0  ;;  %v505_v43 = vpop.f32.mrb[4].mxu1 }
 0x11e   :  { %v558_v44 = vpop.f32.mrb[4].mxu0  ;;  %v589_v46 = vadd.f32 %v581_v35, %v569_v40  ;;  %v506_v47 = vadd.f32 %v505_v43, %v94_v13  ;;  %v507_v48 = vpop.f32.mrb[5].mxu1 }
 0x11f   :  { %v560_v49 = vpop.f32.mrb[5].mxu0  ;;  %v703_v50 = vpack.c.bf16 %v588_v41, %v587_v39  ;;  %v590_v51 = vadd.f32 %v582_v38, %v570_v42  ;;  %v508_v52 = vadd.f32 %v507_v48, %v98_v14  ;;  %v509_v53 = vpop.f32.mrb[6].mxu1 }
 0x120   :  { %v562_v54 = vpop.f32.mrb[6].mxu0  ;;  %v559_v56 = vadd.f32 %v558_v44, %v506_v47  ;;  %v510_v58 = vadd.f32 %v509_v53, %v94_v13  ;;  %v511_v59 = vpop.f32.mrb[7].mxu1 }
 0x121   :  { %v564_v60 = vpop.f32.mrb[7].mxu0  ;;  %619 = vst [vmem:[%s1103_s4] sm:$0xff] %v703_v50  ;;  %v704_v61 = vpack.c.bf16 %v590_v51, %v589_v46  ;;  %v561_v62 = vadd.f32 %v560_v49, %v508_v52  ;;  %v512_v0 = vadd.f32 %v511_v59, %v98_v14 }
 0x122   :  { %v571_v1 = vmax.f32 %v559_v56, 0.0  ;;  %v563_v2 = vadd.f32 %v562_v54, %v510_v58 }
 0x123   :  { %620 = vst [vmem:[%s1103_s4 + $0x8] sm:$0xff] %v704_v61  ;;  %v572_v4 = vmax.f32 %v561_v62, 0.0  ;;  %v565_v5 = vadd.f32 %v564_v60, %v512_v0 }
 0x124   :  { %v591_v7 = vadd.f32 %v583_v57, %v571_v1  ;;  %v573_v8 = vmax.f32 %v563_v2, 0.0 }
 0x125   :  { %v592_v9 = vadd.f32 %v584_v63, %v572_v4  ;;  %v574_v10 = vmax.f32 %v565_v5, 0.0 }
 0x126   :  { %v593_v11 = vadd.f32 %v585_v3, %v573_v8 }
 0x127   :  { %v705_v12 = vpack.c.bf16 %v592_v9, %v591_v7  ;;  %v594_v13 = vadd.f32 %v586_v6, %v574_v10 }
 0x129   :  { %621 = vst [vmem:[%s1103_s4 + $0x10] sm:$0xff] %v705_v12  ;;  %v706_v14 = vpack.c.bf16 %v594_v13, %v593_v11 }
 0x12b   :  { %622 = vst [vmem:[%s1103_s4 + $0x18] sm:$0xff] %v706_v14 }

// kernel: forward.10
= control target key start
LH: loop header
LB: loop body
LE: loop exit
PB: predicated region body
PF: predicated region fallthrough
CT: control target
= control target key end

     0   :  { %vm64_vm0 = vcmask 261120   ;;  %vm9696_vm1 = vmmov 0   ;;  %vm6413_vm2 = vcmask 1041409   ;;  %s11488_s0 = inlined_call_operand.vmem [shape: bf16[32,128], index: 0, kind: input, shape index: {}]   ;;  %s11489_s1 = inlined_call_operand.vmem [shape: bf16[9,32,32], index: 1, kind: input, shape index: {}]   ;;  %s11490_s2 = inlined_call_operand.vmem [shape: bf16[4,9,128,128], index: 2, kind: input, shape index: {}]   ;;  %s11491_s3 = inlined_call_operand.vmem [shape: f32[4,1,128], index: 3, kind: input, shape index: {}]   ;;  %s11492_s4 = inlined_call_operand.vmem [shape: bf16[128,32], index: 4, kind: input, shape index: {}]   ;;  %s11493_s6 = inlined_call_operand.vmem [shape: bf16[32,128], index: 6, kind: input, shape index: {}]   ;;  %s11494_s5 = inlined_call_operand.vmem [shape: f32[1,32], index: 5, kind: input, shape index: {}]   ;;  %s11495_s7 = inlined_call_operand.vmem [shape: f32[1,128], index: 7, kind: input, shape index: {}]   ;;  %s11496_s8 = inlined_call_operand.vmem [shape: bf16[32,128], index: 8, kind: output, shape index: {}]  }
   0x1   :  { %v9746_v0 = vld [vmem:[%s11488_s0] sm:$0xff]   ;;  %v9751_v1 = vld [vmem:[%s11488_s0 + $0x8] sm:$0xff]   ;;  %v9337_v2 = vld [vmem:[%s11489_s1 + $0x10] sm:$0xff]  }
   0x2   :  { %8176 = vmatprep.subr.bf16.mxu1 %v9746_v0  ;;  %8180 = vmatprep.mubr.msk.bf16.mxu1 %vm64_vm0, %v9337_v2  ;;  %v9761_v3 = vld [vmem:[%s11489_s1] sm:$0xff]   ;;  %v9338_v4 = vld [vmem:[%s11489_s1 + $0x18] sm:$0xff]   ;;  %v9340_v5 = vld [vmem:[%s11489_s1 + $0x8] sm:$0xff]  }
   0x3   :  { %8177 = vmatpush3.bf16.msra.mxu1 %v9746_v0  ;;  %8168 = vmatprep.subr.bf16.mxu0 %v9746_v0  ;;  %v9341_v6 = vld [vmem:[%s11489_s1 + $0x20] sm:$0xff]   ;;  %v9342_v8 = vld [vmem:[%s11489_s1 + $0x28] sm:$0xff]   ;;  %v9343_v10 = vld [vmem:[%s11489_s1 + $0x30] sm:$0xff]  }
   0x4   :  { %8178 = vmatprep.subr.bf16.mxu1 %v9751_v1  ;;  %8169 = vmatpush3.bf16.msra.mxu0 %v9746_v0  ;;  %v9349_v7 = vld [vmem:[%s11490_s2 + $0x40] sm:$0xff]   ;;  %v9351_v9 = vld [vmem:[%s11490_s2 + $0x48] sm:$0xff]   ;;  %v9353_v11 = vld [vmem:[%s11490_s2 + $0x50] sm:$0xff]  }
   0x5   :  { %8170 = vmatprep.subr.bf16.mxu0 %v9751_v1  ;;  %8172 = vmatprep.mubr.msk.bf16.mxu0 %vm64_vm0, %v9761_v3  ;;  %v9344_v12 = vld [vmem:[%s11489_s1 + $0x38] sm:$0xff]   ;;  %v9345_v14 = vld [vmem:[%s11489_s1 + $0x40] sm:$0xff]   ;;  %v9356_v16 = vld [vmem:[%s11490_s2 + $0x68] sm:$0xff]  }
   0x6   :  { %v9354_v13 = vld [vmem:[%s11490_s2 + $0x58] sm:$0xff]   ;;  %v9355_v15 = vld [vmem:[%s11490_s2 + $0x60] sm:$0xff]   ;;  %v9346_v17 = vld [vmem:[%s11489_s1 + $0x48] sm:$0xff]  }
   0x7   :  { %8179 = vmatpush3.bf16.msra.mxu1 %v9751_v1  ;;  %v9347_v18 = vld [vmem:[%s11489_s1 + $0x50] sm:$0xff]   ;;  %v9348_v20 = vld [vmem:[%s11489_s1 + $0x58] sm:$0xff]   ;;  %v9350_v21 = vld [vmem:[%s11489_s1 + $0x60] sm:$0xff]  }
   0x8   :  { %8171 = vmatpush3.bf16.msra.mxu0 %v9751_v1  ;;  %8224 = vmatprep.subr.bf16.mxu1 %v9746_v0  ;;  %v9357_v19 = vld [vmem:[%s11490_s2 + $0x70] sm:$0xff]   ;;  %v9352_v22 = vld [vmem:[%s11489_s1 + $0x68] sm:$0xff]   ;;  %v9358_v23 = vld [vmem:[%s11490_s2 + $0x78] sm:$0xff]  }
   0x9   :  { %8184 = vmatprep.subr.bf16.mxu0 %v9349_v7  ;;  %v9359_v24 = vld [vmem:[%s11490_s2] sm:$0xff]   ;;  %v9360_v25 = vld [vmem:[%s11489_s1 + $0x70] sm:$0xff]   ;;  %v9362_v26 = vld [vmem:[%s11489_s1 + $0x78] sm:$0xff]  }
   0xa   :  { %8181 = vmatmul.mubr.msk.bf16.vlgmr.msra.gmra.mrb[0].mxu1 %vm64_vm0, %v9338_v4  ;;  %v9370_v27 = vld [vmem:[%s11489_s1 + $0x80] sm:$0xff]   ;;  %v9371_v28 = vld [vmem:[%s11489_s1 + $0x88] sm:$0xff]   ;;  %v9363_v43 = vld [vmem:[%s11490_s2 + $0x10] sm:$0xff]  }
   0xb   :  { %8173 = vmatmul.mubr.msk.bf16.vlgmr.msra.gmra.mrb[0].mxu0 %vm64_vm0, %v9340_v5  ;;  %8225 = vmatpush3.bf16.msra.mxu1 %v9746_v0  ;;  %v9361_v40 = vld [vmem:[%s11490_s2 + $0x8] sm:$0xff]   ;;  %v9364_v49 = vld [vmem:[%s11490_s2 + $0x18] sm:$0xff]   ;;  %v9365_v51 = vld [vmem:[%s11490_s2 + $0x20] sm:$0xff]  }
   0xc   :  { %8226 = vmatprep.subr.bf16.mxu1 %v9751_v1  ;;  %8228 = vmatprep.mubr.msk.bf16.mxu1 %vm64_vm0, %v9341_v6  ;;  %v9366_v57 = vld [vmem:[%s11490_s2 + $0x28] sm:$0xff]   ;;  %v9367_v59 = vld [vmem:[%s11490_s2 + $0x30] sm:$0xff]  }
   0xd   :  { %8185 = vmatpush3.bf16.msra.mxu0 %v9349_v7 }
   0xe   :  { %8186 = vmatprep.subr.bf16.mxu0 %v9351_v9 }
   0xf   :  { %8227 = vmatpush3.bf16.msra.mxu1 %v9751_v1 }
  0x10   :  { %8252 = vmatprep.subr.bf16.mxu1 %v9746_v0 }
  0x11   :  { %8187 = vmatpush3.bf16.msra.mxu0 %v9351_v9  ;;  %v9372_v9 = vld [vmem:[%s11490_s2 + $0x88] sm:$0xff]  }
  0x12   :  { %8229 = vmatmul.mubr.msk.bf16.vlgmr.msra.gmra.mrb[4].mxu1 %vm64_vm0, %v9342_v8  ;;  %8188 = vmatprep.subr.bf16.mxu0 %v9353_v11 }
  0x13   :  { %8253 = vmatpush3.bf16.msra.mxu1 %v9746_v0  ;;  %8256 = vmatprep.mubr.msk.bf16.mxu1 %vm64_vm0, %v9343_v10  ;;  %v9373_v10 = vld [vmem:[%s11490_s2 + $0x90] sm:$0xff]  }
  0x14   :  { %8254 = vmatprep.subr.bf16.mxu1 %v9751_v1 }
  0x15   :  { %8189 = vmatpush3.bf16.msra.mxu0 %v9353_v11  ;;  %v9374_v11 = vld [vmem:[%s11490_s2 + $0x98] sm:$0xff]  }
  0x16   :  { %8190 = vmatprep.subr.bf16.mxu0 %v9354_v13 }
  0x17   :  { %8255 = vmatpush3.bf16.msra.mxu1 %v9751_v1 }
  0x18   :  { %8280 = vmatprep.subr.bf16.mxu1 %v9746_v0 }
  0x19   :  { %8191 = vmatpush3.bf16.msra.mxu0 %v9354_v13  ;;  %v9376_v13 = vld [vmem:[%s11490_s2 + $0xa8] sm:$0xff]  }
  0x1a   :  { %8257 = vmatmul.mubr.msk.bf16.vlgmr.msra.gmra.mrb[8].mxu1 %vm64_vm0, %v9344_v12  ;;  %8192 = vmatprep.subr.bf16.mxu0 %v9355_v15  ;;  %v9375_v12 = vld [vmem:[%s11490_s2 + $0xa0] sm:$0xff]  }
  0x1b   :  { %8281 = vmatpush3.bf16.msra.mxu1 %v9746_v0  ;;  %8284 = vmatprep.mubr.msk.bf16.mxu1 %vm64_vm0, %v9345_v14  ;;  %v9377_v14 = vld [vmem:[%s11490_s2 + $0xb0] sm:$0xff]  }
  0x1c   :  { %8282 = vmatprep.subr.bf16.mxu1 %v9751_v1 }
  0x1d   :  { %8193 = vmatpush3.bf16.msra.mxu0 %v9355_v15 }
  0x1e   :  { %8194 = vmatprep.subr.bf16.mxu0 %v9356_v16 }
  0x1f   :  { %8283 = vmatpush3.bf16.msra.mxu1 %v9751_v1 }
  0x20   :  { %8308 = vmatprep.subr.bf16.mxu1 %v9746_v0 }
  0x21   :  { %8195 = vmatpush3.bf16.msra.mxu0 %v9356_v16  ;;  %v9378_v16 = vld [vmem:[%s11490_s2 + $0xb8] sm:$0xff]  }
  0x22   :  { %8285 = vmatmul.mubr.msk.bf16.vlgmr.msra.gmra.mrb[12].mxu1 %vm64_vm0, %v9346_v17  ;;  %8196 = vmatprep.subr.bf16.mxu0 %v9357_v19 }
  0x23   :  { %8309 = vmatpush3.bf16.msra.mxu1 %v9746_v0  ;;  %8312 = vmatprep.mubr.msk.bf16.mxu1 %vm64_vm0, %v9347_v18 }
  0x24   :  { %8310 = vmatprep.subr.bf16.mxu1 %v9751_v1 }
  0x25   :  { %8197 = vmatpush3.bf16.msra.mxu0 %v9357_v19 }
  0x26   :  { %8198 = vmatprep.subr.bf16.mxu0 %v9358_v23 }
  0x27   :  { %8311 = vmatpush3.bf16.msra.mxu1 %v9751_v1 }
  0x28   :  { %8336 = vmatprep.subr.bf16.mxu1 %v9746_v0 }
  0x29   :  { %8199 = vmatpush3.bf16.msra.mxu0 %v9358_v23  ;;  %v9380_v23 = vld [vmem:[%s11490_s2 + $0xc8] sm:$0xff]  }
  0x2a   :  { %8313 = vmatmul.mubr.msk.bf16.vlgmr.msra.gmra.mrb[16].mxu1 %vm64_vm0, %v9348_v20  ;;  %8204 = vmatprep.subr.bf16.mxu0 %v9359_v24 }
  0x2b   :  { %8337 = vmatpush3.bf16.msra.mxu1 %v9746_v0  ;;  %8340 = vmatprep.mubr.msk.bf16.mxu1 %vm64_vm0, %v9350_v21  ;;  %v9379_v21 = vld [vmem:[%s11490_s2 + $0xc0] sm:$0xff]  }
  0x2c   :  { %8338 = vmatprep.subr.bf16.mxu1 %v9751_v1 }
  0x2f   :  { %8339 = vmatpush3.bf16.msra.mxu1 %v9751_v1 }
  0x30   :  { %8364 = vmatprep.subr.bf16.mxu1 %v9746_v0 }
  0x32   :  { %8341 = vmatmul.mubr.msk.bf16.vlgmr.msra.gmra.mrb[20].mxu1 %vm64_vm0, %v9352_v22 }
  0x33   :  { %8365 = vmatpush3.bf16.msra.mxu1 %v9746_v0  ;;  %8368 = vmatprep.mubr.msk.bf16.mxu1 %vm64_vm0, %v9360_v25  ;;  %v9382_v25 = vld [vmem:[%s11490_s2 + $0xd8] sm:$0xff]  }
  0x34   :  { %8366 = vmatprep.subr.bf16.mxu1 %v9751_v1 }
  0x37   :  { %8367 = vmatpush3.bf16.msra.mxu1 %v9751_v1 }
  0x38   :  { %8392 = vmatprep.subr.bf16.mxu1 %v9746_v0 }
  0x3a   :  { %8369 = vmatmul.mubr.msk.bf16.vlgmr.msra.gmra.mrb[24].mxu1 %vm64_vm0, %v9362_v26  ;;  %v9383_v26 = vld [vmem:[%s11490_s2 + $0xe0] sm:$0xff]  }
  0x3b   :  { %8393 = vmatpush3.bf16.msra.mxu1 %v9746_v0  ;;  %8396 = vmatprep.mubr.msk.bf16.mxu1 %vm64_vm0, %v9370_v27  ;;  %v9384_v27 = vld [vmem:[%s11490_s2 + $0xe8] sm:$0xff]  }
  0x3c   :  { %8394 = vmatprep.subr.bf16.mxu1 %v9751_v1 }
  0x3f   :  { %8395 = vmatpush3.bf16.msra.mxu1 %v9751_v1  ;;  %v9368_v1 = vld [vmem:[%s11490_s2 + $0x38] sm:$0xff]  }
  0x42   :  { %8397 = vmatmul.mubr.msk.bf16.vlgmr.msra.gmra.mrb[28].mxu1 %vm64_vm0, %v9371_v28  ;;  %v9385_v28 = vld [vmem:[%s11490_s2 + $0xf0] sm:$0xff]  }
  0x43   :  { %8424 = vmatprep.mubr.msk.bf16.mxu1 %vm64_vm0, %v9761_v3  ;;  %v9369_v3 = vld [vmem:[%s11490_s2 + $0x80] sm:$0xff]  }
  0xdd   :  { %v8182_v29 = vpop.f32.mrb[0].mxu1 }
  0xde   :  { %v193_v30 = vpop.f32.mrb[1].mxu1  ;;  %v8174_v31 = vpop.f32.mrb[0].mxu0 }
  0xdf   :  { %v8183_v32 = vpop.f32.mrb[2].mxu1  ;;  %v105_v33 = vpop.f32.mrb[1].mxu0 }
  0xe0   :  { %v209_v34 = vpack.c.bf16 %v8183_v32, %v8182_v29  ;;  %v196_v35 = vpop.f32.mrb[3].mxu1  ;;  %v8175_v36 = vpop.f32.mrb[2].mxu0  ;;  %v9386_v29 = vld [vmem:[%s11490_s2 + $0xf8] sm:$0xff]  }
  0xe1   :  { %v208_v37 = vpack.c.bf16 %v196_v35, %v193_v30  ;;  %v121_v38 = vpack.c.bf16 %v8175_v36, %v8174_v31  ;;  %v108_v39 = vpop.f32.mrb[3].mxu0 }
  0xe2   :  { %v120_v41 = vpack.c.bf16 %v108_v39, %v105_v33  ;;  %v9387_v33 = vld [vmem:[%s11490_s2 + $0x100] sm:$0xff]   ;;  %v9390_v39 = vld [vmem:[%s11490_s2 + $0x118] sm:$0xff]  }
  0xe3   :  { %8200 = vmatprep.mubr.bf16.mxu0 %v208_v37  ;;  %v9388_v37 = vld [vmem:[%s11490_s2 + $0x108] sm:$0xff]  }
  0xe4   :  { %8201 = vmatmul.mubr.bf16.vlgmr.msra.gmra.mrb[4].mxu0 %v209_v34 }
  0xe5   :  { %8205 = vmatpush3.bf16.msra.mxu0 %v9359_v24  ;;  %8220 = vmatprep.mubr.bf16.mxu0 %v120_v41  ;;  %v9896_v42 = vpop.f32.mrb[4].mxu1  ;;  %v9381_v24 = vld [vmem:[%s11490_s2 + $0xd0] sm:$0xff]   ;;  %v9392_v41 = vld [vmem:[%s11490_s2 + $0x128] sm:$0xff]  }
  0xe6   :  { %8206 = vmatprep.subr.bf16.mxu0 %v9361_v40  ;;  %v476_v44 = vpop.f32.mrb[5].mxu1 }
  0xe7   :  { %v9901_v45 = vpop.f32.mrb[6].mxu1 }
  0xe8   :  { %v492_v46 = vpack.c.bf16 %v9901_v45, %v9896_v42  ;;  %v479_v47 = vpop.f32.mrb[7].mxu1  ;;  %v9393_v42 = vld [vmem:[%s11490_s2 + $0x130] sm:$0xff]  }
  0xe9   :  { %8207 = vmatpush3.bf16.msra.mxu0 %v9361_v40  ;;  %v491_v48 = vpack.c.bf16 %v479_v47, %v476_v44  ;;  %v9391_v40 = vld [vmem:[%s11490_s2 + $0x120] sm:$0xff]  }
  0xea   :  { %8208 = vmatprep.subr.bf16.mxu0 %v9363_v43 }
  0xed   :  { %8209 = vmatpush3.bf16.msra.mxu0 %v9363_v43  ;;  %v9908_v50 = vpop.f32.mrb[8].mxu1  ;;  %v9394_v43 = vld [vmem:[%s11490_s2 + $0x138] sm:$0xff]  }
  0xee   :  { %8210 = vmatprep.subr.bf16.mxu0 %v9364_v49  ;;  %v9913_v52 = vpop.f32.mrb[9].mxu1 }
  0xef   :  { %v9915_v53 = vpop.f32.mrb[10].mxu1 }
  0xf0   :  { %v682_v54 = vpack.c.bf16 %v9915_v53, %v9908_v50  ;;  %v9919_v55 = vpop.f32.mrb[11].mxu1  ;;  %v9398_v53 = vld [vmem:[%s11490_s2 + $0x158] sm:$0xff]  }
  0xf1   :  { %8211 = vmatpush3.bf16.msra.mxu0 %v9364_v49  ;;  %v681_v56 = vpack.c.bf16 %v9919_v55, %v9913_v52  ;;  %v9395_v49 = vld [vmem:[%s11490_s2 + $0x140] sm:$0xff]   ;;  %v9397_v52 = vld [vmem:[%s11490_s2 + $0x150] sm:$0xff]   ;;  %v9400_v55 = vld [vmem:[%s11490_s2 + $0x168] sm:$0xff]  }
  0xf2   :  { %8212 = vmatprep.subr.bf16.mxu0 %v9365_v51 }
  0xf5   :  { %8213 = vmatpush3.bf16.msra.mxu0 %v9365_v51  ;;  %v9926_v58 = vpop.f32.mrb[12].mxu1  ;;  %v9396_v51 = vld [vmem:[%s11490_s2 + $0x148] sm:$0xff]  }
  0xf6   :  { %8214 = vmatprep.subr.bf16.mxu0 %v9366_v57  ;;  %v9931_v60 = vpop.f32.mrb[13].mxu1 }
  0xf7   :  { %v9933_v61 = vpop.f32.mrb[14].mxu1 }
  0xf8   :  { %v872_v62 = vpack.c.bf16 %v9933_v61, %v9926_v58  ;;  %v9937_v63 = vpop.f32.mrb[15].mxu1  ;;  %v9403_v58 = vld [vmem:[%s11490_s2 + $0x180] sm:$0xff]   ;;  %v9406_v61 = vld [vmem:[%s11490_s2 + $0x198] sm:$0xff]  }
  0xf9   :  { %8215 = vmatpush3.bf16.msra.mxu0 %v9366_v57  ;;  %v871_v0 = vpack.c.bf16 %v9937_v63, %v9931_v60  ;;  %v9402_v57 = vld [vmem:[%s11490_s2 + $0x178] sm:$0xff]   ;;  %v9405_v60 = vld [vmem:[%s11490_s2 + $0x190] sm:$0xff]   ;;  %v9408_v63 = vld [vmem:[%s11490_s2 + $0x1a8] sm:$0xff]  }
  0xfa   :  { %8216 = vmatprep.subr.bf16.mxu0 %v9367_v59 }
  0xfd   :  { %8217 = vmatpush3.bf16.msra.mxu0 %v9367_v59  ;;  %v9944_v2 = vpop.f32.mrb[16].mxu1  ;;  %v9404_v59 = vld [vmem:[%s11490_s2 + $0x188] sm:$0xff]  }
  0xfe   :  { %8218 = vmatprep.subr.bf16.mxu0 %v9368_v1  ;;  %v9949_v4 = vpop.f32.mrb[17].mxu1 }
  0xff   :  { %v9951_v5 = vpop.f32.mrb[18].mxu1 }
 0x100   :  { %v1062_v6 = vpack.c.bf16 %v9951_v5, %v9944_v2  ;;  %v9955_v7 = vpop.f32.mrb[19].mxu1  ;;  %v9411_v2 = vld [vmem:[%s11490_s2 + $0x1c0] sm:$0xff]   ;;  %v9414_v5 = vld [vmem:[%s11490_s2 + $0x1d8] sm:$0xff]  }
 0x101   :  { %8219 = vmatpush3.bf16.msra.mxu0 %v9368_v1  ;;  %v1061_v8 = vpack.c.bf16 %v9955_v7, %v9949_v4  ;;  %v9410_v1 = vld [vmem:[%s11490_s2 + $0x1b8] sm:$0xff]   ;;  %v9413_v4 = vld [vmem:[%s11490_s2 + $0x1d0] sm:$0xff]   ;;  %v9416_v7 = vld [vmem:[%s11490_s2 + $0x1e8] sm:$0xff]  }
 0x102   :  { %8232 = vmatprep.subr.bf16.mxu0 %v9369_v3 }
 0x104   :  { %8221 = vmatmul.mubr.bf16.vlgmr.msra.gmra.mrb[4].mxu0 %v121_v38  ;;  %v9389_v38 = vld [vmem:[%s11490_s2 + $0x110] sm:$0xff]  }
 0x105   :  { %8233 = vmatpush3.bf16.msra.mxu0 %v9369_v3  ;;  %8248 = vmatprep.mubr.bf16.mxu0 %v491_v48  ;;  %v9977_v15 = vpop.f32.mrb[20].mxu1  ;;  %v9412_v3 = vld [vmem:[%s11490_s2 + $0x1c8] sm:$0xff]  }
 0x106   :  { %8234 = vmatprep.subr.bf16.mxu0 %v9372_v9  ;;  %v9982_v17 = vpop.f32.mrb[21].mxu1 }
 0x107   :  { %v9984_v18 = vpop.f32.mrb[22].mxu1 }
 0x108   :  { %v1252_v19 = vpack.c.bf16 %v9984_v18, %v9977_v15  ;;  %v9988_v20 = vpop.f32.mrb[23].mxu1  ;;  %v9424_v15 = vld [vmem:[%s11490_s2 + $0x228] sm:$0xff]   ;;  %v9427_v18 = vld [vmem:[%s11490_s2 + $0x280] sm:$0xff]  }
 0x109   :  { %8235 = vmatpush3.bf16.msra.mxu0 %v9372_v9  ;;  %v1251_v22 = vpack.c.bf16 %v9988_v20, %v9982_v17  ;;  %v9418_v9 = vld [vmem:[%s11490_s2 + $0x1f8] sm:$0xff]   ;;  %v9429_v20 = vld [vmem:[%s11490_s2 + $0x290] sm:$0xff]  }
 0x10a   :  { %8236 = vmatprep.subr.bf16.mxu0 %v9373_v10  ;;  %v9426_v17 = vld [vmem:[%s11490_s2 + $0x238] sm:$0xff]  }
 0x10d   :  { %8237 = vmatpush3.bf16.msra.mxu0 %v9373_v10  ;;  %v10019_v30 = vpop.f32.mrb[24].mxu1  ;;  %v9419_v10 = vld [vmem:[%s11490_s2 + $0x200] sm:$0xff]  }
 0x10e   :  { %8238 = vmatprep.subr.bf16.mxu0 %v9374_v11  ;;  %v10021_v31 = vpop.f32.mrb[25].mxu1 }
 0x10f   :  { %v10023_v32 = vpop.f32.mrb[26].mxu1 }
 0x110   :  { %v1442_v34 = vpack.c.bf16 %v10023_v32, %v10019_v30  ;;  %v10030_v35 = vpop.f32.mrb[27].mxu1 }
 0x111   :  { %8239 = vmatpush3.bf16.msra.mxu0 %v9374_v11  ;;  %v1441_v36 = vpack.c.bf16 %v10030_v35, %v10021_v31  ;;  %v9420_v11 = vld [vmem:[%s11490_s2 + $0x208] sm:$0xff]  }
 0x112   :  { %8240 = vmatprep.subr.bf16.mxu0 %v9375_v12 }
 0x115   :  { %8241 = vmatpush3.bf16.msra.mxu0 %v9375_v12  ;;  %v10061_v44 = vpop.f32.mrb[28].mxu1  ;;  %v9421_v12 = vld [vmem:[%s11490_s2 + $0x210] sm:$0xff]  }
 0x116   :  { %8242 = vmatprep.subr.bf16.mxu0 %v9376_v13  ;;  %v10063_v45 = vpop.f32.mrb[29].mxu1 }
 0x119   :  { %8243 = vmatpush3.bf16.msra.mxu0 %v9376_v13  ;;  %v9422_v13 = vld [vmem:[%s11490_s2 + $0x218] sm:$0xff]  }
 0x11a   :  { %8244 = vmatprep.subr.bf16.mxu0 %v9377_v14 }
 0x11d   :  { %8245 = vmatpush3.bf16.msra.mxu0 %v9377_v14  ;;  %v9423_v14 = vld [vmem:[%s11490_s2 + $0x220] sm:$0xff]  }
 0x11e   :  { %8246 = vmatprep.subr.bf16.mxu0 %v9378_v16 }
 0x121   :  { %8247 = vmatpush3.bf16.msra.mxu0 %v9378_v16  ;;  %v9425_v16 = vld [vmem:[%s11490_s2 + $0x230] sm:$0xff]  }
 0x122   :  { %8260 = vmatprep.subr.bf16.mxu0 %v9379_v21 }
 0x124   :  { %8249 = vmatmul.mubr.bf16.vlgmr.msra.gmra.mrb[4].mxu0 %v492_v46  ;;  %v10065_v46 = vpop.f32.mrb[30].mxu1 }
 0x125   :  { %8261 = vmatpush3.bf16.msra.mxu0 %v9379_v21  ;;  %8276 = vmatprep.mubr.bf16.mxu0 %v681_v56  ;;  %v1632_v47 = vpack.c.bf16 %v10065_v46, %v10061_v44  ;;  %v10069_v48 = vpop.f32.mrb[31].mxu1  ;;  %v9401_v56 = vld [vmem:[%s11490_s2 + $0x170] sm:$0xff]   ;;  %v9430_v21 = vld [vmem:[%s11490_s2 + $0x298] sm:$0xff]   ;;  %v9436_v44 = vld [vmem:[%s11490_s2 + $0x248] sm:$0xff]  }
 0x126   :  { %8262 = vmatprep.subr.bf16.mxu0 %v9380_v23  ;;  %v1631_v50 = vpack.c.bf16 %v10069_v48, %v10063_v45  ;;  %v10259_v45 = vld [vmem:[%s11489_s1 + $0x18] sm:$0xff]   ;;  %v9437_v46 = vld [vmem:[%s11490_s2 + $0x250] sm:$0xff]   ;;  %v9439_v48 = vld [vmem:[%s11490_s2 + $0x260] sm:$0xff]  }
 0x129   :  { %8263 = vmatpush3.bf16.msra.mxu0 %v9380_v23  ;;  %v9432_v23 = vld [vmem:[%s11490_s2 + $0x2a8] sm:$0xff]  }
 0x12a   :  { %8264 = vmatprep.subr.bf16.mxu0 %v9381_v24 }
 0x12d   :  { %8265 = vmatpush3.bf16.msra.mxu0 %v9381_v24  ;;  %v9433_v24 = vld [vmem:[%s11490_s2 + $0x2b0] sm:$0xff]  }
 0x12e   :  { %8266 = vmatprep.subr.bf16.mxu0 %v9382_v25 }
 0x131   :  { %8267 = vmatpush3.bf16.msra.mxu0 %v9382_v25  ;;  %v9434_v25 = vld [vmem:[%s11490_s2 + $0x2b8] sm:$0xff]  }
 0x132   :  { %8268 = vmatprep.subr.bf16.mxu0 %v9383_v26 }
 0x135   :  { %8269 = vmatpush3.bf16.msra.mxu0 %v9383_v26  ;;  %v6910_v26 = vld [vmem:[%s11491_s3] ss:$0 sm:$0xff] }
 0x136   :  { %8270 = vmatprep.subr.bf16.mxu0 %v9384_v27 }
 0x139   :  { %8271 = vmatpush3.bf16.msra.mxu0 %v9384_v27 }
 0x13a   :  { %8272 = vmatprep.subr.bf16.mxu0 %v9385_v28 }
 0x13d   :  { %8273 = vmatpush3.bf16.msra.mxu0 %v9385_v28 }
 0x13e   :  { %8274 = vmatprep.subr.bf16.mxu0 %v9386_v29 }
 0x141   :  { %8275 = vmatpush3.bf16.msra.mxu0 %v9386_v29 }
 0x142   :  { %8288 = vmatprep.subr.bf16.mxu0 %v9387_v33 }
 0x144   :  { %8277 = vmatmul.mubr.bf16.vlgmr.msra.gmra.mrb[4].mxu0 %v682_v54  ;;  %v9399_v54 = vld [vmem:[%s11490_s2 + $0x160] sm:$0xff]  }
 0x145   :  { %8289 = vmatpush3.bf16.msra.mxu0 %v9387_v33  ;;  %8304 = vmatprep.mubr.bf16.mxu0 %v871_v0  ;;  %v9409_v0 = vld [vmem:[%s11490_s2 + $0x1b0] sm:$0xff]  }
 0x146   :  { %8290 = vmatprep.subr.bf16.mxu0 %v9388_v37 }
 0x149   :  { %8291 = vmatpush3.bf16.msra.mxu0 %v9388_v37 }
 0x14a   :  { %8292 = vmatprep.subr.bf16.mxu0 %v9389_v38 }
 0x14d   :  { %8293 = vmatpush3.bf16.msra.mxu0 %v9389_v38 }
 0x14e   :  { %8294 = vmatprep.subr.bf16.mxu0 %v9390_v39 }
 0x151   :  { %8295 = vmatpush3.bf16.msra.mxu0 %v9390_v39 }
 0x152   :  { %8296 = vmatprep.subr.bf16.mxu0 %v9391_v40 }
 0x155   :  { %8297 = vmatpush3.bf16.msra.mxu0 %v9391_v40 }
 0x156   :  { %8298 = vmatprep.subr.bf16.mxu0 %v9392_v41 }
 0x159   :  { %8299 = vmatpush3.bf16.msra.mxu0 %v9392_v41  ;;  %v10236_v41 = vld [vmem:[%s11489_s1 + $0x8] sm:$0xff]  }
 0x15a   :  { %8300 = vmatprep.subr.bf16.mxu0 %v9393_v42 }
 0x15d   :  { %8301 = vmatpush3.bf16.msra.mxu0 %v9393_v42  ;;  %v10244_v42 = vld [vmem:[%s11489_s1 + $0x10] sm:$0xff]  }
 0x15e   :  { %8302 = vmatprep.subr.bf16.mxu0 %v9394_v43 }
 0x161   :  { %8303 = vmatpush3.bf16.msra.mxu0 %v9394_v43  ;;  %v9435_v43 = vld [vmem:[%s11490_s2 + $0x240] sm:$0xff]  }
 0x162   :  { %8316 = vmatprep.subr.bf16.mxu0 %v9395_v49 }
 0x164   :  { %8305 = vmatmul.mubr.bf16.vlgmr.msra.gmra.mrb[4].mxu0 %v872_v62  ;;  %v9407_v62 = vld [vmem:[%s11490_s2 + $0x1a0] sm:$0xff]  }
 0x165   :  { %8317 = vmatpush3.bf16.msra.mxu0 %v9395_v49  ;;  %8332 = vmatprep.mubr.bf16.mxu0 %v1061_v8  ;;  %v9417_v8 = vld [vmem:[%s11490_s2 + $0x1f0] sm:$0xff]   ;;  %v9440_v49 = vld [vmem:[%s11490_s2 + $0x268] sm:$0xff]  }
 0x166   :  { %8318 = vmatprep.subr.bf16.mxu0 %v9396_v51 }
 0x169   :  { %8319 = vmatpush3.bf16.msra.mxu0 %v9396_v51  ;;  %v9442_v51 = vld [vmem:[%s11490_s2 + $0x278] sm:$0xff]  }
 0x16a   :  { %8320 = vmatprep.subr.bf16.mxu0 %v9397_v52 }
 0x16d   :  { %8321 = vmatpush3.bf16.msra.mxu0 %v9397_v52 }
 0x16e   :  { %8322 = vmatprep.subr.bf16.mxu0 %v9398_v53 }
 0x171   :  { %8323 = vmatpush3.bf16.msra.mxu0 %v9398_v53 }
 0x172   :  { %8324 = vmatprep.subr.bf16.mxu0 %v9399_v54 }
 0x175   :  { %8325 = vmatpush3.bf16.msra.mxu0 %v9399_v54 }
 0x176   :  { %8326 = vmatprep.subr.bf16.mxu0 %v9400_v55 }
 0x179   :  { %8327 = vmatpush3.bf16.msra.mxu0 %v9400_v55 }
 0x17a   :  { %8328 = vmatprep.subr.bf16.mxu0 %v9401_v56 }
 0x17d   :  { %8329 = vmatpush3.bf16.msra.mxu0 %v9401_v56 }
 0x17e   :  { %8330 = vmatprep.subr.bf16.mxu0 %v9402_v57 }
 0x181   :  { %8331 = vmatpush3.bf16.msra.mxu0 %v9402_v57 }
 0x182   :  { %8344 = vmatprep.subr.bf16.mxu0 %v9403_v58 }
 0x184   :  { %8333 = vmatmul.mubr.bf16.vlgmr.msra.gmra.mrb[4].mxu0 %v1062_v6  ;;  %v9415_v6 = vld [vmem:[%s11490_s2 + $0x1e0] sm:$0xff]  }
 0x185   :  { %8345 = vmatpush3.bf16.msra.mxu0 %v9403_v58  ;;  %8360 = vmatprep.mubr.bf16.mxu0 %v1251_v22  ;;  %v9431_v22 = vld [vmem:[%s11490_s2 + $0x2a0] sm:$0xff]  }
 0x186   :  { %8346 = vmatprep.subr.bf16.mxu0 %v9404_v59 }
 0x189   :  { %8347 = vmatpush3.bf16.msra.mxu0 %v9404_v59  ;;  %v10286_v59 = vld [vmem:[%s11489_s1 + $0x20] sm:$0xff]  }
 0x18a   :  { %8348 = vmatprep.subr.bf16.mxu0 %v9405_v60 }
 0x18d   :  { %8349 = vmatpush3.bf16.msra.mxu0 %v9405_v60 }
 0x18e   :  { %8350 = vmatprep.subr.bf16.mxu0 %v9406_v61 }
 0x191   :  { %8351 = vmatpush3.bf16.msra.mxu0 %v9406_v61  ;;  %v9443_v61 = vld [vmem:[%s11490_s2 + $0x2c0] sm:$0xff]  }
 0x192   :  { %8352 = vmatprep.subr.bf16.mxu0 %v9407_v62 }
 0x195   :  { %8353 = vmatpush3.bf16.msra.mxu0 %v9407_v62 }
 0x196   :  { %8354 = vmatprep.subr.bf16.mxu0 %v9408_v63 }
 0x199   :  { %8355 = vmatpush3.bf16.msra.mxu0 %v9408_v63 }
 0x19a   :  { %8356 = vmatprep.subr.bf16.mxu0 %v9409_v0 }
 0x19d   :  { %8357 = vmatpush3.bf16.msra.mxu0 %v9409_v0 }
 0x19e   :  { %8358 = vmatprep.subr.bf16.mxu0 %v9410_v1 }
 0x1a1   :  { %8359 = vmatpush3.bf16.msra.mxu0 %v9410_v1 }
 0x1a2   :  { %8372 = vmatprep.subr.bf16.mxu0 %v9411_v2 }
 0x1a4   :  { %8361 = vmatmul.mubr.bf16.vlgmr.msra.gmra.mrb[4].mxu0 %v1252_v19  ;;  %v9428_v19 = vld [vmem:[%s11490_s2 + $0x288] sm:$0xff]  }
 0x1a5   :  { %8373 = vmatpush3.bf16.msra.mxu0 %v9411_v2  ;;  %8388 = vmatprep.mubr.bf16.mxu0 %v1441_v36  ;;  %v9444_v2 = vld [vmem:[%s11490_s2 + $0x2c8] sm:$0xff]  }
 0x1a6   :  { %8374 = vmatprep.subr.bf16.mxu0 %v9412_v3 }
 0x1a9   :  { %8375 = vmatpush3.bf16.msra.mxu0 %v9412_v3  ;;  %v10301_v3 = vld [vmem:[%s11489_s1 + $0x28] sm:$0xff]  }
 0x1aa   :  { %8376 = vmatprep.subr.bf16.mxu0 %v9413_v4 }
 0x1ad   :  { %8377 = vmatpush3.bf16.msra.mxu0 %v9413_v4  ;;  %v9445_v4 = vld [vmem:[%s11490_s2 + $0x2d0] sm:$0xff]  }
 0x1ae   :  { %8378 = vmatprep.subr.bf16.mxu0 %v9414_v5 }
 0x1b1   :  { %8379 = vmatpush3.bf16.msra.mxu0 %v9414_v5  ;;  %v10313_v5 = vld [vmem:[%s11489_s1 + $0x60] sm:$0xff]  }
 0x1b2   :  { %8380 = vmatprep.subr.bf16.mxu0 %v9415_v6 }
 0x1b5   :  { %8381 = vmatpush3.bf16.msra.mxu0 %v9415_v6  ;;  %v9446_v6 = vld [vmem:[%s11490_s2 + $0x2d8] sm:$0xff]  }
 0x1b6   :  { %8382 = vmatprep.subr.bf16.mxu0 %v9416_v7 }
 0x1b9   :  { %8383 = vmatpush3.bf16.msra.mxu0 %v9416_v7  ;;  %v10325_v7 = vld [vmem:[%s11489_s1 + $0x68] sm:$0xff]  }
 0x1ba   :  { %8384 = vmatprep.subr.bf16.mxu0 %v9417_v8 }
 0x1bd   :  { %8385 = vmatpush3.bf16.msra.mxu0 %v9417_v8  ;;  %v9447_v8 = vld [vmem:[%s11490_s2 + $0x2e0] sm:$0xff]  }
 0x1be   :  { %8386 = vmatprep.subr.bf16.mxu0 %v9418_v9 }
 0x1c1   :  { %8387 = vmatpush3.bf16.msra.mxu0 %v9418_v9  ;;  %v10337_v9 = vld [vmem:[%s11489_s1 + $0x70] sm:$0xff]  }
 0x1c2   :  { %8400 = vmatprep.subr.bf16.mxu0 %v9419_v10 }
 0x1c4   :  { %8389 = vmatmul.mubr.bf16.vlgmr.msra.gmra.mrb[4].mxu0 %v1442_v34 }
 0x1c5   :  { %8401 = vmatpush3.bf16.msra.mxu0 %v9419_v10  ;;  %8416 = vmatprep.mubr.bf16.mxu0 %v1631_v50  ;;  %v9441_v50 = vld [vmem:[%s11490_s2 + $0x270] sm:$0xff]   ;;  %v9448_v10 = vld [vmem:[%s11490_s2 + $0x2e8] sm:$0xff]  }
 0x1c6   :  { %8402 = vmatprep.subr.bf16.mxu0 %v9420_v11 }
 0x1c9   :  { %8403 = vmatpush3.bf16.msra.mxu0 %v9420_v11  ;;  %v10349_v11 = vld [vmem:[%s11489_s1 + $0x78] sm:$0xff]  }
 0x1ca   :  { %8404 = vmatprep.subr.bf16.mxu0 %v9421_v12 }
 0x1cd   :  { %8405 = vmatpush3.bf16.msra.mxu0 %v9421_v12  ;;  %v9449_v12 = vld [vmem:[%s11490_s2 + $0x2f0] sm:$0xff]  }
 0x1ce   :  { %8406 = vmatprep.subr.bf16.mxu0 %v9422_v13 }
 0x1d1   :  { %8407 = vmatpush3.bf16.msra.mxu0 %v9422_v13  ;;  %v10361_v13 = vld [vmem:[%s11489_s1 + $0x80] sm:$0xff]  }
 0x1d2   :  { %8408 = vmatprep.subr.bf16.mxu0 %v9423_v14 }
 0x1d5   :  { %8409 = vmatpush3.bf16.msra.mxu0 %v9423_v14  ;;  %v9450_v14 = vld [vmem:[%s11490_s2 + $0x2f8] sm:$0xff]  }
 0x1d6   :  { %8410 = vmatprep.subr.bf16.mxu0 %v9424_v15 }
 0x1d9   :  { %8411 = vmatpush3.bf16.msra.mxu0 %v9424_v15  ;;  %v10372_v15 = vld [vmem:[%s11489_s1 + $0x88] sm:$0xff]  }
 0x1da   :  { %8412 = vmatprep.subr.bf16.mxu0 %v9425_v16 }
 0x1dd   :  { %8413 = vmatpush3.bf16.msra.mxu0 %v9425_v16  ;;  %v10379_v16 = vld [vmem:[%s11489_s1] sm:$0xff]  }
 0x1de   :  { %8414 = vmatprep.subr.bf16.mxu0 %v9426_v17 }
 0x1e1   :  { %8415 = vmatpush3.bf16.msra.mxu0 %v9426_v17 }
 0x1e2   :  { %8436 = vmatprep.subr.bf16.mxu0 %v9427_v18 }
 0x1e4   :  { %8417 = vmatmul.mubr.bf16.vlgmr.msra.gmra.mrb[4].mxu0 %v1632_v47  ;;  %v9438_v47 = vld [vmem:[%s11490_s2 + $0x258] sm:$0xff]  }
 0x1e5   :  { %8437 = vmatpush3.bf16.msra.mxu0 %v9427_v18 }
 0x1e6   :  { %8438 = vmatprep.subr.bf16.mxu0 %v9428_v19 }
 0x1e9   :  { %8439 = vmatpush3.bf16.msra.mxu0 %v9428_v19 }
 0x1ea   :  { %8440 = vmatprep.subr.bf16.mxu0 %v9429_v20 }
 0x1ed   :  { %8441 = vmatpush3.bf16.msra.mxu0 %v9429_v20 }
 0x1ee   :  { %8442 = vmatprep.subr.bf16.mxu0 %v9430_v21 }
 0x1f1   :  { %8443 = vmatpush3.bf16.msra.mxu0 %v9430_v21 }
 0x1f2   :  { %8444 = vmatprep.subr.bf16.mxu0 %v9431_v22 }
 0x1f5   :  { %8445 = vmatpush3.bf16.msra.mxu0 %v9431_v22 }
 0x1f6   :  { %8446 = vmatprep.subr.bf16.mxu0 %v9432_v23 }
 0x1f9   :  { %8447 = vmatpush3.bf16.msra.mxu0 %v9432_v23 }
 0x1fa   :  { %8448 = vmatprep.subr.bf16.mxu0 %v9433_v24 }
 0x1fd   :  { %8449 = vmatpush3.bf16.msra.mxu0 %v9433_v24 }
 0x1fe   :  { %8450 = vmatprep.subr.bf16.mxu0 %v9434_v25 }
 0x201   :  { %8451 = vmatpush3.bf16.msra.mxu0 %v9434_v25 }
 0x2b7   :  { %v8418_v27 = vpop.f32.mrb[4].mxu0 }
 0x2b8   :  { %v1760_v28 = vadd.f32 %v8418_v27, %v6910_v26  ;;  %v1732_v29 = vpop.f32.mrb[5].mxu0  ;;  %v10396_v27 = vld [vmem:[%s11489_s1 + $0x30] sm:$0xff]  }
 0x2b9   :  { %v1758_v30 = vadd.f32 %v6910_v26, %v1732_v29  ;;  %v8419_v31 = vpop.f32.mrb[6].mxu0  ;;  %v9452_v29 = vld [vmem:[%s11490_s2 + $0x308] sm:$0xff]  }
 0x2ba   :  { %v1761_v32 = vadd.f32 %v8419_v31, %v6910_v26  ;;  %v1735_v33 = vpop.f32.mrb[7].mxu0  ;;  %v1764_v35 = vmax.f32 %v1760_v28, 0.0  ;;  %v9451_v28 = vld [vmem:[%s11490_s2 + $0x300] sm:$0xff]   ;;  %v9453_v31 = vld [vmem:[%s11490_s2 + $0x310] sm:$0xff]  }
 0x2bb   :  { %v1759_v34 = vadd.f32 %v6910_v26, %v1735_v33  ;;  %v1762_v37 = vmax.f32 %v1758_v30, 0.0  ;;  %v10411_v30 = vld [vmem:[%s11489_s1 + $0x38] sm:$0xff]   ;;  %v9455_v33 = vld [vmem:[%s11490_s2 + $0x320] sm:$0xff]  }
 0x2bc   :  { %v1765_v36 = vmax.f32 %v1761_v32, 0.0  ;;  %v9454_v32 = vld [vmem:[%s11490_s2 + $0x318] sm:$0xff]  }
 0x2bd   :  { %v1763_v38 = vmax.f32 %v1759_v34, 0.0  ;;  %v9456_v34 = vld [vmem:[%s11490_s2 + $0x328] sm:$0xff]  }
 0x2be   :  { %v10223_v39 = vpack.c.bf16 %v1765_v36, %v1764_v35  ;;  %v9457_v35 = vld [vmem:[%s11490_s2 + $0x330] sm:$0xff]   ;;  %v9458_v36 = vld [vmem:[%s11490_s2 + $0x338] sm:$0xff]  }
 0x2bf   :  { %v10225_v40 = vpack.c.bf16 %v1763_v38, %v1762_v37 }
 0x2c1   :  { %8420 = vmatprep.subr.bf16.mxu1 %v10225_v40  ;;  %8588 = vmatprep.subr.bf16.mxu0 %v10225_v40 }
 0x2c2   :  { %8421 = vmatpush3.bf16.msra.mxu1 %v10225_v40 }
 0x2c3   :  { %8422 = vmatprep.subr.bf16.mxu1 %v10223_v39 }
 0x2c6   :  { %8423 = vmatpush3.bf16.msra.mxu1 %v10223_v39 }
 0x2c7   :  { %8428 = vmatprep.subr.bf16.mxu1 %v10225_v40 }
 0x2c9   :  { %8425 = vmatmul.mubr.msk.bf16.vlgmr.msra.gmra.mrb[32].mxu1 %vm64_vm0, %v10236_v41 }
 0x2ca   :  { %8429 = vmatpush3.bf16.msra.mxu1 %v10225_v40  ;;  %8432 = vmatprep.mubr.msk.bf16.mxu1 %vm64_vm0, %v10244_v42 }
 0x2cb   :  { %8430 = vmatprep.subr.bf16.mxu1 %v10223_v39 }
 0x2ce   :  { %8431 = vmatpush3.bf16.msra.mxu1 %v10223_v39 }
 0x2cf   :  { %8456 = vmatprep.subr.bf16.mxu1 %v9435_v43 }
 0x2d1   :  { %8433 = vmatmul.mubr.msk.bf16.vlgmr.msra.gmra.mrb[36].mxu1 %vm64_vm0, %v10259_v45 }
 0x2d2   :  { %8457 = vmatpush3.bf16.msra.mxu1 %v9435_v43 }
 0x2d3   :  { %8458 = vmatprep.subr.bf16.mxu1 %v9436_v44 }
 0x2d6   :  { %8459 = vmatpush3.bf16.msra.mxu1 %v9436_v44 }
 0x2d7   :  { %8460 = vmatprep.subr.bf16.mxu1 %v9437_v46 }
 0x2da   :  { %8461 = vmatpush3.bf16.msra.mxu1 %v9437_v46 }
 0x2db   :  { %8462 = vmatprep.subr.bf16.mxu1 %v9438_v47 }
 0x2de   :  { %8463 = vmatpush3.bf16.msra.mxu1 %v9438_v47 }
 0x2df   :  { %8464 = vmatprep.subr.bf16.mxu1 %v9439_v48 }
 0x2e2   :  { %8465 = vmatpush3.bf16.msra.mxu1 %v9439_v48  ;;  %v10438_v48 = vld [vmem:[%s11489_s1 + $0x40] sm:$0xff]  }
 0x2e3   :  { %8466 = vmatprep.subr.bf16.mxu1 %v9440_v49 }
 0x2e6   :  { %8467 = vmatpush3.bf16.msra.mxu1 %v9440_v49  ;;  %v9459_v49 = vld [vmem:[%s11490_s2 + $0x340] sm:$0xff]  }
 0x2e7   :  { %8468 = vmatprep.subr.bf16.mxu1 %v9441_v50 }
 0x2ea   :  { %8469 = vmatpush3.bf16.msra.mxu1 %v9441_v50  ;;  %v9460_v50 = vld [vmem:[%s11490_s2 + $0x348] sm:$0xff]  }
 0x2eb   :  { %8470 = vmatprep.subr.bf16.mxu1 %v9442_v51 }
 0x2ee   :  { %8471 = vmatpush3.bf16.msra.mxu1 %v9442_v51  ;;  %v10453_v51 = vld [vmem:[%s11489_s1 + $0x48] sm:$0xff]  }
 0x2ef   :  { %8476 = vmatprep.subr.bf16.mxu1 %v10225_v40 }
 0x39c   :  { %v8426_v52 = vpop.f32.mrb[32].mxu1 }
 0x39d   :  { %v1802_v53 = vpop.f32.mrb[33].mxu1 }
 0x39e   :  { %v8427_v54 = vpop.f32.mrb[34].mxu1 }
 0x39f   :  { %v1818_v55 = vpack.c.bf16 %v8427_v54, %v8426_v52  ;;  %v1805_v56 = vpop.f32.mrb[35].mxu1  ;;  %v9461_v52 = vld [vmem:[%s11490_s2 + $0x350] sm:$0xff]   ;;  %v9463_v54 = vld [vmem:[%s11490_s2 + $0x360] sm:$0xff]  }
 0x3a0   :  { %v1817_v57 = vpack.c.bf16 %v1805_v56, %v1802_v53  ;;  %v9462_v53 = vld [vmem:[%s11490_s2 + $0x358] sm:$0xff]   ;;  %v9465_v56 = vld [vmem:[%s11490_s2 + $0x370] sm:$0xff]  }
 0x3a2   :  { %8472 = vmatprep.mubr.bf16.mxu1 %v1817_v57  ;;  %v9466_v57 = vld [vmem:[%s11490_s2 + $0x378] sm:$0xff]  }
 0x3a3   :  { %8473 = vmatmul.mubr.bf16.vlgmr.msra.gmra.mrb[40].mxu1 %v1818_v55  ;;  %v9464_v55 = vld [vmem:[%s11490_s2 + $0x368] sm:$0xff]  }
 0x3a4   :  { %8477 = vmatpush3.bf16.msra.mxu1 %v10225_v40  ;;  %v8434_v58 = vpop.f32.mrb[36].mxu1  ;;  %8480 = vmatprep.mubr.msk.bf16.mxu1 %vm64_vm0, %v10286_v59 }
 0x3a5   :  { %8478 = vmatprep.subr.bf16.mxu1 %v10223_v39  ;;  %v1870_v60 = vpop.f32.mrb[37].mxu1 }
 0x3a6   :  { %v8435_v62 = vpop.f32.mrb[38].mxu1 }
 0x3a7   :  { %v1886_v63 = vpack.c.bf16 %v8435_v62, %v8434_v58  ;;  %v1873_v0 = vpop.f32.mrb[39].mxu1 }
 0x3a8   :  { %v1885_v1 = vpack.c.bf16 %v1873_v0, %v1870_v60  ;;  %8479 = vmatpush3.bf16.msra.mxu1 %v10223_v39 }
 0x3a9   :  { %8484 = vmatprep.subr.bf16.mxu1 %v9443_v61 }
 0x3aa   :  { %8452 = vmatprep.mubr.bf16.mxu0 %v1885_v1  ;;  %v10480_v1 = vld [vmem:[%s11489_s1 + $0x50] sm:$0xff]  }
 0x3ab   :  { %8453 = vmatmul.mubr.bf16.vlgmr.msra.gmra.mrb[8].mxu0 %v1886_v63  ;;  %8481 = vmatmul.mubr.msk.bf16.vlgmr.msra.gmra.mrb[44].mxu1 %vm64_vm0, %v10301_v3 }
 0x3ac   :  { %8485 = vmatpush3.bf16.msra.mxu1 %v9443_v61  ;;  %8589 = vmatpush3.bf16.msra.mxu0 %v10225_v40 }
 0x3ad   :  { %8590 = vmatprep.subr.bf16.mxu0 %v10223_v39  ;;  %8486 = vmatprep.subr.bf16.mxu1 %v9444_v2 }
 0x3ae   :  { %8592 = vmatprep.mubr.msk.bf16.mxu0 %vm64_vm0, %v10313_v5 }
 0x3b0   :  { %8487 = vmatpush3.bf16.msra.mxu1 %v9444_v2  ;;  %8591 = vmatpush3.bf16.msra.mxu0 %v10223_v39  ;;  %v9467_v2 = vld [vmem:[%s11490_s2 + $0x380] sm:$0xff]  }
 0x3b1   :  { %8616 = vmatprep.subr.bf16.mxu0 %v10225_v40  ;;  %8488 = vmatprep.subr.bf16.mxu1 %v9445_v4 }
 0x3b3   :  { %8593 = vmatmul.mubr.msk.bf16.vlgmr.msra.gmra.mrb[12].mxu0 %vm64_vm0, %v10325_v7 }
 0x3b4   :  { %8489 = vmatpush3.bf16.msra.mxu1 %v9445_v4  ;;  %8617 = vmatpush3.bf16.msra.mxu0 %v10225_v40  ;;  %v10495_v4 = vld [vmem:[%s11489_s1 + $0x58] sm:$0xff]  }
 0x3b5   :  { %8618 = vmatprep.subr.bf16.mxu0 %v10223_v39  ;;  %8490 = vmatprep.subr.bf16.mxu1 %v9446_v6 }
 0x3b6   :  { %8620 = vmatprep.mubr.msk.bf16.mxu0 %vm64_vm0, %v10337_v9 }
 0x3b8   :  { %8491 = vmatpush3.bf16.msra.mxu1 %v9446_v6  ;;  %8619 = vmatpush3.bf16.msra.mxu0 %v10223_v39  ;;  %v9469_v6 = vld [vmem:[%s11490_s2 + $0x390] sm:$0xff]  }
 0x3b9   :  { %8644 = vmatprep.subr.bf16.mxu0 %v10225_v40  ;;  %8492 = vmatprep.subr.bf16.mxu1 %v9447_v8 }
 0x3bb   :  { %8621 = vmatmul.mubr.msk.bf16.vlgmr.msra.gmra.mrb[16].mxu0 %vm64_vm0, %v10349_v11 }
 0x3bc   :  { %8493 = vmatpush3.bf16.msra.mxu1 %v9447_v8  ;;  %8645 = vmatpush3.bf16.msra.mxu0 %v10225_v40  ;;  %v9471_v8 = vld [vmem:[%s11490_s2 + $0x3a0] sm:$0xff]  }
 0x3bd   :  { %8646 = vmatprep.subr.bf16.mxu0 %v10223_v39  ;;  %8494 = vmatprep.subr.bf16.mxu1 %v9448_v10 }
 0x3be   :  { %8648 = vmatprep.mubr.msk.bf16.mxu0 %vm64_vm0, %v10361_v13 }
 0x3c0   :  { %8495 = vmatpush3.bf16.msra.mxu1 %v9448_v10  ;;  %8647 = vmatpush3.bf16.msra.mxu0 %v10223_v39  ;;  %v9472_v10 = vld [vmem:[%s11490_s2 + $0x3a8] sm:$0xff]  }
 0x3c1   :  { %8496 = vmatprep.subr.bf16.mxu1 %v9449_v12 }
 0x3c3   :  { %8649 = vmatmul.mubr.msk.bf16.vlgmr.msra.gmra.mrb[20].mxu0 %vm64_vm0, %v10372_v15 }
 0x3c4   :  { %8497 = vmatpush3.bf16.msra.mxu1 %v9449_v12  ;;  %8676 = vmatprep.mubr.msk.bf16.mxu0 %vm64_vm0, %v10379_v16  ;;  %v9473_v12 = vld [vmem:[%s11490_s2 + $0x3b0] sm:$0xff]  }
 0x3c5   :  { %8498 = vmatprep.subr.bf16.mxu1 %v9450_v14 }
 0x3c8   :  { %8499 = vmatpush3.bf16.msra.mxu1 %v9450_v14  ;;  %v9474_v14 = vld [vmem:[%s11490_s2 + $0x3b8] sm:$0xff]  }
 0x3c9   :  { %8504 = vmatprep.subr.bf16.mxu1 %v10225_v40 }
 0x47e   :  { %v8482_v17 = vpop.f32.mrb[44].mxu1  ;;  %v10384_v18 = vpop.f32.mrb[8].mxu0 }
 0x47f   :  { %v2132_v19 = vpop.f32.mrb[45].mxu1  ;;  %v10386_v20 = vpop.f32.mrb[9].mxu0 }
 0x480   :  { %v8483_v21 = vpop.f32.mrb[46].mxu1  ;;  %v10388_v22 = vpop.f32.mrb[10].mxu0 }
 0x481   :  { %v2148_v23 = vpack.c.bf16 %v8483_v21, %v8482_v17  ;;  %v2135_v24 = vpop.f32.mrb[47].mxu1  ;;  %v10390_v25 = vpop.f32.mrb[11].mxu0  ;;  %v9475_v17 = vld [vmem:[%s11490_s2 + $0x3c0] sm:$0xff]  }
 0x482   :  { %v2147_v26 = vpack.c.bf16 %v2135_v24, %v2132_v19 }
 0x484   :  { %8500 = vmatprep.mubr.bf16.mxu1 %v2147_v26 }
 0x485   :  { %8501 = vmatmul.mubr.bf16.vlgmr.msra.gmra.mrb[40].mxu1 %v2148_v23 }
 0x486   :  { %8505 = vmatpush3.bf16.msra.mxu1 %v10225_v40  ;;  %8508 = vmatprep.mubr.msk.bf16.mxu1 %vm64_vm0, %v10396_v27  ;;  %v8594_v19 = vpop.f32.mrb[12].mxu0 }
 0x487   :  { %8506 = vmatprep.subr.bf16.mxu1 %v10223_v39  ;;  %v2808_v21 = vpop.f32.mrb[13].mxu0 }
 0x488   :  { %v8595_v23 = vpop.f32.mrb[14].mxu0 }
 0x489   :  { %v2824_v24 = vpack.c.bf16 %v8595_v23, %v8594_v19  ;;  %v2811_v26 = vpop.f32.mrb[15].mxu0  ;;  %v9494_v19 = vld [vmem:[%s11490_s2 + $0x458] sm:$0xff]   ;;  %v9496_v23 = vld [vmem:[%s11490_s2 + $0x468] sm:$0xff]  }
 0x48a   :  { %8507 = vmatpush3.bf16.msra.mxu1 %v10223_v39 }
 0x48b   :  { %8512 = vmatprep.subr.bf16.mxu1 %v9451_v28 }
 0x48d   :  { %8509 = vmatmul.mubr.msk.bf16.vlgmr.msra.gmra.mrb[48].mxu1 %vm64_vm0, %v10411_v30 }
 0x48e   :  { %8513 = vmatpush3.bf16.msra.mxu1 %v9451_v28  ;;  %v2823_v28 = vpack.c.bf16 %v2811_v26, %v2808_v21  ;;  %v9495_v21 = vld [vmem:[%s11490_s2 + $0x460] sm:$0xff]   ;;  %v9498_v26 = vld [vmem:[%s11490_s2 + $0x478] sm:$0xff]  }
 0x48f   :  { %8514 = vmatprep.subr.bf16.mxu1 %v9452_v29 }
 0x492   :  { %8515 = vmatpush3.bf16.msra.mxu1 %v9452_v29  ;;  %v10520_v29 = vpop.f32.mrb[16].mxu0 }
 0x493   :  { %8516 = vmatprep.subr.bf16.mxu1 %v9453_v31 }
 0x496   :  { %8517 = vmatpush3.bf16.msra.mxu1 %v9453_v31  ;;  %v2977_v31 = vpop.f32.mrb[17].mxu0 }
 0x497   :  { %8518 = vmatprep.subr.bf16.mxu1 %v9454_v32 }
 0x49a   :  { %8519 = vmatpush3.bf16.msra.mxu1 %v9454_v32  ;;  %v10522_v32 = vpop.f32.mrb[18].mxu0 }
 0x49b   :  { %8520 = vmatprep.subr.bf16.mxu1 %v9455_v33 }
 0x49e   :  { %8521 = vmatpush3.bf16.msra.mxu1 %v9455_v33  ;;  %v2993_v33 = vpack.c.bf16 %v10522_v32, %v10520_v29 }
 0x49f   :  { %8522 = vmatprep.subr.bf16.mxu1 %v9456_v34 }
 0x4a2   :  { %8523 = vmatpush3.bf16.msra.mxu1 %v9456_v34  ;;  %v2980_v34 = vpop.f32.mrb[19].mxu0 }
 0x4a3   :  { %8524 = vmatprep.subr.bf16.mxu1 %v9457_v35 }
 0x4a6   :  { %8525 = vmatpush3.bf16.msra.mxu1 %v9457_v35  ;;  %v2992_v35 = vpack.c.bf16 %v2980_v34, %v2977_v31  ;;  %v7146_v31 = vld [vmem:[%s11491_s3 + $0x1] ss:$0 sm:$0xff] }
 0x4a7   :  { %8526 = vmatprep.subr.bf16.mxu1 %v9458_v36 }
 0x4aa   :  { %8527 = vmatpush3.bf16.msra.mxu1 %v9458_v36  ;;  %v10526_v36 = vpop.f32.mrb[20].mxu0 }
 0x4ab   :  { %8532 = vmatprep.subr.bf16.mxu1 %v10225_v40 }
 0x560   :  { %v8510_v37 = vpop.f32.mrb[48].mxu1 }
 0x561   :  { %v2301_v38 = vpop.f32.mrb[49].mxu1 }
 0x562   :  { %v8511_v43 = vpop.f32.mrb[50].mxu1 }
 0x563   :  { %v2317_v44 = vpack.c.bf16 %v8511_v43, %v8510_v37  ;;  %v2304_v46 = vpop.f32.mrb[51].mxu1  ;;  %v10528_v37 = vpop.f32.mrb[21].mxu0 }
 0x564   :  { %v2316_v47 = vpack.c.bf16 %v2304_v46, %v2301_v38  ;;  %v10530_v38 = vpop.f32.mrb[22].mxu0 }
 0x565   :  { %v3162_v43 = vpack.c.bf16 %v10530_v38, %v10526_v36 }
 0x566   :  { %8528 = vmatprep.mubr.bf16.mxu1 %v2316_v47 }
 0x567   :  { %8529 = vmatmul.mubr.bf16.vlgmr.msra.gmra.mrb[40].mxu1 %v2317_v44  ;;  %v10534_v44 = vpop.f32.mrb[23].mxu0 }
 0x568   :  { %8533 = vmatpush3.bf16.msra.mxu1 %v10225_v40  ;;  %8536 = vmatprep.mubr.msk.bf16.mxu1 %vm64_vm0, %v10438_v48  ;;  %v3161_v46 = vpack.c.bf16 %v10534_v44, %v10528_v37 }
 0x569   :  { %8534 = vmatprep.subr.bf16.mxu1 %v10223_v39 }
 0x56c   :  { %8535 = vmatpush3.bf16.msra.mxu1 %v10223_v39 }
 0x56d   :  { %8540 = vmatprep.subr.bf16.mxu1 %v9459_v49 }
 0x56f   :  { %8537 = vmatmul.mubr.msk.bf16.vlgmr.msra.gmra.mrb[52].mxu1 %vm64_vm0, %v10453_v51 }
 0x570   :  { %8541 = vmatpush3.bf16.msra.mxu1 %v9459_v49 }
 0x571   :  { %8542 = vmatprep.subr.bf16.mxu1 %v9460_v50 }
 0x574   :  { %8543 = vmatpush3.bf16.msra.mxu1 %v9460_v50 }
 0x575   :  { %8544 = vmatprep.subr.bf16.mxu1 %v9461_v52 }
 0x578   :  { %8545 = vmatpush3.bf16.msra.mxu1 %v9461_v52 }
 0x579   :  { %8546 = vmatprep.subr.bf16.mxu1 %v9462_v53 }
 0x57c   :  { %8547 = vmatpush3.bf16.msra.mxu1 %v9462_v53 }
 0x57d   :  { %8548 = vmatprep.subr.bf16.mxu1 %v9463_v54 }
 0x580   :  { %8549 = vmatpush3.bf16.msra.mxu1 %v9463_v54 }
 0x581   :  { %8550 = vmatprep.subr.bf16.mxu1 %v9464_v55 }
 0x584   :  { %8551 = vmatpush3.bf16.msra.mxu1 %v9464_v55  ;;  %v9476_v55 = vld [vmem:[%s11490_s2 + $0x3c8] sm:$0xff]  }
 0x585   :  { %8552 = vmatprep.subr.bf16.mxu1 %v9465_v56 }
 0x588   :  { %8553 = vmatpush3.bf16.msra.mxu1 %v9465_v56  ;;  %v9477_v56 = vld [vmem:[%s11490_s2 + $0x3d0] sm:$0xff]  }
 0x589   :  { %8554 = vmatprep.subr.bf16.mxu1 %v9466_v57 }
 0x58c   :  { %8555 = vmatpush3.bf16.msra.mxu1 %v9466_v57  ;;  %v9478_v57 = vld [vmem:[%s11490_s2 + $0x3d8] sm:$0xff]  }
 0x58d   :  { %8560 = vmatprep.subr.bf16.mxu1 %v10225_v40 }
 0x642   :  { %v8538_v58 = vpop.f32.mrb[52].mxu1 }
 0x643   :  { %v2470_v60 = vpop.f32.mrb[53].mxu1 }
 0x644   :  { %v8539_v61 = vpop.f32.mrb[54].mxu1 }
 0x645   :  { %v2486_v62 = vpack.c.bf16 %v8539_v61, %v8538_v58  ;;  %v2473_v63 = vpop.f32.mrb[55].mxu1  ;;  %v9479_v58 = vld [vmem:[%s11490_s2 + $0x3e0] sm:$0xff]   ;;  %v9481_v61 = vld [vmem:[%s11490_s2 + $0x3f0] sm:$0xff]  }
 0x646   :  { %v2485_v0 = vpack.c.bf16 %v2473_v63, %v2470_v60  ;;  %v9480_v60 = vld [vmem:[%s11490_s2 + $0x3e8] sm:$0xff]   ;;  %v9483_v63 = vld [vmem:[%s11490_s2 + $0x400] sm:$0xff]  }
 0x648   :  { %8556 = vmatprep.mubr.bf16.mxu1 %v2485_v0  ;;  %v9484_v0 = vld [vmem:[%s11490_s2 + $0x408] sm:$0xff]  }
 0x649   :  { %8557 = vmatmul.mubr.bf16.vlgmr.msra.gmra.mrb[40].mxu1 %v2486_v62  ;;  %v9482_v62 = vld [vmem:[%s11490_s2 + $0x3f8] sm:$0xff]  }
 0x64a   :  { %8561 = vmatpush3.bf16.msra.mxu1 %v10225_v40  ;;  %8564 = vmatprep.mubr.msk.bf16.mxu1 %vm64_vm0, %v10480_v1  ;;  %v9468_v40 = vld [vmem:[%s11490_s2 + $0x388] sm:$0xff]  }
 0x64b   :  { %8562 = vmatprep.subr.bf16.mxu1 %v10223_v39 }
 0x64e   :  { %8563 = vmatpush3.bf16.msra.mxu1 %v10223_v39  ;;  %v9470_v39 = vld [vmem:[%s11490_s2 + $0x398] sm:$0xff]  }
 0x64f   :  { %8568 = vmatprep.subr.bf16.mxu1 %v9467_v2 }
 0x651   :  { %8565 = vmatmul.mubr.msk.bf16.vlgmr.msra.gmra.mrb[56].mxu1 %vm64_vm0, %v10495_v4 }
 0x652   :  { %8569 = vmatpush3.bf16.msra.mxu1 %v9467_v2  ;;  %v9485_v2 = vld [vmem:[%s11490_s2 + $0x410] sm:$0xff]  }
 0x653   :  { %8570 = vmatprep.subr.bf16.mxu1 %v9468_v40 }
 0x656   :  { %8571 = vmatpush3.bf16.msra.mxu1 %v9468_v40  ;;  %v9486_v40 = vld [vmem:[%s11490_s2 + $0x418] sm:$0xff]  }
 0x657   :  { %8572 = vmatprep.subr.bf16.mxu1 %v9469_v6 }
 0x65a   :  { %8573 = vmatpush3.bf16.msra.mxu1 %v9469_v6  ;;  %v9487_v6 = vld [vmem:[%s11490_s2 + $0x420] sm:$0xff]  }
 0x65b   :  { %8574 = vmatprep.subr.bf16.mxu1 %v9470_v39 }
 0x65e   :  { %8575 = vmatpush3.bf16.msra.mxu1 %v9470_v39  ;;  %v9488_v39 = vld [vmem:[%s11490_s2 + $0x428] sm:$0xff]  }
 0x65f   :  { %8576 = vmatprep.subr.bf16.mxu1 %v9471_v8 }
 0x662   :  { %8577 = vmatpush3.bf16.msra.mxu1 %v9471_v8  ;;  %v9489_v8 = vld [vmem:[%s11490_s2 + $0x430] sm:$0xff]  }
 0x663   :  { %8578 = vmatprep.subr.bf16.mxu1 %v9472_v10 }
 0x666   :  { %8579 = vmatpush3.bf16.msra.mxu1 %v9472_v10  ;;  %v9490_v10 = vld [vmem:[%s11490_s2 + $0x438] sm:$0xff]  }
 0x667   :  { %8580 = vmatprep.subr.bf16.mxu1 %v9473_v12 }
 0x66a   :  { %8581 = vmatpush3.bf16.msra.mxu1 %v9473_v12  ;;  %v9491_v12 = vld [vmem:[%s11490_s2 + $0x440] sm:$0xff]  }
 0x66b   :  { %8582 = vmatprep.subr.bf16.mxu1 %v9474_v14 }
 0x66e   :  { %8583 = vmatpush3.bf16.msra.mxu1 %v9474_v14  ;;  %v9492_v14 = vld [vmem:[%s11490_s2 + $0x448] sm:$0xff]  }
 0x66f   :  { %8596 = vmatprep.subr.bf16.mxu1 %v9475_v17 }
 0x724   :  { %v8566_v47 = vpop.f32.mrb[56].mxu1 }
 0x725   :  { %v2639_v49 = vpop.f32.mrb[57].mxu1 }
 0x726   :  { %v8567_v50 = vpop.f32.mrb[58].mxu1 }
 0x727   :  { %v2655_v52 = vpack.c.bf16 %v8567_v50, %v8566_v47  ;;  %v2642_v53 = vpop.f32.mrb[59].mxu1 }
 0x728   :  { %v2654_v54 = vpack.c.bf16 %v2642_v53, %v2639_v49 }
 0x72a   :  { %8584 = vmatprep.mubr.bf16.mxu1 %v2654_v54 }
 0x72b   :  { %8585 = vmatmul.mubr.bf16.vlgmr.msra.gmra.mrb[40].mxu1 %v2655_v52 }
 0x72c   :  { %8597 = vmatpush3.bf16.msra.mxu1 %v9475_v17  ;;  %8612 = vmatprep.mubr.bf16.mxu1 %v2823_v28  ;;  %v9493_v17 = vld [vmem:[%s11490_s2 + $0x450] sm:$0xff]  }
 0x72d   :  { %8598 = vmatprep.subr.bf16.mxu1 %v9476_v55 }
 0x730   :  { %8599 = vmatpush3.bf16.msra.mxu1 %v9476_v55 }
 0x731   :  { %8600 = vmatprep.subr.bf16.mxu1 %v9477_v56 }
 0x734   :  { %8601 = vmatpush3.bf16.msra.mxu1 %v9477_v56 }
 0x735   :  { %8602 = vmatprep.subr.bf16.mxu1 %v9478_v57 }
 0x738   :  { %8603 = vmatpush3.bf16.msra.mxu1 %v9478_v57 }
 0x739   :  { %8604 = vmatprep.subr.bf16.mxu1 %v9479_v58 }
 0x73c   :  { %8605 = vmatpush3.bf16.msra.mxu1 %v9479_v58 }
 0x73d   :  { %8606 = vmatprep.subr.bf16.mxu1 %v9480_v60 }
 0x740   :  { %8607 = vmatpush3.bf16.msra.mxu1 %v9480_v60 }
 0x741   :  { %8608 = vmatprep.subr.bf16.mxu1 %v9481_v61 }
 0x744   :  { %8609 = vmatpush3.bf16.msra.mxu1 %v9481_v61  ;;  %v9499_v61 = vld [vmem:[%s11490_s2 + $0x4c0] sm:$0xff]  }
 0x745   :  { %8610 = vmatprep.subr.bf16.mxu1 %v9482_v62 }
 0x748   :  { %8611 = vmatpush3.bf16.msra.mxu1 %v9482_v62 }
 0x749   :  { %8624 = vmatprep.subr.bf16.mxu1 %v9483_v63 }
 0x74b   :  { %8613 = vmatmul.mubr.bf16.vlgmr.msra.gmra.mrb[40].mxu1 %v2824_v24  ;;  %v9497_v24 = vld [vmem:[%s11490_s2 + $0x470] sm:$0xff]  }
 0x74c   :  { %8625 = vmatpush3.bf16.msra.mxu1 %v9483_v63  ;;  %8640 = vmatprep.mubr.bf16.mxu1 %v2992_v35 }
 0x74d   :  { %8626 = vmatprep.subr.bf16.mxu1 %v9484_v0 }
 0x750   :  { %8627 = vmatpush3.bf16.msra.mxu1 %v9484_v0 }
 0x751   :  { %8628 = vmatprep.subr.bf16.mxu1 %v9485_v2 }
 0x754   :  { %8629 = vmatpush3.bf16.msra.mxu1 %v9485_v2 }
 0x755   :  { %8630 = vmatprep.subr.bf16.mxu1 %v9486_v40 }
 0x758   :  { %8631 = vmatpush3.bf16.msra.mxu1 %v9486_v40 }
 0x759   :  { %8632 = vmatprep.subr.bf16.mxu1 %v9487_v6 }
 0x75c   :  { %8633 = vmatpush3.bf16.msra.mxu1 %v9487_v6 }
 0x75d   :  { %8634 = vmatprep.subr.bf16.mxu1 %v9488_v39 }
 0x760   :  { %8635 = vmatpush3.bf16.msra.mxu1 %v9488_v39  ;;  %v9508_v39 = vld [vmem:[%s11490_s2 + $0x488] sm:$0xff]  }
 0x761   :  { %8636 = vmatprep.subr.bf16.mxu1 %v9489_v8 }
 0x764   :  { %8637 = vmatpush3.bf16.msra.mxu1 %v9489_v8  ;;  %v9509_v8 = vld [vmem:[%s11490_s2 + $0x490] sm:$0xff]  }
 0x765   :  { %8638 = vmatprep.subr.bf16.mxu1 %v9490_v10 }
 0x768   :  { %8639 = vmatpush3.bf16.msra.mxu1 %v9490_v10  ;;  %v9510_v10 = vld [vmem:[%s11490_s2 + $0x498] sm:$0xff]  }
 0x769   :  { %8652 = vmatprep.subr.bf16.mxu1 %v9491_v12 }
 0x76b   :  { %8641 = vmatmul.mubr.bf16.vlgmr.msra.gmra.mrb[40].mxu1 %v2993_v33  ;;  %v9677_v33 = vld [vmem:[%s11488_s0] sm:$0xff]  }
 0x76c   :  { %8653 = vmatpush3.bf16.msra.mxu1 %v9491_v12  ;;  %8668 = vmatprep.mubr.bf16.mxu1 %v3161_v46  ;;  %v34_v34 = vunpack.c.l.bf16 %v9677_v33  ;;  %v35_v47 = vunpack.c.h.bf16 %v9677_v33  ;;  %v9511_v12 = vld [vmem:[%s11490_s2 + $0x4a0] sm:$0xff]  }
 0x76d   :  { %8654 = vmatprep.subr.bf16.mxu1 %v9492_v14 }
 0x770   :  { %8655 = vmatpush3.bf16.msra.mxu1 %v9492_v14  ;;  %v9512_v14 = vld [vmem:[%s11490_s2 + $0x4a8] sm:$0xff]  }
 0x771   :  { %8656 = vmatprep.subr.bf16.mxu1 %v9493_v17 }
 0x774   :  { %8657 = vmatpush3.bf16.msra.mxu1 %v9493_v17  ;;  %v9513_v17 = vld [vmem:[%s11490_s2 + $0x4b0] sm:$0xff]  }
 0x775   :  { %8658 = vmatprep.subr.bf16.mxu1 %v9494_v19 }
 0x778   :  { %8659 = vmatpush3.bf16.msra.mxu1 %v9494_v19  ;;  %v9514_v19 = vld [vmem:[%s11490_s2 + $0x4b8] sm:$0xff]  }
 0x779   :  { %8660 = vmatprep.subr.bf16.mxu1 %v9495_v21 }
 0x77c   :  { %8661 = vmatpush3.bf16.msra.mxu1 %v9495_v21  ;;  %v9515_v21 = vld [vmem:[%s11490_s2 + $0x500] sm:$0xff]  }
 0x77d   :  { %8662 = vmatprep.subr.bf16.mxu1 %v9496_v23 }
 0x780   :  { %8663 = vmatpush3.bf16.msra.mxu1 %v9496_v23  ;;  %v9516_v23 = vld [vmem:[%s11490_s2 + $0x508] sm:$0xff]  }
 0x781   :  { %8664 = vmatprep.subr.bf16.mxu1 %v9497_v24 }
 0x784   :  { %8665 = vmatpush3.bf16.msra.mxu1 %v9497_v24  ;;  %v9518_v24 = vld [vmem:[%s11490_s2 + $0x518] sm:$0xff]  }
 0x785   :  { %8666 = vmatprep.subr.bf16.mxu1 %v9498_v26 }
 0x788   :  { %8667 = vmatpush3.bf16.msra.mxu1 %v9498_v26  ;;  %v9519_v26 = vld [vmem:[%s11490_s2 + $0x520] sm:$0xff]  }
 0x78b   :  { %8669 = vmatmul.mubr.bf16.vlgmr.msra.gmra.mrb[40].mxu1 %v3162_v43 }
 0x78c   :  { %8760 = vmatprep.mubr.msk.bf16.mxu1 %vm64_vm0, %v10396_v27  ;;  %v9678_v27 = vld [vmem:[%s11488_s0 + $0x8] sm:$0xff]  }
 0x78d   :  { %v36_v37 = vunpack.c.l.bf16 %v9678_v27  ;;  %v37_v38 = vunpack.c.h.bf16 %v9678_v27 }
 0x85e   :  { %v8670_v28 = vpop.f32.mrb[40].mxu1 }
 0x85f   :  { %v9204_v29 = vadd.f32 %v8670_v28, %v10384_v18  ;;  %v3262_v32 = vpop.f32.mrb[41].mxu1  ;;  %v9521_v28 = vld [vmem:[%s11490_s2 + $0x530] sm:$0xff]  }
 0x860   :  { %v9205_v35 = vadd.f32 %v3262_v32, %v10386_v20  ;;  %v8671_v36 = vpop.f32.mrb[42].mxu1 }
 0x861   :  { %v9206_v18 = vadd.f32 %v8671_v36, %v10388_v22  ;;  %v3265_v43 = vpop.f32.mrb[43].mxu1  ;;  %v3291_v44 = vadd.f32 %v9204_v29, %v7146_v31  ;;  %v9522_v29 = vld [vmem:[%s11490_s2 + $0x538] sm:$0xff]  }
 0x862   :  { %v3289_v46 = vadd.f32 %v9205_v35, %v7146_v31  ;;  %v9207_v49 = vadd.f32 %v3265_v43, %v10390_v25 }
 0x863   :  { %v3292_v50 = vadd.f32 %v9206_v18, %v7146_v31  ;;  %v10632_v54 = vadd.f32 %v3291_v44, %v36_v37 }
 0x864   :  { %v10628_v52 = vadd.f32 %v3289_v46, %v34_v34  ;;  %v3290_v53 = vadd.f32 %v9207_v49, %v7146_v31  ;;  %v9523_v31 = vld [vmem:[%s11490_s2 + $0x540] sm:$0xff]  }
 0x865   :  { %v10630_v20 = vadd.f32 %v3292_v50, %v37_v38  ;;  %v3299_v58 = vmax.f32 %v10632_v54, 0.0 }
 0x866   :  { %v10634_v55 = vadd.f32 %v3290_v53, %v35_v47  ;;  %v3297_v56 = vmax.f32 %v10628_v52, 0.0 }
 0x867   :  { %v3300_v22 = vmax.f32 %v10630_v20, 0.0 }
 0x868   :  { %v3298_v57 = vmax.f32 %v10634_v55, 0.0 }
 0x869   :  { %v10650_v60 = vpack.c.bf16 %v3300_v22, %v3299_v58 }
 0x86a   :  { %v10644_v25 = vpack.c.bf16 %v3298_v57, %v3297_v56 }
 0x86c   :  { %8672 = vmatprep.subr.bf16.mxu0 %v10644_v25  ;;  %8756 = vmatprep.subr.bf16.mxu1 %v10644_v25 }
 0x86d   :  { %8673 = vmatpush3.bf16.msra.mxu0 %v10644_v25  ;;  %8757 = vmatpush3.bf16.msra.mxu1 %v10644_v25 }
 0x86e   :  { %8674 = vmatprep.subr.bf16.mxu0 %v10650_v60  ;;  %8758 = vmatprep.subr.bf16.mxu1 %v10650_v60 }
 0x871   :  { %8675 = vmatpush3.bf16.msra.mxu0 %v10650_v60  ;;  %8759 = vmatpush3.bf16.msra.mxu1 %v10650_v60 }
 0x872   :  { %8680 = vmatprep.subr.bf16.mxu0 %v10644_v25  ;;  %8784 = vmatprep.subr.bf16.mxu1 %v10644_v25 }
 0x874   :  { %8677 = vmatmul.mubr.msk.bf16.vlgmr.msra.gmra.mrb[24].mxu0 %vm64_vm0, %v10236_v41  ;;  %8761 = vmatmul.mubr.msk.bf16.vlgmr.msra.gmra.mrb[60].mxu1 %vm64_vm0, %v10411_v30  ;;  %v9500_v41 = vld [vmem:[%s11490_s2 + $0x4c8] sm:$0xff]   ;;  %v9503_v30 = vld [vmem:[%s11490_s2 + $0x4e0] sm:$0xff]  }
 0x875   :  { %8681 = vmatpush3.bf16.msra.mxu0 %v10644_v25  ;;  %8785 = vmatpush3.bf16.msra.mxu1 %v10644_v25 }
 0x876   :  { %8682 = vmatprep.subr.bf16.mxu0 %v10650_v60  ;;  %8786 = vmatprep.subr.bf16.mxu1 %v10650_v60 }
 0x877   :  { %8684 = vmatprep.mubr.msk.bf16.mxu0 %vm64_vm0, %v10244_v42  ;;  %8788 = vmatprep.mubr.msk.bf16.mxu1 %vm64_vm0, %v10438_v48  ;;  %v9501_v42 = vld [vmem:[%s11490_s2 + $0x4d0] sm:$0xff]  }
 0x879   :  { %8683 = vmatpush3.bf16.msra.mxu0 %v10650_v60  ;;  %8787 = vmatpush3.bf16.msra.mxu1 %v10650_v60 }
 0x87a   :  { %8812 = vmatprep.subr.bf16.mxu1 %v10644_v25  ;;  %8688 = vmatprep.subr.bf16.mxu0 %v9499_v61 }
 0x87c   :  { %8685 = vmatmul.mubr.msk.bf16.vlgmr.msra.gmra.mrb[28].mxu0 %vm64_vm0, %v10259_v45  ;;  %8789 = vmatmul.mubr.msk.bf16.vlgmr.msra.gmra.mrb[64].mxu1 %vm64_vm0, %v10453_v51  ;;  %v9502_v45 = vld [vmem:[%s11490_s2 + $0x4d8] sm:$0xff]  }
 0x87d   :  { %8813 = vmatpush3.bf16.msra.mxu1 %v10644_v25  ;;  %8816 = vmatprep.mubr.msk.bf16.mxu1 %vm64_vm0, %v10480_v1 }
 0x87e   :  { %8814 = vmatprep.subr.bf16.mxu1 %v10650_v60  ;;  %8689 = vmatpush3.bf16.msra.mxu0 %v9499_v61 }
 0x87f   :  { %8690 = vmatprep.subr.bf16.mxu0 %v9500_v41 }
 0x881   :  { %8815 = vmatpush3.bf16.msra.mxu1 %v10650_v60 }
 0x882   :  { %8840 = vmatprep.subr.bf16.mxu1 %v10644_v25  ;;  %8691 = vmatpush3.bf16.msra.mxu0 %v9500_v41 }
 0x883   :  { %8692 = vmatprep.subr.bf16.mxu0 %v9501_v42 }
 0x884   :  { %8817 = vmatmul.mubr.msk.bf16.vlgmr.msra.gmra.mrb[68].mxu1 %vm64_vm0, %v10495_v4 }
 0x885   :  { %8841 = vmatpush3.bf16.msra.mxu1 %v10644_v25  ;;  %8844 = vmatprep.mubr.msk.bf16.mxu1 %vm64_vm0, %v10313_v5  ;;  %v9504_v5 = vld [vmem:[%s11490_s2 + $0x4e8] sm:$0xff]  }
 0x886   :  { %8842 = vmatprep.subr.bf16.mxu1 %v10650_v60  ;;  %8693 = vmatpush3.bf16.msra.mxu0 %v9501_v42 }
 0x887   :  { %8694 = vmatprep.subr.bf16.mxu0 %v9502_v45 }
 0x889   :  { %8843 = vmatpush3.bf16.msra.mxu1 %v10650_v60 }
 0x88a   :  { %8868 = vmatprep.subr.bf16.mxu1 %v10644_v25  ;;  %8695 = vmatpush3.bf16.msra.mxu0 %v9502_v45 }
 0x88b   :  { %8696 = vmatprep.subr.bf16.mxu0 %v9503_v30 }
 0x88c   :  { %8845 = vmatmul.mubr.msk.bf16.vlgmr.msra.gmra.mrb[72].mxu1 %vm64_vm0, %v10325_v7  ;;  %v9505_v7 = vld [vmem:[%s11490_s2 + $0x4f0] sm:$0xff]  }
 0x88d   :  { %8869 = vmatpush3.bf16.msra.mxu1 %v10644_v25  ;;  %8872 = vmatprep.mubr.msk.bf16.mxu1 %vm64_vm0, %v10337_v9  ;;  %v9506_v9 = vld [vmem:[%s11490_s2 + $0x4f8] sm:$0xff]  }
 0x88e   :  { %8870 = vmatprep.subr.bf16.mxu1 %v10650_v60  ;;  %8697 = vmatpush3.bf16.msra.mxu0 %v9503_v30 }
 0x88f   :  { %8698 = vmatprep.subr.bf16.mxu0 %v9504_v5 }
 0x891   :  { %8871 = vmatpush3.bf16.msra.mxu1 %v10650_v60 }
 0x892   :  { %8896 = vmatprep.subr.bf16.mxu1 %v10644_v25  ;;  %8699 = vmatpush3.bf16.msra.mxu0 %v9504_v5 }
 0x893   :  { %8700 = vmatprep.subr.bf16.mxu0 %v9505_v7 }
 0x894   :  { %8873 = vmatmul.mubr.msk.bf16.vlgmr.msra.gmra.mrb[76].mxu1 %vm64_vm0, %v10349_v11  ;;  %v9507_v11 = vld [vmem:[%s11490_s2 + $0x480] sm:$0xff]  }
 0x895   :  { %8897 = vmatpush3.bf16.msra.mxu1 %v10644_v25  ;;  %8900 = vmatprep.mubr.msk.bf16.mxu1 %vm64_vm0, %v10361_v13 }
 0x896   :  { %8898 = vmatprep.subr.bf16.mxu1 %v10650_v60  ;;  %8701 = vmatpush3.bf16.msra.mxu0 %v9505_v7 }
 0x897   :  { %8702 = vmatprep.subr.bf16.mxu0 %v9506_v9 }
 0x899   :  { %8899 = vmatpush3.bf16.msra.mxu1 %v10650_v60 }
 0x89a   :  { %8703 = vmatpush3.bf16.msra.mxu0 %v9506_v9 }
 0x89b   :  { %8708 = vmatprep.subr.bf16.mxu0 %v9507_v11 }
 0x89c   :  { %8901 = vmatmul.mubr.msk.bf16.vlgmr.msra.gmra.mrb[80].mxu1 %vm64_vm0, %v10372_v15 }
 0x89d   :  { %8928 = vmatprep.mubr.msk.bf16.mxu1 %vm64_vm0, %v10379_v16 }
 0x947   :  { %v8678_v13 = vpop.f32.mrb[24].mxu0  ;;  %v10797_v32 = vpop.f32.mrb[60].mxu1 }
 0x948   :  { %v3337_v15 = vpop.f32.mrb[25].mxu0  ;;  %v3836_v33 = vpop.f32.mrb[61].mxu1 }
 0x949   :  { %v8679_v16 = vpop.f32.mrb[26].mxu0  ;;  %v8763_v34 = vpop.f32.mrb[62].mxu1 }
 0x94a   :  { %v3353_v48 = vpack.c.bf16 %v8679_v16, %v8678_v13  ;;  %v3340_v51 = vpop.f32.mrb[27].mxu0  ;;  %v3852_v35 = vpack.c.bf16 %v8763_v34, %v10797_v32  ;;  %v3839_v36 = vpop.f32.mrb[63].mxu1  ;;  %v9539_v34 = vld [vmem:[%s11490_s2 + $0x5c0] sm:$0xff]  }
 0x94b   :  { %v3352_v4 = vpack.c.bf16 %v3340_v51, %v3337_v15  ;;  %v3851_v27 = vpack.c.bf16 %v3839_v36, %v3836_v33  ;;  %v9525_v51 = vld [vmem:[%s11490_s2 + $0x550] sm:$0xff]  }
 0x94c   :  { %v9541_v36 = vld [vmem:[%s11490_s2 + $0x5d0] sm:$0xff]  }
 0x94f   :  { %v8686_v62 = vpop.f32.mrb[28].mxu0  ;;  %v10800_v37 = vpop.f32.mrb[64].mxu1 }
 0x950   :  { %v3405_v63 = vpop.f32.mrb[29].mxu0  ;;  %v4005_v38 = vpop.f32.mrb[65].mxu1 }
 0x951   :  { %v8687_v0 = vpop.f32.mrb[30].mxu0  ;;  %v10802_v18 = vpop.f32.mrb[66].mxu1 }
 0x952   :  { %v3421_v2 = vpack.c.bf16 %v8687_v0, %v8686_v62  ;;  %v3408_v40 = vpop.f32.mrb[31].mxu0  ;;  %v4021_v43 = vpack.c.bf16 %v10802_v18, %v10800_v37  ;;  %v4008_v44 = vpop.f32.mrb[67].mxu1  ;;  %v9527_v62 = vld [vmem:[%s11490_s2 + $0x560] sm:$0xff]   ;;  %v9529_v0 = vld [vmem:[%s11490_s2 + $0x570] sm:$0xff]  }
 0x953   :  { %v3420_v6 = vpack.c.bf16 %v3408_v40, %v3405_v63  ;;  %v4020_v46 = vpack.c.bf16 %v4008_v44, %v4005_v38  ;;  %v9528_v63 = vld [vmem:[%s11490_s2 + $0x568] sm:$0xff]   ;;  %v9530_v40 = vld [vmem:[%s11490_s2 + $0x578] sm:$0xff]   ;;  %v9543_v37 = vld [vmem:[%s11490_s2 + $0x5e0] sm:$0xff]  }
 0x954   :  { %v9544_v38 = vld [vmem:[%s11490_s2 + $0x5e8] sm:$0xff]   ;;  %v9545_v18 = vld [vmem:[%s11490_s2 + $0x5f0] sm:$0xff]   ;;  %v9547_v44 = vld [vmem:[%s11490_s2 + $0x600] sm:$0xff]  }
 0x955   :  { %8704 = vmatprep.mubr.bf16.mxu0 %v3420_v6 }
 0x956   :  { %8705 = vmatmul.mubr.bf16.vlgmr.msra.gmra.mrb[32].mxu0 %v3421_v2 }
 0x957   :  { %8709 = vmatpush3.bf16.msra.mxu0 %v9507_v11  ;;  %8724 = vmatprep.mubr.bf16.mxu0 %v3352_v4  ;;  %v10806_v47 = vpop.f32.mrb[68].mxu1  ;;  %v9526_v4 = vld [vmem:[%s11490_s2 + $0x558] sm:$0xff]  }
 0x958   :  { %8710 = vmatprep.subr.bf16.mxu0 %v9508_v39  ;;  %v10808_v49 = vpop.f32.mrb[69].mxu1 }
 0x959   :  { %v10810_v50 = vpop.f32.mrb[70].mxu1 }
 0x95a   :  { %v4190_v53 = vpack.c.bf16 %v10810_v50, %v10806_v47  ;;  %v9551_v47 = vld [vmem:[%s11490_s2 + $0x620] sm:$0xff]   ;;  %v9552_v50 = vld [vmem:[%s11490_s2 + $0x628] sm:$0xff]  }
 0x95b   :  { %8711 = vmatpush3.bf16.msra.mxu0 %v9508_v39 }
 0x95c   :  { %8712 = vmatprep.subr.bf16.mxu0 %v9509_v8 }
 0x95f   :  { %8713 = vmatpush3.bf16.msra.mxu0 %v9509_v8 }
 0x960   :  { %8714 = vmatprep.subr.bf16.mxu0 %v9510_v10 }
 0x963   :  { %8715 = vmatpush3.bf16.msra.mxu0 %v9510_v10 }
 0x964   :  { %8716 = vmatprep.subr.bf16.mxu0 %v9511_v12 }
 0x967   :  { %8717 = vmatpush3.bf16.msra.mxu0 %v9511_v12  ;;  %v9531_v12 = vld [vmem:[%s11490_s2 + $0x580] sm:$0xff]  }
 0x968   :  { %8718 = vmatprep.subr.bf16.mxu0 %v9512_v14 }
 0x96b   :  { %8719 = vmatpush3.bf16.msra.mxu0 %v9512_v14 }
 0x96c   :  { %8720 = vmatprep.subr.bf16.mxu0 %v9513_v17 }
 0x96f   :  { %8721 = vmatpush3.bf16.msra.mxu0 %v9513_v17  ;;  %v9532_v17 = vld [vmem:[%s11490_s2 + $0x588] sm:$0xff]  }
 0x970   :  { %8722 = vmatprep.subr.bf16.mxu0 %v9514_v19 }
 0x973   :  { %8723 = vmatpush3.bf16.msra.mxu0 %v9514_v19  ;;  %v9533_v19 = vld [vmem:[%s11490_s2 + $0x590] sm:$0xff]  }
 0x974   :  { %8728 = vmatprep.subr.bf16.mxu0 %v10644_v25 }
 0x976   :  { %8725 = vmatmul.mubr.bf16.vlgmr.msra.gmra.mrb[32].mxu0 %v3353_v48  ;;  %v9524_v48 = vld [vmem:[%s11490_s2 + $0x548] sm:$0xff]  }
 0x977   :  { %8729 = vmatpush3.bf16.msra.mxu0 %v10644_v25  ;;  %8732 = vmatprep.mubr.msk.bf16.mxu0 %vm64_vm0, %v10286_v59  ;;  %v9517_v59 = vld [vmem:[%s11490_s2 + $0x510] sm:$0xff]   ;;  %v10814_v25 = vpop.f32.mrb[71].mxu1 }
 0x978   :  { %8730 = vmatprep.subr.bf16.mxu0 %v10650_v60  ;;  %v10818_v61 = vpop.f32.mrb[72].mxu1 }
 0x979   :  { %v10820_v41 = vpop.f32.mrb[73].mxu1 }
 0x97a   :  { %v10822_v42 = vpop.f32.mrb[74].mxu1 }
 0x97b   :  { %8731 = vmatpush3.bf16.msra.mxu0 %v10650_v60  ;;  %v4189_v60 = vpack.c.bf16 %v10814_v25, %v10808_v49  ;;  %v4359_v45 = vpack.c.bf16 %v10822_v42, %v10818_v61  ;;  %v10826_v5 = vpop.f32.mrb[75].mxu1  ;;  %v9549_v49 = vld [vmem:[%s11490_s2 + $0x610] sm:$0xff]   ;;  %v9550_v25 = vld [vmem:[%s11490_s2 + $0x618] sm:$0xff]   ;;  %v9559_v61 = vld [vmem:[%s11490_s2 + $0x660] sm:$0xff]  }
 0x97c   :  { %8736 = vmatprep.subr.bf16.mxu0 %v9515_v21  ;;  %v4358_v9 = vpack.c.bf16 %v10826_v5, %v10820_v41  ;;  %v10848_v2 = vpop.f32.mrb[76].mxu1  ;;  %v9555_v41 = vld [vmem:[%s11490_s2 + $0x640] sm:$0xff]   ;;  %v9557_v5 = vld [vmem:[%s11490_s2 + $0x650] sm:$0xff]   ;;  %v9560_v42 = vld [vmem:[%s11490_s2 + $0x668] sm:$0xff]  }
 0x97d   :  { %v10853_v6 = vpop.f32.mrb[77].mxu1 }
 0x97e   :  { %8733 = vmatmul.mubr.msk.bf16.vlgmr.msra.gmra.mrb[36].mxu0 %vm64_vm0, %v10301_v3  ;;  %v9520_v3 = vld [vmem:[%s11490_s2 + $0x528] sm:$0xff]   ;;  %v10855_v39 = vpop.f32.mrb[78].mxu1 }
 0x97f   :  { %8737 = vmatpush3.bf16.msra.mxu0 %v9515_v21  ;;  %v4528_v8 = vpack.c.bf16 %v10855_v39, %v10848_v2  ;;  %v10859_v10 = vpop.f32.mrb[79].mxu1  ;;  %v9534_v21 = vld [vmem:[%s11490_s2 + $0x598] sm:$0xff]  }
 0x980   :  { %8738 = vmatprep.subr.bf16.mxu0 %v9516_v23  ;;  %v4527_v14 = vpack.c.bf16 %v10859_v10, %v10853_v6 }
 0x983   :  { %8739 = vmatpush3.bf16.msra.mxu0 %v9516_v23  ;;  %v9535_v23 = vld [vmem:[%s11490_s2 + $0x5a0] sm:$0xff]  }
 0x984   :  { %8740 = vmatprep.subr.bf16.mxu0 %v9517_v59 }
 0x987   :  { %8741 = vmatpush3.bf16.msra.mxu0 %v9517_v59  ;;  %v9536_v59 = vld [vmem:[%s11490_s2 + $0x5a8] sm:$0xff]  }
 0x988   :  { %8742 = vmatprep.subr.bf16.mxu0 %v9518_v24 }
 0x98b   :  { %8743 = vmatpush3.bf16.msra.mxu0 %v9518_v24  ;;  %v9537_v24 = vld [vmem:[%s11490_s2 + $0x5b0] sm:$0xff]  }
 0x98c   :  { %8744 = vmatprep.subr.bf16.mxu0 %v9519_v26 }
 0x98f   :  { %8745 = vmatpush3.bf16.msra.mxu0 %v9519_v26  ;;  %v10884_v26 = vpop.f32.mrb[80].mxu1 }
 0x990   :  { %8746 = vmatprep.subr.bf16.mxu0 %v9520_v3 }
 0x993   :  { %8747 = vmatpush3.bf16.msra.mxu0 %v9520_v3  ;;  %v9538_v3 = vld [vmem:[%s11490_s2 + $0x5b8] sm:$0xff]  }
 0x994   :  { %8748 = vmatprep.subr.bf16.mxu0 %v9521_v28 }
 0x997   :  { %8749 = vmatpush3.bf16.msra.mxu0 %v9521_v28  ;;  %v10889_v28 = vpop.f32.mrb[81].mxu1 }
 0x998   :  { %8750 = vmatprep.subr.bf16.mxu0 %v9522_v29 }
 0x99b   :  { %8751 = vmatpush3.bf16.msra.mxu0 %v9522_v29  ;;  %v10891_v29 = vpop.f32.mrb[82].mxu1 }
 0x99c   :  { %8764 = vmatprep.subr.bf16.mxu0 %v9523_v31  ;;  %v10895_v32 = vpop.f32.mrb[83].mxu1 }
 0x99d   :  { %v4696_v33 = vpack.c.bf16 %v10895_v32, %v10889_v28  ;;  %v9682_v28 = vld [vmem:[%s11489_s1 + $0x60] sm:$0xff]   ;;  %v9684_v32 = vld [vmem:[%s11489_s1 + $0x68] sm:$0xff]  }
 0xa51   :  { %v8734_v30 = vpop.f32.mrb[36].mxu0 }
 0xa52   :  { %v3667_v7 = vpop.f32.mrb[37].mxu0 }
 0xa53   :  { %v8735_v11 = vpop.f32.mrb[38].mxu0 }
 0xa54   :  { %v3683_v13 = vpack.c.bf16 %v8735_v11, %v8734_v30  ;;  %v3670_v15 = vpop.f32.mrb[39].mxu0  ;;  %v9556_v30 = vld [vmem:[%s11490_s2 + $0x648] sm:$0xff]   ;;  %v9563_v11 = vld [vmem:[%s11490_s2 + $0x680] sm:$0xff]  }
 0xa55   :  { %v3682_v16 = vpack.c.bf16 %v3670_v15, %v3667_v7  ;;  %v9558_v7 = vld [vmem:[%s11490_s2 + $0x658] sm:$0xff]   ;;  %v9565_v15 = vld [vmem:[%s11490_s2 + $0x690] sm:$0xff]  }
 0xa57   :  { %8752 = vmatprep.mubr.bf16.mxu0 %v3682_v16  ;;  %v9566_v16 = vld [vmem:[%s11490_s2 + $0x698] sm:$0xff]  }
 0xa58   :  { %8753 = vmatmul.mubr.bf16.vlgmr.msra.gmra.mrb[32].mxu0 %v3683_v13  ;;  %v9564_v13 = vld [vmem:[%s11490_s2 + $0x688] sm:$0xff]  }
 0xa59   :  { %8765 = vmatpush3.bf16.msra.mxu0 %v9523_v31  ;;  %8780 = vmatprep.mubr.bf16.mxu0 %v3851_v27  ;;  %v4697_v31 = vpack.c.bf16 %v10891_v29, %v10884_v26  ;;  %v9542_v27 = vld [vmem:[%s11490_s2 + $0x5d8] sm:$0xff]   ;;  %v9571_v26 = vld [vmem:[%s11490_s2 + $0x700] sm:$0xff]   ;;  %v9572_v29 = vld [vmem:[%s11490_s2 + $0x708] sm:$0xff]  }
 0xa5a   :  { %8766 = vmatprep.subr.bf16.mxu0 %v9524_v48 }
 0xa5d   :  { %8767 = vmatpush3.bf16.msra.mxu0 %v9524_v48  ;;  %v9567_v48 = vld [vmem:[%s11490_s2 + $0x6a0] sm:$0xff]  }
 0xa5e   :  { %8768 = vmatprep.subr.bf16.mxu0 %v9525_v51 }
 0xa61   :  { %8769 = vmatpush3.bf16.msra.mxu0 %v9525_v51  ;;  %v9568_v51 = vld [vmem:[%s11490_s2 + $0x6a8] sm:$0xff]  }
 0xa62   :  { %8770 = vmatprep.subr.bf16.mxu0 %v9526_v4 }
 0xa65   :  { %8771 = vmatpush3.bf16.msra.mxu0 %v9526_v4  ;;  %v9569_v4 = vld [vmem:[%s11490_s2 + $0x6b0] sm:$0xff]  }
 0xa66   :  { %8772 = vmatprep.subr.bf16.mxu0 %v9527_v62 }
 0xa69   :  { %8773 = vmatpush3.bf16.msra.mxu0 %v9527_v62  ;;  %v9570_v62 = vld [vmem:[%s11490_s2 + $0x6b8] sm:$0xff]  }
 0xa6a   :  { %8774 = vmatprep.subr.bf16.mxu0 %v9528_v63 }
 0xa6d   :  { %8775 = vmatpush3.bf16.msra.mxu0 %v9528_v63  ;;  %v7382_v63 = vld [vmem:[%s11491_s3 + $0x2] ss:$0 sm:$0xff] }
 0xa6e   :  { %8776 = vmatprep.subr.bf16.mxu0 %v9529_v0 }
 0xa71   :  { %8777 = vmatpush3.bf16.msra.mxu0 %v9529_v0 }
 0xa72   :  { %8778 = vmatprep.subr.bf16.mxu0 %v9530_v40 }
 0xa75   :  { %8779 = vmatpush3.bf16.msra.mxu0 %v9530_v40 }
 0xa76   :  { %8792 = vmatprep.subr.bf16.mxu0 %v9531_v12 }
 0xa78   :  { %8781 = vmatmul.mubr.bf16.vlgmr.msra.gmra.mrb[32].mxu0 %v3852_v35  ;;  %v9540_v35 = vld [vmem:[%s11490_s2 + $0x5c8] sm:$0xff]  }
 0xa79   :  { %8793 = vmatpush3.bf16.msra.mxu0 %v9531_v12  ;;  %8808 = vmatprep.mubr.bf16.mxu0 %v4020_v46  ;;  %v9548_v46 = vld [vmem:[%s11490_s2 + $0x608] sm:$0xff]  }
 0xa7a   :  { %8794 = vmatprep.subr.bf16.mxu0 %v9532_v17 }
 0xa7d   :  { %8795 = vmatpush3.bf16.msra.mxu0 %v9532_v17 }
 0xa7e   :  { %8796 = vmatprep.subr.bf16.mxu0 %v9533_v19 }
 0xa81   :  { %8797 = vmatpush3.bf16.msra.mxu0 %v9533_v19 }
 0xa82   :  { %8798 = vmatprep.subr.bf16.mxu0 %v9534_v21 }
 0xa85   :  { %8799 = vmatpush3.bf16.msra.mxu0 %v9534_v21 }
 0xa86   :  { %8800 = vmatprep.subr.bf16.mxu0 %v9535_v23 }
 0xa89   :  { %8801 = vmatpush3.bf16.msra.mxu0 %v9535_v23 }
 0xa8a   :  { %8802 = vmatprep.subr.bf16.mxu0 %v9536_v59 }
 0xa8d   :  { %8803 = vmatpush3.bf16.msra.mxu0 %v9536_v59 }
 0xa8e   :  { %8804 = vmatprep.subr.bf16.mxu0 %v9537_v24 }
 0xa91   :  { %8805 = vmatpush3.bf16.msra.mxu0 %v9537_v24  ;;  %v9680_v24 = vld [vmem:[%s11489_s1 + $0x58] sm:$0xff]  }
 0xa92   :  { %8806 = vmatprep.subr.bf16.mxu0 %v9538_v3 }
 0xa95   :  { %8807 = vmatpush3.bf16.msra.mxu0 %v9538_v3  ;;  %v9681_v3 = vld [vmem:[%s11489_s1 + $0x10] sm:$0xff]  }
 0xa96   :  { %8820 = vmatprep.subr.bf16.mxu0 %v9539_v34 }
 0xa98   :  { %8809 = vmatmul.mubr.bf16.vlgmr.msra.gmra.mrb[32].mxu0 %v4021_v43  ;;  %v9546_v43 = vld [vmem:[%s11490_s2 + $0x5f8] sm:$0xff]  }
 0xa99   :  { %8821 = vmatpush3.bf16.msra.mxu0 %v9539_v34  ;;  %8836 = vmatprep.mubr.bf16.mxu0 %v4189_v60  ;;  %v9554_v60 = vld [vmem:[%s11490_s2 + $0x638] sm:$0xff]   ;;  %v9573_v34 = vld [vmem:[%s11490_s2 + $0x710] sm:$0xff]  }
 0xa9a   :  { %8822 = vmatprep.subr.bf16.mxu0 %v9540_v35 }
 0xa9d   :  { %8823 = vmatpush3.bf16.msra.mxu0 %v9540_v35  ;;  %v9574_v35 = vld [vmem:[%s11490_s2 + $0x718] sm:$0xff]  }
 0xa9e   :  { %8824 = vmatprep.subr.bf16.mxu0 %v9541_v36 }
 0xaa1   :  { %8825 = vmatpush3.bf16.msra.mxu0 %v9541_v36  ;;  %v9686_v36 = vld [vmem:[%s11489_s1 + $0x78] sm:$0xff]  }
 0xaa2   :  { %8826 = vmatprep.subr.bf16.mxu0 %v9542_v27 }
 0xaa5   :  { %8827 = vmatpush3.bf16.msra.mxu0 %v9542_v27  ;;  %v9687_v27 = vld [vmem:[%s11489_s1 + $0x80] sm:$0xff]  }
 0xaa6   :  { %8828 = vmatprep.subr.bf16.mxu0 %v9543_v37 }
 0xaa9   :  { %8829 = vmatpush3.bf16.msra.mxu0 %v9543_v37  ;;  %v9575_v37 = vld [vmem:[%s11490_s2 + $0x720] sm:$0xff]  }
 0xaaa   :  { %8830 = vmatprep.subr.bf16.mxu0 %v9544_v38 }
 0xaad   :  { %8831 = vmatpush3.bf16.msra.mxu0 %v9544_v38  ;;  %v9688_v38 = vld [vmem:[%s11489_s1 + $0x88] sm:$0xff]  }
 0xaae   :  { %8832 = vmatprep.subr.bf16.mxu0 %v9545_v18 }
 0xab1   :  { %8833 = vmatpush3.bf16.msra.mxu0 %v9545_v18  ;;  %v9576_v18 = vld [vmem:[%s11490_s2 + $0x728] sm:$0xff]  }
 0xab2   :  { %8834 = vmatprep.subr.bf16.mxu0 %v9546_v43 }
 0xab5   :  { %8835 = vmatpush3.bf16.msra.mxu0 %v9546_v43  ;;  %v9577_v43 = vld [vmem:[%s11490_s2 + $0x730] sm:$0xff]  }
 0xab6   :  { %8848 = vmatprep.subr.bf16.mxu0 %v9547_v44 }
 0xab8   :  { %8837 = vmatmul.mubr.bf16.vlgmr.msra.gmra.mrb[32].mxu0 %v4190_v53  ;;  %v9553_v53 = vld [vmem:[%s11490_s2 + $0x630] sm:$0xff]  }
 0xab9   :  { %8849 = vmatpush3.bf16.msra.mxu0 %v9547_v44  ;;  %8864 = vmatprep.mubr.bf16.mxu0 %v4358_v9  ;;  %v9562_v9 = vld [vmem:[%s11490_s2 + $0x678] sm:$0xff]  }
 0xaba   :  { %8850 = vmatprep.subr.bf16.mxu0 %v9548_v46  ;;  %v9578_v44 = vld [vmem:[%s11490_s2 + $0x738] sm:$0xff]  }
 0xabd   :  { %8851 = vmatpush3.bf16.msra.mxu0 %v9548_v46  ;;  %v9579_v46 = vld [vmem:[%s11490_s2 + $0x6c0] sm:$0xff]  }
 0xabe   :  { %8852 = vmatprep.subr.bf16.mxu0 %v9549_v49 }
 0xac1   :  { %8853 = vmatpush3.bf16.msra.mxu0 %v9549_v49 }
 0xac2   :  { %8854 = vmatprep.subr.bf16.mxu0 %v9550_v25 }
 0xac5   :  { %8855 = vmatpush3.bf16.msra.mxu0 %v9550_v25 }
 0xac6   :  { %8856 = vmatprep.subr.bf16.mxu0 %v9551_v47 }
 0xac9   :  { %8857 = vmatpush3.bf16.msra.mxu0 %v9551_v47 }
 0xaca   :  { %8858 = vmatprep.subr.bf16.mxu0 %v9552_v50 }
 0xacd   :  { %8859 = vmatpush3.bf16.msra.mxu0 %v9552_v50 }
 0xace   :  { %8860 = vmatprep.subr.bf16.mxu0 %v9553_v53 }
 0xad1   :  { %8861 = vmatpush3.bf16.msra.mxu0 %v9553_v53 }
 0xad2   :  { %8862 = vmatprep.subr.bf16.mxu0 %v9554_v60 }
 0xad5   :  { %8863 = vmatpush3.bf16.msra.mxu0 %v9554_v60 }
 0xad6   :  { %8876 = vmatprep.subr.bf16.mxu0 %v9555_v41 }
 0xad8   :  { %8865 = vmatmul.mubr.bf16.vlgmr.msra.gmra.mrb[32].mxu0 %v4359_v45  ;;  %v9561_v45 = vld [vmem:[%s11490_s2 + $0x670] sm:$0xff]  }
 0xad9   :  { %8877 = vmatpush3.bf16.msra.mxu0 %v9555_v41  ;;  %8892 = vmatprep.mubr.bf16.mxu0 %v4527_v14 }
 0xada   :  { %8878 = vmatprep.subr.bf16.mxu0 %v9556_v30 }
 0xadd   :  { %8879 = vmatpush3.bf16.msra.mxu0 %v9556_v30 }
 0xade   :  { %8880 = vmatprep.subr.bf16.mxu0 %v9557_v5 }
 0xae1   :  { %8881 = vmatpush3.bf16.msra.mxu0 %v9557_v5 }
 0xae2   :  { %8882 = vmatprep.subr.bf16.mxu0 %v9558_v7 }
 0xae5   :  { %8883 = vmatpush3.bf16.msra.mxu0 %v9558_v7 }
 0xae6   :  { %8884 = vmatprep.subr.bf16.mxu0 %v9559_v61 }
 0xae9   :  { %8885 = vmatpush3.bf16.msra.mxu0 %v9559_v61 }
 0xaea   :  { %8886 = vmatprep.subr.bf16.mxu0 %v9560_v42 }
 0xaed   :  { %8887 = vmatpush3.bf16.msra.mxu0 %v9560_v42 }
 0xaee   :  { %8888 = vmatprep.subr.bf16.mxu0 %v9561_v45 }
 0xaf1   :  { %8889 = vmatpush3.bf16.msra.mxu0 %v9561_v45  ;;  %v9580_v45 = vld [vmem:[%s11490_s2 + $0x6c8] sm:$0xff]  }
 0xaf2   :  { %8890 = vmatprep.subr.bf16.mxu0 %v9562_v9 }
 0xaf5   :  { %8891 = vmatpush3.bf16.msra.mxu0 %v9562_v9  ;;  %v9581_v9 = vld [vmem:[%s11490_s2 + $0x6d0] sm:$0xff]  }
 0xaf6   :  { %8904 = vmatprep.subr.bf16.mxu0 %v9563_v11 }
 0xaf8   :  { %8893 = vmatmul.mubr.bf16.vlgmr.msra.gmra.mrb[32].mxu0 %v4528_v8 }
 0xaf9   :  { %8905 = vmatpush3.bf16.msra.mxu0 %v9563_v11  ;;  %8920 = vmatprep.mubr.bf16.mxu0 %v4696_v33  ;;  %v9685_v33 = vld [vmem:[%s11489_s1 + $0x70] sm:$0xff]   ;;  %v9582_v11 = vld [vmem:[%s11490_s2 + $0x6d8] sm:$0xff]  }
 0xafa   :  { %8906 = vmatprep.subr.bf16.mxu0 %v9564_v13 }
 0xafd   :  { %8907 = vmatpush3.bf16.msra.mxu0 %v9564_v13  ;;  %v9583_v13 = vld [vmem:[%s11490_s2 + $0x6e0] sm:$0xff]  }
 0xafe   :  { %8908 = vmatprep.subr.bf16.mxu0 %v9565_v15 }
 0xb01   :  { %8909 = vmatpush3.bf16.msra.mxu0 %v9565_v15  ;;  %v9584_v15 = vld [vmem:[%s11490_s2 + $0x6e8] sm:$0xff]  }
 0xb02   :  { %8910 = vmatprep.subr.bf16.mxu0 %v9566_v16 }
 0xb05   :  { %8911 = vmatpush3.bf16.msra.mxu0 %v9566_v16  ;;  %v9585_v16 = vld [vmem:[%s11490_s2 + $0x6f0] sm:$0xff]  }
 0xb06   :  { %8912 = vmatprep.subr.bf16.mxu0 %v9567_v48 }
 0xb09   :  { %8913 = vmatpush3.bf16.msra.mxu0 %v9567_v48  ;;  %v9586_v48 = vld [vmem:[%s11490_s2 + $0x6f8] sm:$0xff]  }
 0xb0a   :  { %8914 = vmatprep.subr.bf16.mxu0 %v9568_v51 }
 0xb0d   :  { %8915 = vmatpush3.bf16.msra.mxu0 %v9568_v51  ;;  %v9689_v51 = vld [vmem:[%s11489_s1 + $0x20] sm:$0xff]  }
 0xb0e   :  { %8916 = vmatprep.subr.bf16.mxu0 %v9569_v4 }
 0xb11   :  { %8917 = vmatpush3.bf16.msra.mxu0 %v9569_v4  ;;  %v9587_v4 = vld [vmem:[%s11490_s2 + $0x740] sm:$0xff]  }
 0xb12   :  { %8918 = vmatprep.subr.bf16.mxu0 %v9570_v62 }
 0xb15   :  { %8919 = vmatpush3.bf16.msra.mxu0 %v9570_v62  ;;  %v9588_v62 = vld [vmem:[%s11490_s2 + $0x748] sm:$0xff]  }
 0xb18   :  { %8921 = vmatmul.mubr.bf16.vlgmr.msra.gmra.mrb[32].mxu0 %v4697_v31  ;;  %v9683_v31 = vld [vmem:[%s11489_s1 + $0x18] sm:$0xff]  }
 0xb19   :  { %9068 = vmatprep.mubr.msk.bf16.mxu0 %vm64_vm0, %v10480_v1  ;;  %v9679_v1 = vld [vmem:[%s11489_s1 + $0x8] sm:$0xff]  }
 0xbeb   :  { %v8922_v0 = vpop.f32.mrb[32].mxu0 }
 0xbec   :  { %v4826_v2 = vadd.f32 %v8922_v0, %v7382_v63  ;;  %v4797_v40 = vpop.f32.mrb[33].mxu0  ;;  %v9589_v0 = vld [vmem:[%s11490_s2 + $0x750] sm:$0xff]  }
 0xbed   :  { %v4824_v6 = vadd.f32 %v7382_v63, %v4797_v40  ;;  %v8923_v39 = vpop.f32.mrb[34].mxu0  ;;  %v9591_v40 = vld [vmem:[%s11490_s2 + $0x760] sm:$0xff]  }
 0xbee   :  { %v4827_v8 = vadd.f32 %v8923_v39, %v7382_v63  ;;  %v4800_v10 = vpop.f32.mrb[35].mxu0  ;;  %v4830_v14 = vmax.f32 %v4826_v2, 0.0  ;;  %v9590_v2 = vld [vmem:[%s11490_s2 + $0x758] sm:$0xff]   ;;  %v9593_v39 = vld [vmem:[%s11490_s2 + $0x770] sm:$0xff]  }
 0xbef   :  { %v4825_v12 = vadd.f32 %v7382_v63, %v4800_v10  ;;  %v4828_v19 = vmax.f32 %v4824_v6, 0.0  ;;  %v9690_v63 = vld [vmem:[%s11489_s1 + $0x28] sm:$0xff]  }
 0xbf0   :  { %v4831_v17 = vmax.f32 %v4827_v8, 0.0  ;;  %v9592_v6 = vld [vmem:[%s11490_s2 + $0x768] sm:$0xff]   ;;  %v9594_v8 = vld [vmem:[%s11490_s2 + $0x778] sm:$0xff]  }
 0xbf1   :  { %v4829_v21 = vmax.f32 %v4825_v12, 0.0 }
 0xbf2   :  { %v11027_v23 = vpack.c.bf16 %v4831_v17, %v4830_v14 }
 0xbf3   :  { %v11029_v59 = vpack.c.bf16 %v4829_v21, %v4828_v19 }
 0xbf5   :  { %8924 = vmatprep.subr.bf16.mxu1 %v11029_v59  ;;  %9064 = vmatprep.subr.bf16.mxu0 %v11029_v59 }
 0xbf6   :  { %8925 = vmatpush3.bf16.msra.mxu1 %v11029_v59  ;;  %9065 = vmatpush3.bf16.msra.mxu0 %v11029_v59 }
 0xbf7   :  { %8926 = vmatprep.subr.bf16.mxu1 %v11027_v23  ;;  %9066 = vmatprep.subr.bf16.mxu0 %v11027_v23 }
 0xbfa   :  { %8927 = vmatpush3.bf16.msra.mxu1 %v11027_v23  ;;  %9067 = vmatpush3.bf16.msra.mxu0 %v11027_v23 }
 0xbfb   :  { %8932 = vmatprep.subr.bf16.mxu1 %v11029_v59  ;;  %9092 = vmatprep.subr.bf16.mxu0 %v11029_v59 }
 0xbfd   :  { %8929 = vmatmul.mubr.msk.bf16.vlgmr.msra.gmra.mrb[84].mxu1 %vm64_vm0, %v9679_v1  ;;  %9069 = vmatmul.mubr.msk.bf16.vlgmr.msra.gmra.mrb[40].mxu0 %vm64_vm0, %v9680_v24  ;;  %v9691_v1 = vld [vmem:[%s11489_s1 + $0x30] sm:$0xff]   ;;  %v9595_v24 = vld [vmem:[%s11490_s2 + $0x780] sm:$0xff]  }
 0xbfe   :  { %8933 = vmatpush3.bf16.msra.mxu1 %v11029_v59  ;;  %9093 = vmatpush3.bf16.msra.mxu0 %v11029_v59 }
 0xbff   :  { %8934 = vmatprep.subr.bf16.mxu1 %v11027_v23  ;;  %9094 = vmatprep.subr.bf16.mxu0 %v11027_v23 }
 0xc00   :  { %8936 = vmatprep.mubr.msk.bf16.mxu1 %vm64_vm0, %v9681_v3  ;;  %9096 = vmatprep.mubr.msk.bf16.mxu0 %vm64_vm0, %v9682_v28  ;;  %v9692_v3 = vld [vmem:[%s11489_s1 + $0x38] sm:$0xff]   ;;  %v9597_v28 = vld [vmem:[%s11490_s2 + $0x790] sm:$0xff]  }
 0xc02   :  { %8935 = vmatpush3.bf16.msra.mxu1 %v11027_v23  ;;  %9095 = vmatpush3.bf16.msra.mxu0 %v11027_v23 }
 0xc03   :  { %9120 = vmatprep.subr.bf16.mxu0 %v11029_v59  ;;  %8940 = vmatprep.subr.bf16.mxu1 %v9571_v26 }
 0xc05   :  { %8937 = vmatmul.mubr.msk.bf16.vlgmr.msra.gmra.mrb[88].mxu1 %vm64_vm0, %v9683_v31  ;;  %9097 = vmatmul.mubr.msk.bf16.vlgmr.msra.gmra.mrb[44].mxu0 %vm64_vm0, %v9684_v32  ;;  %v9599_v31 = vld [vmem:[%s11490_s2 + $0x7a0] sm:$0xff]   ;;  %v9600_v32 = vld [vmem:[%s11490_s2 + $0x7a8] sm:$0xff]  }
 0xc06   :  { %9121 = vmatpush3.bf16.msra.mxu0 %v11029_v59  ;;  %9124 = vmatprep.mubr.msk.bf16.mxu0 %vm64_vm0, %v9685_v33  ;;  %v9601_v33 = vld [vmem:[%s11490_s2 + $0x7b0] sm:$0xff]  }
 0xc07   :  { %9122 = vmatprep.subr.bf16.mxu0 %v11027_v23  ;;  %8941 = vmatpush3.bf16.msra.mxu1 %v9571_v26  ;;  %v9596_v26 = vld [vmem:[%s11490_s2 + $0x788] sm:$0xff]  }
 0xc08   :  { %8942 = vmatprep.subr.bf16.mxu1 %v9572_v29 }
 0xc0a   :  { %9123 = vmatpush3.bf16.msra.mxu0 %v11027_v23 }
 0xc0b   :  { %9148 = vmatprep.subr.bf16.mxu0 %v11029_v59  ;;  %8943 = vmatpush3.bf16.msra.mxu1 %v9572_v29  ;;  %v9598_v29 = vld [vmem:[%s11490_s2 + $0x798] sm:$0xff]  }
 0xc0c   :  { %8944 = vmatprep.subr.bf16.mxu1 %v9573_v34 }
 0xc0d   :  { %9125 = vmatmul.mubr.msk.bf16.vlgmr.msra.gmra.mrb[48].mxu0 %vm64_vm0, %v9686_v36 }
 0xc0e   :  { %9149 = vmatpush3.bf16.msra.mxu0 %v11029_v59  ;;  %9152 = vmatprep.mubr.msk.bf16.mxu0 %vm64_vm0, %v9687_v27 }
 0xc0f   :  { %9150 = vmatprep.subr.bf16.mxu0 %v11027_v23  ;;  %8945 = vmatpush3.bf16.msra.mxu1 %v9573_v34  ;;  %v9602_v34 = vld [vmem:[%s11490_s2 + $0x7b8] sm:$0xff]  }
 0xc10   :  { %8946 = vmatprep.subr.bf16.mxu1 %v9574_v35 }
 0xc12   :  { %9151 = vmatpush3.bf16.msra.mxu0 %v11027_v23 }
 0xc13   :  { %8947 = vmatpush3.bf16.msra.mxu1 %v9574_v35 }
 0xc14   :  { %8948 = vmatprep.subr.bf16.mxu1 %v9575_v37 }
 0xc15   :  { %9153 = vmatmul.mubr.msk.bf16.vlgmr.msra.gmra.mrb[52].mxu0 %vm64_vm0, %v9688_v38 }
 0xc17   :  { %8949 = vmatpush3.bf16.msra.mxu1 %v9575_v37 }
 0xc18   :  { %8950 = vmatprep.subr.bf16.mxu1 %v9576_v18 }
 0xc1b   :  { %8951 = vmatpush3.bf16.msra.mxu1 %v9576_v18 }
 0xc1c   :  { %8952 = vmatprep.subr.bf16.mxu1 %v9577_v43 }
 0xc1f   :  { %8953 = vmatpush3.bf16.msra.mxu1 %v9577_v43  ;;  %v9693_v43 = vld [vmem:[%s11489_s1 + $0x40] sm:$0xff]  }
 0xc20   :  { %8954 = vmatprep.subr.bf16.mxu1 %v9578_v44 }
 0xc23   :  { %8955 = vmatpush3.bf16.msra.mxu1 %v9578_v44  ;;  %v9603_v44 = vld [vmem:[%s11490_s2 + $0x7c0] sm:$0xff]  }
 0xc24   :  { %8960 = vmatprep.subr.bf16.mxu1 %v9579_v46 }
 0xcd0   :  { %v8930_v49 = vpop.f32.mrb[84].mxu1 }
 0xcd1   :  { %v4868_v25 = vpop.f32.mrb[85].mxu1 }
 0xcd2   :  { %v8931_v47 = vpop.f32.mrb[86].mxu1 }
 0xcd3   :  { %v4884_v50 = vpack.c.bf16 %v8931_v47, %v8930_v49  ;;  %v4871_v53 = vpop.f32.mrb[87].mxu1  ;;  %v9605_v49 = vld [vmem:[%s11490_s2 + $0x7d0] sm:$0xff]   ;;  %v9608_v47 = vld [vmem:[%s11490_s2 + $0x7e8] sm:$0xff]  }
 0xcd4   :  { %v4883_v60 = vpack.c.bf16 %v4871_v53, %v4868_v25  ;;  %v9607_v25 = vld [vmem:[%s11490_s2 + $0x7e0] sm:$0xff]   ;;  %v9610_v53 = vld [vmem:[%s11490_s2 + $0x7f8] sm:$0xff]  }
 0xcd8   :  { %v8938_v41 = vpop.f32.mrb[88].mxu1 }
 0xcd9   :  { %v4936_v30 = vpop.f32.mrb[89].mxu1 }
 0xcda   :  { %v8939_v5 = vpop.f32.mrb[90].mxu1 }
 0xcdb   :  { %v4952_v7 = vpack.c.bf16 %v8939_v5, %v8938_v41  ;;  %v4939_v61 = vpop.f32.mrb[91].mxu1  ;;  %v9070_v41 = vpop.f32.mrb[40].mxu0 }
 0xcdc   :  { %v4951_v42 = vpack.c.bf16 %v4939_v61, %v4936_v30  ;;  %v5705_v30 = vpop.f32.mrb[41].mxu0 }
 0xcdd   :  { %v9071_v5 = vpop.f32.mrb[42].mxu0 }
 0xcde   :  { %8956 = vmatprep.mubr.bf16.mxu1 %v4951_v42  ;;  %v5708_v61 = vpop.f32.mrb[43].mxu0 }
 0xcdf   :  { %8957 = vmatmul.mubr.bf16.vlgmr.msra.gmra.mrb[92].mxu1 %v4952_v7  ;;  %v5721_v7 = vpack.c.bf16 %v9071_v5, %v9070_v41  ;;  %v5720_v42 = vpack.c.bf16 %v5708_v61, %v5705_v30  ;;  %v9638_v41 = vld [vmem:[%s11490_s2 + $0x8d8] sm:$0xff]   ;;  %v9639_v30 = vld [vmem:[%s11490_s2 + $0x8e0] sm:$0xff]   ;;  %v9640_v5 = vld [vmem:[%s11490_s2 + $0x8e8] sm:$0xff]  }
 0xce0   :  { %8961 = vmatpush3.bf16.msra.mxu1 %v9579_v46  ;;  %8976 = vmatprep.mubr.bf16.mxu1 %v4883_v60  ;;  %v9604_v46 = vld [vmem:[%s11490_s2 + $0x7c8] sm:$0xff]   ;;  %v9611_v60 = vld [vmem:[%s11490_s2 + $0x800] sm:$0xff]   ;;  %v9642_v61 = vld [vmem:[%s11490_s2 + $0x8f8] sm:$0xff]  }
 0xce1   :  { %8962 = vmatprep.subr.bf16.mxu1 %v9580_v45 }
 0xce4   :  { %8963 = vmatpush3.bf16.msra.mxu1 %v9580_v45  ;;  %v11254_v45 = vpop.f32.mrb[44].mxu0 }
 0xce5   :  { %8964 = vmatprep.subr.bf16.mxu1 %v9581_v9 }
 0xce8   :  { %8965 = vmatpush3.bf16.msra.mxu1 %v9581_v9  ;;  %v5874_v9 = vpop.f32.mrb[45].mxu0 }
 0xce9   :  { %8966 = vmatprep.subr.bf16.mxu1 %v9582_v11 }
 0xcec   :  { %8967 = vmatpush3.bf16.msra.mxu1 %v9582_v11  ;;  %v11256_v11 = vpop.f32.mrb[46].mxu0 }
 0xced   :  { %8968 = vmatprep.subr.bf16.mxu1 %v9583_v13 }
 0xcf0   :  { %8969 = vmatpush3.bf16.msra.mxu1 %v9583_v13  ;;  %v5890_v13 = vpack.c.bf16 %v11256_v11, %v11254_v45  ;;  %v9695_v45 = vmov 0.0   ;;  %v9645_v11 = vld [vmem:[%s11492_s4 + $0x10] sm:$0xff]  }
 0xcf1   :  { %8970 = vmatprep.subr.bf16.mxu1 %v9584_v15  ;;  %9176 = vmatprep.subr.bf16.mxu0 %v9695_v45 }
 0xcf2   :  { %9192 = vmatprep.mubr.msk.bf16.mxu0 %vm9696_vm1, %v9695_v45 }
 0xcf4   :  { %8971 = vmatpush3.bf16.msra.mxu1 %v9584_v15  ;;  %v5877_v15 = vpop.f32.mrb[47].mxu0 }
 0xcf5   :  { %8972 = vmatprep.subr.bf16.mxu1 %v9585_v16 }
 0xcf8   :  { %8973 = vmatpush3.bf16.msra.mxu1 %v9585_v16  ;;  %v5889_v16 = vpack.c.bf16 %v5877_v15, %v5874_v9  ;;  %v9644_v9 = vld [vmem:[%s11492_s4 + $0x8] sm:$0xff]   ;;  %v9647_v15 = vld [vmem:[%s11492_s4 + $0x20] sm:$0xff]  }
 0xcf9   :  { %8974 = vmatprep.subr.bf16.mxu1 %v9586_v48 }
 0xcfc   :  { %8975 = vmatpush3.bf16.msra.mxu1 %v9586_v48  ;;  %v11260_v48 = vpop.f32.mrb[48].mxu0 }
 0xcfd   :  { %8980 = vmatprep.subr.bf16.mxu1 %v11029_v59 }
 0xcff   :  { %8977 = vmatmul.mubr.bf16.vlgmr.msra.gmra.mrb[92].mxu1 %v4884_v50  ;;  %v9609_v50 = vld [vmem:[%s11490_s2 + $0x7f0] sm:$0xff]  }
 0xd00   :  { %8981 = vmatpush3.bf16.msra.mxu1 %v11029_v59  ;;  %8984 = vmatprep.mubr.msk.bf16.mxu1 %vm64_vm0, %v9689_v51  ;;  %v11262_v51 = vpop.f32.mrb[49].mxu0 }
 0xd01   :  { %8982 = vmatprep.subr.bf16.mxu1 %v11027_v23 }
 0xd04   :  { %8983 = vmatpush3.bf16.msra.mxu1 %v11027_v23 }
 0xd05   :  { %8988 = vmatprep.subr.bf16.mxu1 %v9587_v4 }
 0xd07   :  { %8985 = vmatmul.mubr.msk.bf16.vlgmr.msra.gmra.mrb[96].mxu1 %vm64_vm0, %v9690_v63 }
 0xd08   :  { %8989 = vmatpush3.bf16.msra.mxu1 %v9587_v4  ;;  %v11264_v4 = vpop.f32.mrb[50].mxu0 }
 0xd09   :  { %8990 = vmatprep.subr.bf16.mxu1 %v9588_v62  ;;  %v11268_v63 = vpop.f32.mrb[51].mxu0 }
 0xd0c   :  { %8991 = vmatpush3.bf16.msra.mxu1 %v9588_v62  ;;  %v6059_v62 = vpack.c.bf16 %v11264_v4, %v11260_v48  ;;  %v9649_v48 = vld [vmem:[%s11492_s4 + $0x30] sm:$0xff]   ;;  %v7618_v4 = vld [vmem:[%s11491_s3 + $0x3] ss:$0 sm:$0xff] }
 0xd0d   :  { %8992 = vmatprep.subr.bf16.mxu1 %v9589_v0 }
 0xd10   :  { %8993 = vmatpush3.bf16.msra.mxu1 %v9589_v0  ;;  %v6058_v0 = vpack.c.bf16 %v11268_v63, %v11262_v51  ;;  %v9650_v51 = vld [vmem:[%s11492_s4 + $0x38] sm:$0xff]  }
 0xd11   :  { %8994 = vmatprep.subr.bf16.mxu1 %v9590_v2 }
 0xd14   :  { %8995 = vmatpush3.bf16.msra.mxu1 %v9590_v2  ;;  %v11272_v2 = vpop.f32.mrb[52].mxu0 }
 0xd15   :  { %8996 = vmatprep.subr.bf16.mxu1 %v9591_v40 }
 0xd18   :  { %8997 = vmatpush3.bf16.msra.mxu1 %v9591_v40  ;;  %v11274_v40 = vpop.f32.mrb[53].mxu0 }
 0xd19   :  { %8998 = vmatprep.subr.bf16.mxu1 %v9592_v6 }
 0xd1c   :  { %8999 = vmatpush3.bf16.msra.mxu1 %v9592_v6  ;;  %v11276_v6 = vpop.f32.mrb[54].mxu0 }
 0xd1d   :  { %9000 = vmatprep.subr.bf16.mxu1 %v9593_v39 }
 0xd20   :  { %9001 = vmatpush3.bf16.msra.mxu1 %v9593_v39  ;;  %v6228_v39 = vpack.c.bf16 %v11276_v6, %v11272_v2 }
 0xd21   :  { %9002 = vmatprep.subr.bf16.mxu1 %v9594_v8 }
 0xd24   :  { %9003 = vmatpush3.bf16.msra.mxu1 %v9594_v8 }
 0xd25   :  { %9008 = vmatprep.subr.bf16.mxu1 %v11029_v59 }
 0xdda   :  { %v8986_v10 = vpop.f32.mrb[96].mxu1 }
 0xddb   :  { %v5198_v12 = vpop.f32.mrb[97].mxu1 }
 0xddc   :  { %v8987_v14 = vpop.f32.mrb[98].mxu1 }
 0xddd   :  { %v5214_v17 = vpack.c.bf16 %v8987_v14, %v8986_v10  ;;  %v5201_v19 = vpop.f32.mrb[99].mxu1  ;;  %v11280_v10 = vpop.f32.mrb[55].mxu0 }
 0xdde   :  { %v5213_v21 = vpack.c.bf16 %v5201_v19, %v5198_v12  ;;  %v6227_v14 = vpack.c.bf16 %v11280_v10, %v11274_v40 }
 0xde0   :  { %9004 = vmatprep.mubr.bf16.mxu1 %v5213_v21 }
 0xde1   :  { %9005 = vmatmul.mubr.bf16.vlgmr.msra.gmra.mrb[92].mxu1 %v5214_v17 }
 0xde2   :  { %9009 = vmatpush3.bf16.msra.mxu1 %v11029_v59  ;;  %9012 = vmatprep.mubr.msk.bf16.mxu1 %vm64_vm0, %v9691_v1 }
 0xde3   :  { %9010 = vmatprep.subr.bf16.mxu1 %v11027_v23 }
 0xde6   :  { %9011 = vmatpush3.bf16.msra.mxu1 %v11027_v23 }
 0xde7   :  { %9016 = vmatprep.subr.bf16.mxu1 %v9595_v24 }
 0xde9   :  { %9013 = vmatmul.mubr.msk.bf16.vlgmr.msra.gmra.mrb[100].mxu1 %vm64_vm0, %v9692_v3  ;;  %v9614_v3 = vld [vmem:[%s11490_s2 + $0x818] sm:$0xff]  }
 0xdea   :  { %9017 = vmatpush3.bf16.msra.mxu1 %v9595_v24  ;;  %v9612_v24 = vld [vmem:[%s11490_s2 + $0x808] sm:$0xff]  }
 0xdeb   :  { %9018 = vmatprep.subr.bf16.mxu1 %v9596_v26 }
 0xdee   :  { %9019 = vmatpush3.bf16.msra.mxu1 %v9596_v26  ;;  %v9613_v26 = vld [vmem:[%s11490_s2 + $0x810] sm:$0xff]  }
 0xdef   :  { %9020 = vmatprep.subr.bf16.mxu1 %v9597_v28 }
 0xdf2   :  { %9021 = vmatpush3.bf16.msra.mxu1 %v9597_v28  ;;  %v9615_v28 = vld [vmem:[%s11490_s2 + $0x820] sm:$0xff]  }
 0xdf3   :  { %9022 = vmatprep.subr.bf16.mxu1 %v9598_v29 }
 0xdf6   :  { %9023 = vmatpush3.bf16.msra.mxu1 %v9598_v29  ;;  %v9616_v29 = vld [vmem:[%s11490_s2 + $0x828] sm:$0xff]  }
 0xdf7   :  { %9024 = vmatprep.subr.bf16.mxu1 %v9599_v31 }
 0xdfa   :  { %9025 = vmatpush3.bf16.msra.mxu1 %v9599_v31  ;;  %v9617_v31 = vld [vmem:[%s11490_s2 + $0x830] sm:$0xff]  }
 0xdfb   :  { %9026 = vmatprep.subr.bf16.mxu1 %v9600_v32 }
 0xdfe   :  { %9027 = vmatpush3.bf16.msra.mxu1 %v9600_v32  ;;  %v9618_v32 = vld [vmem:[%s11490_s2 + $0x838] sm:$0xff]  }
 0xdff   :  { %9028 = vmatprep.subr.bf16.mxu1 %v9601_v33 }
 0xe02   :  { %9029 = vmatpush3.bf16.msra.mxu1 %v9601_v33  ;;  %v9619_v33 = vld [vmem:[%s11490_s2 + $0x840] sm:$0xff]  }
 0xe03   :  { %9030 = vmatprep.subr.bf16.mxu1 %v9602_v34 }
 0xe06   :  { %9031 = vmatpush3.bf16.msra.mxu1 %v9602_v34  ;;  %v9620_v34 = vld [vmem:[%s11490_s2 + $0x848] sm:$0xff]  }
 0xe07   :  { %9036 = vmatprep.subr.bf16.mxu1 %v11029_v59 }
 0xebc   :  { %v9014_v35 = vpop.f32.mrb[100].mxu1 }
 0xebd   :  { %v5367_v36 = vpop.f32.mrb[101].mxu1 }
 0xebe   :  { %v9015_v27 = vpop.f32.mrb[102].mxu1 }
 0xebf   :  { %v5383_v37 = vpack.c.bf16 %v9015_v27, %v9014_v35  ;;  %v5370_v38 = vpop.f32.mrb[103].mxu1  ;;  %v9621_v35 = vld [vmem:[%s11490_s2 + $0x850] sm:$0xff]   ;;  %v9623_v27 = vld [vmem:[%s11490_s2 + $0x860] sm:$0xff]  }
 0xec0   :  { %v5382_v18 = vpack.c.bf16 %v5370_v38, %v5367_v36  ;;  %v9622_v36 = vld [vmem:[%s11490_s2 + $0x858] sm:$0xff]   ;;  %v9625_v38 = vld [vmem:[%s11490_s2 + $0x870] sm:$0xff]  }
 0xec2   :  { %9032 = vmatprep.mubr.bf16.mxu1 %v5382_v18  ;;  %v9626_v18 = vld [vmem:[%s11490_s2 + $0x878] sm:$0xff]  }
 0xec3   :  { %9033 = vmatmul.mubr.bf16.vlgmr.msra.gmra.mrb[92].mxu1 %v5383_v37  ;;  %v9624_v37 = vld [vmem:[%s11490_s2 + $0x868] sm:$0xff]  }
 0xec4   :  { %9037 = vmatpush3.bf16.msra.mxu1 %v11029_v59  ;;  %9040 = vmatprep.mubr.msk.bf16.mxu1 %vm64_vm0, %v9693_v43  ;;  %v9694_v59 = vld [vmem:[%s11489_s1 + $0x48] sm:$0xff]   ;;  %v9627_v43 = vld [vmem:[%s11490_s2 + $0x880] sm:$0xff]  }
 0xec5   :  { %9038 = vmatprep.subr.bf16.mxu1 %v11027_v23 }
 0xec8   :  { %9039 = vmatpush3.bf16.msra.mxu1 %v11027_v23  ;;  %v9606_v23 = vld [vmem:[%s11490_s2 + $0x7d8] sm:$0xff]  }
 0xec9   :  { %9044 = vmatprep.subr.bf16.mxu1 %v9603_v44 }
 0xecb   :  { %9041 = vmatmul.mubr.msk.bf16.vlgmr.msra.gmra.mrb[104].mxu1 %vm64_vm0, %v9694_v59  ;;  %v9630_v59 = vld [vmem:[%s11490_s2 + $0x898] sm:$0xff]  }
 0xecc   :  { %9045 = vmatpush3.bf16.msra.mxu1 %v9603_v44  ;;  %v9628_v44 = vld [vmem:[%s11490_s2 + $0x888] sm:$0xff]  }
 0xecd   :  { %9046 = vmatprep.subr.bf16.mxu1 %v9604_v46 }
 0xed0   :  { %9047 = vmatpush3.bf16.msra.mxu1 %v9604_v46  ;;  %v9629_v46 = vld [vmem:[%s11490_s2 + $0x890] sm:$0xff]  }
 0xed1   :  { %9048 = vmatprep.subr.bf16.mxu1 %v9605_v49 }
 0xed4   :  { %9049 = vmatpush3.bf16.msra.mxu1 %v9605_v49  ;;  %v9631_v49 = vld [vmem:[%s11490_s2 + $0x8a0] sm:$0xff]  }
 0xed5   :  { %9050 = vmatprep.subr.bf16.mxu1 %v9606_v23 }
 0xed8   :  { %9051 = vmatpush3.bf16.msra.mxu1 %v9606_v23  ;;  %v9632_v23 = vld [vmem:[%s11490_s2 + $0x8a8] sm:$0xff]  }
 0xed9   :  { %9052 = vmatprep.subr.bf16.mxu1 %v9607_v25 }
 0xedc   :  { %9053 = vmatpush3.bf16.msra.mxu1 %v9607_v25  ;;  %v9633_v25 = vld [vmem:[%s11490_s2 + $0x8b0] sm:$0xff]  }
 0xedd   :  { %9054 = vmatprep.subr.bf16.mxu1 %v9608_v47 }
 0xee0   :  { %9055 = vmatpush3.bf16.msra.mxu1 %v9608_v47  ;;  %v9634_v47 = vld [vmem:[%s11490_s2 + $0x8b8] sm:$0xff]  }
 0xee1   :  { %9056 = vmatprep.subr.bf16.mxu1 %v9609_v50 }
 0xee4   :  { %9057 = vmatpush3.bf16.msra.mxu1 %v9609_v50  ;;  %v9635_v50 = vld [vmem:[%s11490_s2 + $0x8c0] sm:$0xff]  }
 0xee5   :  { %9058 = vmatprep.subr.bf16.mxu1 %v9610_v53 }
 0xee8   :  { %9059 = vmatpush3.bf16.msra.mxu1 %v9610_v53  ;;  %v9636_v53 = vld [vmem:[%s11490_s2 + $0x8c8] sm:$0xff]  }
 0xee9   :  { %9072 = vmatprep.subr.bf16.mxu1 %v9611_v60 }
 0xf9e   :  { %v9042_v8 = vpop.f32.mrb[104].mxu1 }
 0xf9f   :  { %v5536_v12 = vpop.f32.mrb[105].mxu1 }
 0xfa0   :  { %v9043_v17 = vpop.f32.mrb[106].mxu1 }
 0xfa1   :  { %v5552_v19 = vpack.c.bf16 %v9043_v17, %v9042_v8  ;;  %v5539_v21 = vpop.f32.mrb[107].mxu1 }
 0xfa2   :  { %v5551_v1 = vpack.c.bf16 %v5539_v21, %v5536_v12 }
 0xfa4   :  { %9060 = vmatprep.mubr.bf16.mxu1 %v5551_v1 }
 0xfa5   :  { %9061 = vmatmul.mubr.bf16.vlgmr.msra.gmra.mrb[92].mxu1 %v5552_v19 }
 0xfa6   :  { %9073 = vmatpush3.bf16.msra.mxu1 %v9611_v60  ;;  %9088 = vmatprep.mubr.bf16.mxu1 %v5720_v42  ;;  %v9637_v60 = vld [vmem:[%s11490_s2 + $0x8d0] sm:$0xff]   ;;  %v9643_v42 = vld [vmem:[%s11492_s4] sm:$0xff]  }
 0xfa7   :  { %9074 = vmatprep.subr.bf16.mxu1 %v9612_v24  ;;  %9177 = vmatpush3.bf16.msra.mxu0 %v9643_v42 }
 0xfa8   :  { %9178 = vmatprep.subr.bf16.mxu0 %v9695_v45 }
 0xfaa   :  { %9075 = vmatpush3.bf16.msra.mxu1 %v9612_v24 }
 0xfab   :  { %9076 = vmatprep.subr.bf16.mxu1 %v9613_v26  ;;  %9179 = vmatpush3.bf16.msra.mxu0 %v9644_v9 }
 0xfac   :  { %9180 = vmatprep.subr.bf16.mxu0 %v9695_v45 }
 0xfae   :  { %9077 = vmatpush3.bf16.msra.mxu1 %v9613_v26 }
 0xfaf   :  { %9078 = vmatprep.subr.bf16.mxu1 %v9614_v3  ;;  %9181 = vmatpush3.bf16.msra.mxu0 %v9645_v11  ;;  %v9697_v11 = vmov 1966171168  }
 0xfb0   :  { %9182 = vmatprep.subr.bf16.mxu0 %v9695_v45 }
 0xfb2   :  { %9079 = vmatpush3.bf16.msra.mxu1 %v9614_v3 }
 0xfb3   :  { %9080 = vmatprep.subr.bf16.mxu1 %v9615_v28 }
 0xfb6   :  { %9081 = vmatpush3.bf16.msra.mxu1 %v9615_v28 }
 0xfb7   :  { %9082 = vmatprep.subr.bf16.mxu1 %v9616_v29 }
 0xfba   :  { %9083 = vmatpush3.bf16.msra.mxu1 %v9616_v29 }
 0xfbb   :  { %9084 = vmatprep.subr.bf16.mxu1 %v9617_v31 }
 0xfbe   :  { %9085 = vmatpush3.bf16.msra.mxu1 %v9617_v31 }
 0xfbf   :  { %9086 = vmatprep.subr.bf16.mxu1 %v9618_v32 }
 0xfc2   :  { %9087 = vmatpush3.bf16.msra.mxu1 %v9618_v32 }
 0xfc3   :  { %9100 = vmatprep.subr.bf16.mxu1 %v9619_v33 }
 0xfc5   :  { %9089 = vmatmul.mubr.bf16.vlgmr.msra.gmra.mrb[92].mxu1 %v5721_v7  ;;  %v9641_v7 = vld [vmem:[%s11490_s2 + $0x8f0] sm:$0xff]  }
 0xfc6   :  { %9101 = vmatpush3.bf16.msra.mxu1 %v9619_v33  ;;  %9116 = vmatprep.mubr.bf16.mxu1 %v5889_v16  ;;  %v9648_v16 = vld [vmem:[%s11492_s4 + $0x28] sm:$0xff]  }
 0xfc7   :  { %9102 = vmatprep.subr.bf16.mxu1 %v9620_v34 }
 0xfca   :  { %9103 = vmatpush3.bf16.msra.mxu1 %v9620_v34 }
 0xfcb   :  { %9104 = vmatprep.subr.bf16.mxu1 %v9621_v35 }
 0xfce   :  { %9105 = vmatpush3.bf16.msra.mxu1 %v9621_v35 }
 0xfcf   :  { %9106 = vmatprep.subr.bf16.mxu1 %v9622_v36 }
 0xfd2   :  { %9107 = vmatpush3.bf16.msra.mxu1 %v9622_v36 }
 0xfd3   :  { %9108 = vmatprep.subr.bf16.mxu1 %v9623_v27 }
 0xfd6   :  { %9109 = vmatpush3.bf16.msra.mxu1 %v9623_v27 }
 0xfd7   :  { %9110 = vmatprep.subr.bf16.mxu1 %v9624_v37 }
 0xfda   :  { %9111 = vmatpush3.bf16.msra.mxu1 %v9624_v37 }
 0xfdb   :  { %9112 = vmatprep.subr.bf16.mxu1 %v9625_v38 }
 0xfde   :  { %9113 = vmatpush3.bf16.msra.mxu1 %v9625_v38 }
 0xfdf   :  { %9114 = vmatprep.subr.bf16.mxu1 %v9626_v18 }
 0xfe2   :  { %9115 = vmatpush3.bf16.msra.mxu1 %v9626_v18 }
 0xfe3   :  { %9128 = vmatprep.subr.bf16.mxu1 %v9627_v43 }
 0xfe5   :  { %9117 = vmatmul.mubr.bf16.vlgmr.msra.gmra.mrb[92].mxu1 %v5890_v13  ;;  %v9646_v13 = vld [vmem:[%s11492_s4 + $0x18] sm:$0xff]  }
 0xfe6   :  { %9129 = vmatpush3.bf16.msra.mxu1 %v9627_v43  ;;  %9144 = vmatprep.mubr.bf16.mxu1 %v6058_v0  ;;  %v9651_v43 = vld [vmem:[%s11493_s6] sm:$0xff]  }
 0xfe7   :  { %9130 = vmatprep.subr.bf16.mxu1 %v9628_v44  ;;  %9183 = vmatpush3.bf16.msra.mxu0 %v9646_v13  ;;  %v6581_v13 = vunpack.c.l.s4 %v9697_v11 }
 0xfe8   :  { %9184 = vmatprep.subr.bf16.mxu0 %v9695_v45 }
 0xfea   :  { %9131 = vmatpush3.bf16.msra.mxu1 %v9628_v44  ;;  %v9652_v44 = vld [vmem:[%s11493_s6 + $0x8] sm:$0xff]  }
 0xfeb   :  { %9132 = vmatprep.subr.bf16.mxu1 %v9629_v46  ;;  %9185 = vmatpush3.bf16.msra.mxu0 %v9647_v15  ;;  %v6583_v15 = vlaneseq }
 0xfec   :  { %9186 = vmatprep.subr.bf16.mxu0 %v9695_v45 }
 0xfee   :  { %9133 = vmatpush3.bf16.msra.mxu1 %v9629_v46  ;;  %v7619_v46 = vld [vmem:[%s11494_s5] ss:$0 sm:$0xff] }
 0xfef   :  { %9134 = vmatprep.subr.bf16.mxu1 %v9630_v59  ;;  %9187 = vmatpush3.bf16.msra.mxu0 %v9648_v16  ;;  %v6582_v16 = vunpack.c.0.s8 %v6581_v13 }
 0xff0   :  { %9188 = vmatprep.subr.bf16.mxu0 %v9695_v45 }
 0xff2   :  { %9135 = vmatpush3.bf16.msra.mxu1 %v9630_v59 }
 0xff3   :  { %9136 = vmatprep.subr.bf16.mxu1 %v9631_v49  ;;  %9189 = vmatpush3.bf16.msra.mxu0 %v9649_v48  ;;  %v6584_v48 = vshrl.u32 %v6583_v15, 7 }
 0xff4   :  { %9190 = vmatprep.subr.bf16.mxu0 %v9695_v45 }
 0xff6   :  { %9137 = vmatpush3.bf16.msra.mxu1 %v9631_v49 }
 0xff7   :  { %9138 = vmatprep.subr.bf16.mxu1 %v9632_v23  ;;  %9191 = vmatpush3.bf16.msra.mxu0 %v9650_v51  ;;  %v6585_v51 = vsub.s32 %v6582_v16, %v6584_v48 }
 0xff8   :  { %9196 = vmatprep.subr.bf16.mxu0 %v9695_v45 }
 0xffa   :  { %9139 = vmatpush3.bf16.msra.mxu1 %v9632_v23 }
 0xffb   :  { %9140 = vmatprep.subr.bf16.mxu1 %v9633_v25 }
 0xffe   :  { %9141 = vmatpush3.bf16.msra.mxu1 %v9633_v25 }
 0xfff   :  { %9142 = vmatprep.subr.bf16.mxu1 %v9634_v47 }
0x1002   :  { %9143 = vmatpush3.bf16.msra.mxu1 %v9634_v47 }
0x1003   :  { %9156 = vmatprep.subr.bf16.mxu1 %v9635_v50 }
0x1005   :  { %9145 = vmatmul.mubr.bf16.vlgmr.msra.gmra.mrb[92].mxu1 %v6059_v62 }
0x1006   :  { %9157 = vmatpush3.bf16.msra.mxu1 %v9635_v50  ;;  %9172 = vmatprep.mubr.bf16.mxu1 %v6227_v14 }
0x1007   :  { %9158 = vmatprep.subr.bf16.mxu1 %v9636_v53 }
0x100a   :  { %9159 = vmatpush3.bf16.msra.mxu1 %v9636_v53 }
0x100b   :  { %9160 = vmatprep.subr.bf16.mxu1 %v9637_v60 }
0x100e   :  { %9161 = vmatpush3.bf16.msra.mxu1 %v9637_v60  ;;  %v7628_v60 = vld [vmem:[%s11495_s7] ss:$0 sm:$0xff] }
0x100f   :  { %9162 = vmatprep.subr.bf16.mxu1 %v9638_v41 }
0x1012   :  { %9163 = vmatpush3.bf16.msra.mxu1 %v9638_v41 }
0x1013   :  { %9164 = vmatprep.subr.bf16.mxu1 %v9639_v30 }
0x1016   :  { %9165 = vmatpush3.bf16.msra.mxu1 %v9639_v30 }
0x1017   :  { %9166 = vmatprep.subr.bf16.mxu1 %v9640_v5 }
0x101a   :  { %9167 = vmatpush3.bf16.msra.mxu1 %v9640_v5 }
0x101b   :  { %9168 = vmatprep.subr.bf16.mxu1 %v9641_v7 }
0x101e   :  { %9169 = vmatpush3.bf16.msra.mxu1 %v9641_v7 }
0x101f   :  { %9170 = vmatprep.subr.bf16.mxu1 %v9642_v61 }
0x1022   :  { %9171 = vmatpush3.bf16.msra.mxu1 %v9642_v61 }
0x1025   :  { %9173 = vmatmul.mubr.bf16.vlgmr.msra.gmra.mrb[92].mxu1 %v6228_v39 }
0x10f8   :  { %v9174_v62 = vpop.f32.mrb[92].mxu1 }
0x10f9   :  { %v6357_v63 = vadd.f32 %v9174_v62, %v7618_v4  ;;  %v6328_v0 = vpop.f32.mrb[93].mxu1 }
0x10fa   :  { %v6355_v2 = vadd.f32 %v7618_v4, %v6328_v0  ;;  %v9175_v40 = vpop.f32.mrb[94].mxu1 }
0x10fb   :  { %v11432_v6 = vadd.f32 %v6357_v63, %v3299_v58  ;;  %v6358_v39 = vadd.f32 %v9175_v40, %v7618_v4  ;;  %v6331_v8 = vpop.f32.mrb[95].mxu1  ;;  %v6604_v63 = vsub.s32 0, %v6584_v48 }
0x10fc   :  { %v11436_v10 = vadd.f32 %v6355_v2, %v3297_v56  ;;  %v6356_v12 = vadd.f32 %v7618_v4, %v6331_v8 }
0x10fd   :  { %v11440_v14 = vadd.f32 %v6358_v39, %v3300_v22  ;;  %v6365_v19 = vmax.f32 %v11432_v6, 0.0 }
0x10fe   :  { %v11444_v17 = vadd.f32 %v6356_v12, %v3298_v57  ;;  %v6363_v58 = vmax.f32 %v11436_v10, 0.0 }
0x10ff   :  { %v6366_v54 = vmax.f32 %v11440_v14, 0.0 }
0x1100   :  { %v6364_v21 = vmax.f32 %v11444_v17, 0.0 }
0x1101   :  { %v6374_v52 = vadd.f32 %v6366_v54, %v6365_v19 }
0x1102   :  { %v6367_v20 = vadd.f32 %v6364_v21, %v6363_v58 }
0x1103   :  { %v6375_v55 = vrot.slane %v6374_v52, 4 }
0x1104   :  { %v6368_v56 = vrot.slane %v6367_v20, 4 }
0x1105   :  { %v6376_v22 = vadd.f32 %v6375_v55, %v6374_v52 }
0x1106   :  { %v6369_v57 = vadd.f32 %v6368_v56, %v6367_v20 }
0x1107   :  { %v6377_v1 = vrot.slane %v6376_v22, 2 }
0x1108   :  { %v6370_v24 = vrot.slane %v6369_v57, 2 }
0x1109   :  { %v6378_v26 = vadd.f32 %v6377_v1, %v6376_v22 }
0x110a   :  { %v6371_v3 = vadd.f32 %v6370_v24, %v6369_v57 }
0x110b   :  { %v6379_v28 = vrot.slane %v6378_v26, 1 }
0x110c   :  { %v6372_v29 = vrot.slane %v6371_v3, 1 }
0x110d   :  { %v6380_v31 = vadd.f32 %v6379_v28, %v6378_v26 }
0x110e   :  { %v6373_v32 = vadd.f32 %v6372_v29, %v6371_v3 }
0x110f   :  { %v6383_v33 = vmul.f32 0.0625, %v6380_v31 }
0x1110   :  { %v6382_v34 = vmul.f32 0.0625, %v6373_v32 }
0x1111   :  { %v6385_v35 = vpack.c.bf16 %v6383_v33, %v6383_v33 }
0x1112   :  { %v6384_v36 = vpack.c.bf16 %v6382_v34, %v6382_v34 }
0x1113   :  { %v6412_v27 = vunpack.c.l.b16 %v6385_v35 }
0x1114   :  { %v6411_v37 = vunpack.c.l.b16 %v6384_v36 }
0x1116   :  { %v6414_v38 = vsel %vm6413_vm2, %v6412_v27, %v6411_v37 }
0x1117   :  { %v6415_v18 = vpack.c.b16 %v6414_v38, %v6414_v38 }
0x1119   :  { %9193 = vmatmul.mubr.bf16.vlgmr.msra.gmra.mrb[56].mxu0 %v6415_v18 }
0x111a   :  { %9200 = vmatprep.mubr.msk.bf16.mxu0 %vm9696_vm1, %v9695_v45  ;;  %9197 = vmatpush3.bf16.msra.mxu0 %v9651_v43 }
0x111b   :  { %9198 = vmatprep.subr.bf16.mxu0 %v9695_v45 }
0x111e   :  { %9199 = vmatpush3.bf16.msra.mxu0 %v9652_v44 }
0x11ec   :  { %v6499_v59 = vpop.f32.mrb[56].mxu0 }
0x11ed   :  { %v6500_v49 = vadd.f32 %v7619_v46, %v6499_v59  ;;  %v9194_v23 = vpop.f32.mrb[57].mxu0 }
0x11ee   :  { %v6502_v25 = vpop.f32.mrb[58].mxu0 }
0x11ef   :  { %v6505_v47 = vmax.f32 %v6500_v49, 0.0  ;;  %v9195_v50 = vpop.f32.mrb[59].mxu0 }
0x11f1   :  { %v6506_v53 = vpack.c.bf16 %v6505_v47, %v6505_v47 }
0x11f3   :  { %9201 = vmatmul.mubr.msk.bf16.vlgmr.msra.gmra.mrb[60].mxu0 %vm64_vm0, %v6506_v53 }
0x12c6   :  { %v6567_v41 = vpop.f32.mrb[60].mxu0 }
0x12c7   :  { %v6568_v30 = vadd.f32 %v7628_v60, %v6567_v41  ;;  %v9202_v5 = vpop.f32.mrb[61].mxu0 }
0x12c8   :  { %v6570_v7 = vpop.f32.mrb[62].mxu0 }
0x12c9   :  { %v7632_v61 = vmul.f32 -1.442695, %v6568_v30  ;;  %v9203_v42 = vpop.f32.mrb[63].mxu0 }
0x12cb   :  { %9655 = vpow2.f32 %v7632_v61 }
0x12d5   :  { %v9656_v45 = vpop.eup %9655 }
0x12d6   :  { %v6576_v9 = vadd.f32 1.0, %v9656_v45 }
0x12d8   :  { %9657 = vrcp.f32 %v6576_v9 }
0x12e2   :  { %v9658_v4 = vpop.eup %9657 }
0x12e3   :  { %v6586_v62 = vrot.slane %v9658_v4, %v6585_v51 }
0x12e5   :  { %v6587_v0 = vcombine.high %v6586_v62, %v6586_v62  ;;  %v6594_v2 = vrot.slane %v6586_v62, %v6585_v51 }
0x12e7   :  { %v6601_v40 = vrot.slane %v6587_v0, %v6585_v51  ;;  %v6605_v39 = vrot.slane %v6594_v2, %v6604_v63 }
0x12e9   :  { %v6609_v8 = vrot.slane %v6601_v40, %v6604_v63  ;;  %v6612_v12 = vmul.f32 %v6605_v39, %v6363_v58  ;;  %v6613_v52 = vmul.f32 %v6605_v39, %v6364_v21 }
0x12eb   :  { %v6614_v20 = vmul.f32 %v6609_v8, %v6365_v19  ;;  %v6615_v55 = vmul.f32 %v6609_v8, %v6366_v54  ;;  %v7644_v56 = vpack.c.bf16 %v6613_v52, %v6612_v12 }
0x12ed   :  { %7645 = vst [vmem:[%s11496_s8] sm:$0xff] %v7644_v56   ;;  %v7649_v22 = vpack.c.bf16 %v6615_v55, %v6614_v20 }
0x12ef   :  { %7651 = vst [vmem:[%s11496_s8 + $0x8] sm:$0xff] %v7649_v22  }

// kernel: forward.12
= control target key start
LH: loop header
LB: loop body
LE: loop exit
PB: predicated region body
PF: predicated region fallthrough
CT: control target
= control target key end

     0   :  { %s955_s1 = inlined_call_operand.vmem [shape: bf16[256,128], index: 1, kind: input, shape index: {}]   ;;  %s956_s0 = inlined_call_operand.vmem [shape: bf16[128,256], index: 0, kind: input, shape index: {}]   ;;  %s957_s2 = inlined_call_operand.vmem [shape: f32[1,128], index: 2, kind: input, shape index: {}]   ;;  %s958_s3 = inlined_call_operand.vmem [shape: bf16[128,128], index: 3, kind: input, shape index: {}]   ;;  %s959_s4 = inlined_call_operand.vmem [shape: bf16[128,128], index: 4, kind: output, shape index: {}]  }
   0x1   :  { %v725_v0 = vld [vmem:[%s955_s1 + $0x40] sm:$0xff]   ;;  %v727_v2 = vld [vmem:[%s955_s1 + $0x48] sm:$0xff]   ;;  %v729_v4 = vld [vmem:[%s955_s1 + $0x50] sm:$0xff]  }
   0x2   :  { %v726_v1 = vld [vmem:[%s955_s1] sm:$0xff]   ;;  %645 = vmatprep.subr.bf16.mxu0 %v725_v0  ;;  %709 = vmatprep.subr.bf16.mxu1 %v725_v0  ;;  %v728_v3 = vld [vmem:[%s955_s1 + $0x8] sm:$0xff]   ;;  %v730_v5 = vld [vmem:[%s955_s1 + $0x10] sm:$0xff]  }
   0x3   :  { %646 = vmatpush3.bf16.msra.mxu0 %v726_v1  ;;  %717 = vmatpush3.bf16.msra.mxu1 %v726_v1  ;;  %v731_v6 = vld [vmem:[%s955_s1 + $0x58] sm:$0xff]   ;;  %v733_v8 = vld [vmem:[%s955_s1 + $0x60] sm:$0xff]   ;;  %v735_v10 = vld [vmem:[%s955_s1 + $0x68] sm:$0xff]  }
   0x4   :  { %647 = vmatprep.subr.bf16.mxu0 %v727_v2  ;;  %710 = vmatprep.subr.bf16.mxu1 %v727_v2  ;;  %v732_v7 = vld [vmem:[%s955_s1 + $0x18] sm:$0xff]   ;;  %v734_v9 = vld [vmem:[%s955_s1 + $0x20] sm:$0xff]   ;;  %v736_v13 = vld [vmem:[%s955_s1 + $0x28] sm:$0xff]  }
   0x5   :  { %v743_v11 = vld [vmem:[%s956_s0 + $0x4] ss:$8 sps:$4 sm:$0xff]   ;;  %v737_v14 = vld [vmem:[%s955_s1 + $0x70] sm:$0xff]   ;;  %v739_v16 = vld [vmem:[%s955_s1 + $0x78] sm:$0xff]  }
   0x6   :  { %v746_v12 = vld [vmem:[%s956_s0 + $0x44] ss:$8 sps:$4 sm:$0xff]   ;;  %281 = vmatprep.mubr.bf16.mxu0 %v743_v11  ;;  %v738_v15 = vld [vmem:[%s955_s1 + $0x30] sm:$0xff]   ;;  %v740_v17 = vld [vmem:[%s955_s1 + $0x38] sm:$0xff]  }
   0x7   :  { %648 = vmatpush3.bf16.msra.mxu0 %v728_v3  ;;  %718 = vmatpush3.bf16.msra.mxu1 %v728_v3  ;;  %v741_v18 = vld [vmem:[%s956_s0] ss:$8 sps:$4 sm:$0xff]   ;;  %v747_v20 = vld [vmem:[%s956_s0 + $0x14] ss:$8 sps:$4 sm:$0xff]   ;;  %v751_v22 = vld [vmem:[%s956_s0 + $0x10] ss:$8 sps:$4 sm:$0xff]  }
   0x8   :  { %649 = vmatprep.subr.bf16.mxu0 %v729_v4  ;;  %711 = vmatprep.subr.bf16.mxu1 %v729_v4  ;;  %v744_v19 = vld [vmem:[%s956_s0 + $0x40] ss:$8 sps:$4 sm:$0xff]   ;;  %v749_v21 = vld [vmem:[%s956_s0 + $0x54] ss:$8 sps:$4 sm:$0xff]   ;;  %v752_v23 = vld [vmem:[%s956_s0 + $0x50] ss:$8 sps:$4 sm:$0xff]  }
   0x9   :  { %313 = vmatprep.mubr.bf16.mxu1 %v746_v12  ;;  %v753_v24 = vld [vmem:[%s956_s0 + $0x24] ss:$8 sps:$4 sm:$0xff]   ;;  %v757_v26 = vld [vmem:[%s956_s0 + $0x20] ss:$8 sps:$4 sm:$0xff]   ;;  %v759_v28 = vld [vmem:[%s956_s0 + $0x34] ss:$8 sps:$4 sm:$0xff]  }
   0xa   :  { %v755_v25 = vld [vmem:[%s956_s0 + $0x64] ss:$8 sps:$4 sm:$0xff]   ;;  %v758_v27 = vld [vmem:[%s956_s0 + $0x60] ss:$8 sps:$4 sm:$0xff]   ;;  %v761_v29 = vld [vmem:[%s956_s0 + $0x74] ss:$8 sps:$4 sm:$0xff]  }
   0xb   :  { %650 = vmatpush3.bf16.msra.mxu0 %v730_v5  ;;  %719 = vmatpush3.bf16.msra.mxu1 %v730_v5  ;;  %v763_v30 = vld [vmem:[%s956_s0 + $0x30] ss:$8 sps:$4 sm:$0xff]   ;;  %v889_v34 = vld [vmem:[%s957_s2] ss:$0 sm:$0xff] }
   0xc   :  { %651 = vmatprep.subr.bf16.mxu0 %v731_v6  ;;  %712 = vmatprep.subr.bf16.mxu1 %v731_v6  ;;  %v764_v31 = vld [vmem:[%s956_s0 + $0x70] ss:$8 sps:$4 sm:$0xff]   ;;  %v560_v38 = vld [vmem:[%s958_s3] sm:$0xff]  }
   0xd   :  { %v634_v40 = vld [vmem:[%s958_s3 + $0x20] sm:$0xff]   ;;  %v561_v49 = vunpack.c.l.bf16 %v560_v38  ;;  %v562_v51 = vunpack.c.h.bf16 %v560_v38 }
   0xe   :  { %v577_v50 = vunpack.c.l.bf16 %v634_v40  ;;  %v578_v52 = vunpack.c.h.bf16 %v634_v40 }
   0xf   :  { %652 = vmatpush3.bf16.msra.mxu0 %v732_v7  ;;  %720 = vmatpush3.bf16.msra.mxu1 %v732_v7  ;;  %v631_v7 = vld [vmem:[%s958_s3 + $0x8] sm:$0xff]  }
  0x10   :  { %653 = vmatprep.subr.bf16.mxu0 %v733_v8  ;;  %713 = vmatprep.subr.bf16.mxu1 %v733_v8  ;;  %v635_v8 = vld [vmem:[%s958_s3 + $0x28] sm:$0xff]  }
  0x13   :  { %654 = vmatpush3.bf16.msra.mxu0 %v734_v9  ;;  %721 = vmatpush3.bf16.msra.mxu1 %v734_v9 }
  0x14   :  { %655 = vmatprep.subr.bf16.mxu0 %v735_v10  ;;  %714 = vmatprep.subr.bf16.mxu1 %v735_v10 }
  0x17   :  { %656 = vmatpush3.bf16.msra.mxu0 %v736_v13  ;;  %722 = vmatpush3.bf16.msra.mxu1 %v736_v13 }
  0x18   :  { %657 = vmatprep.subr.bf16.mxu0 %v737_v14  ;;  %715 = vmatprep.subr.bf16.mxu1 %v737_v14 }
  0x1b   :  { %658 = vmatpush3.bf16.msra.mxu0 %v738_v15  ;;  %723 = vmatpush3.bf16.msra.mxu1 %v738_v15 }
  0x1c   :  { %659 = vmatprep.subr.bf16.mxu0 %v739_v16  ;;  %716 = vmatprep.subr.bf16.mxu1 %v739_v16 }
  0x1f   :  { %660 = vmatpush3.bf16.msra.mxu0 %v740_v17  ;;  %724 = vmatpush3.bf16.msra.mxu1 %v740_v17  ;;  %v565_v17 = vunpack.c.l.bf16 %v631_v7 }
  0x22   :  { %282 = vmatmul.mubr.bf16.vlgmr.msra.gmra.mrb[0].mxu0 %v741_v18  ;;  %314 = vmatmul.mubr.bf16.vlgmr.msra.gmra.mrb[0].mxu1 %v744_v19  ;;  %v581_v18 = vunpack.c.l.bf16 %v635_v8  ;;  %v566_v19 = vunpack.c.h.bf16 %v631_v7 }
  0x23   :  { %289 = vmatprep.mubr.bf16.mxu0 %v747_v20  ;;  %321 = vmatprep.mubr.bf16.mxu1 %v749_v21  ;;  %v582_v20 = vunpack.c.h.bf16 %v635_v8  ;;  %v633_v8 = vld [vmem:[%s958_s3 + $0x18] sm:$0xff]  }
  0x2a   :  { %290 = vmatmul.mubr.bf16.gmra.mrb[4].mxu0 %v751_v22  ;;  %322 = vmatmul.mubr.bf16.gmra.mrb[4].mxu1 %v752_v23 }
  0x2b   :  { %297 = vmatprep.mubr.bf16.mxu0 %v753_v24  ;;  %329 = vmatprep.mubr.bf16.mxu1 %v755_v25  ;;  %v632_v25 = vld [vmem:[%s958_s3 + $0x10] sm:$0xff]  }
  0x32   :  { %298 = vmatmul.mubr.bf16.gmra.mrb[8].mxu0 %v757_v26  ;;  %330 = vmatmul.mubr.bf16.gmra.mrb[8].mxu1 %v758_v27  ;;  %v636_v26 = vld [vmem:[%s958_s3 + $0x30] sm:$0xff]  }
  0x33   :  { %305 = vmatprep.mubr.bf16.mxu0 %v759_v28  ;;  %337 = vmatprep.mubr.bf16.mxu1 %v761_v29 }
  0x3a   :  { %306 = vmatmul.mubr.bf16.gmra.mrb[12].mxu0 %v763_v30  ;;  %338 = vmatmul.mubr.bf16.gmra.mrb[12].mxu1 %v764_v31 }
  0xf5   :  { %v661_v32 = vpop.f32.mrb[0].mxu0  ;;  %v685_v33 = vpop.f32.mrb[0].mxu1 }
  0xf6   :  { %v662_v35 = vpop.f32.mrb[1].mxu0  ;;  %v686_v36 = vpop.f32.mrb[1].mxu1 }
  0xf7   :  { %v663_v37 = vadd.f32 %v662_v35, %v661_v32  ;;  %v687_v39 = vadd.f32 %v686_v36, %v685_v33  ;;  %v664_v41 = vpop.f32.mrb[2].mxu0  ;;  %v688_v42 = vpop.f32.mrb[2].mxu1  ;;  %v569_v35 = vunpack.c.l.bf16 %v632_v25 }
  0xf8   :  { %v665_v43 = vpop.f32.mrb[3].mxu0  ;;  %v689_v44 = vpop.f32.mrb[3].mxu1 }
  0xf9   :  { %v284_v45 = vadd.f32 %v663_v37, %v889_v34  ;;  %v316_v46 = vadd.f32 %v687_v39, %v889_v34  ;;  %v666_v47 = vadd.f32 %v665_v43, %v664_v41  ;;  %v690_v48 = vadd.f32 %v689_v44, %v688_v42 }
  0xfa   :  { %v585_v37 = vunpack.c.l.bf16 %v636_v26 }
  0xfb   :  { %v346_v53 = vmax.f32 %v284_v45, 0.0  ;;  %v354_v54 = vmax.f32 %v316_v46, 0.0  ;;  %v287_v55 = vadd.f32 %v666_v47, %v889_v34  ;;  %v319_v56 = vadd.f32 %v690_v48, %v889_v34 }
  0xfd   :  { %v347_v57 = vmax.f32 %v287_v55, 0.0  ;;  %v355_v58 = vmax.f32 %v319_v56, 0.0  ;;  %v667_v59 = vpop.f32.mrb[4].mxu0  ;;  %v691_v60 = vpop.f32.mrb[4].mxu1  ;;  %v394_v61 = vadd.f32 %v561_v49, %v346_v53  ;;  %v402_v62 = vadd.f32 %v577_v50, %v354_v54 }
  0xfe   :  { %v668_v63 = vpop.f32.mrb[5].mxu0  ;;  %v692_v0 = vpop.f32.mrb[5].mxu1  ;;  %v586_v53 = vunpack.c.h.bf16 %v636_v26 }
  0xff   :  { %v395_v1 = vadd.f32 %v562_v51, %v347_v57  ;;  %v403_v2 = vadd.f32 %v578_v52, %v355_v58  ;;  %v669_v3 = vadd.f32 %v668_v63, %v667_v59  ;;  %v693_v4 = vadd.f32 %v692_v0, %v691_v60  ;;  %v670_v5 = vpop.f32.mrb[6].mxu0  ;;  %v694_v6 = vpop.f32.mrb[6].mxu1 }
 0x100   :  { %v671_v9 = vpop.f32.mrb[7].mxu0  ;;  %v695_v10 = vpop.f32.mrb[7].mxu1  ;;  %v570_v52 = vunpack.c.h.bf16 %v632_v25 }
 0x101   :  { %v594_v11 = vpack.c.bf16 %v395_v1, %v394_v61  ;;  %v614_v12 = vpack.c.bf16 %v403_v2, %v402_v62  ;;  %v292_v13 = vadd.f32 %v669_v3, %v889_v34  ;;  %v324_v14 = vadd.f32 %v693_v4, %v889_v34 }
 0x102   :  { %v672_v15 = vadd.f32 %v671_v9, %v670_v5  ;;  %v696_v16 = vadd.f32 %v695_v10, %v694_v6  ;;  %v637_v9 = vld [vmem:[%s958_s3 + $0x38] sm:$0xff]  }
 0x103   :  { %595 = vst [vmem:[%s959_s4] sm:$0xff] %v594_v11   ;;  %641 = vst [vmem:[%s959_s4 + $0x20] sm:$0xff] %v614_v12   ;;  %v348_v21 = vmax.f32 %v292_v13, 0.0  ;;  %v356_v22 = vmax.f32 %v324_v14, 0.0 }
 0x104   :  { %v295_v23 = vadd.f32 %v672_v15, %v889_v34  ;;  %v327_v24 = vadd.f32 %v696_v16, %v889_v34 }
 0x105   :  { %v673_v27 = vpop.f32.mrb[8].mxu0  ;;  %v697_v28 = vpop.f32.mrb[8].mxu1  ;;  %v396_v40 = vadd.f32 %v565_v17, %v348_v21  ;;  %v404_v41 = vadd.f32 %v581_v18, %v356_v22  ;;  %v573_v18 = vunpack.c.l.bf16 %v633_v8  ;;  %v590_v21 = vunpack.c.h.bf16 %v637_v9 }
 0x106   :  { %v349_v29 = vmax.f32 %v295_v23, 0.0  ;;  %v357_v30 = vmax.f32 %v327_v24, 0.0  ;;  %v674_v31 = vpop.f32.mrb[9].mxu0  ;;  %v698_v32 = vpop.f32.mrb[9].mxu1 }
 0x107   :  { %v675_v33 = vadd.f32 %v674_v31, %v673_v27  ;;  %v699_v36 = vadd.f32 %v698_v32, %v697_v28  ;;  %v676_v38 = vpop.f32.mrb[10].mxu0  ;;  %v700_v39 = vpop.f32.mrb[10].mxu1 }
 0x108   :  { %v397_v42 = vadd.f32 %v566_v19, %v349_v29  ;;  %v405_v43 = vadd.f32 %v582_v20, %v357_v30  ;;  %v677_v44 = vpop.f32.mrb[11].mxu0  ;;  %v701_v45 = vpop.f32.mrb[11].mxu1  ;;  %v589_v19 = vunpack.c.l.bf16 %v637_v9  ;;  %v574_v20 = vunpack.c.h.bf16 %v633_v8 }
 0x109   :  { %v300_v46 = vadd.f32 %v675_v33, %v889_v34  ;;  %v332_v47 = vadd.f32 %v699_v36, %v889_v34  ;;  %v678_v48 = vadd.f32 %v677_v44, %v676_v38  ;;  %v702_v49 = vadd.f32 %v701_v45, %v700_v39 }
 0x10a   :  { %v599_v50 = vpack.c.bf16 %v397_v42, %v396_v40  ;;  %v619_v51 = vpack.c.bf16 %v405_v43, %v404_v41 }
 0x10b   :  { %v350_v54 = vmax.f32 %v300_v46, 0.0  ;;  %v358_v55 = vmax.f32 %v332_v47, 0.0  ;;  %v303_v56 = vadd.f32 %v678_v48, %v889_v34  ;;  %v335_v57 = vadd.f32 %v702_v49, %v889_v34 }
 0x10c   :  { %638 = vst [vmem:[%s959_s4 + $0x8] sm:$0xff] %v599_v50   ;;  %642 = vst [vmem:[%s959_s4 + $0x28] sm:$0xff] %v619_v51  }
 0x10d   :  { %v351_v58 = vmax.f32 %v303_v56, 0.0  ;;  %v359_v59 = vmax.f32 %v335_v57, 0.0  ;;  %v679_v60 = vpop.f32.mrb[12].mxu0  ;;  %v703_v61 = vpop.f32.mrb[12].mxu1  ;;  %v398_v62 = vadd.f32 %v569_v35, %v350_v54  ;;  %v406_v63 = vadd.f32 %v585_v37, %v358_v55 }
 0x10e   :  { %v680_v0 = vpop.f32.mrb[13].mxu0  ;;  %v704_v1 = vpop.f32.mrb[13].mxu1 }
 0x10f   :  { %v399_v2 = vadd.f32 %v570_v52, %v351_v58  ;;  %v407_v3 = vadd.f32 %v586_v53, %v359_v59  ;;  %v681_v4 = vadd.f32 %v680_v0, %v679_v60  ;;  %v705_v5 = vadd.f32 %v704_v1, %v703_v61  ;;  %v682_v6 = vpop.f32.mrb[14].mxu0  ;;  %v706_v7 = vpop.f32.mrb[14].mxu1 }
 0x110   :  { %v683_v10 = vpop.f32.mrb[15].mxu0  ;;  %v707_v11 = vpop.f32.mrb[15].mxu1 }
 0x111   :  { %v604_v12 = vpack.c.bf16 %v399_v2, %v398_v62  ;;  %v624_v13 = vpack.c.bf16 %v407_v3, %v406_v63  ;;  %v308_v14 = vadd.f32 %v681_v4, %v889_v34  ;;  %v340_v15 = vadd.f32 %v705_v5, %v889_v34 }
 0x112   :  { %v684_v16 = vadd.f32 %v683_v10, %v682_v6  ;;  %v708_v17 = vadd.f32 %v707_v11, %v706_v7 }
 0x113   :  { %639 = vst [vmem:[%s959_s4 + $0x10] sm:$0xff] %v604_v12   ;;  %643 = vst [vmem:[%s959_s4 + $0x30] sm:$0xff] %v624_v13   ;;  %v352_v22 = vmax.f32 %v308_v14, 0.0  ;;  %v360_v23 = vmax.f32 %v340_v15, 0.0 }
 0x114   :  { %v311_v24 = vadd.f32 %v684_v16, %v889_v34  ;;  %v343_v25 = vadd.f32 %v708_v17, %v889_v34 }
 0x115   :  { %v400_v28 = vadd.f32 %v573_v18, %v352_v22  ;;  %v408_v29 = vadd.f32 %v589_v19, %v360_v23 }
 0x116   :  { %v353_v26 = vmax.f32 %v311_v24, 0.0  ;;  %v361_v27 = vmax.f32 %v343_v25, 0.0 }
 0x118   :  { %v401_v30 = vadd.f32 %v574_v20, %v353_v26  ;;  %v409_v31 = vadd.f32 %v590_v21, %v361_v27 }
 0x11a   :  { %v609_v32 = vpack.c.bf16 %v401_v30, %v400_v28  ;;  %v629_v33 = vpack.c.bf16 %v409_v31, %v408_v29 }
 0x11c   :  { %640 = vst [vmem:[%s959_s4 + $0x18] sm:$0xff] %v609_v32   ;;  %644 = vst [vmem:[%s959_s4 + $0x38] sm:$0xff] %v629_v33  }

// kernel: forward.13
= control target key start
LH: loop header
LB: loop body
LE: loop exit
PB: predicated region body
PF: predicated region fallthrough
CT: control target
= control target key end

     0   :  { %v2698_v0 = vmov 0   ;;  %s3964_s1 = inlined_call_operand.vmem [shape: bf16[384,128], index: 1, kind: input, shape index: {}]   ;;  %s3965_s0 = inlined_call_operand.vmem [shape: bf16[512,384], index: 0, kind: input, shape index: {}]   ;;  %s3966_s3 = inlined_call_operand.vmem [shape: f32[512,128], index: 3, kind: input, shape index: {}]   ;;  %s3967_s2 = inlined_call_operand.vmem [shape: f32[1,128], index: 2, kind: input, shape index: {}]   ;;  %s3968_s4 = inlined_call_operand.vmem [shape: f32[512,128], index: 4, kind: output, shape index: {}]  }
   0x1   :  { %857 = vmatprep.subr.bf16.mxu0 %v2698_v0  ;;  %2384 = vmatprep.subr.bf16.mxu1 %v2698_v0  ;;  %v2417_v1 = vld [vmem:[%s3964_s1] sm:$0xff]   ;;  %v2418_v2 = vld [vmem:[%s3964_s1 + $0x8] sm:$0xff]   ;;  %v2419_v3 = vld [vmem:[%s3964_s1 + $0x10] sm:$0xff]  }
   0x2   :  { %858 = vmatpush1.bf16.msra.mxu0 %v2417_v1  ;;  %2400 = vmatpush1.bf16.msra.mxu1 %v2417_v1  ;;  %v2420_v4 = vld [vmem:[%s3964_s1 + $0x18] sm:$0xff]   ;;  %v2421_v5 = vld [vmem:[%s3964_s1 + $0x20] sm:$0xff]   ;;  %v2422_v7 = vld [vmem:[%s3964_s1 + $0x28] sm:$0xff]  }
   0x3   :  { %859 = vmatprep.subr.bf16.mxu0 %v2698_v0  ;;  %2385 = vmatprep.subr.bf16.mxu1 %v2698_v0  ;;  %v2435_v6 = vld [vmem:[%s3965_s0 + $0x4] ss:$12 sps:$4 sm:$0xff]   ;;  %v2424_v10 = vld [vmem:[%s3964_s1 + $0x38] sm:$0xff]   ;;  %v2426_v12 = vld [vmem:[%s3964_s1 + $0x48] sm:$0xff]  }
   0x4   :  { %v2438_v8 = vld [vmem:[%s3965_s0 + $0x244] ss:$12 sps:$4 sm:$0xff]   ;;  %889 = vmatprep.mubr.bf16.mxu0 %v2435_v6  ;;  %v2428_v14 = vld [vmem:[%s3964_s1 + $0x58] sm:$0xff]   ;;  %v2430_v16 = vld [vmem:[%s3964_s1 + $0x68] sm:$0xff]  }
   0x5   :  { %1081 = vmatprep.mubr.bf16.mxu1 %v2438_v8  ;;  %v2423_v9 = vld [vmem:[%s3964_s1 + $0x30] sm:$0xff]   ;;  %v2425_v11 = vld [vmem:[%s3964_s1 + $0x40] sm:$0xff]   ;;  %v2432_v18 = vld [vmem:[%s3964_s1 + $0x78] sm:$0xff]  }
   0x6   :  { %860 = vmatpush1.bf16.msra.mxu0 %v2418_v2  ;;  %2401 = vmatpush1.bf16.msra.mxu1 %v2418_v2  ;;  %v2427_v13 = vld [vmem:[%s3964_s1 + $0x50] sm:$0xff]   ;;  %v2429_v15 = vld [vmem:[%s3964_s1 + $0x60] sm:$0xff]   ;;  %v2440_v22 = vld [vmem:[%s3965_s0 + $0x1c] ss:$12 sps:$4 sm:$0xff]  }
   0x7   :  { %861 = vmatprep.subr.bf16.mxu0 %v2698_v0  ;;  %2386 = vmatprep.subr.bf16.mxu1 %v2698_v0  ;;  %v2431_v17 = vld [vmem:[%s3964_s1 + $0x70] sm:$0xff]   ;;  %v2439_v19 = vld [vmem:[%s3964_s1 + $0x80] sm:$0xff]   ;;  %v2442_v23 = vld [vmem:[%s3965_s0 + $0x25c] ss:$12 sps:$4 sm:$0xff]  }
   0x8   :  { %v2433_v20 = vld [vmem:[%s3965_s0] ss:$12 sps:$4 sm:$0xff]   ;;  %v2453_v25 = vld [vmem:[%s3964_s1 + $0x90] sm:$0xff]   ;;  %v2444_v26 = vld [vmem:[%s3965_s0 + $0x18] ss:$12 sps:$4 sm:$0xff]  }
   0x9   :  { %v2436_v21 = vld [vmem:[%s3965_s0 + $0x240] ss:$12 sps:$4 sm:$0xff]   ;;  %v2445_v27 = vld [vmem:[%s3965_s0 + $0x258] ss:$12 sps:$4 sm:$0xff]   ;;  %v2451_v31 = vld [vmem:[%s3965_s0 + $0x30] ss:$12 sps:$4 sm:$0xff]  }
   0xa   :  { %862 = vmatpush1.bf16.msra.mxu0 %v2419_v3  ;;  %2402 = vmatpush1.bf16.msra.mxu1 %v2419_v3  ;;  %v2446_v24 = vld [vmem:[%s3964_s1 + $0x88] sm:$0xff]   ;;  %v2447_v28 = vld [vmem:[%s3965_s0 + $0x34] ss:$12 sps:$4 sm:$0xff]   ;;  %v2460_v30 = vld [vmem:[%s3964_s1 + $0x98] sm:$0xff]  }
   0xb   :  { %863 = vmatprep.subr.bf16.mxu0 %v2698_v0  ;;  %2387 = vmatprep.subr.bf16.mxu1 %v2698_v0  ;;  %v2449_v29 = vld [vmem:[%s3965_s0 + $0x274] ss:$12 sps:$4 sm:$0xff]   ;;  %v2452_v33 = vld [vmem:[%s3965_s0 + $0x270] ss:$12 sps:$4 sm:$0xff]   ;;  %v2454_v34 = vld [vmem:[%s3965_s0 + $0x4c] ss:$12 sps:$4 sm:$0xff]  }
   0xc   :  { %v2467_v32 = vld [vmem:[%s3964_s1 + $0xa0] sm:$0xff]   ;;  %v2456_v35 = vld [vmem:[%s3965_s0 + $0x28c] ss:$12 sps:$4 sm:$0xff]   ;;  %v2458_v37 = vld [vmem:[%s3965_s0 + $0x48] ss:$12 sps:$4 sm:$0xff]  }
   0xd   :  { %v2474_v36 = vld [vmem:[%s3964_s1 + $0xa8] sm:$0xff]   ;;  %v2461_v39 = vld [vmem:[%s3965_s0 + $0x64] ss:$12 sps:$4 sm:$0xff]   ;;  %v2488_v42 = vld [vmem:[%s3964_s1 + $0xb8] sm:$0xff]  }
   0xe   :  { %864 = vmatpush1.bf16.msra.mxu0 %v2420_v4  ;;  %2403 = vmatpush1.bf16.msra.mxu1 %v2420_v4  ;;  %v2459_v38 = vld [vmem:[%s3965_s0 + $0x288] ss:$12 sps:$4 sm:$0xff]   ;;  %v2463_v40 = vld [vmem:[%s3965_s0 + $0x2a4] ss:$12 sps:$4 sm:$0xff]   ;;  %v2465_v43 = vld [vmem:[%s3965_s0 + $0x60] ss:$12 sps:$4 sm:$0xff]  }
   0xf   :  { %865 = vmatprep.subr.bf16.mxu0 %v2698_v0  ;;  %2388 = vmatprep.subr.bf16.mxu1 %v2698_v0  ;;  %v2481_v41 = vld [vmem:[%s3964_s1 + $0xb0] sm:$0xff]   ;;  %v2466_v44 = vld [vmem:[%s3965_s0 + $0x2a0] ss:$12 sps:$4 sm:$0xff]   ;;  %v2468_v45 = vld [vmem:[%s3965_s0 + $0x7c] ss:$12 sps:$4 sm:$0xff]  }
  0x10   :  { %v2470_v46 = vld [vmem:[%s3965_s0 + $0x2bc] ss:$12 sps:$4 sm:$0xff]   ;;  %v2472_v47 = vld [vmem:[%s3965_s0 + $0x78] ss:$12 sps:$4 sm:$0xff]   ;;  %v2475_v49 = vld [vmem:[%s3965_s0 + $0x94] ss:$12 sps:$4 sm:$0xff]  }
  0x11   :  { %v2473_v48 = vld [vmem:[%s3965_s0 + $0x2b8] ss:$12 sps:$4 sm:$0xff]   ;;  %v2477_v50 = vld [vmem:[%s3965_s0 + $0x2d4] ss:$12 sps:$4 sm:$0xff]   ;;  %v2479_v51 = vld [vmem:[%s3965_s0 + $0x90] ss:$12 sps:$4 sm:$0xff]  }
  0x12   :  { %866 = vmatpush1.bf16.msra.mxu0 %v2421_v5  ;;  %2404 = vmatpush1.bf16.msra.mxu1 %v2421_v5  ;;  %v2480_v52 = vld [vmem:[%s3965_s0 + $0x2d0] ss:$12 sps:$4 sm:$0xff]   ;;  %v2482_v53 = vld [vmem:[%s3965_s0 + $0xac] ss:$12 sps:$4 sm:$0xff]   ;;  %v2486_v55 = vld [vmem:[%s3965_s0 + $0xa8] ss:$12 sps:$4 sm:$0xff]  }
  0x13   :  { %867 = vmatprep.subr.bf16.mxu0 %v2698_v0  ;;  %2389 = vmatprep.subr.bf16.mxu1 %v2698_v0  ;;  %v2484_v54 = vld [vmem:[%s3965_s0 + $0x2ec] ss:$12 sps:$4 sm:$0xff]   ;;  %v2487_v56 = vld [vmem:[%s3965_s0 + $0x2e8] ss:$12 sps:$4 sm:$0xff]   ;;  %v2489_v57 = vld [vmem:[%s3965_s0 + $0xc4] ss:$12 sps:$4 sm:$0xff]  }
  0x14   :  { %v2491_v58 = vld [vmem:[%s3965_s0 + $0x8] ss:$12 sps:$4 sm:$0xff]   ;;  %v2492_v59 = vld [vmem:[%s3965_s0 + $0xc0] ss:$12 sps:$4 sm:$0xff]   ;;  %v2496_v62 = vld [vmem:[%s3965_s0 + $0x38] ss:$12 sps:$4 sm:$0xff]  }
  0x15   :  { %v2493_v60 = vld [vmem:[%s3965_s0 + $0x20] ss:$12 sps:$4 sm:$0xff]   ;;  %v2494_v61 = vld [vmem:[%s3965_s0 + $0xdc] ss:$12 sps:$4 sm:$0xff]   ;;  %v2497_v63 = vld [vmem:[%s3965_s0 + $0xd8] ss:$12 sps:$4 sm:$0xff]  }
  0x16   :  { %868 = vmatpush1.bf16.msra.mxu0 %v2422_v7  ;;  %2405 = vmatpush1.bf16.msra.mxu1 %v2422_v7  ;;  %v2499_v1 = vld [vmem:[%s3965_s0 + $0xf4] ss:$12 sps:$4 sm:$0xff]   ;;  %v2502_v3 = vld [vmem:[%s3965_s0 + $0xf0] ss:$12 sps:$4 sm:$0xff]   ;;  %v2504_v5 = vld [vmem:[%s3965_s0 + $0x10c] ss:$12 sps:$4 sm:$0xff]  }
  0x17   :  { %869 = vmatprep.subr.bf16.mxu0 %v2698_v0  ;;  %2390 = vmatprep.subr.bf16.mxu1 %v2698_v0  ;;  %v2501_v2 = vld [vmem:[%s3965_s0 + $0x68] ss:$12 sps:$4 sm:$0xff]   ;;  %v2503_v4 = vld [vmem:[%s3965_s0 + $0x80] ss:$12 sps:$4 sm:$0xff]   ;;  %v2506_v6 = vld [vmem:[%s3965_s0 + $0x98] ss:$12 sps:$4 sm:$0xff]  }
  0x18   :  { %v2507_v7 = vld [vmem:[%s3965_s0 + $0x108] ss:$12 sps:$4 sm:$0xff]   ;;  %v2508_v8 = vld [vmem:[%s3965_s0 + $0xb0] ss:$12 sps:$4 sm:$0xff]  }
  0x1a   :  { %870 = vmatpush1.bf16.msra.mxu0 %v2423_v9  ;;  %2406 = vmatpush1.bf16.msra.mxu1 %v2423_v9  ;;  %v2509_v9 = vld [vmem:[%s3965_s0 + $0x124] ss:$12 sps:$4 sm:$0xff]  }
  0x1b   :  { %871 = vmatprep.subr.bf16.mxu0 %v2698_v0  ;;  %2391 = vmatprep.subr.bf16.mxu1 %v2698_v0 }
  0x1e   :  { %872 = vmatpush1.bf16.msra.mxu0 %v2424_v10  ;;  %2407 = vmatpush1.bf16.msra.mxu1 %v2424_v10  ;;  %v2511_v10 = vld [vmem:[%s3965_s0 + $0xc8] ss:$12 sps:$4 sm:$0xff]  }
  0x1f   :  { %873 = vmatprep.subr.bf16.mxu0 %v2698_v0  ;;  %2392 = vmatprep.subr.bf16.mxu1 %v2698_v0 }
  0x22   :  { %874 = vmatpush1.bf16.msra.mxu0 %v2425_v11  ;;  %2408 = vmatpush1.bf16.msra.mxu1 %v2425_v11  ;;  %v2512_v11 = vld [vmem:[%s3965_s0 + $0x120] ss:$12 sps:$4 sm:$0xff]  }
  0x23   :  { %875 = vmatprep.subr.bf16.mxu0 %v2698_v0  ;;  %2393 = vmatprep.subr.bf16.mxu1 %v2698_v0 }
  0x26   :  { %876 = vmatpush1.bf16.msra.mxu0 %v2426_v12  ;;  %2409 = vmatpush1.bf16.msra.mxu1 %v2426_v12  ;;  %v2513_v12 = vld [vmem:[%s3965_s0 + $0xe0] ss:$12 sps:$4 sm:$0xff]  }
  0x27   :  { %877 = vmatprep.subr.bf16.mxu0 %v2698_v0  ;;  %2394 = vmatprep.subr.bf16.mxu1 %v2698_v0 }
  0x2a   :  { %878 = vmatpush1.bf16.msra.mxu0 %v2427_v13  ;;  %2410 = vmatpush1.bf16.msra.mxu1 %v2427_v13  ;;  %v2514_v13 = vld [vmem:[%s3965_s0 + $0x13c] ss:$12 sps:$4 sm:$0xff]  }
  0x2b   :  { %879 = vmatprep.subr.bf16.mxu0 %v2698_v0  ;;  %2395 = vmatprep.subr.bf16.mxu1 %v2698_v0 }
  0x2e   :  { %880 = vmatpush1.bf16.msra.mxu0 %v2428_v14  ;;  %2411 = vmatpush1.bf16.msra.mxu1 %v2428_v14  ;;  %v2516_v14 = vld [vmem:[%s3965_s0 + $0xf8] ss:$12 sps:$4 sm:$0xff]  }
  0x2f   :  { %881 = vmatprep.subr.bf16.mxu0 %v2698_v0  ;;  %2396 = vmatprep.subr.bf16.mxu1 %v2698_v0 }
  0x32   :  { %882 = vmatpush1.bf16.msra.mxu0 %v2429_v15  ;;  %2412 = vmatpush1.bf16.msra.mxu1 %v2429_v15  ;;  %v2517_v15 = vld [vmem:[%s3965_s0 + $0x138] ss:$12 sps:$4 sm:$0xff]  }
  0x33   :  { %883 = vmatprep.subr.bf16.mxu0 %v2698_v0  ;;  %2397 = vmatprep.subr.bf16.mxu1 %v2698_v0 }
  0x36   :  { %884 = vmatpush1.bf16.msra.mxu0 %v2430_v16  ;;  %2413 = vmatpush1.bf16.msra.mxu1 %v2430_v16  ;;  %v2518_v16 = vld [vmem:[%s3965_s0 + $0x110] ss:$12 sps:$4 sm:$0xff]  }
  0x37   :  { %885 = vmatprep.subr.bf16.mxu0 %v2698_v0  ;;  %2398 = vmatprep.subr.bf16.mxu1 %v2698_v0 }
  0x3a   :  { %886 = vmatpush1.bf16.msra.mxu0 %v2431_v17  ;;  %2414 = vmatpush1.bf16.msra.mxu1 %v2431_v17  ;;  %v2519_v17 = vld [vmem:[%s3965_s0 + $0x154] ss:$12 sps:$4 sm:$0xff]  }
  0x3b   :  { %887 = vmatprep.subr.bf16.mxu0 %v2698_v0  ;;  %2399 = vmatprep.subr.bf16.mxu1 %v2698_v0  ;;  %v2498_v0 = vld [vmem:[%s3965_s0 + $0x50] ss:$12 sps:$4 sm:$0xff]  }
  0x3e   :  { %888 = vmatpush1.bf16.msra.mxu0 %v2432_v18  ;;  %2415 = vmatpush1.bf16.msra.mxu1 %v2432_v18  ;;  %v2521_v18 = vld [vmem:[%s3965_s0 + $0x128] ss:$12 sps:$4 sm:$0xff]  }
  0x3f   :  { %2304 = vmatprep.subr.bf16.mxu1 %v2439_v19 }
  0x41   :  { %890 = vmatmul.mubr.bf16.vlgmr.msra.gmra.mrb[0].mxu0 %v2433_v20  ;;  %1082 = vmatmul.mubr.bf16.vlgmr.msra.gmra.mrb[0].mxu1 %v2436_v21  ;;  %v2523_v20 = vld [vmem:[%s3965_s0 + $0x140] ss:$12 sps:$4 sm:$0xff]  }
  0x42   :  { %2305 = vmatpush3.bf16.msra.mxu1 %v2439_v19  ;;  %897 = vmatprep.mubr.bf16.mxu0 %v2440_v22  ;;  %v2522_v19 = vld [vmem:[%s3965_s0 + $0x150] ss:$12 sps:$4 sm:$0xff]   ;;  %v2524_v21 = vld [vmem:[%s3965_s0 + $0x16c] ss:$12 sps:$4 sm:$0xff]  }
  0x43   :  { %1089 = vmatprep.mubr.bf16.mxu1 %v2442_v23  ;;  %2306 = vmatprep.subr.bf16.mxu1 %v2446_v24  ;;  %v2526_v22 = vld [vmem:[%s3965_s0 + $0x158] ss:$12 sps:$4 sm:$0xff]   ;;  %v2527_v23 = vld [vmem:[%s3965_s0 + $0x168] ss:$12 sps:$4 sm:$0xff]  }
  0x46   :  { %2307 = vmatpush3.bf16.msra.mxu1 %v2446_v24  ;;  %v2528_v24 = vld [vmem:[%s3965_s0 + $0x170] ss:$12 sps:$4 sm:$0xff]  }
  0x47   :  { %2308 = vmatprep.subr.bf16.mxu1 %v2453_v25 }
  0x49   :  { %898 = vmatmul.mubr.bf16.gmra.mrb[4].mxu0 %v2444_v26  ;;  %1090 = vmatmul.mubr.bf16.gmra.mrb[4].mxu1 %v2445_v27  ;;  %v2531_v26 = vld [vmem:[%s3965_s0 + $0x188] ss:$12 sps:$4 sm:$0xff]   ;;  %v2532_v27 = vld [vmem:[%s3965_s0 + $0x180] ss:$12 sps:$4 sm:$0xff]  }
  0x4a   :  { %905 = vmatprep.mubr.bf16.mxu0 %v2447_v28  ;;  %1097 = vmatprep.mubr.bf16.mxu1 %v2449_v29  ;;  %v2533_v28 = vld [vmem:[%s3965_s0 + $0x1a0] ss:$12 sps:$4 sm:$0xff]   ;;  %v2534_v29 = vld [vmem:[%s3965_s0 + $0x19c] ss:$12 sps:$4 sm:$0xff]  }
  0x4b   :  { %2309 = vmatpush3.bf16.msra.mxu1 %v2453_v25  ;;  %v2529_v25 = vld [vmem:[%s3965_s0 + $0x184] ss:$12 sps:$4 sm:$0xff]  }
  0x4c   :  { %2310 = vmatprep.subr.bf16.mxu1 %v2460_v30 }
  0x4f   :  { %2311 = vmatpush3.bf16.msra.mxu1 %v2460_v30  ;;  %v2536_v30 = vld [vmem:[%s3965_s0 + $0x1b8] ss:$12 sps:$4 sm:$0xff]  }
  0x50   :  { %2312 = vmatprep.subr.bf16.mxu1 %v2467_v32 }
  0x51   :  { %906 = vmatmul.mubr.bf16.gmra.mrb[8].mxu0 %v2451_v31  ;;  %1098 = vmatmul.mubr.bf16.gmra.mrb[8].mxu1 %v2452_v33  ;;  %v2537_v31 = vld [vmem:[%s3965_s0 + $0x198] ss:$12 sps:$4 sm:$0xff]   ;;  %v2539_v33 = vld [vmem:[%s3965_s0 + $0x1b4] ss:$12 sps:$4 sm:$0xff]  }
  0x52   :  { %913 = vmatprep.mubr.bf16.mxu0 %v2454_v34  ;;  %1105 = vmatprep.mubr.bf16.mxu1 %v2456_v35  ;;  %v2541_v34 = vld [vmem:[%s3965_s0 + $0x1e8] ss:$12 sps:$4 sm:$0xff]   ;;  %v2542_v35 = vld [vmem:[%s3965_s0 + $0x1b0] ss:$12 sps:$4 sm:$0xff]  }
  0x53   :  { %2313 = vmatpush3.bf16.msra.mxu1 %v2467_v32  ;;  %v2538_v32 = vld [vmem:[%s3965_s0 + $0x1d0] ss:$12 sps:$4 sm:$0xff]  }
  0x54   :  { %2314 = vmatprep.subr.bf16.mxu1 %v2474_v36 }
  0x57   :  { %2315 = vmatpush3.bf16.msra.mxu1 %v2474_v36  ;;  %v2543_v36 = vld [vmem:[%s3965_s0 + $0x200] ss:$12 sps:$4 sm:$0xff]  }
  0x58   :  { %2316 = vmatprep.subr.bf16.mxu1 %v2481_v41 }
  0x59   :  { %914 = vmatmul.mubr.bf16.gmra.mrb[12].mxu0 %v2458_v37  ;;  %1106 = vmatmul.mubr.bf16.gmra.mrb[12].mxu1 %v2459_v38  ;;  %v2544_v37 = vld [vmem:[%s3965_s0 + $0x1cc] ss:$12 sps:$4 sm:$0xff]  }
  0x5a   :  { %921 = vmatprep.mubr.bf16.mxu0 %v2461_v39  ;;  %1113 = vmatprep.mubr.bf16.mxu1 %v2463_v40  ;;  %v2546_v38 = vld [vmem:[%s3965_s0 + $0x218] ss:$12 sps:$4 sm:$0xff]   ;;  %v2547_v39 = vld [vmem:[%s3965_s0 + $0x1c8] ss:$12 sps:$4 sm:$0xff]   ;;  %v2548_v40 = vld [vmem:[%s3965_s0 + $0x230] ss:$12 sps:$4 sm:$0xff]  }
  0x5b   :  { %2317 = vmatpush3.bf16.msra.mxu1 %v2481_v41  ;;  %v2549_v41 = vld [vmem:[%s3965_s0 + $0x1e4] ss:$12 sps:$4 sm:$0xff]  }
  0x5c   :  { %2318 = vmatprep.subr.bf16.mxu1 %v2488_v42 }
  0x5f   :  { %2319 = vmatpush3.bf16.msra.mxu1 %v2488_v42  ;;  %v2551_v42 = vld [vmem:[%s3965_s0 + $0x248] ss:$12 sps:$4 sm:$0xff]  }
  0x61   :  { %922 = vmatmul.mubr.bf16.gmra.mrb[16].mxu0 %v2465_v43  ;;  %1114 = vmatmul.mubr.bf16.gmra.mrb[16].mxu1 %v2466_v44  ;;  %v2552_v43 = vld [vmem:[%s3965_s0 + $0x1e0] ss:$12 sps:$4 sm:$0xff]  }
  0x62   :  { %929 = vmatprep.mubr.bf16.mxu0 %v2468_v45  ;;  %1121 = vmatprep.mubr.bf16.mxu1 %v2470_v46  ;;  %v2553_v44 = vld [vmem:[%s3965_s0 + $0x260] ss:$12 sps:$4 sm:$0xff]   ;;  %v2554_v45 = vld [vmem:[%s3965_s0 + $0x1fc] ss:$12 sps:$4 sm:$0xff]   ;;  %v2556_v46 = vld [vmem:[%s3965_s0 + $0x278] ss:$12 sps:$4 sm:$0xff]  }
  0x69   :  { %930 = vmatmul.mubr.bf16.gmra.mrb[20].mxu0 %v2472_v47  ;;  %1122 = vmatmul.mubr.bf16.gmra.mrb[20].mxu1 %v2473_v48  ;;  %v2557_v47 = vld [vmem:[%s3965_s0 + $0x1f8] ss:$12 sps:$4 sm:$0xff]   ;;  %v2558_v48 = vld [vmem:[%s3965_s0 + $0x290] ss:$12 sps:$4 sm:$0xff]  }
  0x6a   :  { %937 = vmatprep.mubr.bf16.mxu0 %v2475_v49  ;;  %1129 = vmatprep.mubr.bf16.mxu1 %v2477_v50  ;;  %v2559_v49 = vld [vmem:[%s3965_s0 + $0x214] ss:$12 sps:$4 sm:$0xff]  }
  0x6b   :  { %v2561_v50 = vld [vmem:[%s3965_s0 + $0x2a8] ss:$12 sps:$4 sm:$0xff]  }
  0x71   :  { %938 = vmatmul.mubr.bf16.gmra.mrb[24].mxu0 %v2479_v51  ;;  %1130 = vmatmul.mubr.bf16.gmra.mrb[24].mxu1 %v2480_v52  ;;  %v2562_v51 = vld [vmem:[%s3965_s0 + $0x210] ss:$12 sps:$4 sm:$0xff]   ;;  %v2563_v52 = vld [vmem:[%s3965_s0 + $0x2c0] ss:$12 sps:$4 sm:$0xff]  }
  0x72   :  { %945 = vmatprep.mubr.bf16.mxu0 %v2482_v53  ;;  %1137 = vmatprep.mubr.bf16.mxu1 %v2484_v54  ;;  %v2564_v53 = vld [vmem:[%s3965_s0 + $0x22c] ss:$12 sps:$4 sm:$0xff]  }
  0x73   :  { %v2566_v54 = vld [vmem:[%s3965_s0 + $0x2d8] ss:$12 sps:$4 sm:$0xff]  }
  0x79   :  { %946 = vmatmul.mubr.bf16.gmra.mrb[28].mxu0 %v2486_v55  ;;  %1138 = vmatmul.mubr.bf16.gmra.mrb[28].mxu1 %v2487_v56  ;;  %v2567_v55 = vld [vmem:[%s3965_s0 + $0x228] ss:$12 sps:$4 sm:$0xff]   ;;  %v2568_v56 = vld [vmem:[%s3965_s0 + $0x2f0] ss:$12 sps:$4 sm:$0xff]  }
  0x7a   :  { %953 = vmatprep.mubr.bf16.mxu0 %v2489_v57  ;;  %2320 = vmatprep.mubr.bf16.mxu1 %v2491_v58 }
  0x81   :  { %954 = vmatmul.mubr.bf16.gmra.mrb[32].mxu0 %v2492_v59  ;;  %2321 = vmatmul.mubr.bf16.vlgmr.msra.gmra.mrb[32].mxu1 %v2493_v60 }
  0x82   :  { %961 = vmatprep.mubr.bf16.mxu0 %v2494_v61  ;;  %2324 = vmatprep.mubr.bf16.mxu1 %v2496_v62 }
  0x89   :  { %962 = vmatmul.mubr.bf16.gmra.mrb[36].mxu0 %v2497_v63  ;;  %2325 = vmatmul.mubr.bf16.gmra.mrb[36].mxu1 %v2498_v0 }
  0x8a   :  { %969 = vmatprep.mubr.bf16.mxu0 %v2499_v1  ;;  %2328 = vmatprep.mubr.bf16.mxu1 %v2501_v2 }
  0x91   :  { %970 = vmatmul.mubr.bf16.gmra.mrb[40].mxu0 %v2502_v3  ;;  %2329 = vmatmul.mubr.bf16.gmra.mrb[40].mxu1 %v2503_v4 }
  0x92   :  { %977 = vmatprep.mubr.bf16.mxu0 %v2504_v5  ;;  %2332 = vmatprep.mubr.bf16.mxu1 %v2506_v6 }
  0x99   :  { %978 = vmatmul.mubr.bf16.gmra.mrb[44].mxu0 %v2507_v7  ;;  %2333 = vmatmul.mubr.bf16.gmra.mrb[44].mxu1 %v2508_v8 }
  0x9a   :  { %985 = vmatprep.mubr.bf16.mxu0 %v2509_v9  ;;  %2336 = vmatprep.mubr.bf16.mxu1 %v2511_v10 }
  0xa1   :  { %986 = vmatmul.mubr.bf16.gmra.mrb[48].mxu0 %v2512_v11  ;;  %2337 = vmatmul.mubr.bf16.gmra.mrb[48].mxu1 %v2513_v12 }
  0xa2   :  { %993 = vmatprep.mubr.bf16.mxu0 %v2514_v13  ;;  %2340 = vmatprep.mubr.bf16.mxu1 %v2516_v14 }
  0xa9   :  { %994 = vmatmul.mubr.bf16.gmra.mrb[52].mxu0 %v2517_v15  ;;  %2341 = vmatmul.mubr.bf16.gmra.mrb[52].mxu1 %v2518_v16 }
  0xaa   :  { %1001 = vmatprep.mubr.bf16.mxu0 %v2519_v17  ;;  %2344 = vmatprep.mubr.bf16.mxu1 %v2521_v18 }
  0xb1   :  { %1002 = vmatmul.mubr.bf16.gmra.mrb[56].mxu0 %v2522_v19  ;;  %2345 = vmatmul.mubr.bf16.gmra.mrb[56].mxu1 %v2523_v20 }
  0xb2   :  { %1009 = vmatprep.mubr.bf16.mxu0 %v2524_v21  ;;  %2348 = vmatprep.mubr.bf16.mxu1 %v2526_v22 }
  0xb9   :  { %1010 = vmatmul.mubr.bf16.gmra.mrb[60].mxu0 %v2527_v23  ;;  %2349 = vmatmul.mubr.bf16.gmra.mrb[60].mxu1 %v2528_v24 }
  0xba   :  { %1017 = vmatprep.mubr.bf16.mxu0 %v2529_v25  ;;  %2352 = vmatprep.mubr.bf16.mxu1 %v2531_v26 }
  0xc1   :  { %1018 = vmatmul.mubr.bf16.gmra.mrb[64].mxu0 %v2532_v27  ;;  %2353 = vmatmul.mubr.bf16.gmra.mrb[64].mxu1 %v2533_v28 }
  0xc2   :  { %1025 = vmatprep.mubr.bf16.mxu0 %v2534_v29  ;;  %2356 = vmatprep.mubr.bf16.mxu1 %v2536_v30 }
  0xc9   :  { %1026 = vmatmul.mubr.bf16.gmra.mrb[68].mxu0 %v2537_v31  ;;  %2357 = vmatmul.mubr.bf16.gmra.mrb[68].mxu1 %v2538_v32 }
  0xca   :  { %1033 = vmatprep.mubr.bf16.mxu0 %v2539_v33  ;;  %2360 = vmatprep.mubr.bf16.mxu1 %v2541_v34 }
  0xd1   :  { %1034 = vmatmul.mubr.bf16.gmra.mrb[72].mxu0 %v2542_v35  ;;  %2361 = vmatmul.mubr.bf16.gmra.mrb[72].mxu1 %v2543_v36 }
  0xd2   :  { %1041 = vmatprep.mubr.bf16.mxu0 %v2544_v37  ;;  %2364 = vmatprep.mubr.bf16.mxu1 %v2546_v38 }
  0xd9   :  { %1042 = vmatmul.mubr.bf16.gmra.mrb[76].mxu0 %v2547_v39  ;;  %2365 = vmatmul.mubr.bf16.gmra.mrb[76].mxu1 %v2548_v40 }
  0xda   :  { %1049 = vmatprep.mubr.bf16.mxu0 %v2549_v41  ;;  %2368 = vmatprep.mubr.bf16.mxu1 %v2551_v42 }
  0xe1   :  { %1050 = vmatmul.mubr.bf16.gmra.mrb[80].mxu0 %v2552_v43  ;;  %2369 = vmatmul.mubr.bf16.gmra.mrb[80].mxu1 %v2553_v44 }
  0xe2   :  { %1057 = vmatprep.mubr.bf16.mxu0 %v2554_v45  ;;  %2372 = vmatprep.mubr.bf16.mxu1 %v2556_v46 }
  0xe9   :  { %1058 = vmatmul.mubr.bf16.gmra.mrb[84].mxu0 %v2557_v47  ;;  %2373 = vmatmul.mubr.bf16.gmra.mrb[84].mxu1 %v2558_v48 }
  0xea   :  { %1065 = vmatprep.mubr.bf16.mxu0 %v2559_v49  ;;  %2376 = vmatprep.mubr.bf16.mxu1 %v2561_v50  ;;  %v1501_v49 = vld [vmem:[%s3966_s3 + $0x10] sm:$0xff]  ;;  %v1499_v50 = vld [vmem:[%s3966_s3] sm:$0xff] }
  0xf1   :  { %1066 = vmatmul.mubr.bf16.gmra.mrb[88].mxu0 %v2562_v51  ;;  %2377 = vmatmul.mubr.bf16.gmra.mrb[88].mxu1 %v2563_v52  ;;  %v1502_v51 = vld [vmem:[%s3966_s3 + $0x18] sm:$0xff]  ;;  %v1500_v52 = vld [vmem:[%s3966_s3 + $0x8] sm:$0xff] }
  0xf2   :  { %1073 = vmatprep.mubr.bf16.mxu0 %v2564_v53  ;;  %2380 = vmatprep.mubr.bf16.mxu1 %v2566_v54  ;;  %v1505_v53 = vld [vmem:[%s3966_s3 + $0x30] sm:$0xff]  ;;  %v1503_v54 = vld [vmem:[%s3966_s3 + $0x20] sm:$0xff] }
  0xf9   :  { %1074 = vmatmul.mubr.bf16.gmra.mrb[92].mxu0 %v2567_v55  ;;  %2381 = vmatmul.mubr.bf16.gmra.mrb[92].mxu1 %v2568_v56  ;;  %v1506_v55 = vld [vmem:[%s3966_s3 + $0x38] sm:$0xff]  ;;  %v1504_v56 = vld [vmem:[%s3966_s3 + $0x28] sm:$0xff] }
 0x114   :  { %v3116_v57 = vpop.f32.mrb[0].mxu0  ;;  %v3118_v58 = vpop.f32.mrb[0].mxu1 }
 0x115   :  { %v893_v59 = vpop.f32.mrb[1].mxu0  ;;  %v1085_v60 = vpop.f32.mrb[1].mxu1 }
 0x116   :  { %v3120_v61 = vpop.f32.mrb[2].mxu0  ;;  %v3122_v62 = vpop.f32.mrb[2].mxu1 }
 0x117   :  { %v896_v63 = vpop.f32.mrb[3].mxu0  ;;  %v1088_v0 = vpop.f32.mrb[3].mxu1 }
 0x118   :  { %v1565_v63 = vmul.f32 2.0, %v1501_v49  ;;  %v1509_v0 = vld [vmem:[%s3966_s3 + $0x50] sm:$0xff] }
 0x119   :  { %v1513_v49 = vld [vmem:[%s3966_s3 + $0x70] sm:$0xff] }
 0x11c   :  { %v3124_v1 = vpop.f32.mrb[4].mxu0  ;;  %v3126_v2 = vpop.f32.mrb[4].mxu1 }
 0x11d   :  { %v901_v3 = vpop.f32.mrb[5].mxu0  ;;  %v1093_v4 = vpop.f32.mrb[5].mxu1 }
 0x11e   :  { %v3128_v5 = vpop.f32.mrb[6].mxu0  ;;  %v3130_v6 = vpop.f32.mrb[6].mxu1  ;;  %v1507_v3 = vld [vmem:[%s3966_s3 + $0x40] sm:$0xff] }
 0x11f   :  { %v904_v7 = vpop.f32.mrb[7].mxu0  ;;  %v1096_v8 = vpop.f32.mrb[7].mxu1 }
 0x120   :  { %v1563_v8 = vmul.f32 2.0, %v1499_v50 }
 0x124   :  { %v3132_v9 = vpop.f32.mrb[8].mxu0  ;;  %v3134_v10 = vpop.f32.mrb[8].mxu1 }
 0x125   :  { %3969 = vst [vmem:[#allocation2_spill] sm:$0xff] %v3134_v10  ;;  %v909_v11 = vpop.f32.mrb[9].mxu0  ;;  %v1101_v12 = vpop.f32.mrb[9].mxu1 }
 0x126   :  { %v3136_v13 = vpop.f32.mrb[10].mxu0  ;;  %v3138_v14 = vpop.f32.mrb[10].mxu1  ;;  %v1566_v11 = vmul.f32 2.0, %v1502_v51  ;;  %v1564_v12 = vmul.f32 2.0, %v1500_v52 }
 0x127   :  { %3970 = vst [vmem:[#allocation3_spill] sm:$0xff] %v3138_v14  ;;  %v912_v15 = vpop.f32.mrb[11].mxu0  ;;  %v1104_v16 = vpop.f32.mrb[11].mxu1 }
 0x128   :  { %v1510_v15 = vld [vmem:[%s3966_s3 + $0x58] sm:$0xff] }
 0x12c   :  { %v3140_v17 = vpop.f32.mrb[12].mxu0  ;;  %v3142_v18 = vpop.f32.mrb[12].mxu1 }
 0x12d   :  { %3971 = vst [vmem:[#allocation4_spill] sm:$0xff] %v3142_v18  ;;  %v917_v19 = vpop.f32.mrb[13].mxu0  ;;  %v1109_v20 = vpop.f32.mrb[13].mxu1 }
 0x12e   :  { %v3144_v21 = vpop.f32.mrb[14].mxu0  ;;  %v3146_v22 = vpop.f32.mrb[14].mxu1  ;;  %v1569_v20 = vmul.f32 2.0, %v1505_v53 }
 0x12f   :  { %3972 = vst [vmem:[#allocation5_spill] sm:$0xff] %v3146_v22  ;;  %v920_v23 = vpop.f32.mrb[15].mxu0  ;;  %v1112_v24 = vpop.f32.mrb[15].mxu1 }
 0x130   :  { %v1567_v23 = vmul.f32 2.0, %v1503_v54  ;;  %v1570_v24 = vmul.f32 2.0, %v1506_v55  ;;  %v3232_v50 = vadd.f32 -1.0, %v1569_v20  ;;  %v1511_v54 = vld [vmem:[%s3966_s3 + $0x60] sm:$0xff]  ;;  %v1514_v55 = vld [vmem:[%s3966_s3 + $0x78] sm:$0xff] }
 0x131   :  { %v1515_v20 = vld [vmem:[%s3966_s3 + $0x80] sm:$0xff] }
 0x132   :  { %v3234_v51 = vadd.f32 -1.0, %v1567_v23  ;;  %v3236_v52 = vadd.f32 -1.0, %v1570_v24  ;;  %v1518_v23 = vld [vmem:[%s3966_s3 + $0x98] sm:$0xff] }
 0x134   :  { %v3148_v25 = vpop.f32.mrb[16].mxu0  ;;  %v3150_v26 = vpop.f32.mrb[16].mxu1 }
 0x135   :  { %3973 = vst [vmem:[#allocation6_spill] sm:$0xff] %v3150_v26  ;;  %v925_v27 = vpop.f32.mrb[17].mxu0  ;;  %v1117_v28 = vpop.f32.mrb[17].mxu1 }
 0x136   :  { %v3152_v29 = vpop.f32.mrb[18].mxu0  ;;  %v3154_v30 = vpop.f32.mrb[18].mxu1  ;;  %v1568_v27 = vmul.f32 2.0, %v1504_v56 }
 0x137   :  { %3974 = vst [vmem:[#allocation7_spill] sm:$0xff] %v3154_v30  ;;  %v928_v31 = vpop.f32.mrb[19].mxu0  ;;  %v1120_v32 = vpop.f32.mrb[19].mxu1 }
 0x138   :  { %v1573_v32 = vmul.f32 2.0, %v1509_v0  ;;  %v3238_v53 = vadd.f32 -1.0, %v1568_v27 }
 0x13c   :  { %v3156_v33 = vpop.f32.mrb[20].mxu0  ;;  %v3158_v34 = vpop.f32.mrb[20].mxu1 }
 0x13d   :  { %3975 = vst [vmem:[#allocation8_spill] sm:$0xff] %v3158_v34  ;;  %v933_v35 = vpop.f32.mrb[21].mxu0  ;;  %v1125_v36 = vpop.f32.mrb[21].mxu1 }
 0x13e   :  { %v3160_v37 = vpop.f32.mrb[22].mxu0  ;;  %v3162_v38 = vpop.f32.mrb[22].mxu1  ;;  %v1571_v35 = vmul.f32 2.0, %v1507_v3  ;;  %v3216_v36 = vld [vmem:[%s3967_s2] ss:$0 sm:$0xff] }
 0x13f   :  { %3976 = vst [vmem:[#allocation9_spill] sm:$0xff] %v3162_v38  ;;  %v936_v39 = vpop.f32.mrb[23].mxu0  ;;  %v1128_v40 = vpop.f32.mrb[23].mxu1  ;;  %v900_v56 = vadd.f32 %v3216_v36, %v3124_v1  ;;  %v903_v24 = vadd.f32 %v3216_v36, %v3128_v5 }
 0x140   :  { %v1574_v39 = vmul.f32 2.0, %v1510_v15  ;;  %v1508_v40 = vld [vmem:[%s3966_s3 + $0x48] sm:$0xff]  ;;  %v3250_v0 = vadd.f32 -1.0, %v1571_v35  ;;  %v1577_v15 = vmul.f32 2.0, %v1513_v49 }
 0x141   :  { %v1572_v3 = vmul.f32 2.0, %v1508_v40  ;;  %v1516_v35 = vld [vmem:[%s3966_s3 + $0x88] sm:$0xff] }
 0x142   :  { %v3262_v1 = vadd.f32 -1.0, %v1574_v39  ;;  %v895_v39 = vadd.f32 %v3216_v36, %v3120_v61  ;;  %v1580_v61 = vmul.f32 2.0, %v1516_v35 }
 0x143   :  { %v3282_v38 = vadd.f32 -1.0, %v1572_v3  ;;  %v1520_v3 = vld [vmem:[%s3966_s3 + $0xa8] sm:$0xff] }
 0x144   :  { %v3164_v41 = vpop.f32.mrb[24].mxu0  ;;  %v3166_v42 = vpop.f32.mrb[24].mxu1 }
 0x145   :  { %3977 = vst [vmem:[#allocation10_spill] sm:$0xff] %v3166_v42  ;;  %v941_v43 = vpop.f32.mrb[25].mxu0  ;;  %v1133_v44 = vpop.f32.mrb[25].mxu1 }
 0x146   :  { %v3168_v45 = vpop.f32.mrb[26].mxu0  ;;  %v3170_v46 = vpop.f32.mrb[26].mxu1  ;;  %v3221_v43 = vadd.f32 -1.0, %v1565_v63  ;;  %v3223_v44 = vadd.f32 -1.0, %v1563_v8  ;;  %v3248_v63 = vadd.f32 -1.0, %v1573_v32  ;;  %v892_v8 = vadd.f32 %v3216_v36, %v3116_v57 }
 0x147   :  { %3978 = vst [vmem:[#allocation11_spill] sm:$0xff] %v3170_v46  ;;  %v944_v47 = vpop.f32.mrb[27].mxu0  ;;  %v1136_v48 = vpop.f32.mrb[27].mxu1  ;;  %v1578_v32 = vmul.f32 2.0, %v1514_v55  ;;  %v1521_v55 = vld [vmem:[%s3966_s3 + $0xb0] sm:$0xff] }
 0x148   :  { %v3225_v47 = vadd.f32 -1.0, %v1566_v11  ;;  %v3227_v48 = vadd.f32 -1.0, %v1564_v12 }
 0x14c   :  { %v3196_v59 = vpop.f32.mrb[28].mxu0  ;;  %v3198_v60 = vpop.f32.mrb[28].mxu1 }
 0x14d   :  { %3979 = vst [vmem:[#allocation12_spill] sm:$0xff] %v3198_v60  ;;  %v949_v4 = vpop.f32.mrb[29].mxu0  ;;  %v1141_v7 = vpop.f32.mrb[29].mxu1 }
 0x14e   :  { %v3209_v16 = vpop.f32.mrb[30].mxu0  ;;  %v3211_v19 = vpop.f32.mrb[30].mxu1  ;;  %v1512_v4 = vld [vmem:[%s3966_s3 + $0x68] sm:$0xff]  ;;  %v1517_v7 = vld [vmem:[%s3966_s3 + $0x90] sm:$0xff] }
 0x14f   :  { %3980 = vst [vmem:[#allocation13_spill] sm:$0xff] %v3211_v19  ;;  %v952_v28 = vpop.f32.mrb[31].mxu0  ;;  %v1144_v31 = vpop.f32.mrb[31].mxu1  ;;  %v1576_v60 = vmul.f32 2.0, %v1512_v4  ;;  %v1581_v46 = vmul.f32 2.0, %v1517_v7  ;;  %v1519_v4 = vld [vmem:[%s3966_s3 + $0xa0] sm:$0xff] }
 0x150   :  { %v1575_v31 = vmul.f32 2.0, %v1511_v54  ;;  %v1582_v54 = vmul.f32 2.0, %v1518_v23  ;;  %v3287_v7 = vadd.f32 -1.0, %v1577_v15  ;;  %v1525_v15 = vld [vmem:[%s3966_s3 + $0xd0] sm:$0xff] }
 0x151   :  { %v3299_v23 = vadd.f32 -1.0, %v1576_v60  ;;  %v908_v60 = vadd.f32 %v3216_v36, %v3132_v9  ;;  %v1589_v34 = vmul.f32 2.0, %v1525_v15  ;;  %v911_v9 = vadd.f32 %v3216_v36, %v3136_v13  ;;  %v1527_v13 = vld [vmem:[%s3966_s3 + $0xe0] sm:$0xff] }
 0x152   :  { %v3313_v35 = vadd.f32 -1.0, %v1582_v54 }
 0x154   :  { %v3260_v11 = vpop.f32.mrb[32].mxu0  ;;  %v2322_v12 = vpop.f32.mrb[32].mxu1 }
 0x155   :  { %v1189_v27 = vadd.f32 %v2322_v12, %v900_v56  ;;  %v957_v28 = vpop.f32.mrb[33].mxu0  ;;  %v1180_v57 = vpop.f32.mrb[33].mxu1 }
 0x156   :  { %v1181_v40 = vadd.f32 %v1180_v57, %v892_v8  ;;  %v3277_v49 = vpop.f32.mrb[34].mxu0  ;;  %v2323_v19 = vpop.f32.mrb[34].mxu1  ;;  %v1579_v28 = vmul.f32 2.0, %v1515_v20  ;;  %v3291_v8 = vadd.f32 -1.0, %v1578_v32  ;;  %v1522_v20 = vld [vmem:[%s3966_s3 + $0xb8] sm:$0xff]  ;;  %v1523_v57 = vld [vmem:[%s3966_s3 + $0xc0] sm:$0xff] }
 0x157   :  { %2569 = vtanh.f32 %v1189_v27  ;;  %v1192_v5 = vadd.f32 %v2323_v19, %v903_v24  ;;  %v960_v56 = vpop.f32.mrb[35].mxu0  ;;  %v1183_v12 = vpop.f32.mrb[35].mxu1  ;;  %v3289_v19 = vadd.f32 -1.0, %v1575_v31  ;;  %v3301_v24 = vadd.f32 -1.0, %v1581_v46  ;;  %v1526_v46 = vld [vmem:[%s3966_s3 + $0xd8] sm:$0xff] }
 0x158   :  { %2571 = vtanh.f32 %v1181_v40  ;;  %v1184_v42 = vadd.f32 %v1183_v12, %v895_v39  ;;  %v1585_v27 = vmul.f32 2.0, %v1521_v55  ;;  %v916_v31 = vadd.f32 %v3216_v36, %v3140_v17  ;;  %v1524_v17 = vld [vmem:[%s3966_s3 + $0xc8] sm:$0xff] }
 0x159   :  { %2573 = vtanh.f32 %v1192_v5  ;;  %v3311_v32 = vadd.f32 -1.0, %v1579_v28  ;;  %v3322_v5 = vadd.f32 -1.0, %v1580_v61  ;;  %v1586_v56 = vmul.f32 2.0, %v1522_v20 }
 0x15a   :  { %2575 = vtanh.f32 %v1184_v42  ;;  %v1583_v42 = vmul.f32 2.0, %v1519_v4  ;;  %v1584_v12 = vmul.f32 2.0, %v1520_v3  ;;  %v919_v28 = vadd.f32 %v3216_v36, %v3144_v21 }
 0x15b   :  { %v1587_v30 = vmul.f32 2.0, %v1523_v57  ;;  %v3333_v3 = vadd.f32 -1.0, %v1585_v27  ;;  %v1590_v22 = vmul.f32 2.0, %v1526_v46  ;;  %v3337_v57 = vadd.f32 -1.0, %v1586_v56 }
 0x15c   :  { %v3320_v39 = vpop.f32.mrb[36].mxu0  ;;  %v2326_v40 = vpop.f32.mrb[36].mxu1  ;;  %v3335_v21 = vadd.f32 -1.0, %v1583_v42  ;;  %v3346_v46 = vadd.f32 %v3216_v36, %v3118_v58 }
 0x15d   :  { %v1205_v54 = vadd.f32 %v2326_v40, %v916_v31  ;;  %v965_v55 = vpop.f32.mrb[37].mxu0  ;;  %v1196_v4 = vpop.f32.mrb[37].mxu1  ;;  %v1588_v31 = vmul.f32 2.0, %v1524_v17  ;;  %v3339_v40 = vadd.f32 -1.0, %v1584_v12  ;;  %v3350_v42 = vadd.f32 -1.0, %v1587_v30 }
 0x15e   :  { %v1197_v26 = vadd.f32 %v1196_v4, %v908_v60  ;;  %v3331_v61 = vpop.f32.mrb[38].mxu0  ;;  %v2327_v20 = vpop.f32.mrb[38].mxu1  ;;  %3981 = vst [vmem:[#allocation14_spill] sm:$0xff] %v3346_v46  ;;  %v3356_v56 = vadd.f32 -1.0, %v1590_v22  ;;  %v932_v17 = vadd.f32 %v3216_v36, %v3156_v33  ;;  %v927_v33 = vadd.f32 %v3216_v36, %v3152_v29 }
 0x15f   :  { %2577 = vtanh.f32 %v1205_v54  ;;  %v1208_v18 = vadd.f32 %v2327_v20, %v919_v28  ;;  %v968_v14 = vpop.f32.mrb[39].mxu0  ;;  %v1199_v10 = vpop.f32.mrb[39].mxu1  ;;  %v3360_v28 = vadd.f32 -1.0, %v1588_v31 }
 0x160   :  { %2579 = vtanh.f32 %v1197_v26  ;;  %v1200_v15 = vadd.f32 %v1199_v10, %v911_v9  ;;  %v3348_v14 = vadd.f32 -1.0, %v1589_v34  ;;  %v3354_v10 = vadd.f32 %v3216_v36, %v3122_v62 }
 0x161   :  { %v2570_v27 = vpop.eup %2569  ;;  %2581 = vtanh.f32 %v1208_v18  ;;  %v3362_v18 = vmul.f32 2.0, %v1527_v13  ;;  %v3366_v34 = vadd.f32 %v3216_v36, %v3126_v2  ;;  %v924_v62 = vadd.f32 %v3216_v36, %v3148_v25 }
 0x162   :  { %v2572_v26 = vpop.eup %2571  ;;  %3982 = vst [vmem:[#allocation15_spill] sm:$0xff] %v3354_v10  ;;  %v1693_v60 = vadd.f32 1.0, %v2570_v27  ;;  %2583 = vtanh.f32 %v1200_v15  ;;  %v935_v2 = vadd.f32 %v3216_v36, %v3160_v37  ;;  %v940_v10 = vadd.f32 %v3216_v36, %v3164_v41 }
 0x163   :  { %v2574_v12 = vpop.eup %2573  ;;  %v1691_v58 = vadd.f32 1.0, %v2572_v26 }
 0x164   :  { %v2576_v30 = vpop.eup %2575  ;;  %v1757_v54 = vmul.f32 0.5, %v1693_v60  ;;  %v1694_v22 = vadd.f32 1.0, %v2574_v12  ;;  %v3370_v55 = vpop.f32.mrb[40].mxu0 }
 0x165   :  { %v2330_v4 = vpop.f32.mrb[40].mxu1  ;;  %v1755_v9 = vmul.f32 0.5, %v1691_v58  ;;  %v1692_v20 = vadd.f32 1.0, %v2576_v30  ;;  %v973_v15 = vpop.f32.mrb[41].mxu0 }
 0x166   :  { %v1221_v31 = vadd.f32 %v2330_v4, %v932_v17  ;;  %v1212_v13 = vpop.f32.mrb[41].mxu1  ;;  %v1821_v27 = vsub.f32 %v3221_v43, %v1757_v54  ;;  %v1758_v26 = vmul.f32 0.5, %v1694_v22  ;;  %v3377_v60 = vpop.f32.mrb[42].mxu0 }
 0x167   :  { %v1213_v25 = vadd.f32 %v1212_v13, %v924_v62  ;;  %v2331_v12 = vpop.f32.mrb[42].mxu1  ;;  %v1819_v29 = vsub.f32 %v3223_v44, %v1755_v9  ;;  %v1756_v58 = vmul.f32 0.5, %v1692_v20  ;;  %v976_v17 = vpop.f32.mrb[43].mxu0  ;;  %v943_v62 = vadd.f32 %v3216_v36, %v3168_v45 }
 0x168   :  { %2585 = vtanh.f32 %v1221_v31  ;;  %v1215_v30 = vpop.f32.mrb[43].mxu1  ;;  %v1885_v4 = vmax.f32 %v1821_v27, 0.0  ;;  %v1822_v15 = vsub.f32 %v3225_v47, %v1758_v26  ;;  %v1224_v37 = vadd.f32 %v2331_v12, %v935_v2  ;;  %v1529_v12 = vld [vmem:[%s3966_s3 + $0xf0] sm:$0xff] }
 0x169   :  { %2587 = vtanh.f32 %v1213_v25  ;;  %v2578_v43 = vpop.eup %2577  ;;  %v1883_v54 = vmax.f32 %v1819_v29, 0.0  ;;  %v1820_v22 = vsub.f32 %v3227_v48, %v1756_v58  ;;  %v1216_v13 = vadd.f32 %v1215_v30, %v927_v33 }
 0x16a   :  { %v2580_v41 = vpop.eup %2579  ;;  %v1949_v46 = vmin.f32 %v1885_v4, 1.0  ;;  %v1886_v44 = vmax.f32 %v1822_v15, 0.0  ;;  %v1697_v9 = vadd.f32 1.0, %v2578_v43  ;;  %2589 = vtanh.f32 %v1224_v37 }
 0x16b   :  { %v2582_v20 = vpop.eup %2581  ;;  %v1947_v31 = vmin.f32 %v1883_v54, 1.0  ;;  %v1884_v27 = vmax.f32 %v1820_v22, 0.0  ;;  %v1695_v17 = vadd.f32 1.0, %v2580_v41  ;;  %2591 = vtanh.f32 %v1216_v13 }
 0x16c   :  { %v2584_v47 = vpop.eup %2583  ;;  %v948_v2 = vadd.f32 %v3216_v36, %v3196_v59  ;;  %2013 = vst [vmem:[%s3968_s4 + $0x10] sm:$0xff] %v1949_v46  ;;  %v1950_v45 = vmin.f32 %v1886_v44, 1.0  ;;  %v1761_v48 = vmul.f32 0.5, %v1697_v9  ;;  %v1698_v33 = vadd.f32 1.0, %v2582_v20  ;;  %v3391_v26 = vpop.f32.mrb[44].mxu0 }
 0x16d   :  { %v2334_v25 = vpop.f32.mrb[44].mxu1  ;;  %v951_v29 = vadd.f32 %v3216_v36, %v3209_v16  ;;  %2011 = vst [vmem:[%s3968_s4] sm:$0xff] %v1947_v31  ;;  %v1948_v59 = vmin.f32 %v1884_v27, 1.0  ;;  %v1759_v58 = vmul.f32 0.5, %v1695_v17  ;;  %v1696_v46 = vadd.f32 1.0, %v2584_v47  ;;  %v981_v30 = vpop.f32.mrb[45].mxu0 }
 0x16e   :  { %v1228_v4 = vpop.f32.mrb[45].mxu1  ;;  %2014 = vst [vmem:[%s3968_s4 + $0x18] sm:$0xff] %v1950_v45  ;;  %v1825_v15 = vsub.f32 %v3232_v50, %v1761_v48  ;;  %v1762_v37 = vmul.f32 0.5, %v1698_v33  ;;  %v1237_v43 = vadd.f32 %v2334_v25, %v948_v2  ;;  %v3405_v22 = vpop.f32.mrb[46].mxu0  ;;  %v3411_v31 = vmul.f32 2.0, %v1529_v12 }
 0x16f   :  { %v1229_v54 = vadd.f32 %v1228_v4, %v940_v10  ;;  %v2335_v16 = vpop.f32.mrb[46].mxu1  ;;  %2012 = vst [vmem:[%s3968_s4 + $0x8] sm:$0xff] %v1948_v59  ;;  %v1823_v13 = vsub.f32 %v3234_v51, %v1759_v58  ;;  %v1760_v41 = vmul.f32 0.5, %v1696_v46  ;;  %v984_v9 = vpop.f32.mrb[47].mxu0  ;;  %v956_v47 = vadd.f32 %v3216_v36, %v3260_v11 }
 0x170   :  { %v1240_v44 = vadd.f32 %v2335_v16, %v951_v29  ;;  %v1231_v20 = vpop.f32.mrb[47].mxu1  ;;  %v1889_v27 = vmax.f32 %v1825_v15, 0.0  ;;  %v1826_v50 = vsub.f32 %v3236_v52, %v1762_v37  ;;  %2593 = vtanh.f32 %v1237_v43 }
 0x171   :  { %v1232_v10 = vadd.f32 %v1231_v20, %v943_v62  ;;  %v1887_v2 = vmax.f32 %v1823_v13, 0.0  ;;  %v1824_v45 = vsub.f32 %v3238_v53, %v1760_v41  ;;  %2595 = vtanh.f32 %v1229_v54 }
 0x172   :  { %v2586_v17 = vpop.eup %2585  ;;  %v1953_v48 = vmin.f32 %v1889_v27, 1.0  ;;  %v1890_v33 = vmax.f32 %v1826_v50, 0.0  ;;  %2597 = vtanh.f32 %v1240_v44  ;;  %v959_v62 = vadd.f32 %v3216_v36, %v3277_v49 }
 0x173   :  { %v2588_v51 = vpop.eup %2587  ;;  %v1701_v25 = vadd.f32 1.0, %v2586_v17  ;;  %v1951_v12 = vmin.f32 %v1887_v2, 1.0  ;;  %v1888_v29 = vmax.f32 %v1824_v45, 0.0  ;;  %2599 = vtanh.f32 %v1232_v10 }
 0x174   :  { %v1699_v59 = vadd.f32 1.0, %v2588_v51  ;;  %v2590_v52 = vpop.eup %2589  ;;  %v964_v11 = vadd.f32 %v3216_v36, %v3320_v39  ;;  %2017 = vst [vmem:[%s3968_s4 + $0x30] sm:$0xff] %v1953_v48  ;;  %v1954_v53 = vmin.f32 %v1890_v33, 1.0  ;;  %v3424_v46 = vpop.f32.mrb[48].mxu0  ;;  %v967_v49 = vadd.f32 %v3216_v36, %v3331_v61  ;;  %v1528_v61 = vld [vmem:[%s3966_s3 + $0xe8] sm:$0xff] }
 0x175   :  { %v1765_v58 = vmul.f32 0.5, %v1701_v25  ;;  %v2338_v30 = vpop.f32.mrb[48].mxu1  ;;  %v2592_v4 = vpop.eup %2591  ;;  %2015 = vst [vmem:[%s3968_s4 + $0x20] sm:$0xff] %v1951_v12  ;;  %v1952_v15 = vmin.f32 %v1888_v29, 1.0  ;;  %v1702_v39 = vadd.f32 1.0, %v2590_v52  ;;  %v3445_v2 = vadd.f32 -1.0, %v3362_v18 }
 0x176   :  { %v1763_v37 = vmul.f32 0.5, %v1699_v59  ;;  %v989_v43 = vpop.f32.mrb[49].mxu0  ;;  %v1244_v54 = vpop.f32.mrb[49].mxu1  ;;  %2018 = vst [vmem:[%s3968_s4 + $0x38] sm:$0xff] %v1954_v53  ;;  %v1700_v13 = vadd.f32 1.0, %v2592_v4  ;;  %v1253_v41 = vadd.f32 %v2338_v30, %v964_v11  ;;  %v3448_v25 = vmul.f32 2.0, %v1528_v61 }
 0x177   :  { %v1829_v16 = vsub.f32 %v3248_v63, %v1765_v58  ;;  %v1245_v44 = vadd.f32 %v1244_v54, %v956_v47  ;;  %v3435_v9 = vpop.f32.mrb[50].mxu0  ;;  %v2339_v20 = vpop.f32.mrb[50].mxu1  ;;  %2016 = vst [vmem:[%s3968_s4 + $0x28] sm:$0xff] %v1952_v15  ;;  %v1766_v50 = vmul.f32 0.5, %v1702_v39  ;;  %v975_v61 = vadd.f32 %v3216_v36, %v3377_v60 }
 0x178   :  { %v1827_v27 = vsub.f32 %v3250_v0, %v1763_v37  ;;  %v1256_v10 = vadd.f32 %v2339_v20, %v967_v49  ;;  %v992_v17 = vpop.f32.mrb[51].mxu0  ;;  %v1247_v63 = vpop.f32.mrb[51].mxu1  ;;  %v1764_v45 = vmul.f32 0.5, %v1700_v13  ;;  %2601 = vtanh.f32 %v1253_v41 }
 0x179   :  { %v1893_v47 = vmax.f32 %v1829_v16, 0.0  ;;  %v1248_v51 = vadd.f32 %v1247_v63, %v959_v62  ;;  %v1830_v33 = vsub.f32 %v3262_v1, %v1766_v50  ;;  %2603 = vtanh.f32 %v1245_v44 }
 0x17a   :  { %v1891_v48 = vmax.f32 %v1827_v27, 0.0  ;;  %v2594_v12 = vpop.eup %2593  ;;  %v3452_v0 = vadd.f32 %v3216_v36, %v3130_v6  ;;  %v1828_v59 = vsub.f32 %v3282_v38, %v1764_v45  ;;  %2605 = vtanh.f32 %v1256_v10 }
 0x17b   :  { %v1957_v29 = vmin.f32 %v1893_v47, 1.0  ;;  %v2596_v18 = vpop.eup %2595  ;;  %v1894_v11 = vmax.f32 %v1830_v33, 0.0  ;;  %v1705_v53 = vadd.f32 1.0, %v2594_v12  ;;  %2607 = vtanh.f32 %v1248_v51 }
 0x17c   :  { %v1955_v52 = vmin.f32 %v1891_v48, 1.0  ;;  %v2598_v62 = vpop.eup %2597  ;;  %v972_v1 = vadd.f32 %v3216_v36, %v3370_v55  ;;  %v1892_v58 = vmax.f32 %v1828_v59, 0.0  ;;  %v980_v6 = vadd.f32 %v3216_v36, %v3391_v26  ;;  %v995_v38 = vpop.f32.mrb[52].mxu0 }
 0x17d   :  { %2021 = vst [vmem:[%s3968_s4 + $0x50] sm:$0xff] %v1957_v29  ;;  %v1703_v30 = vadd.f32 1.0, %v2596_v18  ;;  %v2342_v4 = vpop.f32.mrb[52].mxu1  ;;  %v2600_v49 = vpop.eup %2599  ;;  %v1958_v15 = vmin.f32 %v1894_v11, 1.0  ;;  %v1769_v37 = vmul.f32 0.5, %v1705_v53  ;;  %v983_v55 = vadd.f32 %v3216_v36, %v3405_v22 }
 0x17e   :  { %2019 = vst [vmem:[%s3968_s4 + $0x40] sm:$0xff] %v1955_v52  ;;  %v1706_v39 = vadd.f32 1.0, %v2598_v62  ;;  %v997_v43 = vpop.f32.mrb[53].mxu0  ;;  %v1260_v54 = vpop.f32.mrb[53].mxu1  ;;  %v1956_v16 = vmin.f32 %v1892_v58, 1.0  ;;  %v1704_v41 = vadd.f32 1.0, %v2600_v49  ;;  %v1269_v26 = vadd.f32 %v2342_v4, %v980_v6 }
 0x17f   :  { %v1767_v13 = vmul.f32 0.5, %v1703_v30  ;;  %v998_v44 = vpop.f32.mrb[54].mxu0  ;;  %v2343_v20 = vpop.f32.mrb[54].mxu1  ;;  %2022 = vst [vmem:[%s3968_s4 + $0x58] sm:$0xff] %v1958_v15  ;;  %v1833_v27 = vsub.f32 %v3287_v7, %v1769_v37  ;;  %v1261_v22 = vadd.f32 %v1260_v54, %v972_v1  ;;  %v988_v29 = vadd.f32 %v3216_v36, %v3424_v46 }
 0x180   :  { %v1770_v50 = vmul.f32 0.5, %v1706_v39  ;;  %v1000_v10 = vpop.f32.mrb[55].mxu0  ;;  %v1263_v17 = vpop.f32.mrb[55].mxu1  ;;  %2020 = vst [vmem:[%s3968_s4 + $0x48] sm:$0xff] %v1956_v16  ;;  %v1768_v47 = vmul.f32 0.5, %v1704_v41  ;;  %2609 = vtanh.f32 %v1269_v26  ;;  %v1272_v45 = vadd.f32 %v2343_v20, %v983_v55 }
 0x181   :  { %v1831_v63 = vsub.f32 %v3289_v19, %v1767_v13  ;;  %v1897_v60 = vmax.f32 %v1833_v27, 0.0  ;;  %2611 = vtanh.f32 %v1261_v22  ;;  %v1264_v48 = vadd.f32 %v1263_v17, %v975_v61 }
 0x182   :  { %v1834_v51 = vsub.f32 %v3291_v8, %v1770_v50  ;;  %v2602_v33 = vpop.eup %2601  ;;  %v1832_v12 = vsub.f32 %v3299_v23, %v1768_v47  ;;  %2613 = vtanh.f32 %v1272_v45  ;;  %v996_v8 = vadd.f32 %v3216_v36, %v995_v38 }
 0x183   :  { %v1895_v7 = vmax.f32 %v1831_v63, 0.0  ;;  %v2604_v59 = vpop.eup %2603  ;;  %v1961_v18 = vmin.f32 %v1897_v60, 1.0  ;;  %v1709_v19 = vadd.f32 1.0, %v2602_v33  ;;  %2615 = vtanh.f32 %v1264_v48 }
 0x184   :  { %v1898_v52 = vmax.f32 %v1834_v51, 0.0  ;;  %v2606_v11 = vpop.eup %2605  ;;  %v1896_v62 = vmax.f32 %v1832_v12, 0.0  ;;  %v1707_v1 = vadd.f32 1.0, %v2604_v59  ;;  %v1003_v58 = vpop.f32.mrb[56].mxu0  ;;  %v999_v49 = vadd.f32 %v3216_v36, %v998_v44 }
 0x185   :  { %v1959_v53 = vmin.f32 %v1895_v7, 1.0  ;;  %v2346_v6 = vpop.f32.mrb[56].mxu1  ;;  %v2608_v30 = vpop.eup %2607  ;;  %2025 = vst [vmem:[%s3968_s4 + $0x70] sm:$0xff] %v1961_v18  ;;  %v1773_v46 = vmul.f32 0.5, %v1709_v19  ;;  %v1710_v4 = vadd.f32 1.0, %v2606_v11  ;;  %v991_v41 = vadd.f32 %v3216_v36, %v3435_v9 }
 0x186   :  { %v1962_v23 = vmin.f32 %v1898_v52, 1.0  ;;  %v1005_v15 = vpop.f32.mrb[57].mxu0  ;;  %v1276_v37 = vpop.f32.mrb[57].mxu1  ;;  %v1960_v55 = vmin.f32 %v1896_v62, 1.0  ;;  %v1771_v38 = vmul.f32 0.5, %v1707_v1  ;;  %v1708_v39 = vadd.f32 1.0, %v2608_v30 }
 0x187   :  { %2023 = vst [vmem:[%s3968_s4 + $0x60] sm:$0xff] %v1959_v53  ;;  %v1285_v43 = vadd.f32 %v2346_v6, %v996_v8  ;;  %v1006_v54 = vpop.f32.mrb[58].mxu0  ;;  %v2347_v16 = vpop.f32.mrb[58].mxu1  ;;  %v1837_v13 = vsub.f32 %v3301_v24, %v1773_v46  ;;  %v1774_v26 = vmul.f32 0.5, %v1710_v4  ;;  %v1277_v44 = vadd.f32 %v1276_v37, %v988_v29 }
 0x188   :  { %2026 = vst [vmem:[%s3968_s4 + $0x78] sm:$0xff] %v1962_v23  ;;  %v1008_v20 = vpop.f32.mrb[59].mxu0  ;;  %v1279_v61 = vpop.f32.mrb[59].mxu1  ;;  %2024 = vst [vmem:[%s3968_s4 + $0x68] sm:$0xff] %v1960_v55  ;;  %v1835_v27 = vsub.f32 %v3311_v32, %v1771_v38  ;;  %v1772_v50 = vmul.f32 0.5, %v1708_v39  ;;  %v1288_v22 = vadd.f32 %v2347_v16, %v999_v49  ;;  %v1004_v45 = vadd.f32 %v3216_v36, %v1003_v58 }
 0x189   :  { %2617 = vtanh.f32 %v1285_v43  ;;  %v1901_v10 = vmax.f32 %v1837_v13, 0.0  ;;  %v1838_v17 = vsub.f32 %v3313_v35, %v1774_v26  ;;  %v1280_v24 = vadd.f32 %v1279_v61, %v991_v41  ;;  %v1530_v41 = vld [vmem:[%s3966_s3 + $0xf8] sm:$0xff] }
 0x18a   :  { %2619 = vtanh.f32 %v1277_v44  ;;  %v2610_v63 = vpop.eup %2609  ;;  %v1899_v9 = vmax.f32 %v1835_v27, 0.0  ;;  %v1836_v47 = vsub.f32 %v3322_v5, %v1772_v50  ;;  %v1007_v35 = vadd.f32 %v3216_v36, %v1006_v54 }
 0x18b   :  { %2621 = vtanh.f32 %v1288_v22  ;;  %v2612_v60 = vpop.eup %2611  ;;  %v1965_v51 = vmin.f32 %v1901_v10, 1.0  ;;  %v1902_v48 = vmax.f32 %v1838_v17, 0.0  ;;  %v1713_v33 = vadd.f32 1.0, %v2610_v63 }
 0x18c   :  { %2623 = vtanh.f32 %v1280_v24  ;;  %v2614_v32 = vpop.eup %2613  ;;  %v1963_v7 = vmin.f32 %v1899_v9, 1.0  ;;  %v1900_v12 = vmax.f32 %v1836_v47, 0.0  ;;  %v1711_v29 = vadd.f32 1.0, %v2612_v60  ;;  %v1011_v59 = vpop.f32.mrb[60].mxu0 }
 0x18d   :  { %v2350_v18 = vpop.f32.mrb[60].mxu1  ;;  %v2616_v52 = vpop.eup %2615  ;;  %2029 = vst [vmem:[%s3968_s4 + $0x90] sm:$0xff] %v1965_v51  ;;  %v1966_v5 = vmin.f32 %v1902_v48, 1.0  ;;  %v1777_v19 = vmul.f32 0.5, %v1713_v33  ;;  %v1714_v11 = vadd.f32 1.0, %v2614_v32  ;;  %v1012_v53 = vadd.f32 %v3216_v36, %v1011_v59 }
 0x18e   :  { %v1013_v62 = vpop.f32.mrb[61].mxu0  ;;  %v1292_v1 = vpop.f32.mrb[61].mxu1  ;;  %2027 = vst [vmem:[%s3968_s4 + $0x80] sm:$0xff] %v1963_v7  ;;  %v1964_v8 = vmin.f32 %v1900_v12, 1.0  ;;  %v1775_v58 = vmul.f32 0.5, %v1711_v29  ;;  %v1712_v6 = vadd.f32 1.0, %v2616_v52 }
 0x18f   :  { %v1293_v30 = vadd.f32 %v1292_v1, %v1004_v45  ;;  %v1014_v23 = vpop.f32.mrb[62].mxu0  ;;  %v2351_v46 = vpop.f32.mrb[62].mxu1  ;;  %2030 = vst [vmem:[%s3968_s4 + $0x98] sm:$0xff] %v1966_v5  ;;  %v1841_v4 = vsub.f32 %v3333_v3, %v1777_v19  ;;  %v1778_v49 = vmul.f32 0.5, %v1714_v11  ;;  %v1301_v15 = vadd.f32 %v2350_v18, %v1012_v53  ;;  %v1531_v19 = vld [vmem:[%s3966_s3 + $0x100] sm:$0xff] }
 0x190   :  { %v1015_v37 = vadd.f32 %v3216_v36, %v1014_v23  ;;  %v1016_v55 = vpop.f32.mrb[63].mxu0  ;;  %v1295_v38 = vpop.f32.mrb[63].mxu1  ;;  %2028 = vst [vmem:[%s3968_s4 + $0x88] sm:$0xff] %v1964_v8  ;;  %v1839_v39 = vsub.f32 %v3335_v21, %v1775_v58  ;;  %v1776_v43 = vmul.f32 0.5, %v1712_v6  ;;  %v3525_v61 = vadd.f32 -1.0, %v3411_v31  ;;  %v3983_v62 = vld [vmem:[#allocation2_spill] sm:$0xff] }
 0x191   :  { %2625 = vtanh.f32 %v1293_v30  ;;  %v1296_v54 = vadd.f32 %v1295_v38, %v1007_v35  ;;  %v1905_v16 = vmax.f32 %v1841_v4, 0.0  ;;  %v1842_v13 = vsub.f32 %v3337_v57, %v1778_v49  ;;  %v3984_v49 = vld [vmem:[#allocation3_spill] sm:$0xff] }
 0x192   :  { %2627 = vtanh.f32 %v1301_v15  ;;  %v1304_v3 = vadd.f32 %v2351_v46, %v1015_v37  ;;  %v1903_v44 = vmax.f32 %v1839_v39, 0.0  ;;  %v1840_v20 = vsub.f32 %v3339_v40, %v1776_v43  ;;  %v1532_v46 = vld [vmem:[%s3966_s3 + $0x108] sm:$0xff] }
 0x193   :  { %v2618_v26 = vpop.eup %2617  ;;  %2629 = vtanh.f32 %v1296_v54  ;;  %v1969_v27 = vmin.f32 %v1905_v16, 1.0  ;;  %v1906_v50 = vmax.f32 %v1842_v13, 0.0  ;;  %v1594_v63 = vmul.f32 2.0, %v1530_v41 }
 0x194   :  { %v2620_v21 = vpop.eup %2619  ;;  %v1717_v22 = vadd.f32 1.0, %v2618_v26  ;;  %2631 = vtanh.f32 %v1304_v3  ;;  %v1967_v10 = vmin.f32 %v1903_v44, 1.0  ;;  %v1904_v17 = vmax.f32 %v1840_v20, 0.0  ;;  %v1019_v9 = vpop.f32.mrb[64].mxu0 }
 0x195   :  { %v2622_v57 = vpop.eup %2621  ;;  %v1715_v24 = vadd.f32 1.0, %v2620_v21  ;;  %v3527_v47 = vpop.f32.mrb[64].mxu1  ;;  %2033 = vst [vmem:[%s3968_s4 + $0xb0] sm:$0xff] %v1969_v27  ;;  %v1970_v40 = vmin.f32 %v1906_v50, 1.0  ;;  %v1020_v51 = vadd.f32 %v3216_v36, %v1019_v9  ;;  %v3537_v29 = vadd.f32 -1.0, %v3448_v25 }
 0x196   :  { %v2624_v45 = vpop.eup %2623  ;;  %v1781_v31 = vmul.f32 0.5, %v1717_v22  ;;  %v1718_v60 = vadd.f32 1.0, %v2622_v57  ;;  %v1021_v48 = vpop.f32.mrb[65].mxu0  ;;  %2031 = vst [vmem:[%s3968_s4 + $0xa0] sm:$0xff] %v1967_v10  ;;  %v1968_v32 = vmin.f32 %v1904_v17, 1.0  ;;  %v3551_v1 = vadd.f32 %v3216_v36, %v3983_v62  ;;  %v1535_v62 = vld [vmem:[%s3966_s3 + $0x120] sm:$0xff] }
 0x197   :  { %v1308_v33 = vpop.f32.mrb[65].mxu1  ;;  %v1779_v7 = vmul.f32 0.5, %v1715_v24  ;;  %v1716_v12 = vadd.f32 1.0, %v2624_v45  ;;  %v1022_v35 = vpop.f32.mrb[66].mxu0  ;;  %2034 = vst [vmem:[%s3968_s4 + $0xb8] sm:$0xff] %v1970_v40  ;;  %v3557_v58 = vadd.f32 -1.0, %v1594_v63  ;;  %v3565_v15 = vadd.f32 %v3216_v36, %v3984_v49 }
 0x198   :  { %v3539_v59 = vpop.f32.mrb[66].mxu1  ;;  %v1845_v18 = vsub.f32 %v3348_v14, %v1781_v31  ;;  %v1782_v52 = vmul.f32 0.5, %v1718_v60  ;;  %v1309_v5 = vadd.f32 %v1308_v33, %v1020_v51  ;;  %v1023_v11 = vadd.f32 %v3216_v36, %v1022_v35  ;;  %v1024_v53 = vpop.f32.mrb[67].mxu0  ;;  %2032 = vst [vmem:[%s3968_s4 + $0xa8] sm:$0xff] %v1968_v32 }
 0x199   :  { %v1311_v25 = vpop.f32.mrb[67].mxu1  ;;  %v1843_v14 = vsub.f32 %v3350_v42, %v1779_v7  ;;  %v1780_v8 = vmul.f32 0.5, %v1716_v12  ;;  %v1595_v55 = vmul.f32 2.0, %v1531_v19  ;;  %v1596_v26 = vmul.f32 2.0, %v1532_v46  ;;  %v3985_v19 = vld [vmem:[#allocation4_spill] sm:$0xff] }
 0x19a   :  { %v1909_v6 = vmax.f32 %v1845_v18, 0.0  ;;  %v1846_v30 = vsub.f32 %v3356_v56, %v1782_v52  ;;  %2633 = vtanh.f32 %v1309_v5  ;;  %v1312_v23 = vadd.f32 %v1311_v25, %v1023_v11  ;;  %v1533_v56 = vld [vmem:[%s3966_s3 + $0x110] sm:$0xff] }
 0x19b   :  { %v2626_v4 = vpop.eup %2625  ;;  %v1907_v37 = vmax.f32 %v1843_v14, 0.0  ;;  %v1844_v42 = vsub.f32 %v3360_v28, %v1780_v8  ;;  %v1597_v9 = vmul.f32 2.0, %v1533_v56  ;;  %v2232_v35 = vadd.f32 -1.0, %v1595_v55  ;;  %v1538_v55 = vld [vmem:[%s3966_s3 + $0x138] sm:$0xff] }
 0x19c   :  { %v2628_v38 = vpop.eup %2627  ;;  %v1973_v39 = vmin.f32 %v1909_v6, 1.0  ;;  %v1910_v43 = vmax.f32 %v1846_v30, 0.0  ;;  %v1719_v54 = vadd.f32 1.0, %v2626_v4  ;;  %2635 = vtanh.f32 %v1312_v23  ;;  %v1027_v44 = vpop.f32.mrb[68].mxu0  ;;  %v1537_v30 = vld [vmem:[%s3966_s3 + $0x130] sm:$0xff] }
 0x19d   :  { %v2630_v16 = vpop.eup %2629  ;;  %v1971_v13 = vmin.f32 %v1907_v37, 1.0  ;;  %v1908_v3 = vmax.f32 %v1844_v42, 0.0  ;;  %v1721_v41 = vadd.f32 1.0, %v2628_v38  ;;  %v3571_v20 = vpop.f32.mrb[68].mxu1  ;;  %v1028_v22 = vadd.f32 %v3216_v36, %v1027_v44 }
 0x19e   :  { %v2632_v21 = vpop.eup %2631  ;;  %2037 = vst [vmem:[%s3968_s4 + $0xd0] sm:$0xff] %v1973_v39  ;;  %v1974_v28 = vmin.f32 %v1910_v43, 1.0  ;;  %v1783_v27 = vmul.f32 0.5, %v1719_v54  ;;  %v1720_v50 = vadd.f32 1.0, %v2630_v16  ;;  %v1029_v57 = vpop.f32.mrb[69].mxu0  ;;  %v3592_v18 = vadd.f32 -1.0, %v1596_v26 }
 0x19f   :  { %v1324_v10 = vpop.f32.mrb[69].mxu1  ;;  %2035 = vst [vmem:[%s3968_s4 + $0xc0] sm:$0xff] %v1971_v13  ;;  %v1972_v17 = vmin.f32 %v1908_v3, 1.0  ;;  %v1785_v24 = vmul.f32 0.5, %v1721_v41  ;;  %v1722_v63 = vadd.f32 1.0, %v2632_v21  ;;  %v1030_v45 = vpop.f32.mrb[70].mxu0  ;;  %v1317_v51 = vadd.f32 %v3527_v47, %v1028_v22 }
 0x1a0   :  { %v3580_v40 = vpop.f32.mrb[70].mxu1  ;;  %2038 = vst [vmem:[%s3968_s4 + $0xd8] sm:$0xff] %v1974_v28  ;;  %v1847_v31 = vsub.f32 %v3445_v2, %v1783_v27  ;;  %v1784_v60 = vmul.f32 0.5, %v1720_v50  ;;  %v1031_v48 = vadd.f32 %v3216_v36, %v1030_v45  ;;  %v1032_v33 = vpop.f32.mrb[71].mxu0  ;;  %v1534_v2 = vld [vmem:[%s3966_s3 + $0x118] sm:$0xff]  ;;  %v3601_v11 = vadd.f32 %v3216_v36, %v3985_v19  ;;  %v3988_v45 = vld [vmem:[#allocation7_spill] sm:$0xff] }
 0x1a1   :  { %v1327_v32 = vpop.f32.mrb[71].mxu1  ;;  %2036 = vst [vmem:[%s3968_s4 + $0xc8] sm:$0xff] %v1972_v17  ;;  %v1849_v7 = vsub.f32 %v3525_v61, %v1785_v24  ;;  %v1786_v12 = vmul.f32 0.5, %v1722_v63  ;;  %2637 = vtanh.f32 %v1317_v51  ;;  %v3604_v25 = vadd.f32 -1.0, %v1597_v9  ;;  %v3987_v63 = vld [vmem:[#allocation6_spill] sm:$0xff]  ;;  %v1549_v51 = vld [vmem:[%s3966_s3 + $0x190] sm:$0xff] }
 0x1a2   :  { %v1911_v52 = vmax.f32 %v1847_v31, 0.0  ;;  %v1848_v47 = vsub.f32 %v3537_v29, %v1784_v60  ;;  %v1320_v5 = vadd.f32 %v3539_v59, %v1031_v48  ;;  %v1536_v29 = vld [vmem:[%s3966_s3 + $0x128] sm:$0xff]  ;;  %v1598_v6 = vmul.f32 2.0, %v1534_v2  ;;  %v1547_v48 = vld [vmem:[%s3966_s3 + $0x180] sm:$0xff]  ;;  %v3989_v2 = vld [vmem:[#allocation8_spill] sm:$0xff] }
 0x1a3   :  { %v1913_v53 = vmax.f32 %v1849_v7, 0.0  ;;  %v1850_v61 = vsub.f32 %v3557_v58, %v1786_v12  ;;  %v3986_v58 = vld [vmem:[#allocation5_spill] sm:$0xff]  ;;  %v1599_v54 = vmul.f32 2.0, %v1535_v62  ;;  %v1600_v13 = vmul.f32 2.0, %v1536_v29  ;;  %v1539_v19 = vld [vmem:[%s3966_s3 + $0x140] sm:$0xff] }
 0x1a4   :  { %v2634_v14 = vpop.eup %2633  ;;  %v1975_v8 = vmin.f32 %v1911_v52, 1.0  ;;  %v1912_v59 = vmax.f32 %v1848_v47, 0.0  ;;  %2639 = vtanh.f32 %v1320_v5  ;;  %v3617_v23 = vadd.f32 %v3216_v36, %v3986_v58  ;;  %v1035_v37 = vpop.f32.mrb[72].mxu0  ;;  %v3630_v36 = vld [vmem:[%s3967_s2] ss:$0 sm:$0xff] }
 0x1a5   :  { %v1977_v46 = vmin.f32 %v1913_v53, 1.0  ;;  %v1914_v4 = vmax.f32 %v1850_v61, 0.0  ;;  %v1723_v49 = vadd.f32 1.0, %v2634_v14  ;;  %v3619_v42 = vpop.f32.mrb[72].mxu1  ;;  %v1036_v43 = vadd.f32 %v3630_v36, %v1035_v37  ;;  %v1037_v56 = vpop.f32.mrb[73].mxu0  ;;  %v1540_v53 = vld [vmem:[%s3966_s3 + $0x148] sm:$0xff] }
 0x1a6   :  { %v2636_v38 = vpop.eup %2635  ;;  %2039 = vst [vmem:[%s3968_s4 + $0xe0] sm:$0xff] %v1975_v8  ;;  %v1976_v39 = vmin.f32 %v1912_v59, 1.0  ;;  %v3633_v16 = vpop.f32.mrb[73].mxu1  ;;  %v1601_v28 = vmul.f32 2.0, %v1537_v30  ;;  %v3643_v27 = vadd.f32 -1.0, %v1598_v6  ;;  %v1602_v24 = vmul.f32 2.0, %v1538_v55 }
 0x1a7   :  { %2041 = vst [vmem:[%s3968_s4 + $0xf0] sm:$0xff] %v1977_v46  ;;  %v1978_v3 = vmin.f32 %v1914_v4, 1.0  ;;  %v1787_v41 = vmul.f32 0.5, %v1723_v49  ;;  %v1724_v26 = vadd.f32 1.0, %v2636_v38  ;;  %v1038_v44 = vpop.f32.mrb[74].mxu0  ;;  %v3638_v21 = vpop.f32.mrb[74].mxu1  ;;  %v1325_v50 = vadd.f32 %v1324_v10, %v1036_v43 }
 0x1a8   :  { %2040 = vst [vmem:[%s3968_s4 + $0xe8] sm:$0xff] %v1976_v39  ;;  %v1039_v22 = vadd.f32 %v3630_v36, %v1038_v44  ;;  %v1040_v57 = vpop.f32.mrb[75].mxu0  ;;  %v3646_v17 = vpop.f32.mrb[75].mxu1  ;;  %v3650_v9 = vadd.f32 %v3630_v36, %v3987_v63  ;;  %v3654_v31 = vadd.f32 %v3630_v36, %v3988_v45  ;;  %v3665_v33 = vadd.f32 -1.0, %v1599_v54  ;;  %v3990_v14 = vld [vmem:[#allocation9_spill] sm:$0xff]  ;;  %v1548_v4 = vld [vmem:[%s3966_s3 + $0x188] sm:$0xff] }
 0x1a9   :  { %2042 = vst [vmem:[%s3968_s4 + $0xf8] sm:$0xff] %v1978_v3  ;;  %v1851_v60 = vsub.f32 %v2232_v35, %v1787_v41  ;;  %v1788_v10 = vmul.f32 0.5, %v1724_v26  ;;  %2641 = vtanh.f32 %v1325_v50  ;;  %v3667_v12 = vadd.f32 -1.0, %v1600_v13  ;;  %v3991_v56 = vld [vmem:[#allocation10_spill] sm:$0xff]  ;;  %v1553_v50 = vld [vmem:[%s3966_s3 + $0x1b0] sm:$0xff] }
 0x1aa   :  { %v1328_v7 = vadd.f32 %v1327_v32, %v1039_v22  ;;  %v3671_v52 = vadd.f32 %v3630_v36, %v3989_v2  ;;  %v3674_v5 = vadd.f32 -1.0, %v1601_v28  ;;  %v1550_v32 = vld [vmem:[%s3966_s3 + $0x198] sm:$0xff]  ;;  %v3685_v62 = vadd.f32 -1.0, %v1602_v24  ;;  %v1551_v2 = vld [vmem:[%s3966_s3 + $0x1a0] sm:$0xff] }
 0x1ab   :  { %v1915_v35 = vmax.f32 %v1851_v60, 0.0  ;;  %v1852_v47 = vsub.f32 %v3592_v18, %v1788_v10  ;;  %v2638_v61 = vpop.eup %2637  ;;  %v1613_v29 = vmul.f32 2.0, %v1549_v51  ;;  %v1611_v18 = vmul.f32 2.0, %v1547_v48  ;;  %v3992_v10 = vld [vmem:[#allocation11_spill] sm:$0xff] }
 0x1ac   :  { %2643 = vtanh.f32 %v1328_v7  ;;  %v3689_v8 = vadd.f32 %v3630_v36, %v3990_v14  ;;  %v1725_v30 = vadd.f32 1.0, %v2638_v61  ;;  %v1043_v58 = vpop.f32.mrb[76].mxu0  ;;  %v3691_v46 = vpop.f32.mrb[76].mxu1  ;;  %v1603_v39 = vmul.f32 2.0, %v1539_v19  ;;  %v1541_v19 = vld [vmem:[%s3966_s3 + $0x150] sm:$0xff] }
 0x1ad   :  { %v1979_v59 = vmin.f32 %v1915_v35, 1.0  ;;  %v1916_v6 = vmax.f32 %v1852_v47, 0.0  ;;  %v1044_v37 = vadd.f32 %v3630_v36, %v1043_v58  ;;  %v1045_v55 = vpop.f32.mrb[77].mxu0  ;;  %v3697_v38 = vpop.f32.mrb[77].mxu1  ;;  %v1604_v43 = vmul.f32 2.0, %v1540_v53 }
 0x1ae   :  { %v2640_v49 = vpop.eup %2639  ;;  %v1614_v54 = vmul.f32 2.0, %v1550_v32  ;;  %v3701_v13 = vadd.f32 %v3630_v36, %v3991_v56  ;;  %v1789_v41 = vmul.f32 0.5, %v1725_v30  ;;  %v1046_v44 = vpop.f32.mrb[78].mxu0  ;;  %v3715_v45 = vadd.f32 -1.0, %v1613_v29 }
 0x1af   :  { %2043 = vst [vmem:[%s3968_s4 + $0x100] sm:$0xff] %v1979_v59  ;;  %v1980_v3 = vmin.f32 %v1916_v6, 1.0  ;;  %v1726_v26 = vadd.f32 1.0, %v2640_v49  ;;  %v3706_v28 = vpop.f32.mrb[78].mxu1  ;;  %v1333_v22 = vadd.f32 %v3571_v20, %v1044_v37  ;;  %v1047_v57 = vadd.f32 %v3630_v36, %v1046_v44  ;;  %v1048_v24 = vpop.f32.mrb[79].mxu0 }
 0x1b0   :  { %v3713_v63 = vpop.f32.mrb[79].mxu1  ;;  %v1612_v60 = vmul.f32 2.0, %v1548_v4  ;;  %v3719_v51 = vadd.f32 %v3630_v36, %v3992_v10  ;;  %v1853_v48 = vsub.f32 %v3604_v25, %v1789_v41  ;;  %v3725_v20 = vadd.f32 -1.0, %v1611_v18  ;;  %v1554_v18 = vld [vmem:[%s3966_s3 + $0x1b8] sm:$0xff] }
 0x1b1   :  { %2044 = vst [vmem:[%s3968_s4 + $0x108] sm:$0xff] %v1980_v3  ;;  %v1790_v7 = vmul.f32 0.5, %v1726_v26  ;;  %2645 = vtanh.f32 %v1333_v22  ;;  %v1336_v35 = vadd.f32 %v3580_v40, %v1047_v57  ;;  %v3731_v47 = vadd.f32 -1.0, %v1603_v39  ;;  %v3993_v40 = vld [vmem:[#allocation12_spill] sm:$0xff]  ;;  %v3994_v57 = vld [vmem:[#allocation14_spill] sm:$0xff] }
 0x1b2   :  { %v1617_v53 = vmul.f32 2.0, %v1553_v50  ;;  %v1917_v32 = vmax.f32 %v1853_v48, 0.0  ;;  %v3737_v61 = vadd.f32 -1.0, %v1604_v43  ;;  %v3739_v29 = vadd.f32 -1.0, %v1614_v54 }
 0x1b3   :  { %v1854_v25 = vsub.f32 %v3643_v27, %v1790_v7  ;;  %v2642_v14 = vpop.eup %2641  ;;  %v3746_v59 = vadd.f32 %v3630_v36, %v3993_v40  ;;  %2647 = vtanh.f32 %v1336_v35  ;;  %v3748_v6 = vadd.f32 -1.0, %v1612_v60 }
 0x1b4   :  { %v1615_v30 = vmul.f32 2.0, %v1551_v2  ;;  %v1981_v58 = vmin.f32 %v1917_v32, 1.0  ;;  %v1727_v27 = vadd.f32 1.0, %v2642_v14  ;;  %v1051_v49 = vpop.f32.mrb[80].mxu0  ;;  %v2370_v37 = vpop.f32.mrb[80].mxu1  ;;  %v1605_v55 = vmul.f32 2.0, %v1541_v19 }
 0x1b5   :  { %v1918_v4 = vmax.f32 %v1854_v25, 0.0  ;;  %v1052_v43 = vadd.f32 %v3630_v36, %v1051_v49  ;;  %v1381_v54 = vadd.f32 %v2370_v37, %v3366_v34  ;;  %v1053_v56 = vpop.f32.mrb[81].mxu0  ;;  %v1372_v3 = vpop.f32.mrb[81].mxu1  ;;  %v3752_v41 = vadd.f32 -1.0, %v1617_v53  ;;  %v3995_v32 = vld [vmem:[#allocation15_spill] sm:$0xff]  ;;  %v1543_v49 = vld [vmem:[%s3966_s3 + $0x160] sm:$0xff] }
 0x1b6   :  { %v2644_v39 = vpop.eup %2643  ;;  %v1618_v26 = vmul.f32 2.0, %v1554_v18  ;;  %2045 = vst [vmem:[%s3968_s4 + $0x110] sm:$0xff] %v1981_v58  ;;  %v1791_v50 = vmul.f32 0.5, %v1727_v27  ;;  %v1373_v24 = vadd.f32 %v1372_v3, %v3994_v57  ;;  %v1054_v60 = vpop.f32.mrb[82].mxu0  ;;  %v3996_v18 = vld [vmem:[#allocation13_spill] sm:$0xff]  ;;  %v3780_v27 = vadd.f32 -1.0, %v1605_v55 }
 0x1b7   :  { %v1982_v44 = vmin.f32 %v1918_v4, 1.0  ;;  %v1728_v22 = vadd.f32 1.0, %v2644_v39  ;;  %v2371_v10 = vpop.f32.mrb[82].mxu1  ;;  %v1341_v48 = vadd.f32 %v3633_v16, %v1052_v43  ;;  %2649 = vtanh.f32 %v1381_v54  ;;  %v1056_v2 = vpop.f32.mrb[83].mxu0  ;;  %v1542_v16 = vld [vmem:[%s3966_s3 + $0x158] sm:$0xff]  ;;  %v1557_v37 = vld [vmem:[%s3966_s3 + $0x1d0] sm:$0xff] }
 0x1b8   :  { %v1055_v34 = vadd.f32 %v3630_v36, %v1054_v60  ;;  %v1384_v7 = vadd.f32 %v2371_v10, %v3452_v0  ;;  %v1375_v35 = vpop.f32.mrb[83].mxu1  ;;  %v1855_v19 = vsub.f32 %v3665_v33, %v1791_v50  ;;  %2651 = vtanh.f32 %v1373_v24  ;;  %v1552_v0 = vld [vmem:[%s3966_s3 + $0x1a8] sm:$0xff] }
 0x1b9   :  { %2046 = vst [vmem:[%s3968_s4 + $0x118] sm:$0xff] %v1982_v44  ;;  %v1792_v53 = vmul.f32 0.5, %v1728_v22  ;;  %v1376_v25 = vadd.f32 %v1375_v35, %v3995_v32  ;;  %v3774_v14 = vadd.f32 %v3630_v36, %v3996_v18  ;;  %2653 = vtanh.f32 %v1341_v48 }
 0x1ba   :  { %v1344_v40 = vadd.f32 %v3646_v17, %v1055_v34  ;;  %v3777_v33 = vadd.f32 -1.0, %v1615_v30  ;;  %v1919_v58 = vmax.f32 %v1855_v19, 0.0  ;;  %2655 = vtanh.f32 %v1384_v7 }
 0x1bb   :  { %v1856_v4 = vsub.f32 %v3667_v12, %v1792_v53  ;;  %v2646_v39 = vpop.eup %2645  ;;  %v1606_v43 = vmul.f32 2.0, %v1542_v16  ;;  %v3788_v17 = vadd.f32 -1.0, %v1618_v26  ;;  %v1616_v30 = vmul.f32 2.0, %v1552_v0 }
 0x1bc   :  { %2657 = vtanh.f32 %v1344_v40  ;;  %v1983_v54 = vmin.f32 %v1919_v58, 1.0  ;;  %v1729_v12 = vadd.f32 1.0, %v2646_v39  ;;  %v1059_v55 = vpop.f32.mrb[84].mxu0  ;;  %v2374_v3 = vpop.f32.mrb[84].mxu1  ;;  %v1607_v60 = vmul.f32 2.0, %v1543_v49 }
 0x1bd   :  { %v1920_v56 = vmax.f32 %v1856_v4, 0.0  ;;  %2659 = vtanh.f32 %v1376_v25  ;;  %v2648_v44 = vpop.eup %2647  ;;  %v1060_v50 = vadd.f32 %v3630_v36, %v1059_v55  ;;  %v1397_v22 = vadd.f32 %v2374_v3, %v3601_v11  ;;  %v1061_v57 = vpop.f32.mrb[85].mxu0 }
 0x1be   :  { %v1388_v24 = vpop.f32.mrb[85].mxu1  ;;  %v1621_v10 = vmul.f32 2.0, %v1557_v37  ;;  %2047 = vst [vmem:[%s3968_s4 + $0x120] sm:$0xff] %v1983_v54  ;;  %v1793_v48 = vmul.f32 0.5, %v1729_v12  ;;  %v1730_v34 = vadd.f32 1.0, %v2648_v44  ;;  %v1062_v2 = vpop.f32.mrb[86].mxu0 }
 0x1bf   :  { %v1984_v26 = vmin.f32 %v1920_v56, 1.0  ;;  %v1389_v7 = vadd.f32 %v1388_v24, %v3551_v1  ;;  %v2375_v35 = vpop.f32.mrb[86].mxu1  ;;  %v1349_v19 = vadd.f32 %v3619_v42, %v1060_v50  ;;  %2661 = vtanh.f32 %v1397_v22  ;;  %v1064_v32 = vpop.f32.mrb[87].mxu0 }
 0x1c0   :  { %v1063_v11 = vadd.f32 %v3630_v36, %v1062_v2  ;;  %v1400_v53 = vadd.f32 %v2375_v35, %v3617_v23  ;;  %v1391_v25 = vpop.f32.mrb[87].mxu1  ;;  %v1857_v16 = vsub.f32 %v3674_v5, %v1793_v48  ;;  %v1794_v0 = vmul.f32 0.5, %v1730_v34 }
 0x1c1   :  { %2048 = vst [vmem:[%s3968_s4 + $0x128] sm:$0xff] %v1984_v26  ;;  %2663 = vtanh.f32 %v1389_v7  ;;  %v1392_v1 = vadd.f32 %v1391_v25, %v3565_v15  ;;  %v2650_v18 = vpop.eup %2649  ;;  %v3805_v40 = vadd.f32 -1.0, %v1606_v43  ;;  %v3807_v58 = vadd.f32 -1.0, %v1616_v30 }
 0x1c2   :  { %2665 = vtanh.f32 %v1349_v19  ;;  %v1352_v42 = vadd.f32 %v3638_v21, %v1063_v11  ;;  %v2652_v23 = vpop.eup %2651  ;;  %v1921_v4 = vmax.f32 %v1857_v16, 0.0  ;;  %v1858_v49 = vsub.f32 %v3685_v62, %v1794_v0 }
 0x1c3   :  { %v1741_v37 = vadd.f32 1.0, %v2650_v18  ;;  %2667 = vtanh.f32 %v1400_v53  ;;  %v2654_v39 = vpop.eup %2653  ;;  %v1739_v5 = vadd.f32 1.0, %v2652_v23  ;;  %v3810_v54 = vadd.f32 -1.0, %v1607_v60 }
 0x1c4   :  { %2669 = vtanh.f32 %v1352_v42  ;;  %v3812_v15 = vadd.f32 -1.0, %v1621_v10  ;;  %v2656_v56 = vpop.eup %2655  ;;  %v1985_v12 = vmin.f32 %v1921_v4, 1.0  ;;  %v1922_v21 = vmax.f32 %v1858_v49, 0.0  ;;  %v1067_v30 = vpop.f32.mrb[88].mxu0 }
 0x1c5   :  { %v1731_v43 = vadd.f32 1.0, %v2654_v39  ;;  %v1805_v55 = vmul.f32 0.5, %v1741_v37  ;;  %v2378_v3 = vpop.f32.mrb[88].mxu1  ;;  %v1803_v50 = vmul.f32 0.5, %v1739_v5  ;;  %v1742_v22 = vadd.f32 1.0, %v2656_v56  ;;  %v1069_v57 = vpop.f32.mrb[89].mxu0 }
 0x1c6   :  { %v2658_v44 = vpop.eup %2657  ;;  %2671 = vtanh.f32 %v1392_v1  ;;  %v1068_v62 = vadd.f32 %v3630_v36, %v1067_v30  ;;  %v3815_v24 = vpop.f32.mrb[89].mxu1  ;;  %2049 = vst [vmem:[%s3968_s4 + $0x130] sm:$0xff] %v1985_v12  ;;  %v1986_v10 = vmin.f32 %v1922_v21, 1.0  ;;  %v1413_v1 = vadd.f32 %v2378_v3, %v3671_v52 }
 0x1c7   :  { %v2660_v60 = vpop.eup %2659  ;;  %v1795_v26 = vmul.f32 0.5, %v1731_v43  ;;  %v1869_v48 = vsub.f32 %v3715_v45, %v1805_v55  ;;  %v1732_v34 = vadd.f32 1.0, %v2658_v44  ;;  %v3821_v7 = vpop.f32.mrb[90].mxu0  ;;  %v1867_v35 = vsub.f32 %v3725_v20, %v1803_v50 }
 0x1c8   :  { %v3823_v2 = vpop.f32.mrb[90].mxu1  ;;  %v1806_v19 = vmul.f32 0.5, %v1742_v22  ;;  %v1740_v11 = vadd.f32 1.0, %v2660_v60  ;;  %v1357_v53 = vadd.f32 %v3697_v38, %v1068_v62  ;;  %v1072_v32 = vpop.f32.mrb[91].mxu0  ;;  %2050 = vst [vmem:[%s3968_s4 + $0x138] sm:$0xff] %v1986_v10 }
 0x1c9   :  { %v3827_v25 = vpop.f32.mrb[91].mxu1  ;;  %v1859_v45 = vsub.f32 %v3731_v47, %v1795_v26  ;;  %v1933_v16 = vmax.f32 %v1869_v48, 0.0  ;;  %v1796_v0 = vmul.f32 0.5, %v1732_v34  ;;  %v2662_v18 = vpop.eup %2661  ;;  %v1931_v42 = vmax.f32 %v1867_v35, 0.0 }
 0x1ca   :  { %v1870_v20 = vsub.f32 %v3739_v29, %v1806_v19  ;;  %v1804_v23 = vmul.f32 0.5, %v1740_v11  ;;  %2673 = vtanh.f32 %v1357_v53  ;;  %v1745_v39 = vadd.f32 1.0, %v2662_v18 }
 0x1cb   :  { %v2664_v38 = vpop.eup %2663  ;;  %v1923_v4 = vmax.f32 %v1859_v45, 0.0  ;;  %v1997_v49 = vmin.f32 %v1933_v16, 1.0  ;;  %v1860_v37 = vsub.f32 %v3737_v61, %v1796_v0  ;;  %v1995_v56 = vmin.f32 %v1931_v42, 1.0 }
 0x1cc   :  { %v2666_v5 = vpop.eup %2665  ;;  %v1934_v12 = vmax.f32 %v1870_v20, 0.0  ;;  %v1868_v47 = vsub.f32 %v3748_v6, %v1804_v23  ;;  %v1743_v21 = vadd.f32 1.0, %v2664_v38  ;;  %v1809_v30 = vmul.f32 0.5, %v1745_v39  ;;  %v1075_v3 = vpop.f32.mrb[92].mxu0 }
 0x1cd   :  { %v2668_v43 = vpop.eup %2667  ;;  %v1987_v52 = vmin.f32 %v1923_v4, 1.0  ;;  %2061 = vst [vmem:[%s3968_s4 + $0x190] sm:$0xff] %v1997_v49  ;;  %v1924_v29 = vmax.f32 %v1860_v37, 0.0  ;;  %v1733_v55 = vadd.f32 1.0, %v2666_v5  ;;  %v2382_v44 = vpop.f32.mrb[92].mxu1  ;;  %2059 = vst [vmem:[%s3968_s4 + $0x180] sm:$0xff] %v1995_v56  ;;  %2675 = vtanh.f32 %v1413_v1 }
 0x1ce   :  { %v2670_v50 = vpop.eup %2669  ;;  %v1998_v61 = vmin.f32 %v1934_v12, 1.0  ;;  %v1932_v22 = vmax.f32 %v1868_v47, 0.0  ;;  %v1807_v6 = vmul.f32 0.5, %v1743_v21  ;;  %v1746_v62 = vadd.f32 1.0, %v2668_v43  ;;  %v1077_v57 = vpop.f32.mrb[93].mxu0 }
 0x1cf   :  { %v1420_v60 = vpop.f32.mrb[93].mxu1  ;;  %2051 = vst [vmem:[%s3968_s4 + $0x140] sm:$0xff] %v1987_v52  ;;  %v1988_v10 = vmin.f32 %v1924_v29, 1.0  ;;  %v1797_v26 = vmul.f32 0.5, %v1733_v55  ;;  %v1873_v48 = vsub.f32 %v3752_v41, %v1809_v30  ;;  %v1734_v34 = vadd.f32 1.0, %v2670_v50  ;;  %v1078_v35 = vpop.f32.mrb[94].mxu0 }
 0x1d0   :  { %v2383_v19 = vpop.f32.mrb[94].mxu1  ;;  %v2672_v11 = vpop.eup %2671  ;;  %2062 = vst [vmem:[%s3968_s4 + $0x198] sm:$0xff] %v1998_v61  ;;  %v1996_v53 = vmin.f32 %v1932_v22, 1.0  ;;  %v1871_v32 = vsub.f32 %v3777_v33, %v1807_v6  ;;  %v1810_v45 = vmul.f32 0.5, %v1746_v62  ;;  %v1405_v1 = vadd.f32 %v3815_v24, %v3650_v9  ;;  %v1544_v30 = vld [vmem:[%s3966_s3 + $0x168] sm:$0xff]  ;;  %v1561_v57 = vld [vmem:[%s3966_s3 + $0x1f0] sm:$0xff] }
 0x1d1   :  { %v1080_v16 = vpop.f32.mrb[95].mxu0  ;;  %v1423_v0 = vpop.f32.mrb[95].mxu1  ;;  %2052 = vst [vmem:[%s3968_s4 + $0x148] sm:$0xff] %v1988_v10  ;;  %v1861_v41 = vsub.f32 %v3780_v27, %v1797_v26  ;;  %v1937_v18 = vmax.f32 %v1873_v48, 0.0  ;;  %v1798_v42 = vmul.f32 0.5, %v1734_v34  ;;  %v1744_v20 = vadd.f32 1.0, %v2672_v11 }
 0x1d2   :  { %2060 = vst [vmem:[%s3968_s4 + $0x188] sm:$0xff] %v1996_v53  ;;  %v1935_v23 = vmax.f32 %v1871_v32, 0.0  ;;  %v1874_v33 = vsub.f32 %v3788_v17, %v1810_v45  ;;  %v1071_v38 = vadd.f32 %v3630_v36, %v3821_v7  ;;  %2677 = vtanh.f32 %v1405_v1  ;;  %v1546_v10 = vld [vmem:[%s3966_s3 + $0x178] sm:$0xff]  ;;  %v1560_v32 = vld [vmem:[%s3966_s3 + $0x1e8] sm:$0xff] }
 0x1d3   :  { %v1925_v4 = vmax.f32 %v1861_v41, 0.0  ;;  %v2001_v49 = vmin.f32 %v1937_v18, 1.0  ;;  %v1862_v27 = vsub.f32 %v3805_v40, %v1798_v42  ;;  %v1808_v37 = vmul.f32 0.5, %v1744_v20  ;;  %v1562_v53 = vld [vmem:[%s3966_s3 + $0x1f8] sm:$0xff] }
 0x1d4   :  { %v2674_v39 = vpop.eup %2673  ;;  %v1999_v5 = vmin.f32 %v1935_v23, 1.0  ;;  %v1938_v56 = vmax.f32 %v1874_v33, 0.0  ;;  %v1360_v12 = vadd.f32 %v3713_v63, %v1071_v38  ;;  %v1416_v7 = vadd.f32 %v3823_v2, %v3689_v8  ;;  %v1555_v8 = vld [vmem:[%s3966_s3 + $0x1c0] sm:$0xff] }
 0x1d5   :  { %v1989_v47 = vmin.f32 %v1925_v4, 1.0  ;;  %2065 = vst [vmem:[%s3968_s4 + $0x1b0] sm:$0xff] %v2001_v49  ;;  %v1926_v9 = vmax.f32 %v1862_v27, 0.0  ;;  %v1872_v17 = vsub.f32 %v3807_v58, %v1808_v37  ;;  %v1735_v24 = vadd.f32 1.0, %v2674_v39 }
 0x1d6   :  { %2063 = vst [vmem:[%s3968_s4 + $0x1a0] sm:$0xff] %v1999_v5  ;;  %v2002_v40 = vmin.f32 %v1938_v56, 1.0  ;;  %2679 = vtanh.f32 %v1360_v12  ;;  %v1408_v63 = vadd.f32 %v3827_v25, %v3654_v31  ;;  %v1076_v52 = vadd.f32 %v3630_v36, %v1075_v3 }
 0x1d7   :  { %2053 = vst [vmem:[%s3968_s4 + $0x150] sm:$0xff] %v1989_v47  ;;  %v1990_v21 = vmin.f32 %v1926_v9, 1.0  ;;  %v1936_v43 = vmax.f32 %v1872_v17, 0.0  ;;  %v1799_v58 = vmul.f32 0.5, %v1735_v24  ;;  %2681 = vtanh.f32 %v1416_v7  ;;  %v2676_v50 = vpop.eup %2675 }
 0x1d8   :  { %2066 = vst [vmem:[%s3968_s4 + $0x1b8] sm:$0xff] %v2002_v40  ;;  %v1429_v31 = vadd.f32 %v2382_v44, %v3746_v59  ;;  %v1421_v2 = vadd.f32 %v1420_v60, %v3701_v13  ;;  %v1079_v25 = vadd.f32 %v3630_v36, %v1078_v35  ;;  %2683 = vtanh.f32 %v1408_v63  ;;  %v1558_v13 = vld [vmem:[%s3966_s3 + $0x1d8] sm:$0xff]  ;;  %v1559_v60 = vld [vmem:[%s3966_s3 + $0x1e0] sm:$0xff] }
 0x1d9   :  { %2054 = vst [vmem:[%s3968_s4 + $0x158] sm:$0xff] %v1990_v21  ;;  %v2000_v29 = vmin.f32 %v1936_v43, 1.0  ;;  %v1863_v55 = vsub.f32 %v3810_v54, %v1799_v58  ;;  %v1365_v3 = vadd.f32 %v3691_v46, %v1076_v52  ;;  %v1432_v59 = vadd.f32 %v2383_v19, %v3774_v14  ;;  %v1556_v46 = vld [vmem:[%s3966_s3 + $0x1c8] sm:$0xff] }
 0x1da   :  { %2685 = vtanh.f32 %v1429_v31  ;;  %v1368_v36 = vadd.f32 %v3706_v28, %v1079_v25  ;;  %v1424_v44 = vadd.f32 %v1423_v0, %v3719_v51  ;;  %v1749_v61 = vadd.f32 1.0, %v2676_v50  ;;  %v1545_v28 = vld [vmem:[%s3966_s3 + $0x170] sm:$0xff] }
 0x1db   :  { %2064 = vst [vmem:[%s3968_s4 + $0x1a8] sm:$0xff] %v2000_v29  ;;  %v1927_v54 = vmax.f32 %v1863_v55, 0.0  ;;  %v1619_v22 = vmul.f32 2.0, %v1555_v8  ;;  %2687 = vtanh.f32 %v1365_v3  ;;  %v1608_v6 = vmul.f32 2.0, %v1544_v30 }
 0x1dc   :  { %2689 = vtanh.f32 %v1421_v2  ;;  %v1813_v51 = vmul.f32 0.5, %v1749_v61  ;;  %v1622_v62 = vmul.f32 2.0, %v1558_v13  ;;  %v2678_v26 = vpop.eup %2677  ;;  %v1620_v48 = vmul.f32 2.0, %v1556_v46 }
 0x1dd   :  { %v1991_v14 = vmin.f32 %v1927_v54, 1.0  ;;  %2691 = vtanh.f32 %v1368_v36  ;;  %v1609_v34 = vmul.f32 2.0, %v1545_v28  ;;  %v2256_v19 = vadd.f32 -1.0, %v1619_v22 }
 0x1de   :  { %2693 = vtanh.f32 %v1432_v59  ;;  %v1877_v35 = vsub.f32 %v3812_v15, %v1813_v51  ;;  %v1747_v11 = vadd.f32 1.0, %v2678_v26  ;;  %v2245_v16 = vadd.f32 -1.0, %v1608_v6 }
 0x1df   :  { %2055 = vst [vmem:[%s3968_s4 + $0x160] sm:$0xff] %v1991_v14  ;;  %2695 = vtanh.f32 %v1424_v44  ;;  %v1625_v0 = vmul.f32 2.0, %v1561_v57  ;;  %v1623_v41 = vmul.f32 2.0, %v1559_v60  ;;  %v1610_v18 = vmul.f32 2.0, %v1546_v10 }
 0x1e0   :  { %v2680_v45 = vpop.eup %2679  ;;  %v1941_v42 = vmax.f32 %v1877_v35, 0.0  ;;  %v1811_v20 = vmul.f32 0.5, %v1747_v11  ;;  %v2259_v15 = vadd.f32 -1.0, %v1622_v62  ;;  %v2257_v1 = vadd.f32 -1.0, %v1620_v48 }
 0x1e1   :  { %v1736_v23 = vadd.f32 1.0, %v2680_v45  ;;  %v2682_v33 = vpop.eup %2681  ;;  %v2246_v38 = vadd.f32 -1.0, %v1609_v34  ;;  %v1626_v4 = vmul.f32 2.0, %v1562_v53  ;;  %v1624_v49 = vmul.f32 2.0, %v1560_v32 }
 0x1e2   :  { %v2684_v27 = vpop.eup %2683  ;;  %v2005_v37 = vmin.f32 %v1941_v42, 1.0  ;;  %v1875_v39 = vsub.f32 %v2256_v19, %v1811_v20  ;;  %v1750_v56 = vadd.f32 1.0, %v2682_v33  ;;  %v2262_v9 = vadd.f32 -1.0, %v1625_v0 }
 0x1e3   :  { %v1800_v5 = vmul.f32 0.5, %v1736_v23  ;;  %v1748_v47 = vadd.f32 1.0, %v2684_v27  ;;  %v2260_v17 = vadd.f32 -1.0, %v1623_v41  ;;  %v2247_v24 = vadd.f32 -1.0, %v1610_v18 }
 0x1e4   :  { %v2686_v12 = vpop.eup %2685  ;;  %2069 = vst [vmem:[%s3968_s4 + $0x1d0] sm:$0xff] %v2005_v37  ;;  %v1939_v7 = vmax.f32 %v1875_v39, 0.0  ;;  %v1814_v21 = vmul.f32 0.5, %v1750_v56  ;;  %v2263_v31 = vadd.f32 -1.0, %v1626_v4  ;;  %v2261_v2 = vadd.f32 -1.0, %v1624_v49 }
 0x1e5   :  { %v2688_v40 = vpop.eup %2687  ;;  %v1864_v63 = vsub.f32 %v2245_v16, %v1800_v5  ;;  %v1753_v43 = vadd.f32 1.0, %v2686_v12  ;;  %v1812_v52 = vmul.f32 0.5, %v1748_v47 }
 0x1e6   :  { %v2690_v58 = vpop.eup %2689  ;;  %v1737_v8 = vadd.f32 1.0, %v2688_v40  ;;  %v2003_v29 = vmin.f32 %v1939_v7, 1.0  ;;  %v1878_v30 = vsub.f32 %v2259_v15, %v1814_v21 }
 0x1e7   :  { %v2692_v25 = vpop.eup %2691  ;;  %v1928_v55 = vmax.f32 %v1864_v63, 0.0  ;;  %v1817_v3 = vmul.f32 0.5, %v1753_v43  ;;  %v1876_v13 = vsub.f32 %v2257_v1, %v1812_v52  ;;  %v1751_v59 = vadd.f32 1.0, %v2690_v58 }
 0x1e8   :  { %v2694_v50 = vpop.eup %2693  ;;  %v1801_v36 = vmul.f32 0.5, %v1737_v8  ;;  %v1738_v44 = vadd.f32 1.0, %v2692_v25  ;;  %2067 = vst [vmem:[%s3968_s4 + $0x1c0] sm:$0xff] %v2003_v29  ;;  %v1942_v22 = vmax.f32 %v1878_v30, 0.0 }
 0x1e9   :  { %v2696_v54 = vpop.eup %2695  ;;  %v1992_v61 = vmin.f32 %v1928_v55, 1.0  ;;  %v1881_v46 = vsub.f32 %v2262_v9, %v1817_v3  ;;  %v1754_v28 = vadd.f32 1.0, %v2694_v50  ;;  %v1940_v6 = vmax.f32 %v1876_v13, 0.0 }
 0x1ea   :  { %v1865_v14 = vsub.f32 %v2246_v38, %v1801_v36  ;;  %v1815_v51 = vmul.f32 0.5, %v1751_v59  ;;  %v1802_v62 = vmul.f32 0.5, %v1738_v44  ;;  %v2006_v57 = vmin.f32 %v1942_v22, 1.0 }
 0x1eb   :  { %2056 = vst [vmem:[%s3968_s4 + $0x168] sm:$0xff] %v1992_v61  ;;  %v1945_v60 = vmax.f32 %v1881_v46, 0.0  ;;  %v1818_v10 = vmul.f32 0.5, %v1754_v28  ;;  %v1752_v26 = vadd.f32 1.0, %v2696_v54  ;;  %v2004_v48 = vmin.f32 %v1940_v6, 1.0 }
 0x1ec   :  { %v1929_v34 = vmax.f32 %v1865_v14, 0.0  ;;  %v1879_v35 = vsub.f32 %v2260_v17, %v1815_v51  ;;  %v1866_v19 = vsub.f32 %v2247_v24, %v1802_v62  ;;  %2070 = vst [vmem:[%s3968_s4 + $0x1d8] sm:$0xff] %v2006_v57 }
 0x1ed   :  { %v2009_v11 = vmin.f32 %v1945_v60, 1.0  ;;  %v1882_v53 = vsub.f32 %v2263_v31, %v1818_v10  ;;  %v1816_v32 = vmul.f32 0.5, %v1752_v26  ;;  %2068 = vst [vmem:[%s3968_s4 + $0x1c8] sm:$0xff] %v2004_v48 }
 0x1ee   :  { %v1993_v45 = vmin.f32 %v1929_v34, 1.0  ;;  %v1943_v16 = vmax.f32 %v1879_v35, 0.0  ;;  %v1930_v0 = vmax.f32 %v1866_v19, 0.0 }
 0x1ef   :  { %2073 = vst [vmem:[%s3968_s4 + $0x1f0] sm:$0xff] %v2009_v11  ;;  %v1946_v41 = vmax.f32 %v1882_v53, 0.0  ;;  %v1880_v18 = vsub.f32 %v2261_v2, %v1816_v32 }
 0x1f0   :  { %2057 = vst [vmem:[%s3968_s4 + $0x170] sm:$0xff] %v1993_v45  ;;  %v2007_v42 = vmin.f32 %v1943_v16, 1.0  ;;  %v1994_v20 = vmin.f32 %v1930_v0, 1.0 }
 0x1f1   :  { %v2010_v23 = vmin.f32 %v1946_v41, 1.0  ;;  %v1944_v15 = vmax.f32 %v1880_v18, 0.0 }
 0x1f2   :  { %2071 = vst [vmem:[%s3968_s4 + $0x1e0] sm:$0xff] %v2007_v42  ;;  %2058 = vst [vmem:[%s3968_s4 + $0x178] sm:$0xff] %v1994_v20 }
 0x1f3   :  { %2074 = vst [vmem:[%s3968_s4 + $0x1f8] sm:$0xff] %v2010_v23  ;;  %v2008_v33 = vmin.f32 %v1944_v15, 1.0 }
 0x1f5   :  { %2072 = vst [vmem:[%s3968_s4 + $0x1e8] sm:$0xff] %v2008_v33 }

</bundles_post_ra>
